<compile_context>
chip_gen: v7x
topology: tpu7x:2x2x1
jax: 0.10.0
libtpu: 0.0.40
codegen_flags: <defaults>
</compile_context>

<pallas_src>
import functools

import numpy as np

import jax
import jax.numpy as jnp
from jax.experimental import pallas as pl
from jax.experimental.pallas import tpu as pltpu


# ----------------------------------------------------------------------------
# The single fused kernel: encoder -> latent core -> decoder.
# ----------------------------------------------------------------------------
def _vae_kernel(x_ref, eps_ref,
                w1_ref, b1_ref, w2_ref, b2_ref, w3_ref, b3_ref,
                wz_ref, bz_ref, wc_ref, bc_ref,
                w4_ref, b4_ref, w5_ref, b5_ref,
                mu_ref, lv_ref, z_ref, dec_ref, *, num_latent):
    """Whole VAE forward on full-array VMEM blocks (no grid)."""

    def leaky(v):                                    # F.leaky_relu, slope 0.01
        return jnp.where(v > 0.0, v, 0.01 * v)

    def affine(h, w_ref, b_ref):                     # MXU matmul, f32 accumulate
        w = w_ref[...]
        return jnp.dot(h.astype(w.dtype), w,
                       preferred_element_type=jnp.float32) + b_ref[...]

    # --- encoder: 3 convs as lane-dense affine maps (NCHW flatten order) ---
    h = leaky(affine(x_ref[...], w1_ref, b1_ref))    # (B, 16*10*10)
    h = leaky(affine(h, w2_ref, b2_ref))             # (B, 32*4*4)
    h = leaky(affine(h, w3_ref, b3_ref))             # (B, 64*2*2)

    # --- fused z_mean | z_log_var head + reparameterize (all f32) ---
    zz = affine(h, wz_ref, bz_ref)                   # (B, 2L)
    mu = zz[:, :num_latent]
    lv = zz[:, num_latent:]
    z = mu + eps_ref[...] * jnp.exp(0.5 * lv)
    mu_ref[...] = mu
    lv_ref[...] = lv
    z_ref[...] = z

    # --- decoder: (dec_linear_1 ∘ dec_deconv_1), dec_deconv_2, dec_deconv_3 ---
    d = leaky(affine(z, wc_ref, bc_ref))             # (B, 32*4*4)
    d = leaky(affine(d, w4_ref, b4_ref))             # (B, 16*11*11)
    d = leaky(affine(d, w5_ref, b5_ref))             # (B, C*28*28)
    dec_ref[...] = 1.0 / (1.0 + jnp.exp(-d))         # exact sigmoid


# ----------------------------------------------------------------------------
# Forward wrapper: single pallas_call, full-array (default) blocks, no grid.
# ----------------------------------------------------------------------------
@jax.jit
def forward(packed, x, eps):
    B, C = x.shape[0], x.shape[1]
    L = eps.shape[1]
    x_flat = x.reshape(B, -1)                        # NCHW flatten (free)

    ins = (x_flat, eps,
           packed["m1"], packed["b1"], packed["m2"], packed["b2"],
           packed["m3"], packed["b3"], packed["wz"], packed["bz"],
           packed["wc"], packed["bc"], packed["m4"], packed["b4"],
           packed["m5"], packed["b5"])

    mats = ("m1", "m2", "m3", "wz", "wc", "m4", "m5")
    flops = 2 * B * sum(packed[k].shape[0] * packed[k].shape[1] for k in mats)
    out_elems = B * (3 * L + C * 28 * 28)
    bytes_accessed = sum(a.size * a.dtype.itemsize for a in ins) + 4 * out_elems

    z_mean, z_log_var, encoded, dec = pl.pallas_call(
        functools.partial(_vae_kernel, num_latent=L),
        out_shape=(
            jax.ShapeDtypeStruct((B, L), jnp.float32),
            jax.ShapeDtypeStruct((B, L), jnp.float32),
            jax.ShapeDtypeStruct((B, L), jnp.float32),
            jax.ShapeDtypeStruct((B, C * 28 * 28), jnp.float32),
        ),
        compiler_params=pltpu.CompilerParams(
            vmem_limit_bytes=32 * 1024 * 1024),
        cost_estimate=pl.CostEstimate(
            flops=int(flops),
            transcendentals=int(B * (L + C * 28 * 28)),
            bytes_accessed=int(bytes_accessed)),
    )(*ins)

    decoded = dec.reshape(B, C, 28, 28)              # NCHW flatten -> free reshape
    return z_mean, z_log_var, encoded, decoded


# ----------------------------------------------------------------------------
# Parameter init (torch-style uniform), identical to the reference module.
# ----------------------------------------------------------------------------
def _init_conv(key, cout, cin, kh, kw):
    k1, k2 = jax.random.split(key)
    bound = 1.0 / float(np.sqrt(cin * kh * kw))
    w = jax.random.uniform(k1, (cout, cin, kh, kw), jnp.float32, -bound, bound)
    b = jax.random.uniform(k2, (cout,), jnp.float32, -bound, bound)
    return w, b


def _init_convT(key, cin, cout, kh, kw):
    k1, k2 = jax.random.split(key)
    bound = 1.0 / float(np.sqrt(cin * kh * kw))
    w = jax.random.uniform(k1, (cin, cout, kh, kw), jnp.float32, -bound, bound)
    b = jax.random.uniform(k2, (cout,), jnp.float32, -bound, bound)
    return w, b


def _init_linear(key, fin, fout):
    k1, k2 = jax.random.split(key)
    bound = 1.0 / float(np.sqrt(fin))
    w = jax.random.uniform(k1, (fin, fout), jnp.float32, -bound, bound)  # (in, out)
    b = jax.random.uniform(k2, (fout,), jnp.float32, -bound, bound)
    return w, b


def init_params(key, in_channels, num_latent):
    ks = jax.random.split(key, 9)
    return {
        "enc_conv_1": _init_conv(ks[0], 16, in_channels, 6, 6),
        "enc_conv_2": _init_conv(ks[1], 32, 16, 4, 4),
        "enc_conv_3": _init_conv(ks[2], 64, 32, 2, 2),
        "z_mean": _init_linear(ks[3], 64 * 2 * 2, num_latent),
        "z_log_var": _init_linear(ks[4], 64 * 2 * 2, num_latent),
        "dec_linear_1": _init_linear(ks[5], num_latent, 64 * 2 * 2),
        "dec_deconv_1": _init_convT(ks[6], 64, 32, 2, 2),
        "dec_deconv_2": _init_convT(ks[7], 32, 16, 4, 4),
        "dec_deconv_3": _init_convT(ks[8], 16, in_channels, 6, 6),
    }


# ----------------------------------------------------------------------------
# One-time packing: convs / transposed convs -> dense NCHW-flatten affine maps.
# (Done in numpy at init time; exact f32 arithmetic.)
# ----------------------------------------------------------------------------
def _conv_select(k, size_in, size_out, s):
    # S[p, y, i] = 1  iff  y == s*i + p
    p = np.arange(k)[:, None, None]
    y = np.arange(size_in)[None, :, None]
    i = np.arange(size_out)[None, None, :]
    return (y == s * i + p).astype(np.float32)


def _convT_select(k, size_in, size_out, s, pad):
    # T[p, i, y] = 1  iff  y == s*i - pad + p   (and 0 <= y < size_out)
    p = np.arange(k)[:, None, None]
    i = np.arange(size_in)[None, :, None]
    y = np.arange(size_out)[None, None, :]
    return (y == s * i - pad + p).astype(np.float32)


def _conv_dense(w, h_in, w_in, s):
    """Conv2d weight (Cout,Cin,kh,kw) -> dense (Cin*Hin*Win, Cout*Hout*Wout)."""
    w = np.asarray(w, np.float32)
    cout, cin, kh, kw = w.shape
    h_out = (h_in - kh) // s + 1
    w_out = (w_in - kw) // s + 1
    m = np.einsum("ocpq,pyi,qxj->cyxoij", w,
                  _conv_select(kh, h_in, h_out, s),
                  _conv_select(kw, w_in, w_out, s))
    return m.reshape(cin * h_in * w_in, cout * h_out * w_out), h_out * w_out


def _convT_dense(w, h_in, w_in, s, pad):
    """ConvTranspose2d weight (Cin,Cout,kh,kw) -> dense (Cin*Hin*Win, Cout*Hout*Wout)."""
    w = np.asarray(w, np.float32)
    cin, cout, kh, kw = w.shape
    h_out = (h_in - 1) * s - 2 * pad + kh
    w_out = (w_in - 1) * s - 2 * pad + kw
    m = np.einsum("copq,piy,qjx->cijoyx", w,
                  _convT_select(kh, h_in, h_out, s, pad),
                  _convT_select(kw, w_in, w_out, s, pad))
    return m.reshape(cin * h_in * w_in, cout * h_out * w_out), h_out * w_out


def _expand_bias(b, hw):
    return jnp.asarray(np.repeat(np.asarray(b, np.float32), hw)[None, :])


def pack_params(p):
    w1, b1 = p["enc_conv_1"]
    w2, b2 = p["enc_conv_2"]
    w3, b3 = p["enc_conv_3"]
    wmu, bmu = p["z_mean"]
    wlv, blv = p["z_log_var"]
    wd, bd = p["dec_linear_1"]
    wt1, bt1 = p["dec_deconv_1"]
    wt2, bt2 = p["dec_deconv_2"]
    wt3, bt3 = p["dec_deconv_3"]

    # Encoder convs (input pinned to 24x24): 24 -> 10 -> 4 -> 2.
    m1, n1 = _conv_dense(w1, 24, 24, 2)          # (C*576, 16*100)
    m2, n2 = _conv_dense(w2, 10, 10, 2)          # (1600, 32*16)
    m3, n3 = _conv_dense(w3, 4, 4, 2)            # (512, 64*4)

    # Fused z_mean | z_log_var head: one (256, 2L) matmul.
    wz = np.concatenate([np.asarray(wmu, np.float32),
                         np.asarray(wlv, np.float32)], axis=1)
    bz = np.concatenate([np.asarray(bmu, np.float32),
                         np.asarray(blv, np.float32)])[None, :]

    # dec_linear_1 composed with dec_deconv_1 (k=s=2, p=0) -> one (L, 512) affine.
    mt1, n_t1 = _convT_dense(wt1, 2, 2, 2, 0)    # (256, 32*16)
    wd_np, bd_np = np.asarray(wd, np.float32), np.asarray(bd, np.float32)
    wc = wd_np @ mt1                             # (L, 512)
    bc = (bd_np @ mt1 + np.repeat(np.asarray(bt1, np.float32), n_t1))[None, :]

    # Remaining transposed convs: 4x4 -> 11x11 -> 28x28.
    m4, n4 = _convT_dense(wt2, 4, 4, 3, 1)       # (512, 16*121)
    m5, n5 = _convT_dense(wt3, 11, 11, 3, 4)     # (1936, C*784)

    bf, f32 = jnp.bfloat16, jnp.float32
    return {
        "m1": jnp.asarray(m1, bf), "b1": _expand_bias(b1, n1),
        "m2": jnp.asarray(m2, bf), "b2": _expand_bias(b2, n2),
        "m3": jnp.asarray(m3, bf), "b3": _expand_bias(b3, n3),
        "wz": jnp.asarray(wz, f32), "bz": jnp.asarray(bz, f32),
        "wc": jnp.asarray(wc, f32), "bc": jnp.asarray(bc, f32),
        "m4": jnp.asarray(m4, bf), "b4": _expand_bias(bt2, n4),
        "m5": jnp.asarray(m5, bf), "b5": _expand_bias(bt3, n5),
    }


# ----------------------------------------------------------------------------
# Pure-JAX reference (lax convs) mirroring the PyTorch module, for validation.
# ----------------------------------------------------------------------------
@jax.jit
def reference_forward(params, x, eps):
    dn = ("NCHW", "OIHW", "NCHW")

    def leaky(v):
        return jnp.where(v > 0.0, v, 0.01 * v)

    def conv(h, w, b, s):
        y = jax.lax.conv_general_dilated(h, w, (s, s), "VALID",
                                         dimension_numbers=dn)
        return y + b[None, :, None, None]

    def convT(h, w, b, s, p):
        k = w.shape[2]
        w_conv = jnp.transpose(w, (1, 0, 2, 3))[:, :, ::-1, ::-1]
        pad = k - 1 - p
        y = jax.lax.conv_general_dilated(h, w_conv, (1, 1),
                                         [(pad, pad), (pad, pad)],
                                         lhs_dilation=(s, s),
                                         dimension_numbers=dn)
        return y + b[None, :, None, None]

    B = x.shape[0]
    w1, b1 = params["enc_conv_1"]
    w2, b2 = params["enc_conv_2"]
    w3, b3 = params["enc_conv_3"]
    h = leaky(conv(x, w1, b1, 2))
    h = leaky(conv(h, w2, b2, 2))
    h = leaky(conv(h, w3, b3, 2))
    flat = h.reshape(B, -1)

    wmu, bmu = params["z_mean"]
    wlv, blv = params["z_log_var"]
    mu = flat @ wmu + bmu
    lv = flat @ wlv + blv
    z = mu + eps * jnp.exp(0.5 * lv)

    wd, bd = params["dec_linear_1"]
    d = (z @ wd + bd).reshape(B, 64, 2, 2)
    wt1, bt1 = params["dec_deconv_1"]
    wt2, bt2 = params["dec_deconv_2"]
    wt3, bt3 = params["dec_deconv_3"]
    d = leaky(convT(d, wt1, bt1, 2, 0))
    d = leaky(convT(d, wt2, bt2, 3, 1))
    d = leaky(convT(d, wt3, bt3, 3, 4))
    return mu, lv, z, jax.nn.sigmoid(d)


# ----------------------------------------------------------------------------
if __name__ == "__main__":
    key = jax.random.PRNGKey(0)
    kp, kx, ke = jax.random.split(key, 3)

    batch = 2
    in_channels = 1
    num_latent = 8
    # Input spatial size is pinned to 24x24 by the 64*2*2 flatten in the module.
    x = jax.random.uniform(kx, (batch, in_channels, 24, 24), jnp.float32)
    # torch.randn inside reparameterize has no in-kernel equivalent; the noise
    # is an explicit input so the forward stays a pure function of its inputs.
    eps = jax.random.normal(ke, (batch, num_latent), jnp.float32)

    params = init_params(kp, in_channels, num_latent)
    packed = pack_params(params)

    outs = forward(packed, x, eps)
    jax.block_until_ready(outs)
    z_mean, z_log_var, encoded, decoded = outs

    assert z_mean.shape == (batch, num_latent)
    assert z_log_var.shape == (batch, num_latent)
    assert encoded.shape == (batch, num_latent)
    assert decoded.shape == (batch, in_channels, 28, 28)   # matches torch output

    # Validate the fused kernel against the pure-JAX reference (bf16 weight
    # rounding in the conv/deconv maps keeps errors at ~1e-3).
    refs = reference_forward(params, x, eps)
    for name, got, want in zip(("z_mean", "z_log_var", "encoded", "decoded"),
                               outs, refs):
        err = float(jnp.max(jnp.abs(got.reshape(-1) - want.reshape(-1))))
        assert err < 5e-2, f"{name}: max abs err {err:.3e}"

    print("KERNEL_OK")
</pallas_src>

<mosaic_0001>
module attributes {stable_mosaic.version = 11 : i64} {
  func.func @_vae_kernel(%arg0: memref<2x576xf32, #tpu.memory_space<vmem>>, %arg1: memref<2x8xf32, #tpu.memory_space<vmem>>, %arg2: memref<576x1600xbf16, #tpu.memory_space<vmem>>, %arg3: memref<1x1600xf32, #tpu.memory_space<vmem>>, %arg4: memref<1600x512xbf16, #tpu.memory_space<vmem>>, %arg5: memref<1x512xf32, #tpu.memory_space<vmem>>, %arg6: memref<512x256xbf16, #tpu.memory_space<vmem>>, %arg7: memref<1x256xf32, #tpu.memory_space<vmem>>, %arg8: memref<256x16xf32, #tpu.memory_space<vmem>>, %arg9: memref<1x16xf32, #tpu.memory_space<vmem>>, %arg10: memref<8x512xf32, #tpu.memory_space<vmem>>, %arg11: memref<1x512xf32, #tpu.memory_space<vmem>>, %arg12: memref<512x1936xbf16, #tpu.memory_space<vmem>>, %arg13: memref<1x1936xf32, #tpu.memory_space<vmem>>, %arg14: memref<1936x784xbf16, #tpu.memory_space<vmem>>, %arg15: memref<1x784xf32, #tpu.memory_space<vmem>>, %arg16: memref<2x8xf32, #tpu.memory_space<vmem>>, %arg17: memref<2x8xf32, #tpu.memory_space<vmem>>, %arg18: memref<2x8xf32, #tpu.memory_space<vmem>>, %arg19: memref<2x784xf32, #tpu.memory_space<vmem>>) attributes {dimension_semantics = [], scalar_prefetch = 0 : i64, scratch_operands = 0 : i64, tpu.core_type = #tpu.core_type<tc>} {
    %c0 = arith.constant 0 : index
    %c0_0 = arith.constant 0 : index
    %0 = vector.load %arg0[%c0, %c0_0] : memref<2x576xf32, #tpu.memory_space<vmem>>, vector<2x576xf32>
    %c0_1 = arith.constant 0 : index
    %c0_2 = arith.constant 0 : index
    %1 = vector.load %arg2[%c0_1, %c0_2] : memref<576x1600xbf16, #tpu.memory_space<vmem>>, vector<576x1600xbf16>
    %2 = arith.truncf %0 : vector<2x576xf32> to vector<2x576xbf16>
    %cst = arith.constant dense<0.000000e+00> : vector<2x1600xf32>
    %3 = tpu.matmul %2, %1, %cst {dimension_numbers = #tpu.dot_dimension_numbers<[1], [0], [0], [1], [0, 0, 1, 1], [], []>} : vector<2x576xbf16>, vector<576x1600xbf16>, vector<2x1600xf32> -> vector<2x1600xf32>
    %c0_3 = arith.constant 0 : index
    %c0_4 = arith.constant 0 : index
    %4 = vector.load %arg3[%c0_3, %c0_4] : memref<1x1600xf32, #tpu.memory_space<vmem>>, vector<1x1600xf32>
    %5 = vector.broadcast %4 : vector<1x1600xf32> to vector<2x1600xf32>
    %6 = arith.addf %3, %5 : vector<2x1600xf32>
    %cst_5 = arith.constant 0.000000e+00 : f32
    %7 = vector.broadcast %cst_5 : f32 to vector<2x1600xf32>
    %8 = arith.cmpf ogt, %6, %7 : vector<2x1600xf32>
    %cst_6 = arith.constant 0.00999999977 : f32
    %9 = vector.broadcast %cst_6 : f32 to vector<2x1600xf32>
    %10 = arith.mulf %9, %6 : vector<2x1600xf32>
    %11 = arith.select %8, %6, %10 : vector<2x1600xi1>, vector<2x1600xf32>
    %c0_7 = arith.constant 0 : index
    %c0_8 = arith.constant 0 : index
    %12 = vector.load %arg4[%c0_7, %c0_8] : memref<1600x512xbf16, #tpu.memory_space<vmem>>, vector<1600x512xbf16>
    %13 = arith.truncf %11 : vector<2x1600xf32> to vector<2x1600xbf16>
    %cst_9 = arith.constant dense<0.000000e+00> : vector<2x512xf32>
    %14 = tpu.matmul %13, %12, %cst_9 {dimension_numbers = #tpu.dot_dimension_numbers<[1], [0], [0], [1], [0, 0, 1, 1], [], []>} : vector<2x1600xbf16>, vector<1600x512xbf16>, vector<2x512xf32> -> vector<2x512xf32>
    %c0_10 = arith.constant 0 : index
    %c0_11 = arith.constant 0 : index
    %15 = vector.load %arg5[%c0_10, %c0_11] : memref<1x512xf32, #tpu.memory_space<vmem>>, vector<1x512xf32>
    %16 = vector.broadcast %15 : vector<1x512xf32> to vector<2x512xf32>
    %17 = arith.addf %14, %16 : vector<2x512xf32>
    %cst_12 = arith.constant 0.000000e+00 : f32
    %18 = vector.broadcast %cst_12 : f32 to vector<2x512xf32>
    %19 = arith.cmpf ogt, %17, %18 : vector<2x512xf32>
    %cst_13 = arith.constant 0.00999999977 : f32
    %20 = vector.broadcast %cst_13 : f32 to vector<2x512xf32>
    %21 = arith.mulf %20, %17 : vector<2x512xf32>
    %22 = arith.select %19, %17, %21 : vector<2x512xi1>, vector<2x512xf32>
    %c0_14 = arith.constant 0 : index
    %c0_15 = arith.constant 0 : index
    %23 = vector.load %arg6[%c0_14, %c0_15] : memref<512x256xbf16, #tpu.memory_space<vmem>>, vector<512x256xbf16>
    %24 = arith.truncf %22 : vector<2x512xf32> to vector<2x512xbf16>
    %cst_16 = arith.constant dense<0.000000e+00> : vector<2x256xf32>
    %25 = tpu.matmul %24, %23, %cst_16 {dimension_numbers = #tpu.dot_dimension_numbers<[1], [0], [0], [1], [0, 0, 1, 1], [], []>} : vector<2x512xbf16>, vector<512x256xbf16>, vector<2x256xf32> -> vector<2x256xf32>
    %c0_17 = arith.constant 0 : index
    %c0_18 = arith.constant 0 : index
    %26 = vector.load %arg7[%c0_17, %c0_18] : memref<1x256xf32, #tpu.memory_space<vmem>>, vector<1x256xf32>
    %27 = vector.broadcast %26 : vector<1x256xf32> to vector<2x256xf32>
    %28 = arith.addf %25, %27 : vector<2x256xf32>
    %cst_19 = arith.constant 0.000000e+00 : f32
    %29 = vector.broadcast %cst_19 : f32 to vector<2x256xf32>
    %30 = arith.cmpf ogt, %28, %29 : vector<2x256xf32>
    %cst_20 = arith.constant 0.00999999977 : f32
    %31 = vector.broadcast %cst_20 : f32 to vector<2x256xf32>
    %32 = arith.mulf %31, %28 : vector<2x256xf32>
    %33 = arith.select %30, %28, %32 : vector<2x256xi1>, vector<2x256xf32>
    %c0_21 = arith.constant 0 : index
    %c0_22 = arith.constant 0 : index
    %34 = vector.load %arg8[%c0_21, %c0_22] : memref<256x16xf32, #tpu.memory_space<vmem>>, vector<256x16xf32>
    %cst_23 = arith.constant dense<0.000000e+00> : vector<2x16xf32>
    %35 = tpu.matmul %33, %34, %cst_23 {dimension_numbers = #tpu.dot_dimension_numbers<[1], [0], [0], [1], [0, 0, 1, 1], [], []>} : vector<2x256xf32>, vector<256x16xf32>, vector<2x16xf32> -> vector<2x16xf32>
    %c0_24 = arith.constant 0 : index
    %c0_25 = arith.constant 0 : index
    %36 = vector.load %arg9[%c0_24, %c0_25] : memref<1x16xf32, #tpu.memory_space<vmem>>, vector<1x16xf32>
    %37 = vector.broadcast %36 : vector<1x16xf32> to vector<2x16xf32>
    %38 = arith.addf %35, %37 : vector<2x16xf32>
    %39 = vector.extract_strided_slice %38 {offsets = [0, 0], sizes = [2, 8], strides = [1, 1]} : vector<2x16xf32> to vector<2x8xf32>
    %40 = vector.extract_strided_slice %38 {offsets = [0, 8], sizes = [2, 8], strides = [1, 1]} : vector<2x16xf32> to vector<2x8xf32>
    %c0_26 = arith.constant 0 : index
    %c0_27 = arith.constant 0 : index
    %41 = vector.load %arg1[%c0_26, %c0_27] : memref<2x8xf32, #tpu.memory_space<vmem>>, vector<2x8xf32>
    %cst_28 = arith.constant 5.000000e-01 : f32
    %42 = vector.broadcast %cst_28 : f32 to vector<2x8xf32>
    %43 = arith.mulf %42, %40 : vector<2x8xf32>
    %44 = math.exp %43 : vector<2x8xf32>
    %45 = arith.mulf %41, %44 : vector<2x8xf32>
    %46 = arith.addf %39, %45 : vector<2x8xf32>
    %c0_29 = arith.constant 0 : index
    %c0_30 = arith.constant 0 : index
    %47 = vector.load %arg16[%c0_29, %c0_30] : memref<2x8xf32, #tpu.memory_space<vmem>>, vector<2x8xf32>
    tpu.vector_store %arg16[%c0_29, %c0_30], %39 {strides = array<i32>} : memref<2x8xf32, #tpu.memory_space<vmem>>, vector<2x8xf32>,
    %c0_31 = arith.constant 0 : index
    %c0_32 = arith.constant 0 : index
    %48 = vector.load %arg17[%c0_31, %c0_32] : memref<2x8xf32, #tpu.memory_space<vmem>>, vector<2x8xf32>
    tpu.vector_store %arg17[%c0_31, %c0_32], %40 {strides = array<i32>} : memref<2x8xf32, #tpu.memory_space<vmem>>, vector<2x8xf32>,
    %c0_33 = arith.constant 0 : index
    %c0_34 = arith.constant 0 : index
    %49 = vector.load %arg18[%c0_33, %c0_34] : memref<2x8xf32, #tpu.memory_space<vmem>>, vector<2x8xf32>
    tpu.vector_store %arg18[%c0_33, %c0_34], %46 {strides = array<i32>} : memref<2x8xf32, #tpu.memory_space<vmem>>, vector<2x8xf32>,
    %c0_35 = arith.constant 0 : index
    %c0_36 = arith.constant 0 : index
    %50 = vector.load %arg10[%c0_35, %c0_36] : memref<8x512xf32, #tpu.memory_space<vmem>>, vector<8x512xf32>
    %cst_37 = arith.constant dense<0.000000e+00> : vector<2x512xf32>
    %51 = tpu.matmul %46, %50, %cst_37 {dimension_numbers = #tpu.dot_dimension_numbers<[1], [0], [0], [1], [0, 0, 1, 1], [], []>} : vector<2x8xf32>, vector<8x512xf32>, vector<2x512xf32> -> vector<2x512xf32>
    %c0_38 = arith.constant 0 : index
    %c0_39 = arith.constant 0 : index
    %52 = vector.load %arg11[%c0_38, %c0_39] : memref<1x512xf32, #tpu.memory_space<vmem>>, vector<1x512xf32>
    %53 = vector.broadcast %52 : vector<1x512xf32> to vector<2x512xf32>
    %54 = arith.addf %51, %53 : vector<2x512xf32>
    %cst_40 = arith.constant 0.000000e+00 : f32
    %55 = vector.broadcast %cst_40 : f32 to vector<2x512xf32>
    %56 = arith.cmpf ogt, %54, %55 : vector<2x512xf32>
    %cst_41 = arith.constant 0.00999999977 : f32
    %57 = vector.broadcast %cst_41 : f32 to vector<2x512xf32>
    %58 = arith.mulf %57, %54 : vector<2x512xf32>
    %59 = arith.select %56, %54, %58 : vector<2x512xi1>, vector<2x512xf32>
    %c0_42 = arith.constant 0 : index
    %c0_43 = arith.constant 0 : index
    %60 = vector.load %arg12[%c0_42, %c0_43] : memref<512x1936xbf16, #tpu.memory_space<vmem>>, vector<512x1936xbf16>
    %61 = arith.truncf %59 : vector<2x512xf32> to vector<2x512xbf16>
    %cst_44 = arith.constant dense<0.000000e+00> : vector<2x1936xf32>
    %62 = tpu.matmul %61, %60, %cst_44 {dimension_numbers = #tpu.dot_dimension_numbers<[1], [0], [0], [1], [0, 0, 1, 1], [], []>} : vector<2x512xbf16>, vector<512x1936xbf16>, vector<2x1936xf32> -> vector<2x1936xf32>
    %c0_45 = arith.constant 0 : index
    %c0_46 = arith.constant 0 : index
    %63 = vector.load %arg13[%c0_45, %c0_46] : memref<1x1936xf32, #tpu.memory_space<vmem>>, vector<1x1936xf32>
    %64 = vector.broadcast %63 : vector<1x1936xf32> to vector<2x1936xf32>
    %65 = arith.addf %62, %64 : vector<2x1936xf32>
    %cst_47 = arith.constant 0.000000e+00 : f32
    %66 = vector.broadcast %cst_47 : f32 to vector<2x1936xf32>
    %67 = arith.cmpf ogt, %65, %66 : vector<2x1936xf32>
    %cst_48 = arith.constant 0.00999999977 : f32
    %68 = vector.broadcast %cst_48 : f32 to vector<2x1936xf32>
    %69 = arith.mulf %68, %65 : vector<2x1936xf32>
    %70 = arith.select %67, %65, %69 : vector<2x1936xi1>, vector<2x1936xf32>
    %c0_49 = arith.constant 0 : index
    %c0_50 = arith.constant 0 : index
    %71 = vector.load %arg14[%c0_49, %c0_50] : memref<1936x784xbf16, #tpu.memory_space<vmem>>, vector<1936x784xbf16>
    %72 = arith.truncf %70 : vector<2x1936xf32> to vector<2x1936xbf16>
    %cst_51 = arith.constant dense<0.000000e+00> : vector<2x784xf32>
    %73 = tpu.matmul %72, %71, %cst_51 {dimension_numbers = #tpu.dot_dimension_numbers<[1], [0], [0], [1], [0, 0, 1, 1], [], []>} : vector<2x1936xbf16>, vector<1936x784xbf16>, vector<2x784xf32> -> vector<2x784xf32>
    %c0_52 = arith.constant 0 : index
    %c0_53 = arith.constant 0 : index
    %74 = vector.load %arg15[%c0_52, %c0_53] : memref<1x784xf32, #tpu.memory_space<vmem>>, vector<1x784xf32>
    %75 = vector.broadcast %74 : vector<1x784xf32> to vector<2x784xf32>
    %76 = arith.addf %73, %75 : vector<2x784xf32>
    %cst_54 = arith.constant 0.000000e+00 : f32
    %77 = vector.broadcast %cst_54 : f32 to vector<2x784xf32>
    %78 = arith.cmpf ogt, %76, %77 : vector<2x784xf32>
    %cst_55 = arith.constant 0.00999999977 : f32
    %79 = vector.broadcast %cst_55 : f32 to vector<2x784xf32>
    %80 = arith.mulf %79, %76 : vector<2x784xf32>
    %81 = arith.select %78, %76, %80 : vector<2x784xi1>, vector<2x784xf32>
    %cst_56 = arith.constant 0.000000e+00 : f32
    %82 = vector.broadcast %cst_56 : f32 to vector<2x784xf32>
    %83 = arith.subf %82, %81 : vector<2x784xf32>
    %84 = math.exp %83 : vector<2x784xf32>
    %cst_57 = arith.constant 1.000000e+00 : f32
    %85 = vector.broadcast %cst_57 : f32 to vector<2x784xf32>
    %86 = arith.addf %85, %84 : vector<2x784xf32>
    %cst_58 = arith.constant 1.000000e+00 : f32
    %87 = vector.broadcast %cst_58 : f32 to vector<2x784xf32>
    %88 = arith.divf %87, %86 : vector<2x784xf32>
    %c0_59 = arith.constant 0 : index
    %c0_60 = arith.constant 0 : index
    %89 = vector.load %arg19[%c0_59, %c0_60] : memref<2x784xf32, #tpu.memory_space<vmem>>, vector<2x784xf32>
    tpu.vector_store %arg19[%c0_59, %c0_60], %88 {strides = array<i32>} : memref<2x784xf32, #tpu.memory_space<vmem>>, vector<2x784xf32>,
    return
  }
}

</mosaic_0001>

<bundles_post_ra>
// kernel: forward.1
= control target key start
LH: loop header
LB: loop body
LE: loop exit
PB: predicated region body
PF: predicated region fallthrough
CT: control target
= control target key end

     0   :  { %s31725_s0 = inlined_call_operand.vmem [shape: f32[2,576], index: 0, kind: input, shape index: {}]   ;;  %s31726_s1 = inlined_call_operand.vmem [shape: f32[2,8], index: 1, kind: input, shape index: {}]   ;;  %s31727_s2 = inlined_call_operand.vmem [shape: bf16[576,1600], index: 2, kind: input, shape index: {}]   ;;  %s31728_s3 = inlined_call_operand.vmem [shape: f32[1,1600], index: 3, kind: input, shape index: {}]   ;;  %s31729_s4 = inlined_call_operand.vmem [shape: bf16[1600,512], index: 4, kind: input, shape index: {}]   ;;  %s31730_s5 = inlined_call_operand.vmem [shape: f32[1,512], index: 5, kind: input, shape index: {}]   ;;  %s31731_s6 = inlined_call_operand.vmem [shape: bf16[512,256], index: 6, kind: input, shape index: {}]   ;;  %s31732_s7 = inlined_call_operand.vmem [shape: f32[1,256], index: 7, kind: input, shape index: {}]   ;;  %s31733_s8 = inlined_call_operand.vmem [shape: f32[256,16], index: 8, kind: input, shape index: {}]   ;;  %s31734_s9 = inlined_call_operand.vmem [shape: f32[1,16], index: 9, kind: input, shape index: {}]   ;;  %s31735_s10 = inlined_call_operand.vmem [shape: f32[8,512], index: 10, kind: input, shape index: {}]   ;;  %s31736_s11 = inlined_call_operand.vmem [shape: f32[1,512], index: 11, kind: input, shape index: {}]   ;;  %s31737_s12 = inlined_call_operand.vmem [shape: bf16[512,1936], index: 12, kind: input, shape index: {}]   ;;  %s31738_s13 = inlined_call_operand.vmem [shape: f32[1,1936], index: 13, kind: input, shape index: {}]   ;;  %s31739_s14 = inlined_call_operand.vmem [shape: bf16[1936,784], index: 14, kind: input, shape index: {}]   ;;  %s31740_s15 = inlined_call_operand.vmem [shape: f32[1,784], index: 15, kind: input, shape index: {}]   ;;  %s31741_s16 = inlined_call_operand.hbm [shape: f32[2,8], index: 16, kind: output, shape index: {0}]   ;;  %s31742_s17 = inlined_call_operand.hbm [shape: f32[2,8], index: 17, kind: output, shape index: {1}]   ;;  %s31743_s18 = inlined_call_operand.hbm [shape: f32[2,8], index: 18, kind: output, shape index: {2}]   ;;  %s31744_s19 = inlined_call_operand.vmem [shape: f32[2,784], index: 19, kind: output, shape index: {3}]  }
   0x1   :  { %31748 = sst [smem:[#allocation9_spill]] %s31725_s0 }
   0x2   :  { %31749 = sst [smem:[#allocation10_spill]] %s31726_s1 }
   0x3   :  { %31750 = sst [smem:[#allocation11_spill]] %s31727_s2 }
   0x4   :  { %31751 = sst [smem:[#allocation12_spill]] %s31728_s3 }
   0x5   :  { %25 = vsyncpa [#allocation3], 0  ;;  %s31752_s20 = sld [smem:[#allocation11_spill]]  ;;  %v24023_v36 = vmov 1983009808   ;;  %v572_v38 = vlaneseq  ;;  %s31753_s26 = sld [smem:[#allocation9_spill]] }
   0x6   :  { %v570_v37 = vunpack.c.l.s4 %v24023_v36  ;;  %vm3047_vm0 = vcmask 523264   ;;  %s31754_s22 = sld [smem:[#allocation12_spill]]  ;;  %vm24026_vm1 = vmmov 0  }
   0x7   :  { %v24248_v43 = vshrl.u32 %v572_v38, 7 }
   0x8   :  { %v571_v42 = vunpack.c.0.s8 %v570_v37 }
   0xa   :  { %v24266_v49 = vsub.s32 %v571_v42, %v24248_v43 }
   0xb   :  { %v21327_v0 = vld [vmem:[%s31752_s20 + $0x4] ss:$52 sps:$4 sm:$0xff]   ;;  %v21331_v2 = vld [vmem:[%s31752_s20] ss:$52 sps:$4 sm:$0xff]   ;;  %v21337_v6 = vld [vmem:[%s31752_s20 + $0x68] ss:$52 sps:$4 sm:$0xff]  }
   0xc   :  { %v21329_v1 = vld [vmem:[%s31752_s20 + $0x684] ss:$52 sps:$4 sm:$0xff]   ;;  %3051 = vmatprep.subr.bf16.mxu1 %v21327_v0  ;;  %v21332_v3 = vld [vmem:[%s31752_s20 + $0x680] ss:$52 sps:$4 sm:$0xff]   ;;  %v21338_v7 = vld [vmem:[%s31752_s20 + $0x6e8] ss:$52 sps:$4 sm:$0xff]  }
   0xd   :  { %3092 = vmatprep.subr.bf16.mxu0 %v21329_v1  ;;  %v21333_v4 = vld [vmem:[%s31752_s20 + $0x6c] ss:$52 sps:$4 sm:$0xff]   ;;  %3052 = vmatpush1.bf16.msra.mxu1 %v21331_v2  ;;  %v21339_v8 = vld [vmem:[%s31752_s20 + $0xd4] ss:$52 sps:$4 sm:$0xff]   ;;  %v21343_v10 = vld [vmem:[%s31752_s20 + $0xd0] ss:$52 sps:$4 sm:$0xff]  }
   0xe   :  { %3093 = vmatpush1.bf16.msra.mxu0 %v21332_v3  ;;  %v21335_v5 = vld [vmem:[%s31752_s20 + $0x6ec] ss:$52 sps:$4 sm:$0xff]   ;;  %3053 = vmatprep.subr.bf16.mxu1 %v21333_v4  ;;  %v21341_v9 = vld [vmem:[%s31752_s20 + $0x754] ss:$52 sps:$4 sm:$0xff]   ;;  %v21344_v11 = vld [vmem:[%s31752_s20 + $0x750] ss:$52 sps:$4 sm:$0xff]  }
   0xf   :  { %3094 = vmatprep.subr.bf16.mxu0 %v21335_v5  ;;  %v21345_v12 = vld [vmem:[%s31752_s20 + $0x13c] ss:$52 sps:$4 sm:$0xff]   ;;  %v21349_v14 = vld [vmem:[%s31752_s20 + $0x138] ss:$52 sps:$4 sm:$0xff]   ;;  %v21355_v18 = vld [vmem:[%s31752_s20 + $0x1a0] ss:$52 sps:$4 sm:$0xff]  }
  0x10   :  { %v21347_v13 = vld [vmem:[%s31752_s20 + $0x7bc] ss:$52 sps:$4 sm:$0xff]   ;;  %v21350_v15 = vld [vmem:[%s31752_s20 + $0x7b8] ss:$52 sps:$4 sm:$0xff]   ;;  %v21356_v19 = vld [vmem:[%s31752_s20 + $0x820] ss:$52 sps:$4 sm:$0xff]  }
  0x11   :  { %3054 = vmatpush1.bf16.msra.mxu1 %v21337_v6  ;;  %v21351_v16 = vld [vmem:[%s31752_s20 + $0x1a4] ss:$52 sps:$4 sm:$0xff]   ;;  %v21357_v20 = vld [vmem:[%s31752_s20 + $0x20c] ss:$52 sps:$4 sm:$0xff]   ;;  %v21361_v22 = vld [vmem:[%s31752_s20 + $0x208] ss:$52 sps:$4 sm:$0xff]  }
  0x12   :  { %3095 = vmatpush1.bf16.msra.mxu0 %v21338_v7  ;;  %3055 = vmatprep.subr.bf16.mxu1 %v21339_v8  ;;  %v21353_v17 = vld [vmem:[%s31752_s20 + $0x824] ss:$52 sps:$4 sm:$0xff]   ;;  %v21359_v21 = vld [vmem:[%s31752_s20 + $0x88c] ss:$52 sps:$4 sm:$0xff]   ;;  %v21362_v23 = vld [vmem:[%s31752_s20 + $0x888] ss:$52 sps:$4 sm:$0xff]  }
  0x13   :  { %3096 = vmatprep.subr.bf16.mxu0 %v21341_v9  ;;  %v21363_v24 = vld [vmem:[%s31752_s20 + $0x274] ss:$52 sps:$4 sm:$0xff]   ;;  %v21367_v26 = vld [vmem:[%s31752_s20 + $0x270] ss:$52 sps:$4 sm:$0xff]   ;;  %v21373_v30 = vld [vmem:[%s31752_s20 + $0x2d8] ss:$52 sps:$4 sm:$0xff]  }
  0x14   :  { %v21365_v25 = vld [vmem:[%s31752_s20 + $0x8f4] ss:$52 sps:$4 sm:$0xff]   ;;  %v21368_v27 = vld [vmem:[%s31752_s20 + $0x8f0] ss:$52 sps:$4 sm:$0xff]   ;;  %v21374_v31 = vld [vmem:[%s31752_s20 + $0x958] ss:$52 sps:$4 sm:$0xff]  }
  0x15   :  { %3056 = vmatpush1.bf16.msra.mxu1 %v21343_v10  ;;  %v21369_v28 = vld [vmem:[%s31752_s20 + $0x2dc] ss:$52 sps:$4 sm:$0xff]   ;;  %v21375_v32 = vld [vmem:[%s31752_s20 + $0x344] ss:$52 sps:$4 sm:$0xff]   ;;  %v21379_v34 = vld [vmem:[%s31752_s20 + $0x340] ss:$52 sps:$4 sm:$0xff]  }
  0x16   :  { %3097 = vmatpush1.bf16.msra.mxu0 %v21344_v11  ;;  %3057 = vmatprep.subr.bf16.mxu1 %v21345_v12  ;;  %v21371_v29 = vld [vmem:[%s31752_s20 + $0x95c] ss:$52 sps:$4 sm:$0xff]   ;;  %v21377_v33 = vld [vmem:[%s31752_s20 + $0x9c4] ss:$52 sps:$4 sm:$0xff]   ;;  %v21380_v35 = vld [vmem:[%s31752_s20 + $0x9c0] ss:$52 sps:$4 sm:$0xff]  }
  0x17   :  { %3098 = vmatprep.subr.bf16.mxu0 %v21347_v13  ;;  %v21381_v39 = vld [vmem:[%s31752_s20 + $0x3ac] ss:$52 sps:$4 sm:$0xff]   ;;  %v21385_v41 = vld [vmem:[%s31752_s20 + $0x3a8] ss:$52 sps:$4 sm:$0xff]   ;;  %v21391_v47 = vld [vmem:[%s31752_s20 + $0x410] ss:$52 sps:$4 sm:$0xff]  }
  0x18   :  { %v21383_v40 = vld [vmem:[%s31752_s20 + $0xa2c] ss:$52 sps:$4 sm:$0xff]   ;;  %v21386_v44 = vld [vmem:[%s31752_s20 + $0xa28] ss:$52 sps:$4 sm:$0xff]   ;;  %v21392_v48 = vld [vmem:[%s31752_s20 + $0xa90] ss:$52 sps:$4 sm:$0xff]  }
  0x19   :  { %3058 = vmatpush1.bf16.msra.mxu1 %v21349_v14  ;;  %v21387_v45 = vld [vmem:[%s31752_s20 + $0x414] ss:$52 sps:$4 sm:$0xff]   ;;  %v21393_v50 = vld [vmem:[%s31752_s20 + $0x47c] ss:$52 sps:$4 sm:$0xff]   ;;  %v60_v52 = vld [vmem:[%s31753_s26] sm:$0xff] }
  0x1a   :  { %3099 = vmatpush1.bf16.msra.mxu0 %v21350_v15  ;;  %3059 = vmatprep.subr.bf16.mxu1 %v21351_v16  ;;  %v21389_v46 = vld [vmem:[%s31752_s20 + $0xa94] ss:$52 sps:$4 sm:$0xff]   ;;  %v21395_v51 = vld [vmem:[%s31752_s20 + $0xafc] ss:$52 sps:$4 sm:$0xff]   ;;  %v21397_v53 = vld [vmem:[%s31752_s20 + $0x478] ss:$52 sps:$4 sm:$0xff]   ;;  %v575_v54 = vrot.slane %v60_v52, %v24266_v49  ;;  %v568_v55 = vcombine.high %v60_v52, %v60_v52 }
  0x1b   :  { %3100 = vmatprep.subr.bf16.mxu0 %v21353_v17  ;;  %v21398_v56 = vld [vmem:[%s31752_s20 + $0xaf8] ss:$52 sps:$4 sm:$0xff]   ;;  %v21403_v61 = vld [vmem:[%s31752_s20 + $0x4e0] ss:$52 sps:$4 sm:$0xff]   ;;  %v21409_v4 = vld [vmem:[%s31752_s20 + $0x548] ss:$52 sps:$4 sm:$0xff]  }
  0x1c   :  { %v21399_v57 = vld [vmem:[%s31752_s20 + $0x4e4] ss:$52 sps:$4 sm:$0xff]   ;;  %v583_v59 = vcombine.high %v575_v54, %v575_v54  ;;  %v582_v60 = vrot.slane %v568_v55, %v24266_v49  ;;  %v21404_v0 = vld [vmem:[%s31752_s20 + $0xb60] ss:$52 sps:$4 sm:$0xff]   ;;  %v21410_v5 = vld [vmem:[%s31752_s20 + $0xbc8] ss:$52 sps:$4 sm:$0xff]   ;;  %v24345_v16 = vpack.c.bf16 %v575_v54, %v575_v54 }
  0x1d   :  { %3060 = vmatpush1.bf16.msra.mxu1 %v21355_v18  ;;  %v21401_v58 = vld [vmem:[%s31752_s20 + $0xb64] ss:$52 sps:$4 sm:$0xff]   ;;  %v21405_v1 = vld [vmem:[%s31752_s20 + $0x54c] ss:$52 sps:$4 sm:$0xff]   ;;  %v21411_v6 = vld [vmem:[%s31752_s20 + $0x5b4] ss:$52 sps:$4 sm:$0xff]  }
  0x1e   :  { %3101 = vmatpush1.bf16.msra.mxu0 %v21356_v19  ;;  %3061 = vmatprep.subr.bf16.mxu1 %v21357_v20  ;;  %v24294_v62 = vpack.c.bf16 %v583_v59, %v583_v59  ;;  %v584_v63 = vcombine.high %v582_v60, %v582_v60  ;;  %v21407_v2 = vld [vmem:[%s31752_s20 + $0xbcc] ss:$52 sps:$4 sm:$0xff]   ;;  %v21413_v7 = vld [vmem:[%s31752_s20 + $0xc34] ss:$52 sps:$4 sm:$0xff]   ;;  %v21415_v8 = vld [vmem:[%s31752_s20 + $0x5b0] ss:$52 sps:$4 sm:$0xff]   ;;  %v24347_v17 = vpack.c.bf16 %v582_v60, %v582_v60 }
  0x1f   :  { %3102 = vmatprep.subr.bf16.mxu0 %v21359_v21  ;;  %v21416_v9 = vld [vmem:[%s31752_s20 + $0xc30] ss:$52 sps:$4 sm:$0xff]   ;;  %v21421_v12 = vld [vmem:[%s31752_s20 + $0x618] ss:$52 sps:$4 sm:$0xff]   ;;  %v21429_v15 = vld [vmem:[%s31752_s20 + $0x14] ss:$52 sps:$4 sm:$0xff]  }
  0x20   :  { %v24305_v3 = vpack.c.bf16 %v584_v63, %v584_v63  ;;  %3083 = vmatprep.mubr.bf16.mxu1 %v24294_v62  ;;  %v21417_v10 = vld [vmem:[%s31752_s20 + $0x61c] ss:$52 sps:$4 sm:$0xff]   ;;  %v21422_v13 = vld [vmem:[%s31752_s20 + $0xc98] ss:$52 sps:$4 sm:$0xff]   ;;  %v21424_v18 = vld [vmem:[%s31752_s20 + $0xd00] ss:$52 sps:$4 sm:$0xff]  }
  0x21   :  { %3062 = vmatpush1.bf16.msra.mxu1 %v21361_v22  ;;  %v21419_v11 = vld [vmem:[%s31752_s20 + $0xc9c] ss:$52 sps:$4 sm:$0xff]   ;;  %v21426_v14 = vld [vmem:[%s31752_s20 + $0xd04] ss:$52 sps:$4 sm:$0xff]   ;;  %v21432_v20 = vld [vmem:[%s31752_s20 + $0xd6c] ss:$52 sps:$4 sm:$0xff]  }
  0x22   :  { %3103 = vmatpush1.bf16.msra.mxu0 %v21362_v23  ;;  %3063 = vmatprep.subr.bf16.mxu1 %v21363_v24  ;;  %v21427_v19 = vld [vmem:[%s31752_s20 + $0x10] ss:$52 sps:$4 sm:$0xff]   ;;  %v21430_v22 = vld [vmem:[%s31752_s20 + $0xd68] ss:$52 sps:$4 sm:$0xff]   ;;  %v21433_v23 = vld [vmem:[%s31752_s20 + $0x78] ss:$52 sps:$4 sm:$0xff]  }
  0x23   :  { %3104 = vmatprep.subr.bf16.mxu0 %v21365_v25  ;;  %3124 = vmatprep.mubr.bf16.mxu0 %v24305_v3  ;;  %v21435_v21 = vld [vmem:[%s31752_s20 + $0x7c] ss:$52 sps:$4 sm:$0xff]   ;;  %v21438_v24 = vld [vmem:[%s31752_s20 + $0xdd4] ss:$52 sps:$4 sm:$0xff]   ;;  %v21441_v25 = vld [vmem:[%s31752_s20 + $0xe4] ss:$52 sps:$4 sm:$0xff]  }
  0x24   :  { %v21448_v37 = vld [vmem:[%s31752_s20 + $0x8] ss:$52 sps:$4 sm:$0xff]   ;;  %v21451_v38 = vld [vmem:[%s31752_s20 + $0x1b0] ss:$52 sps:$4 sm:$0xff]   ;;  %v21457_v42 = vld [vmem:[%s31752_s20 + $0x218] ss:$52 sps:$4 sm:$0xff]  }
  0x25   :  { %3064 = vmatpush1.bf16.msra.mxu1 %v21367_v26  ;;  %v24024_v26 = vmov 0   ;;  %v21469_v52 = vld [vmem:[%s31752_s20 + $0x2e8] ss:$52 sps:$4 sm:$0xff]   ;;  %v21478_v59 = vld [vmem:[%s31752_s20 + $0x210] ss:$52 sps:$4 sm:$0xff]  }
  0x26   :  { %3105 = vmatpush1.bf16.msra.mxu0 %v21368_v27  ;;  %3065 = vmatprep.subr.bf16.mxu1 %v21369_v28  ;;  %v21436_v27 = vld [vmem:[%s31752_s20 + $0xdd0] ss:$52 sps:$4 sm:$0xff]   ;;  %v21439_v28 = vld [vmem:[%s31752_s20 + $0xe0] ss:$52 sps:$4 sm:$0xff]   ;;  %v21472_v55 = vld [vmem:[%s31752_s20 + $0x1a8] ss:$52 sps:$4 sm:$0xff]  }
  0x27   :  { %3106 = vmatprep.subr.bf16.mxu0 %v21371_v29  ;;  %v21444_v29 = vld [vmem:[%s31752_s20 + $0xe3c] ss:$52 sps:$4 sm:$0xff]   ;;  %v21477_v54 = vld [vmem:[%s31752_s20 + $0x354] ss:$52 sps:$4 sm:$0xff]   ;;  %v21481_v60 = vld [vmem:[%s31752_s20 + $0x3b8] ss:$52 sps:$4 sm:$0xff]  }
  0x28   :  { %v21489_v63 = vld [vmem:[%s31752_s20 + $0x424] ss:$52 sps:$4 sm:$0xff]  }
  0x29   :  { %3066 = vmatpush1.bf16.msra.mxu1 %v21373_v30  ;;  %v21447_v30 = vld [vmem:[%s31752_s20 + $0x14c] ss:$52 sps:$4 sm:$0xff]  }
  0x2a   :  { %3107 = vmatpush1.bf16.msra.mxu0 %v21374_v31  ;;  %3067 = vmatprep.subr.bf16.mxu1 %v21375_v32  ;;  %v21442_v31 = vld [vmem:[%s31752_s20 + $0xe38] ss:$52 sps:$4 sm:$0xff]   ;;  %v21445_v32 = vld [vmem:[%s31752_s20 + $0x148] ss:$52 sps:$4 sm:$0xff]  }
  0x2b   :  { %3108 = vmatprep.subr.bf16.mxu0 %v21377_v33  ;;  %v18477_v33 = vld.sshfl [vmem:[%s31753_s26 + $0x8] sm:$0x3 pattern:$0x76325410] }
  0x2c   :  { %v24404_v36 = vpack.c.bf16 %v18477_v33, %v18477_v33  ;;  %v21529_v33 = vld [vmem:[%s31752_s20 + $0x6f8] ss:$52 sps:$4 sm:$0xff]  }
  0x2d   :  { %3068 = vmatpush1.bf16.msra.mxu1 %v21379_v34  ;;  %v21450_v34 = vld [vmem:[%s31752_s20 + $0xc] ss:$52 sps:$4 sm:$0xff]  }
  0x2e   :  { %3109 = vmatpush1.bf16.msra.mxu0 %v21380_v35  ;;  %3069 = vmatprep.subr.bf16.mxu1 %v21381_v39  ;;  %v21453_v35 = vld [vmem:[%s31752_s20 + $0x1b4] ss:$52 sps:$4 sm:$0xff]  }
  0x2f   :  { %3110 = vmatprep.subr.bf16.mxu0 %v21383_v40  ;;  %v21456_v39 = vld [vmem:[%s31752_s20 + $0x74] ss:$52 sps:$4 sm:$0xff]   ;;  %v21459_v40 = vld [vmem:[%s31752_s20 + $0x21c] ss:$52 sps:$4 sm:$0xff]  }
  0x31   :  { %3070 = vmatpush1.bf16.msra.mxu1 %v21385_v41  ;;  %v21454_v41 = vld [vmem:[%s31752_s20 + $0x70] ss:$52 sps:$4 sm:$0xff]  }
  0x32   :  { %3111 = vmatpush1.bf16.msra.mxu0 %v21386_v44  ;;  %3071 = vmatprep.subr.bf16.mxu1 %v21387_v45  ;;  %v21462_v44 = vld [vmem:[%s31752_s20 + $0xdc] ss:$52 sps:$4 sm:$0xff]   ;;  %v21465_v45 = vld [vmem:[%s31752_s20 + $0x284] ss:$52 sps:$4 sm:$0xff]  }
  0x33   :  { %3112 = vmatprep.subr.bf16.mxu0 %v21389_v46  ;;  %v21460_v46 = vld [vmem:[%s31752_s20 + $0xd8] ss:$52 sps:$4 sm:$0xff]  }
  0x35   :  { %3072 = vmatpush1.bf16.msra.mxu1 %v21391_v47  ;;  %v21463_v47 = vld [vmem:[%s31752_s20 + $0x280] ss:$52 sps:$4 sm:$0xff]  }
  0x36   :  { %3113 = vmatpush1.bf16.msra.mxu0 %v21392_v48  ;;  %3073 = vmatprep.subr.bf16.mxu1 %v21393_v50  ;;  %v21468_v48 = vld [vmem:[%s31752_s20 + $0x144] ss:$52 sps:$4 sm:$0xff]   ;;  %v21471_v50 = vld [vmem:[%s31752_s20 + $0x2ec] ss:$52 sps:$4 sm:$0xff]  }
  0x37   :  { %3114 = vmatprep.subr.bf16.mxu0 %v21395_v51  ;;  %v21466_v51 = vld [vmem:[%s31752_s20 + $0x140] ss:$52 sps:$4 sm:$0xff]  }
  0x39   :  { %3074 = vmatpush1.bf16.msra.mxu1 %v21397_v53  ;;  %v21474_v53 = vld [vmem:[%s31752_s20 + $0x1ac] ss:$52 sps:$4 sm:$0xff]  }
  0x3a   :  { %3115 = vmatpush1.bf16.msra.mxu0 %v21398_v56  ;;  %3075 = vmatprep.subr.bf16.mxu1 %v21399_v57  ;;  %v21475_v56 = vld [vmem:[%s31752_s20 + $0x350] ss:$52 sps:$4 sm:$0xff]   ;;  %v21480_v57 = vld [vmem:[%s31752_s20 + $0x214] ss:$52 sps:$4 sm:$0xff]  }
  0x3b   :  { %3116 = vmatprep.subr.bf16.mxu0 %v21401_v58  ;;  %v21483_v58 = vld [vmem:[%s31752_s20 + $0x3bc] ss:$52 sps:$4 sm:$0xff]  }
  0x3d   :  { %3076 = vmatpush1.bf16.msra.mxu1 %v21403_v61  ;;  %v21486_v61 = vld [vmem:[%s31752_s20 + $0x27c] ss:$52 sps:$4 sm:$0xff]  }
  0x3e   :  { %3117 = vmatpush1.bf16.msra.mxu0 %v21404_v0  ;;  %3077 = vmatprep.subr.bf16.mxu1 %v21405_v1  ;;  %v21484_v0 = vld [vmem:[%s31752_s20 + $0x278] ss:$52 sps:$4 sm:$0xff]   ;;  %v21487_v1 = vld [vmem:[%s31752_s20 + $0x420] ss:$52 sps:$4 sm:$0xff]  }
  0x3f   :  { %3118 = vmatprep.subr.bf16.mxu0 %v21407_v2  ;;  %v21492_v2 = vld [vmem:[%s31752_s20 + $0x2e4] ss:$52 sps:$4 sm:$0xff]  }
  0x41   :  { %3078 = vmatpush1.bf16.msra.mxu1 %v21409_v4  ;;  %v21495_v4 = vld [vmem:[%s31752_s20 + $0x48c] ss:$52 sps:$4 sm:$0xff]  }
  0x42   :  { %3119 = vmatpush1.bf16.msra.mxu0 %v21410_v5  ;;  %3079 = vmatprep.subr.bf16.mxu1 %v21411_v6  ;;  %v21490_v5 = vld [vmem:[%s31752_s20 + $0x2e0] ss:$52 sps:$4 sm:$0xff]   ;;  %v21493_v6 = vld [vmem:[%s31752_s20 + $0x488] ss:$52 sps:$4 sm:$0xff]  }
  0x43   :  { %3120 = vmatprep.subr.bf16.mxu0 %v21413_v7  ;;  %v21498_v7 = vld [vmem:[%s31752_s20 + $0x34c] ss:$52 sps:$4 sm:$0xff]  }
  0x45   :  { %3080 = vmatpush1.bf16.msra.mxu1 %v21415_v8  ;;  %v21501_v8 = vld [vmem:[%s31752_s20 + $0x4f4] ss:$52 sps:$4 sm:$0xff]  }
  0x46   :  { %3121 = vmatpush1.bf16.msra.mxu0 %v21416_v9  ;;  %3081 = vmatprep.subr.bf16.mxu1 %v21417_v10  ;;  %v21496_v9 = vld [vmem:[%s31752_s20 + $0x348] ss:$52 sps:$4 sm:$0xff]   ;;  %v21499_v10 = vld [vmem:[%s31752_s20 + $0x4f0] ss:$52 sps:$4 sm:$0xff]  }
  0x47   :  { %3122 = vmatprep.subr.bf16.mxu0 %v21419_v11  ;;  %v21504_v11 = vld [vmem:[%s31752_s20 + $0x3b4] ss:$52 sps:$4 sm:$0xff]  }
  0x49   :  { %3082 = vmatpush1.bf16.msra.mxu1 %v21421_v12  ;;  %v21507_v12 = vld [vmem:[%s31752_s20 + $0x55c] ss:$52 sps:$4 sm:$0xff]  }
  0x4a   :  { %3123 = vmatpush1.bf16.msra.mxu0 %v21422_v13  ;;  %3133 = vmatprep.subr.bf16.mxu1 %v21426_v14  ;;  %v21502_v13 = vld [vmem:[%s31752_s20 + $0x3b0] ss:$52 sps:$4 sm:$0xff]   ;;  %v21505_v14 = vld [vmem:[%s31752_s20 + $0x558] ss:$52 sps:$4 sm:$0xff]  }
  0x4b   :  { %3297 = vmatprep.subr.bf16.mxu0 %v21429_v15  ;;  %v21510_v15 = vld [vmem:[%s31752_s20 + $0x41c] ss:$52 sps:$4 sm:$0xff]  }
  0x4c   :  { %3084 = vmatmul.mubr.bf16.vlgmr.msra.gmra.mrb[0].mxu1 %v24345_v16 }
  0x4d   :  { %3125 = vmatmul.mubr.bf16.vlgmr.msra.gmra.mrb[0].mxu0 %v24347_v17  ;;  %3134 = vmatpush1.bf16.msra.mxu1 %v21424_v18  ;;  %v21513_v18 = vld [vmem:[%s31752_s20 + $0x5c4] ss:$52 sps:$4 sm:$0xff]  }
  0x4e   :  { %3298 = vmatpush1.bf16.msra.mxu0 %v21427_v19  ;;  %3135 = vmatprep.subr.bf16.mxu1 %v21432_v20  ;;  %v21508_v19 = vld [vmem:[%s31752_s20 + $0x418] ss:$52 sps:$4 sm:$0xff]   ;;  %v21511_v20 = vld [vmem:[%s31752_s20 + $0x5c0] ss:$52 sps:$4 sm:$0xff]  }
  0x4f   :  { %3299 = vmatprep.subr.bf16.mxu0 %v21435_v21  ;;  %3165 = vmatprep.mubr.bf16.mxu1 %v24024_v26  ;;  %v21516_v21 = vld [vmem:[%s31752_s20 + $0x484] ss:$52 sps:$4 sm:$0xff]  }
  0x50   :  { %3329 = vmatprep.mubr.bf16.mxu0 %v24294_v62 }
  0x51   :  { %3136 = vmatpush1.bf16.msra.mxu1 %v21430_v22  ;;  %v21519_v22 = vld [vmem:[%s31752_s20 + $0x62c] ss:$52 sps:$4 sm:$0xff]  }
  0x52   :  { %3300 = vmatpush1.bf16.msra.mxu0 %v21433_v23  ;;  %3137 = vmatprep.subr.bf16.mxu1 %v21438_v24  ;;  %v21514_v23 = vld [vmem:[%s31752_s20 + $0x480] ss:$52 sps:$4 sm:$0xff]   ;;  %v21517_v24 = vld [vmem:[%s31752_s20 + $0x628] ss:$52 sps:$4 sm:$0xff]  }
  0x53   :  { %3301 = vmatprep.subr.bf16.mxu0 %v21441_v25  ;;  %v21522_v25 = vld [vmem:[%s31752_s20 + $0x4ec] ss:$52 sps:$4 sm:$0xff]  }
  0x55   :  { %3138 = vmatpush1.bf16.msra.mxu1 %v21436_v27  ;;  %v21525_v27 = vld [vmem:[%s31752_s20 + $0x694] ss:$52 sps:$4 sm:$0xff]  }
  0x56   :  { %3302 = vmatpush1.bf16.msra.mxu0 %v21439_v28  ;;  %3139 = vmatprep.subr.bf16.mxu1 %v21444_v29  ;;  %v21520_v28 = vld [vmem:[%s31752_s20 + $0x4e8] ss:$52 sps:$4 sm:$0xff]   ;;  %v21523_v29 = vld [vmem:[%s31752_s20 + $0x690] ss:$52 sps:$4 sm:$0xff]  }
  0x57   :  { %3303 = vmatprep.subr.bf16.mxu0 %v21447_v30  ;;  %v21528_v30 = vld [vmem:[%s31752_s20 + $0x554] ss:$52 sps:$4 sm:$0xff]  }
  0x59   :  { %3140 = vmatpush1.bf16.msra.mxu1 %v21442_v31  ;;  %v21531_v31 = vld [vmem:[%s31752_s20 + $0x6fc] ss:$52 sps:$4 sm:$0xff]  }
  0x5a   :  { %3304 = vmatpush1.bf16.msra.mxu0 %v21445_v32  ;;  %3174 = vmatprep.subr.bf16.mxu1 %v21450_v34  ;;  %v21526_v32 = vld [vmem:[%s31752_s20 + $0x550] ss:$52 sps:$4 sm:$0xff]  }
  0x5b   :  { %3305 = vmatprep.subr.bf16.mxu0 %v21453_v35  ;;  %v21534_v34 = vld [vmem:[%s31752_s20 + $0x5bc] ss:$52 sps:$4 sm:$0xff]   ;;  %v21537_v35 = vld [vmem:[%s31752_s20 + $0x764] ss:$52 sps:$4 sm:$0xff]  }
  0x5c   :  { %18946 = vmatmul.mubr.msk.bf16.vlgmr.msra.gmra.mrb[4].mxu1 %vm3047_vm0, %v24404_v36 }
  0x5d   :  { %3175 = vmatpush1.bf16.msra.mxu1 %v21448_v37  ;;  %3206 = vmatprep.mubr.bf16.mxu1 %v24294_v62  ;;  %v21532_v37 = vld [vmem:[%s31752_s20 + $0x5b8] ss:$52 sps:$4 sm:$0xff]  }
  0x5e   :  { %3306 = vmatpush1.bf16.msra.mxu0 %v21451_v38  ;;  %3176 = vmatprep.subr.bf16.mxu1 %v21456_v39  ;;  %v21535_v38 = vld [vmem:[%s31752_s20 + $0x760] ss:$52 sps:$4 sm:$0xff]   ;;  %v21540_v39 = vld [vmem:[%s31752_s20 + $0x624] ss:$52 sps:$4 sm:$0xff]  }
  0x5f   :  { %3307 = vmatprep.subr.bf16.mxu0 %v21459_v40  ;;  %v21543_v40 = vld [vmem:[%s31752_s20 + $0x7cc] ss:$52 sps:$4 sm:$0xff]  }
  0x61   :  { %3177 = vmatpush1.bf16.msra.mxu1 %v21454_v41  ;;  %v21538_v41 = vld [vmem:[%s31752_s20 + $0x620] ss:$52 sps:$4 sm:$0xff]  }
  0x62   :  { %3308 = vmatpush1.bf16.msra.mxu0 %v21457_v42  ;;  %3178 = vmatprep.subr.bf16.mxu1 %v21462_v44  ;;  %v21541_v42 = vld [vmem:[%s31752_s20 + $0x7c8] ss:$52 sps:$4 sm:$0xff]   ;;  %v21546_v44 = vld [vmem:[%s31752_s20 + $0x68c] ss:$52 sps:$4 sm:$0xff]  }
  0x63   :  { %3309 = vmatprep.subr.bf16.mxu0 %v21465_v45  ;;  %v21549_v45 = vld [vmem:[%s31752_s20 + $0x834] ss:$52 sps:$4 sm:$0xff]  }
  0x65   :  { %3179 = vmatpush1.bf16.msra.mxu1 %v21460_v46  ;;  %v21544_v46 = vld [vmem:[%s31752_s20 + $0x688] ss:$52 sps:$4 sm:$0xff]  }
  0x66   :  { %3310 = vmatpush1.bf16.msra.mxu0 %v21463_v47  ;;  %3180 = vmatprep.subr.bf16.mxu1 %v21468_v48  ;;  %v21547_v47 = vld [vmem:[%s31752_s20 + $0x830] ss:$52 sps:$4 sm:$0xff]   ;;  %v21552_v48 = vld [vmem:[%s31752_s20 + $0x6f4] ss:$52 sps:$4 sm:$0xff]  }
  0x67   :  { %3311 = vmatprep.subr.bf16.mxu0 %v21471_v50  ;;  %v21555_v50 = vld [vmem:[%s31752_s20 + $0x89c] ss:$52 sps:$4 sm:$0xff]  }
  0x69   :  { %3181 = vmatpush1.bf16.msra.mxu1 %v21466_v51  ;;  %v21550_v51 = vld [vmem:[%s31752_s20 + $0x6f0] ss:$52 sps:$4 sm:$0xff]  }
  0x6a   :  { %3312 = vmatpush1.bf16.msra.mxu0 %v21469_v52  ;;  %3182 = vmatprep.subr.bf16.mxu1 %v21474_v53  ;;  %v21553_v52 = vld [vmem:[%s31752_s20 + $0x898] ss:$52 sps:$4 sm:$0xff]   ;;  %v21558_v53 = vld [vmem:[%s31752_s20 + $0x75c] ss:$52 sps:$4 sm:$0xff]  }
  0x6b   :  { %3313 = vmatprep.subr.bf16.mxu0 %v21477_v54  ;;  %v21561_v54 = vld [vmem:[%s31752_s20 + $0x904] ss:$52 sps:$4 sm:$0xff]  }
  0x6d   :  { %3183 = vmatpush1.bf16.msra.mxu1 %v21472_v55  ;;  %v21556_v55 = vld [vmem:[%s31752_s20 + $0x758] ss:$52 sps:$4 sm:$0xff]  }
  0x6e   :  { %3314 = vmatpush1.bf16.msra.mxu0 %v21475_v56  ;;  %3184 = vmatprep.subr.bf16.mxu1 %v21480_v57  ;;  %v21559_v56 = vld [vmem:[%s31752_s20 + $0x900] ss:$52 sps:$4 sm:$0xff]   ;;  %v21564_v57 = vld [vmem:[%s31752_s20 + $0x7c4] ss:$52 sps:$4 sm:$0xff]  }
  0x6f   :  { %3315 = vmatprep.subr.bf16.mxu0 %v21483_v58  ;;  %v21567_v58 = vld [vmem:[%s31752_s20 + $0x96c] ss:$52 sps:$4 sm:$0xff]  }
  0x71   :  { %3185 = vmatpush1.bf16.msra.mxu1 %v21478_v59  ;;  %v21562_v59 = vld [vmem:[%s31752_s20 + $0x7c0] ss:$52 sps:$4 sm:$0xff]  }
  0x72   :  { %3316 = vmatpush1.bf16.msra.mxu0 %v21481_v60  ;;  %3186 = vmatprep.subr.bf16.mxu1 %v21486_v61  ;;  %v21565_v60 = vld [vmem:[%s31752_s20 + $0x968] ss:$52 sps:$4 sm:$0xff]   ;;  %v21570_v61 = vld [vmem:[%s31752_s20 + $0x82c] ss:$52 sps:$4 sm:$0xff]  }
  0x73   :  { %3317 = vmatprep.subr.bf16.mxu0 %v21489_v63  ;;  %v21573_v63 = vld [vmem:[%s31752_s20 + $0x9d4] ss:$52 sps:$4 sm:$0xff]  }
  0x75   :  { %3187 = vmatpush1.bf16.msra.mxu1 %v21484_v0  ;;  %v21568_v0 = vld [vmem:[%s31752_s20 + $0x828] ss:$52 sps:$4 sm:$0xff]  }
  0x76   :  { %3318 = vmatpush1.bf16.msra.mxu0 %v21487_v1  ;;  %3188 = vmatprep.subr.bf16.mxu1 %v21492_v2  ;;  %v21571_v1 = vld [vmem:[%s31752_s20 + $0x9d0] ss:$52 sps:$4 sm:$0xff]   ;;  %v21576_v2 = vld [vmem:[%s31752_s20 + $0x894] ss:$52 sps:$4 sm:$0xff]  }
  0x77   :  { %3319 = vmatprep.subr.bf16.mxu0 %v21495_v4  ;;  %v21579_v4 = vld [vmem:[%s31752_s20 + $0xa3c] ss:$52 sps:$4 sm:$0xff]  }
  0x79   :  { %3189 = vmatpush1.bf16.msra.mxu1 %v21490_v5  ;;  %v21574_v5 = vld [vmem:[%s31752_s20 + $0x890] ss:$52 sps:$4 sm:$0xff]  }
  0x7a   :  { %3320 = vmatpush1.bf16.msra.mxu0 %v21493_v6  ;;  %3190 = vmatprep.subr.bf16.mxu1 %v21498_v7  ;;  %v21577_v6 = vld [vmem:[%s31752_s20 + $0xa38] ss:$52 sps:$4 sm:$0xff]   ;;  %v21582_v7 = vld [vmem:[%s31752_s20 + $0x8fc] ss:$52 sps:$4 sm:$0xff]  }
  0x7b   :  { %3321 = vmatprep.subr.bf16.mxu0 %v21501_v8  ;;  %v21585_v8 = vld [vmem:[%s31752_s20 + $0xaa4] ss:$52 sps:$4 sm:$0xff]  }
  0x7d   :  { %3191 = vmatpush1.bf16.msra.mxu1 %v21496_v9  ;;  %v21580_v9 = vld [vmem:[%s31752_s20 + $0x8f8] ss:$52 sps:$4 sm:$0xff]  }
  0x7e   :  { %3322 = vmatpush1.bf16.msra.mxu0 %v21499_v10  ;;  %3192 = vmatprep.subr.bf16.mxu1 %v21504_v11  ;;  %v21583_v10 = vld [vmem:[%s31752_s20 + $0xaa0] ss:$52 sps:$4 sm:$0xff]   ;;  %v21588_v11 = vld [vmem:[%s31752_s20 + $0x964] ss:$52 sps:$4 sm:$0xff]  }
  0x7f   :  { %3323 = vmatprep.subr.bf16.mxu0 %v21507_v12  ;;  %v21591_v12 = vld [vmem:[%s31752_s20 + $0xb0c] ss:$52 sps:$4 sm:$0xff]  }
  0x81   :  { %3193 = vmatpush1.bf16.msra.mxu1 %v21502_v13  ;;  %v21586_v13 = vld [vmem:[%s31752_s20 + $0x960] ss:$52 sps:$4 sm:$0xff]  }
  0x82   :  { %3324 = vmatpush1.bf16.msra.mxu0 %v21505_v14  ;;  %3194 = vmatprep.subr.bf16.mxu1 %v21510_v15  ;;  %v21589_v14 = vld [vmem:[%s31752_s20 + $0xb08] ss:$52 sps:$4 sm:$0xff]   ;;  %v21594_v15 = vld [vmem:[%s31752_s20 + $0x9cc] ss:$52 sps:$4 sm:$0xff]  }
  0x83   :  { %3325 = vmatprep.subr.bf16.mxu0 %v21513_v18  ;;  %v21597_v18 = vld [vmem:[%s31752_s20 + $0xb74] ss:$52 sps:$4 sm:$0xff]  }
  0x85   :  { %3195 = vmatpush1.bf16.msra.mxu1 %v21508_v19  ;;  %v21592_v19 = vld [vmem:[%s31752_s20 + $0x9c8] ss:$52 sps:$4 sm:$0xff]  }
  0x86   :  { %3326 = vmatpush1.bf16.msra.mxu0 %v21511_v20  ;;  %3196 = vmatprep.subr.bf16.mxu1 %v21516_v21  ;;  %v21595_v20 = vld [vmem:[%s31752_s20 + $0xb70] ss:$52 sps:$4 sm:$0xff]   ;;  %v21600_v21 = vld [vmem:[%s31752_s20 + $0xa34] ss:$52 sps:$4 sm:$0xff]  }
  0x87   :  { %3327 = vmatprep.subr.bf16.mxu0 %v21519_v22  ;;  %v21603_v22 = vld [vmem:[%s31752_s20 + $0xbdc] ss:$52 sps:$4 sm:$0xff]  }
  0x89   :  { %3197 = vmatpush1.bf16.msra.mxu1 %v21514_v23  ;;  %v21598_v23 = vld [vmem:[%s31752_s20 + $0xa30] ss:$52 sps:$4 sm:$0xff]  }
  0x8a   :  { %3328 = vmatpush1.bf16.msra.mxu0 %v21517_v24  ;;  %3198 = vmatprep.subr.bf16.mxu1 %v21522_v25  ;;  %v21601_v24 = vld [vmem:[%s31752_s20 + $0xbd8] ss:$52 sps:$4 sm:$0xff]   ;;  %v21606_v25 = vld [vmem:[%s31752_s20 + $0xa9c] ss:$52 sps:$4 sm:$0xff]  }
  0x8b   :  { %3338 = vmatprep.subr.bf16.mxu0 %v21525_v27  ;;  %v21609_v27 = vld [vmem:[%s31752_s20 + $0xc44] ss:$52 sps:$4 sm:$0xff]  }
  0x8d   :  { %3330 = vmatmul.mubr.bf16.vlgmr.msra.gmra.mrb[4].mxu0 %v24345_v16  ;;  %3199 = vmatpush1.bf16.msra.mxu1 %v21520_v28  ;;  %v21604_v28 = vld [vmem:[%s31752_s20 + $0xa98] ss:$52 sps:$4 sm:$0xff]  }
  0x8e   :  { %3339 = vmatpush1.bf16.msra.mxu0 %v21523_v29  ;;  %3200 = vmatprep.subr.bf16.mxu1 %v21528_v30  ;;  %v21607_v29 = vld [vmem:[%s31752_s20 + $0xc40] ss:$52 sps:$4 sm:$0xff]   ;;  %v21612_v30 = vld [vmem:[%s31752_s20 + $0xb04] ss:$52 sps:$4 sm:$0xff]  }
  0x8f   :  { %3340 = vmatprep.subr.bf16.mxu0 %v21531_v31  ;;  %3370 = vmatprep.mubr.bf16.mxu0 %v24305_v3  ;;  %v21615_v31 = vld [vmem:[%s31752_s20 + $0xcac] ss:$52 sps:$4 sm:$0xff]  }
  0x91   :  { %3201 = vmatpush1.bf16.msra.mxu1 %v21526_v32  ;;  %v21610_v32 = vld [vmem:[%s31752_s20 + $0xb00] ss:$52 sps:$4 sm:$0xff]  }
  0x92   :  { %3341 = vmatpush1.bf16.msra.mxu0 %v21529_v33  ;;  %3202 = vmatprep.subr.bf16.mxu1 %v21534_v34  ;;  %v21613_v33 = vld [vmem:[%s31752_s20 + $0xca8] ss:$52 sps:$4 sm:$0xff]   ;;  %v21618_v34 = vld [vmem:[%s31752_s20 + $0xb6c] ss:$52 sps:$4 sm:$0xff]  }
  0x93   :  { %3342 = vmatprep.subr.bf16.mxu0 %v21537_v35  ;;  %v21621_v35 = vld [vmem:[%s31752_s20 + $0xd14] ss:$52 sps:$4 sm:$0xff]  }
  0x95   :  { %3203 = vmatpush1.bf16.msra.mxu1 %v21532_v37  ;;  %v21616_v37 = vld [vmem:[%s31752_s20 + $0xb68] ss:$52 sps:$4 sm:$0xff]  }
  0x96   :  { %3343 = vmatpush1.bf16.msra.mxu0 %v21535_v38  ;;  %3204 = vmatprep.subr.bf16.mxu1 %v21540_v39  ;;  %v21619_v38 = vld [vmem:[%s31752_s20 + $0xd10] ss:$52 sps:$4 sm:$0xff]   ;;  %v21624_v39 = vld [vmem:[%s31752_s20 + $0xbd4] ss:$52 sps:$4 sm:$0xff]  }
  0x97   :  { %3344 = vmatprep.subr.bf16.mxu0 %v21543_v40  ;;  %v21627_v40 = vld [vmem:[%s31752_s20 + $0xd7c] ss:$52 sps:$4 sm:$0xff]  }
  0x99   :  { %3205 = vmatpush1.bf16.msra.mxu1 %v21538_v41  ;;  %v21622_v41 = vld [vmem:[%s31752_s20 + $0xbd0] ss:$52 sps:$4 sm:$0xff]  }
  0x9a   :  { %3345 = vmatpush1.bf16.msra.mxu0 %v21541_v42  ;;  %3215 = vmatprep.subr.bf16.mxu1 %v21546_v44  ;;  %v21625_v42 = vld [vmem:[%s31752_s20 + $0xd78] ss:$52 sps:$4 sm:$0xff]   ;;  %v21630_v44 = vld [vmem:[%s31752_s20 + $0xc3c] ss:$52 sps:$4 sm:$0xff]  }
  0x9b   :  { %3346 = vmatprep.subr.bf16.mxu0 %v21549_v45  ;;  %v21633_v45 = vld [vmem:[%s31752_s20 + $0xde4] ss:$52 sps:$4 sm:$0xff]  }
  0x9c   :  { %3207 = vmatmul.mubr.bf16.vlgmr.msra.gmra.mrb[8].mxu1 %v24345_v16 }
  0x9d   :  { %3216 = vmatpush1.bf16.msra.mxu1 %v21544_v46  ;;  %3247 = vmatprep.mubr.bf16.mxu1 %v24305_v3  ;;  %v21628_v46 = vld [vmem:[%s31752_s20 + $0xc38] ss:$52 sps:$4 sm:$0xff]  }
  0x9e   :  { %3347 = vmatpush1.bf16.msra.mxu0 %v21547_v47  ;;  %3217 = vmatprep.subr.bf16.mxu1 %v21552_v48  ;;  %v21631_v47 = vld [vmem:[%s31752_s20 + $0xde0] ss:$52 sps:$4 sm:$0xff]   ;;  %v21636_v48 = vld [vmem:[%s31752_s20 + $0xca4] ss:$52 sps:$4 sm:$0xff]  }
  0x9f   :  { %3348 = vmatprep.subr.bf16.mxu0 %v21555_v50  ;;  %v21639_v50 = vld [vmem:[%s31752_s20 + $0xe4c] ss:$52 sps:$4 sm:$0xff]  }
  0xa1   :  { %3218 = vmatpush1.bf16.msra.mxu1 %v21550_v51  ;;  %v21634_v51 = vld [vmem:[%s31752_s20 + $0xca0] ss:$52 sps:$4 sm:$0xff]  }
  0xa2   :  { %3349 = vmatpush1.bf16.msra.mxu0 %v21553_v52  ;;  %3219 = vmatprep.subr.bf16.mxu1 %v21558_v53  ;;  %v21637_v52 = vld [vmem:[%s31752_s20 + $0xe48] ss:$52 sps:$4 sm:$0xff]   ;;  %v21642_v53 = vld [vmem:[%s31752_s20 + $0xd0c] ss:$52 sps:$4 sm:$0xff]  }
  0xa3   :  { %3350 = vmatprep.subr.bf16.mxu0 %v21561_v54  ;;  %v21645_v54 = vld [vmem:[%s31752_s20 + $0x24] ss:$52 sps:$4 sm:$0xff]  }
  0xa5   :  { %3220 = vmatpush1.bf16.msra.mxu1 %v21556_v55  ;;  %v21640_v55 = vld [vmem:[%s31752_s20 + $0xd08] ss:$52 sps:$4 sm:$0xff]  }
  0xa6   :  { %3351 = vmatpush1.bf16.msra.mxu0 %v21559_v56  ;;  %3221 = vmatprep.subr.bf16.mxu1 %v21564_v57  ;;  %v21643_v56 = vld [vmem:[%s31752_s20 + $0x20] ss:$52 sps:$4 sm:$0xff]  }
  0xa7   :  { %3352 = vmatprep.subr.bf16.mxu0 %v21567_v58  ;;  %v21648_v57 = vld [vmem:[%s31752_s20 + $0xd74] ss:$52 sps:$4 sm:$0xff]   ;;  %v21651_v58 = vld [vmem:[%s31752_s20 + $0x8c] ss:$52 sps:$4 sm:$0xff]  }
  0xa9   :  { %3222 = vmatpush1.bf16.msra.mxu1 %v21562_v59  ;;  %v21646_v59 = vld [vmem:[%s31752_s20 + $0xd70] ss:$52 sps:$4 sm:$0xff]  }
  0xaa   :  { %3353 = vmatpush1.bf16.msra.mxu0 %v21565_v60  ;;  %3223 = vmatprep.subr.bf16.mxu1 %v21570_v61  ;;  %v21649_v60 = vld [vmem:[%s31752_s20 + $0x88] ss:$52 sps:$4 sm:$0xff]  }
  0xab   :  { %3354 = vmatprep.subr.bf16.mxu0 %v21573_v63  ;;  %v21654_v61 = vld [vmem:[%s31752_s20 + $0xddc] ss:$52 sps:$4 sm:$0xff]   ;;  %v21657_v63 = vld [vmem:[%s31752_s20 + $0xf4] ss:$52 sps:$4 sm:$0xff]  }
  0xad   :  { %3224 = vmatpush1.bf16.msra.mxu1 %v21568_v0  ;;  %v21652_v0 = vld [vmem:[%s31752_s20 + $0xdd8] ss:$52 sps:$4 sm:$0xff]  }
  0xae   :  { %3355 = vmatpush1.bf16.msra.mxu0 %v21571_v1  ;;  %3225 = vmatprep.subr.bf16.mxu1 %v21576_v2  ;;  %v21655_v1 = vld [vmem:[%s31752_s20 + $0xf0] ss:$52 sps:$4 sm:$0xff]  }
  0xaf   :  { %3356 = vmatprep.subr.bf16.mxu0 %v21579_v4  ;;  %v21660_v2 = vld [vmem:[%s31752_s20 + $0xe44] ss:$52 sps:$4 sm:$0xff]   ;;  %v21663_v4 = vld [vmem:[%s31752_s20 + $0x15c] ss:$52 sps:$4 sm:$0xff]  }
  0xb1   :  { %3226 = vmatpush1.bf16.msra.mxu1 %v21574_v5  ;;  %v21658_v5 = vld [vmem:[%s31752_s20 + $0xe40] ss:$52 sps:$4 sm:$0xff]  }
  0xb2   :  { %3357 = vmatpush1.bf16.msra.mxu0 %v21577_v6  ;;  %3227 = vmatprep.subr.bf16.mxu1 %v21582_v7  ;;  %v21661_v6 = vld [vmem:[%s31752_s20 + $0x158] ss:$52 sps:$4 sm:$0xff]   ;;  %v21666_v7 = vld [vmem:[%s31752_s20 + $0x1c] ss:$52 sps:$4 sm:$0xff]  }
  0xb3   :  { %3358 = vmatprep.subr.bf16.mxu0 %v21585_v8  ;;  %v21669_v8 = vld [vmem:[%s31752_s20 + $0x1c4] ss:$52 sps:$4 sm:$0xff]  }
  0xb5   :  { %3228 = vmatpush1.bf16.msra.mxu1 %v21580_v9  ;;  %v21664_v9 = vld [vmem:[%s31752_s20 + $0x18] ss:$52 sps:$4 sm:$0xff]  }
  0xb6   :  { %3359 = vmatpush1.bf16.msra.mxu0 %v21583_v10  ;;  %3229 = vmatprep.subr.bf16.mxu1 %v21588_v11  ;;  %v21667_v10 = vld [vmem:[%s31752_s20 + $0x1c0] ss:$52 sps:$4 sm:$0xff]   ;;  %v21672_v11 = vld [vmem:[%s31752_s20 + $0x84] ss:$52 sps:$4 sm:$0xff]  }
  0xb7   :  { %3360 = vmatprep.subr.bf16.mxu0 %v21591_v12  ;;  %v21675_v12 = vld [vmem:[%s31752_s20 + $0x22c] ss:$52 sps:$4 sm:$0xff]  }
  0xb9   :  { %3230 = vmatpush1.bf16.msra.mxu1 %v21586_v13  ;;  %v21670_v13 = vld [vmem:[%s31752_s20 + $0x80] ss:$52 sps:$4 sm:$0xff]  }
  0xba   :  { %3361 = vmatpush1.bf16.msra.mxu0 %v21589_v14  ;;  %3231 = vmatprep.subr.bf16.mxu1 %v21594_v15  ;;  %v21673_v14 = vld [vmem:[%s31752_s20 + $0x228] ss:$52 sps:$4 sm:$0xff]   ;;  %v21678_v15 = vld [vmem:[%s31752_s20 + $0xec] ss:$52 sps:$4 sm:$0xff]  }
  0xbb   :  { %3362 = vmatprep.subr.bf16.mxu0 %v21597_v18  ;;  %v21681_v18 = vld [vmem:[%s31752_s20 + $0x294] ss:$52 sps:$4 sm:$0xff]  }
  0xbd   :  { %3232 = vmatpush1.bf16.msra.mxu1 %v21592_v19  ;;  %v21676_v19 = vld [vmem:[%s31752_s20 + $0xe8] ss:$52 sps:$4 sm:$0xff]  }
  0xbe   :  { %3363 = vmatpush1.bf16.msra.mxu0 %v21595_v20  ;;  %3233 = vmatprep.subr.bf16.mxu1 %v21600_v21  ;;  %v21679_v20 = vld [vmem:[%s31752_s20 + $0x290] ss:$52 sps:$4 sm:$0xff]   ;;  %v21684_v21 = vld [vmem:[%s31752_s20 + $0x154] ss:$52 sps:$4 sm:$0xff]  }
  0xbf   :  { %3364 = vmatprep.subr.bf16.mxu0 %v21603_v22  ;;  %v21687_v22 = vld [vmem:[%s31752_s20 + $0x2fc] ss:$52 sps:$4 sm:$0xff]  }
  0xc1   :  { %3234 = vmatpush1.bf16.msra.mxu1 %v21598_v23  ;;  %v21682_v23 = vld [vmem:[%s31752_s20 + $0x150] ss:$52 sps:$4 sm:$0xff]  }
  0xc2   :  { %3365 = vmatpush1.bf16.msra.mxu0 %v21601_v24  ;;  %3235 = vmatprep.subr.bf16.mxu1 %v21606_v25  ;;  %v21685_v24 = vld [vmem:[%s31752_s20 + $0x2f8] ss:$52 sps:$4 sm:$0xff]   ;;  %v21690_v25 = vld [vmem:[%s31752_s20 + $0x1bc] ss:$52 sps:$4 sm:$0xff]  }
  0xc3   :  { %3366 = vmatprep.subr.bf16.mxu0 %v21609_v27  ;;  %v21693_v27 = vld [vmem:[%s31752_s20 + $0x364] ss:$52 sps:$4 sm:$0xff]  }
  0xc5   :  { %3236 = vmatpush1.bf16.msra.mxu1 %v21604_v28  ;;  %v21688_v28 = vld [vmem:[%s31752_s20 + $0x1b8] ss:$52 sps:$4 sm:$0xff]  }
  0xc6   :  { %3367 = vmatpush1.bf16.msra.mxu0 %v21607_v29  ;;  %3237 = vmatprep.subr.bf16.mxu1 %v21612_v30  ;;  %v21691_v29 = vld [vmem:[%s31752_s20 + $0x360] ss:$52 sps:$4 sm:$0xff]   ;;  %v21696_v30 = vld [vmem:[%s31752_s20 + $0x224] ss:$52 sps:$4 sm:$0xff]  }
  0xc7   :  { %3368 = vmatprep.subr.bf16.mxu0 %v21615_v31  ;;  %v21699_v31 = vld [vmem:[%s31752_s20 + $0x3cc] ss:$52 sps:$4 sm:$0xff]  }
  0xc9   :  { %3238 = vmatpush1.bf16.msra.mxu1 %v21610_v32  ;;  %v21694_v32 = vld [vmem:[%s31752_s20 + $0x220] ss:$52 sps:$4 sm:$0xff]  }
  0xca   :  { %3369 = vmatpush1.bf16.msra.mxu0 %v21613_v33  ;;  %3239 = vmatprep.subr.bf16.mxu1 %v21618_v34  ;;  %v21697_v33 = vld [vmem:[%s31752_s20 + $0x3c8] ss:$52 sps:$4 sm:$0xff]   ;;  %v21702_v34 = vld [vmem:[%s31752_s20 + $0x28c] ss:$52 sps:$4 sm:$0xff]  }
  0xcb   :  { %3379 = vmatprep.subr.bf16.mxu0 %v21621_v35  ;;  %v21705_v35 = vld [vmem:[%s31752_s20 + $0x434] ss:$52 sps:$4 sm:$0xff]  }
  0xcd   :  { %3371 = vmatmul.mubr.bf16.vlgmr.msra.gmra.mrb[4].mxu0 %v24347_v17  ;;  %3240 = vmatpush1.bf16.msra.mxu1 %v21616_v37  ;;  %v21700_v37 = vld [vmem:[%s31752_s20 + $0x288] ss:$52 sps:$4 sm:$0xff]  }
  0xce   :  { %3380 = vmatpush1.bf16.msra.mxu0 %v21619_v38  ;;  %3241 = vmatprep.subr.bf16.mxu1 %v21624_v39  ;;  %v21703_v38 = vld [vmem:[%s31752_s20 + $0x430] ss:$52 sps:$4 sm:$0xff]   ;;  %v21708_v39 = vld [vmem:[%s31752_s20 + $0x2f4] ss:$52 sps:$4 sm:$0xff]  }
  0xcf   :  { %3381 = vmatprep.subr.bf16.mxu0 %v21627_v40  ;;  %3411 = vmatprep.mubr.bf16.mxu0 %v24024_v26  ;;  %v21711_v40 = vld [vmem:[%s31752_s20 + $0x49c] ss:$52 sps:$4 sm:$0xff]  }
  0xd1   :  { %3242 = vmatpush1.bf16.msra.mxu1 %v21622_v41  ;;  %v21706_v41 = vld [vmem:[%s31752_s20 + $0x2f0] ss:$52 sps:$4 sm:$0xff]  }
  0xd2   :  { %3382 = vmatpush1.bf16.msra.mxu0 %v21625_v42  ;;  %3243 = vmatprep.subr.bf16.mxu1 %v21630_v44  ;;  %v21709_v42 = vld [vmem:[%s31752_s20 + $0x498] ss:$52 sps:$4 sm:$0xff]   ;;  %v21714_v44 = vld [vmem:[%s31752_s20 + $0x35c] ss:$52 sps:$4 sm:$0xff]  }
  0xd3   :  { %3383 = vmatprep.subr.bf16.mxu0 %v21633_v45  ;;  %v21717_v45 = vld [vmem:[%s31752_s20 + $0x504] ss:$52 sps:$4 sm:$0xff]  }
  0xd5   :  { %3244 = vmatpush1.bf16.msra.mxu1 %v21628_v46  ;;  %v21712_v46 = vld [vmem:[%s31752_s20 + $0x358] ss:$52 sps:$4 sm:$0xff]  }
  0xd6   :  { %3384 = vmatpush1.bf16.msra.mxu0 %v21631_v47  ;;  %3245 = vmatprep.subr.bf16.mxu1 %v21636_v48  ;;  %v21715_v47 = vld [vmem:[%s31752_s20 + $0x500] ss:$52 sps:$4 sm:$0xff]   ;;  %v21720_v48 = vld [vmem:[%s31752_s20 + $0x3c4] ss:$52 sps:$4 sm:$0xff]  }
  0xd7   :  { %3385 = vmatprep.subr.bf16.mxu0 %v21639_v50  ;;  %v21723_v50 = vld [vmem:[%s31752_s20 + $0x56c] ss:$52 sps:$4 sm:$0xff]  }
  0xd9   :  { %3246 = vmatpush1.bf16.msra.mxu1 %v21634_v51  ;;  %v21718_v51 = vld [vmem:[%s31752_s20 + $0x3c0] ss:$52 sps:$4 sm:$0xff]  }
  0xda   :  { %3386 = vmatpush1.bf16.msra.mxu0 %v21637_v52  ;;  %3256 = vmatprep.subr.bf16.mxu1 %v21642_v53  ;;  %v21721_v52 = vld [vmem:[%s31752_s20 + $0x568] ss:$52 sps:$4 sm:$0xff]   ;;  %v21726_v53 = vld [vmem:[%s31752_s20 + $0x42c] ss:$52 sps:$4 sm:$0xff]  }
  0xdb   :  { %3543 = vmatprep.subr.bf16.mxu0 %v21645_v54  ;;  %v21729_v54 = vld [vmem:[%s31752_s20 + $0x5d4] ss:$52 sps:$4 sm:$0xff]  }
  0xdc   :  { %3248 = vmatmul.mubr.bf16.vlgmr.msra.gmra.mrb[8].mxu1 %v24347_v17 }
  0xdd   :  { %18948 = vmatmul.mubr.msk.bf16.vlgmr.msra.gmra.mrb[4].mxu0 %vm3047_vm0, %v24404_v36  ;;  %3257 = vmatpush1.bf16.msra.mxu1 %v21640_v55  ;;  %v21724_v55 = vld [vmem:[%s31752_s20 + $0x428] ss:$52 sps:$4 sm:$0xff]  }
  0xde   :  { %3544 = vmatpush1.bf16.msra.mxu0 %v21643_v56  ;;  %3258 = vmatprep.subr.bf16.mxu1 %v21648_v57  ;;  %v21727_v56 = vld [vmem:[%s31752_s20 + $0x5d0] ss:$52 sps:$4 sm:$0xff]   ;;  %v21732_v57 = vld [vmem:[%s31752_s20 + $0x494] ss:$52 sps:$4 sm:$0xff]  }
  0xdf   :  { %3545 = vmatprep.subr.bf16.mxu0 %v21651_v58  ;;  %3288 = vmatprep.mubr.bf16.mxu1 %v24024_v26  ;;  %v21735_v58 = vld [vmem:[%s31752_s20 + $0x63c] ss:$52 sps:$4 sm:$0xff]  }
  0xe0   :  { %3575 = vmatprep.mubr.bf16.mxu0 %v24294_v62 }
  0xe1   :  { %3259 = vmatpush1.bf16.msra.mxu1 %v21646_v59  ;;  %v21730_v59 = vld [vmem:[%s31752_s20 + $0x490] ss:$52 sps:$4 sm:$0xff]  }
  0xe2   :  { %3546 = vmatpush1.bf16.msra.mxu0 %v21649_v60  ;;  %3260 = vmatprep.subr.bf16.mxu1 %v21654_v61  ;;  %v21733_v60 = vld [vmem:[%s31752_s20 + $0x638] ss:$52 sps:$4 sm:$0xff]   ;;  %v21738_v61 = vld [vmem:[%s31752_s20 + $0x4fc] ss:$52 sps:$4 sm:$0xff]  }
  0xe3   :  { %3547 = vmatprep.subr.bf16.mxu0 %v21657_v63  ;;  %v21741_v63 = vld [vmem:[%s31752_s20 + $0x6a4] ss:$52 sps:$4 sm:$0xff]  }
  0xe5   :  { %3261 = vmatpush1.bf16.msra.mxu1 %v21652_v0  ;;  %v21736_v0 = vld [vmem:[%s31752_s20 + $0x4f8] ss:$52 sps:$4 sm:$0xff]  }
  0xe6   :  { %3548 = vmatpush1.bf16.msra.mxu0 %v21655_v1  ;;  %3262 = vmatprep.subr.bf16.mxu1 %v21660_v2  ;;  %v21739_v1 = vld [vmem:[%s31752_s20 + $0x6a0] ss:$52 sps:$4 sm:$0xff]   ;;  %v25006_v2 = vsub.s32 0, %v24248_v43 }
  0xe7   :  { %3549 = vmatprep.subr.bf16.mxu0 %v21663_v4  ;;  %v602_v4 = vld [vmem:[%s31754_s22] sm:$0xff] }
  0xe9   :  { %3263 = vmatpush1.bf16.msra.mxu1 %v21658_v5  ;;  %v25012_v5 = vsub.s32 1, %v24248_v43 }
  0xea   :  { %3550 = vmatpush1.bf16.msra.mxu0 %v21661_v6  ;;  %3420 = vmatprep.subr.bf16.mxu1 %v21666_v7  ;;  %v21744_v6 = vld [vmem:[%s31752_s20 + $0x564] ss:$52 sps:$4 sm:$0xff]   ;;  %v21747_v7 = vld [vmem:[%s31752_s20 + $0x70c] ss:$52 sps:$4 sm:$0xff]  }
  0xeb   :  { %3551 = vmatprep.subr.bf16.mxu0 %v21669_v8  ;;  %v21742_v8 = vld [vmem:[%s31752_s20 + $0x560] ss:$52 sps:$4 sm:$0xff]  }
  0xec   :  { %18947 = vmatmul.mubr.msk.bf16.vlgmr.msra.gmra.mrb[8].mxu1 %vm3047_vm0, %v24404_v36 }
  0xed   :  { %3421 = vmatpush1.bf16.msra.mxu1 %v21664_v9  ;;  %3452 = vmatprep.mubr.bf16.mxu1 %v24294_v62  ;;  %v21745_v9 = vld [vmem:[%s31752_s20 + $0x708] ss:$52 sps:$4 sm:$0xff]  }
  0xee   :  { %3552 = vmatpush1.bf16.msra.mxu0 %v21667_v10  ;;  %3422 = vmatprep.subr.bf16.mxu1 %v21672_v11  ;;  %v609_v10 = vrot.slane %v602_v4, %v25006_v2  ;;  %v613_v11 = vrot.slane %v602_v4, %v25012_v5  ;;  %v21795_v4 = vld [vmem:[%s31752_s20 + $0xa4c] ss:$52 sps:$4 sm:$0xff]  }
  0xef   :  { %3553 = vmatprep.subr.bf16.mxu0 %v21675_v12  ;;  %v21750_v12 = vld [vmem:[%s31752_s20 + $0x5cc] ss:$52 sps:$4 sm:$0xff]  }
  0xf1   :  { %3423 = vmatpush1.bf16.msra.mxu1 %v21670_v13  ;;  %v21753_v13 = vld [vmem:[%s31752_s20 + $0x774] ss:$52 sps:$4 sm:$0xff]  }
  0xf2   :  { %3554 = vmatpush1.bf16.msra.mxu0 %v21673_v14  ;;  %3424 = vmatprep.subr.bf16.mxu1 %v21678_v15 }
  0xf3   :  { %3555 = vmatprep.subr.bf16.mxu0 %v21681_v18 }
  0xf5   :  { %3425 = vmatpush1.bf16.msra.mxu1 %v21676_v19 }
  0xf6   :  { %3556 = vmatpush1.bf16.msra.mxu0 %v21679_v20  ;;  %3426 = vmatprep.subr.bf16.mxu1 %v21684_v21 }
  0xf7   :  { %3557 = vmatprep.subr.bf16.mxu0 %v21687_v22 }
  0xf9   :  { %3427 = vmatpush1.bf16.msra.mxu1 %v21682_v23  ;;  %v21748_v23 = vld [vmem:[%s31752_s20 + $0x5c8] ss:$52 sps:$4 sm:$0xff]  }
  0xfa   :  { %3558 = vmatpush1.bf16.msra.mxu0 %v21685_v24  ;;  %3428 = vmatprep.subr.bf16.mxu1 %v21690_v25  ;;  %v21751_v24 = vld [vmem:[%s31752_s20 + $0x770] ss:$52 sps:$4 sm:$0xff]  }
  0xfb   :  { %3559 = vmatprep.subr.bf16.mxu0 %v21693_v27 }
  0xfd   :  { %3429 = vmatpush1.bf16.msra.mxu1 %v21688_v28  ;;  %v21756_v28 = vld [vmem:[%s31752_s20 + $0x634] ss:$52 sps:$4 sm:$0xff]  }
  0xfe   :  { %3560 = vmatpush1.bf16.msra.mxu0 %v21691_v29  ;;  %3430 = vmatprep.subr.bf16.mxu1 %v21696_v30  ;;  %v21759_v29 = vld [vmem:[%s31752_s20 + $0x7dc] ss:$52 sps:$4 sm:$0xff]  }
  0xff   :  { %3561 = vmatprep.subr.bf16.mxu0 %v21699_v31 }
 0x101   :  { %3431 = vmatpush1.bf16.msra.mxu1 %v21694_v32 }
 0x102   :  { %3562 = vmatpush1.bf16.msra.mxu0 %v21697_v33  ;;  %3432 = vmatprep.subr.bf16.mxu1 %v21702_v34  ;;  %v21754_v33 = vld [vmem:[%s31752_s20 + $0x630] ss:$52 sps:$4 sm:$0xff]   ;;  %v21757_v34 = vld [vmem:[%s31752_s20 + $0x7d8] ss:$52 sps:$4 sm:$0xff]  }
 0x103   :  { %3563 = vmatprep.subr.bf16.mxu0 %v21705_v35  ;;  %v21762_v35 = vld [vmem:[%s31752_s20 + $0x69c] ss:$52 sps:$4 sm:$0xff]  }
 0x105   :  { %3433 = vmatpush1.bf16.msra.mxu1 %v21700_v37  ;;  %v21765_v37 = vld [vmem:[%s31752_s20 + $0x844] ss:$52 sps:$4 sm:$0xff]  }
 0x106   :  { %3564 = vmatpush1.bf16.msra.mxu0 %v21703_v38  ;;  %3434 = vmatprep.subr.bf16.mxu1 %v21708_v39  ;;  %v21760_v38 = vld [vmem:[%s31752_s20 + $0x698] ss:$52 sps:$4 sm:$0xff]   ;;  %v21763_v39 = vld [vmem:[%s31752_s20 + $0x840] ss:$52 sps:$4 sm:$0xff]  }
 0x107   :  { %3565 = vmatprep.subr.bf16.mxu0 %v21711_v40  ;;  %v21768_v40 = vld [vmem:[%s31752_s20 + $0x704] ss:$52 sps:$4 sm:$0xff]  }
 0x109   :  { %3435 = vmatpush1.bf16.msra.mxu1 %v21706_v41  ;;  %v21771_v41 = vld [vmem:[%s31752_s20 + $0x8ac] ss:$52 sps:$4 sm:$0xff]  }
 0x10a   :  { %3566 = vmatpush1.bf16.msra.mxu0 %v21709_v42  ;;  %3436 = vmatprep.subr.bf16.mxu1 %v21714_v44  ;;  %v21766_v42 = vld [vmem:[%s31752_s20 + $0x700] ss:$52 sps:$4 sm:$0xff]   ;;  %v21769_v44 = vld [vmem:[%s31752_s20 + $0x8a8] ss:$52 sps:$4 sm:$0xff]  }
 0x10b   :  { %3567 = vmatprep.subr.bf16.mxu0 %v21717_v45  ;;  %v21774_v45 = vld [vmem:[%s31752_s20 + $0x76c] ss:$52 sps:$4 sm:$0xff]  }
 0x10d   :  { %3437 = vmatpush1.bf16.msra.mxu1 %v21712_v46  ;;  %v21777_v46 = vld [vmem:[%s31752_s20 + $0x914] ss:$52 sps:$4 sm:$0xff]  }
 0x10e   :  { %3568 = vmatpush1.bf16.msra.mxu0 %v21715_v47  ;;  %3438 = vmatprep.subr.bf16.mxu1 %v21720_v48 }
 0x10f   :  { %3569 = vmatprep.subr.bf16.mxu0 %v21723_v50 }
 0x111   :  { %3439 = vmatpush1.bf16.msra.mxu1 %v21718_v51 }
 0x112   :  { %3570 = vmatpush1.bf16.msra.mxu0 %v21721_v52  ;;  %3440 = vmatprep.subr.bf16.mxu1 %v21726_v53  ;;  %v21772_v53 = vld [vmem:[%s31752_s20 + $0x768] ss:$52 sps:$4 sm:$0xff]  }
 0x113   :  { %3571 = vmatprep.subr.bf16.mxu0 %v21729_v54  ;;  %v21775_v54 = vld [vmem:[%s31752_s20 + $0x910] ss:$52 sps:$4 sm:$0xff]  }
 0x115   :  { %3441 = vmatpush1.bf16.msra.mxu1 %v21724_v55 }
 0x116   :  { %3572 = vmatpush1.bf16.msra.mxu0 %v21727_v56  ;;  %3442 = vmatprep.subr.bf16.mxu1 %v21732_v57  ;;  %v21780_v56 = vld [vmem:[%s31752_s20 + $0x7d4] ss:$52 sps:$4 sm:$0xff]   ;;  %v21783_v57 = vld [vmem:[%s31752_s20 + $0x97c] ss:$52 sps:$4 sm:$0xff]  }
 0x117   :  { %3573 = vmatprep.subr.bf16.mxu0 %v21735_v58  ;;  %v21778_v58 = vld [vmem:[%s31752_s20 + $0x7d0] ss:$52 sps:$4 sm:$0xff]  }
 0x119   :  { %3443 = vmatpush1.bf16.msra.mxu1 %v21730_v59  ;;  %v21781_v59 = vld [vmem:[%s31752_s20 + $0x978] ss:$52 sps:$4 sm:$0xff]  }
 0x11a   :  { %3574 = vmatpush1.bf16.msra.mxu0 %v21733_v60  ;;  %3444 = vmatprep.subr.bf16.mxu1 %v21738_v61  ;;  %v21786_v60 = vld [vmem:[%s31752_s20 + $0x83c] ss:$52 sps:$4 sm:$0xff]   ;;  %v21789_v61 = vld [vmem:[%s31752_s20 + $0x9e4] ss:$52 sps:$4 sm:$0xff]  }
 0x11b   :  { %3584 = vmatprep.subr.bf16.mxu0 %v21741_v63  ;;  %v21784_v63 = vld [vmem:[%s31752_s20 + $0x838] ss:$52 sps:$4 sm:$0xff]  }
 0x11d   :  { %3576 = vmatmul.mubr.bf16.vlgmr.msra.gmra.mrb[8].mxu0 %v24345_v16  ;;  %3445 = vmatpush1.bf16.msra.mxu1 %v21736_v0  ;;  %v21787_v0 = vld [vmem:[%s31752_s20 + $0x9e0] ss:$52 sps:$4 sm:$0xff]  }
 0x11e   :  { %3585 = vmatpush1.bf16.msra.mxu0 %v21739_v1  ;;  %3446 = vmatprep.subr.bf16.mxu1 %v21744_v6  ;;  %v21792_v1 = vld [vmem:[%s31752_s20 + $0x8a4] ss:$52 sps:$4 sm:$0xff]   ;;  %v21790_v6 = vld [vmem:[%s31752_s20 + $0x8a0] ss:$52 sps:$4 sm:$0xff]  }
 0x11f   :  { %3586 = vmatprep.subr.bf16.mxu0 %v21747_v7  ;;  %v3085_v14 = vpop.f32.mrb[0].mxu1  ;;  %3616 = vmatprep.mubr.bf16.mxu0 %v24305_v3  ;;  %v21793_v7 = vld [vmem:[%s31752_s20 + $0xa48] ss:$52 sps:$4 sm:$0xff]  }
 0x120   :  { %v3126_v15 = vpop.f32.mrb[0].mxu0  ;;  %v3086_v18 = vadd.f32 %v3085_v14, %v609_v10  ;;  %v3087_v19 = vpop.f32.mrb[1].mxu1  ;;  %v21796_v10 = vld [vmem:[%s31752_s20 + $0x908] ss:$52 sps:$4 sm:$0xff]   ;;  %v21802_v14 = vld [vmem:[%s31752_s20 + $0x970] ss:$52 sps:$4 sm:$0xff]  }
 0x121   :  { %v3128_v20 = vpop.f32.mrb[1].mxu0  ;;  %v3088_v21 = vadd.f32 %v3087_v19, %v613_v11  ;;  %v3089_v22 = vpop.f32.mrb[2].mxu1  ;;  %3447 = vmatpush1.bf16.msra.mxu1 %v21742_v8  ;;  %v21798_v8 = vld [vmem:[%s31752_s20 + $0x90c] ss:$52 sps:$4 sm:$0xff]   ;;  %v21799_v11 = vld [vmem:[%s31752_s20 + $0xab0] ss:$52 sps:$4 sm:$0xff]  }
 0x122   :  { %3587 = vmatpush1.bf16.msra.mxu0 %v21745_v9  ;;  %v3127_v25 = vadd.f32 %v3126_v15, %v3086_v18  ;;  %v3090_v27 = vpop.f32.mrb[3].mxu1  ;;  %3448 = vmatprep.subr.bf16.mxu1 %v21750_v12  ;;  %v3130_v31 = vpop.f32.mrb[2].mxu0  ;;  %v21801_v9 = vld [vmem:[%s31752_s20 + $0xab4] ss:$52 sps:$4 sm:$0xff]   ;;  %v21805_v15 = vld [vmem:[%s31752_s20 + $0xb18] ss:$52 sps:$4 sm:$0xff]  }
 0x123   :  { %3588 = vmatprep.subr.bf16.mxu0 %v21753_v13  ;;  %v3129_v30 = vadd.f32 %v3128_v20, %v3088_v21  ;;  %v3131_v32 = vpop.f32.mrb[3].mxu0  ;;  %v21804_v12 = vld [vmem:[%s31752_s20 + $0x974] ss:$52 sps:$4 sm:$0xff]   ;;  %v21807_v13 = vld [vmem:[%s31752_s20 + $0xb1c] ss:$52 sps:$4 sm:$0xff]  }
 0x124   :  { %v21810_v18 = vld [vmem:[%s31752_s20 + $0x9dc] ss:$52 sps:$4 sm:$0xff]   ;;  %v21813_v19 = vld [vmem:[%s31752_s20 + $0xb84] ss:$52 sps:$4 sm:$0xff]   ;;  %v21811_v21 = vld [vmem:[%s31752_s20 + $0xb80] ss:$52 sps:$4 sm:$0xff]  }
 0x125   :  { %3449 = vmatpush1.bf16.msra.mxu1 %v21748_v23  ;;  %v21808_v20 = vld [vmem:[%s31752_s20 + $0x9d8] ss:$52 sps:$4 sm:$0xff]   ;;  %v21828_v31 = vld [vmem:[%s31752_s20 + $0xb14] ss:$52 sps:$4 sm:$0xff]   ;;  %v21831_v32 = vld [vmem:[%s31752_s20 + $0xcbc] ss:$52 sps:$4 sm:$0xff]  }
 0x126   :  { %3589 = vmatpush1.bf16.msra.mxu0 %v21751_v24  ;;  %3450 = vmatprep.subr.bf16.mxu1 %v21756_v28  ;;  %v21816_v22 = vld [vmem:[%s31752_s20 + $0xa44] ss:$52 sps:$4 sm:$0xff]   ;;  %v21819_v23 = vld [vmem:[%s31752_s20 + $0xbec] ss:$52 sps:$4 sm:$0xff]   ;;  %v21825_v28 = vld [vmem:[%s31752_s20 + $0xc54] ss:$52 sps:$4 sm:$0xff]  }
 0x127   :  { %3590 = vmatprep.subr.bf16.mxu0 %v21759_v29  ;;  %v21814_v24 = vld [vmem:[%s31752_s20 + $0xa40] ss:$52 sps:$4 sm:$0xff]   ;;  %v21820_v29 = vld [vmem:[%s31752_s20 + $0xaa8] ss:$52 sps:$4 sm:$0xff]  }
 0x128   :  { %v21822_v27 = vld [vmem:[%s31752_s20 + $0xaac] ss:$52 sps:$4 sm:$0xff]  }
 0x129   :  { %3451 = vmatpush1.bf16.msra.mxu1 %v21754_v33  ;;  %v21826_v33 = vld [vmem:[%s31752_s20 + $0xb10] ss:$52 sps:$4 sm:$0xff]  }
 0x12a   :  { %3591 = vmatpush1.bf16.msra.mxu0 %v21757_v34  ;;  %3461 = vmatprep.subr.bf16.mxu1 %v21762_v35  ;;  %v21829_v34 = vld [vmem:[%s31752_s20 + $0xcb8] ss:$52 sps:$4 sm:$0xff]   ;;  %v21834_v35 = vld [vmem:[%s31752_s20 + $0xb7c] ss:$52 sps:$4 sm:$0xff]  }
 0x12b   :  { %3592 = vmatprep.subr.bf16.mxu0 %v21765_v37  ;;  %v21837_v37 = vld [vmem:[%s31752_s20 + $0xd24] ss:$52 sps:$4 sm:$0xff]  }
 0x12c   :  { %3453 = vmatmul.mubr.bf16.vlgmr.msra.gmra.mrb[12].mxu1 %v24345_v16 }
 0x12d   :  { %3462 = vmatpush1.bf16.msra.mxu1 %v21760_v38  ;;  %3493 = vmatprep.mubr.bf16.mxu1 %v24305_v3  ;;  %v21832_v38 = vld [vmem:[%s31752_s20 + $0xb78] ss:$52 sps:$4 sm:$0xff]  }
 0x12e   :  { %3593 = vmatpush1.bf16.msra.mxu0 %v21763_v39  ;;  %3463 = vmatprep.subr.bf16.mxu1 %v21768_v40  ;;  %v21835_v39 = vld [vmem:[%s31752_s20 + $0xd20] ss:$52 sps:$4 sm:$0xff]   ;;  %v21840_v40 = vld [vmem:[%s31752_s20 + $0xbe4] ss:$52 sps:$4 sm:$0xff]  }
 0x12f   :  { %3594 = vmatprep.subr.bf16.mxu0 %v21771_v41  ;;  %v3167_v47 = vpop.f32.mrb[4].mxu1  ;;  %v21843_v41 = vld [vmem:[%s31752_s20 + $0xd8c] ss:$52 sps:$4 sm:$0xff]  }
 0x130   :  { %v25086_v48 = vadd.f32 %v3167_v47, %v3127_v25  ;;  %v3169_v50 = vpop.f32.mrb[5].mxu1  ;;  %v21817_v25 = vld [vmem:[%s31752_s20 + $0xbe8] ss:$52 sps:$4 sm:$0xff]  }
 0x131   :  { %v25088_v51 = vadd.f32 %v3169_v50, %v3129_v30  ;;  %v3171_v52 = vpop.f32.mrb[6].mxu1  ;;  %3464 = vmatpush1.bf16.msra.mxu1 %v21766_v42  ;;  %v21823_v30 = vld [vmem:[%s31752_s20 + $0xc50] ss:$52 sps:$4 sm:$0xff]   ;;  %v21838_v42 = vld [vmem:[%s31752_s20 + $0xbe0] ss:$52 sps:$4 sm:$0xff]  }
 0x132   :  { %3595 = vmatpush1.bf16.msra.mxu0 %v21769_v44  ;;  %v3172_v55 = vpop.f32.mrb[7].mxu1  ;;  %3465 = vmatprep.subr.bf16.mxu1 %v21774_v45  ;;  %v21841_v44 = vld [vmem:[%s31752_s20 + $0xd88] ss:$52 sps:$4 sm:$0xff]   ;;  %v21846_v45 = vld [vmem:[%s31752_s20 + $0xc4c] ss:$52 sps:$4 sm:$0xff]   ;;  %vm3909_vm3 = vcmp.gt.f32.partialorder %v25086_v48, 0.0 }
 0x133   :  { %3596 = vmatprep.subr.bf16.mxu0 %v21777_v46  ;;  %v21849_v46 = vld [vmem:[%s31752_s20 + $0xdf4] ss:$52 sps:$4 sm:$0xff]   ;;  %v21847_v50 = vld [vmem:[%s31752_s20 + $0xdf0] ss:$52 sps:$4 sm:$0xff]   ;;  %v21853_v55 = vld [vmem:[%s31752_s20 + $0xe58] ss:$52 sps:$4 sm:$0xff]  }
 0x134   :  { %v21844_v47 = vld [vmem:[%s31752_s20 + $0xc48] ss:$52 sps:$4 sm:$0xff]   ;;  %vm3910_vm2 = vcmp.gt.f32.partialorder %v25088_v51, 0.0 }
 0x135   :  { %3466 = vmatpush1.bf16.msra.mxu1 %v21772_v53  ;;  %v21852_v52 = vld [vmem:[%s31752_s20 + $0xcb4] ss:$52 sps:$4 sm:$0xff]   ;;  %v21855_v53 = vld [vmem:[%s31752_s20 + $0xe5c] ss:$52 sps:$4 sm:$0xff]  }
 0x136   :  { %3597 = vmatpush1.bf16.msra.mxu0 %v21775_v54  ;;  %3467 = vmatprep.subr.bf16.mxu1 %v21780_v56  ;;  %v21850_v54 = vld [vmem:[%s31752_s20 + $0xcb0] ss:$52 sps:$4 sm:$0xff]  }
 0x137   :  { %3598 = vmatprep.subr.bf16.mxu0 %v21783_v57  ;;  %v21858_v56 = vld [vmem:[%s31752_s20 + $0xd1c] ss:$52 sps:$4 sm:$0xff]  }
 0x138   :  { %v21859_v57 = vld [vmem:[%s31752_s20 + $0x370] ss:$52 sps:$4 sm:$0xff]  }
 0x139   :  { %3468 = vmatpush1.bf16.msra.mxu1 %v21778_v58  ;;  %v21856_v58 = vld [vmem:[%s31752_s20 + $0xd18] ss:$52 sps:$4 sm:$0xff]  }
 0x13a   :  { %3599 = vmatpush1.bf16.msra.mxu0 %v21781_v59  ;;  %3469 = vmatprep.subr.bf16.mxu1 %v21786_v60  ;;  %v21860_v59 = vld [vmem:[%s31752_s20 + $0x30] ss:$52 sps:$4 sm:$0xff]  }
 0x13b   :  { %3600 = vmatprep.subr.bf16.mxu0 %v21789_v61  ;;  %v21863_v60 = vld [vmem:[%s31752_s20 + $0xd84] ss:$52 sps:$4 sm:$0xff]  }
 0x13c   :  { %v21864_v61 = vld [vmem:[%s31752_s20 + $0x3d8] ss:$52 sps:$4 sm:$0xff]  }
 0x13d   :  { %3470 = vmatpush1.bf16.msra.mxu1 %v21784_v63  ;;  %v21861_v63 = vld [vmem:[%s31752_s20 + $0xd80] ss:$52 sps:$4 sm:$0xff]  }
 0x13e   :  { %3601 = vmatpush1.bf16.msra.mxu0 %v21787_v0  ;;  %3471 = vmatprep.subr.bf16.mxu1 %v21792_v1  ;;  %v21865_v0 = vld [vmem:[%s31752_s20 + $0x98] ss:$52 sps:$4 sm:$0xff]  }
 0x13f   :  { %3602 = vmatprep.subr.bf16.mxu0 %v21795_v4  ;;  %v21868_v1 = vld [vmem:[%s31752_s20 + $0xdec] ss:$52 sps:$4 sm:$0xff]  }
 0x140   :  { %v21869_v4 = vld [vmem:[%s31752_s20 + $0x440] ss:$52 sps:$4 sm:$0xff]  }
 0x141   :  { %3472 = vmatpush1.bf16.msra.mxu1 %v21790_v6  ;;  %v21866_v6 = vld [vmem:[%s31752_s20 + $0xde8] ss:$52 sps:$4 sm:$0xff]  }
 0x142   :  { %3603 = vmatpush1.bf16.msra.mxu0 %v21793_v7  ;;  %3473 = vmatprep.subr.bf16.mxu1 %v21798_v8  ;;  %v21870_v7 = vld [vmem:[%s31752_s20 + $0x100] ss:$52 sps:$4 sm:$0xff]  }
 0x143   :  { %3604 = vmatprep.subr.bf16.mxu0 %v21801_v9  ;;  %v21873_v8 = vld [vmem:[%s31752_s20 + $0xe54] ss:$52 sps:$4 sm:$0xff]  }
 0x144   :  { %v21874_v9 = vld [vmem:[%s31752_s20 + $0x4a8] ss:$52 sps:$4 sm:$0xff]  }
 0x145   :  { %3474 = vmatpush1.bf16.msra.mxu1 %v21796_v10  ;;  %v21871_v10 = vld [vmem:[%s31752_s20 + $0xe50] ss:$52 sps:$4 sm:$0xff]  }
 0x146   :  { %3605 = vmatpush1.bf16.msra.mxu0 %v21799_v11  ;;  %3475 = vmatprep.subr.bf16.mxu1 %v21804_v12  ;;  %v21875_v11 = vld [vmem:[%s31752_s20 + $0x168] ss:$52 sps:$4 sm:$0xff]   ;;  %v21878_v12 = vld [vmem:[%s31752_s20 + $0x2c] ss:$52 sps:$4 sm:$0xff]  }
 0x147   :  { %3606 = vmatprep.subr.bf16.mxu0 %v21807_v13  ;;  %v21879_v13 = vld [vmem:[%s31752_s20 + $0x510] ss:$52 sps:$4 sm:$0xff]  }
 0x149   :  { %3476 = vmatpush1.bf16.msra.mxu1 %v21802_v14  ;;  %v21876_v14 = vld [vmem:[%s31752_s20 + $0x28] ss:$52 sps:$4 sm:$0xff]  }
 0x14a   :  { %3607 = vmatpush1.bf16.msra.mxu0 %v21805_v15  ;;  %3477 = vmatprep.subr.bf16.mxu1 %v21810_v18  ;;  %v21880_v15 = vld [vmem:[%s31752_s20 + $0x1d0] ss:$52 sps:$4 sm:$0xff]   ;;  %v21883_v18 = vld [vmem:[%s31752_s20 + $0x94] ss:$52 sps:$4 sm:$0xff]  }
 0x14b   :  { %3608 = vmatprep.subr.bf16.mxu0 %v21813_v19  ;;  %v21884_v19 = vld [vmem:[%s31752_s20 + $0x578] ss:$52 sps:$4 sm:$0xff]  }
 0x14d   :  { %3478 = vmatpush1.bf16.msra.mxu1 %v21808_v20  ;;  %v21881_v20 = vld [vmem:[%s31752_s20 + $0x90] ss:$52 sps:$4 sm:$0xff]  }
 0x14e   :  { %3609 = vmatpush1.bf16.msra.mxu0 %v21811_v21  ;;  %3479 = vmatprep.subr.bf16.mxu1 %v21816_v22  ;;  %v21885_v21 = vld [vmem:[%s31752_s20 + $0x238] ss:$52 sps:$4 sm:$0xff]   ;;  %v21888_v22 = vld [vmem:[%s31752_s20 + $0xfc] ss:$52 sps:$4 sm:$0xff]  }
 0x14f   :  { %3610 = vmatprep.subr.bf16.mxu0 %v21819_v23  ;;  %v21889_v23 = vld [vmem:[%s31752_s20 + $0x5e0] ss:$52 sps:$4 sm:$0xff]  }
 0x151   :  { %3480 = vmatpush1.bf16.msra.mxu1 %v21814_v24  ;;  %v21886_v24 = vld [vmem:[%s31752_s20 + $0xf8] ss:$52 sps:$4 sm:$0xff]  }
 0x152   :  { %3611 = vmatpush1.bf16.msra.mxu0 %v21817_v25  ;;  %3481 = vmatprep.subr.bf16.mxu1 %v21822_v27  ;;  %v21890_v25 = vld [vmem:[%s31752_s20 + $0x2a0] ss:$52 sps:$4 sm:$0xff]   ;;  %v21893_v27 = vld [vmem:[%s31752_s20 + $0x164] ss:$52 sps:$4 sm:$0xff]  }
 0x153   :  { %3612 = vmatprep.subr.bf16.mxu0 %v21825_v28  ;;  %v21891_v28 = vld [vmem:[%s31752_s20 + $0x160] ss:$52 sps:$4 sm:$0xff]  }
 0x155   :  { %3482 = vmatpush1.bf16.msra.mxu1 %v21820_v29  ;;  %v21895_v29 = vld [vmem:[%s31752_s20 + $0x308] ss:$52 sps:$4 sm:$0xff]  }
 0x156   :  { %3613 = vmatpush1.bf16.msra.mxu0 %v21823_v30  ;;  %3483 = vmatprep.subr.bf16.mxu1 %v21828_v31  ;;  %v21898_v30 = vld [vmem:[%s31752_s20 + $0x1cc] ss:$52 sps:$4 sm:$0xff]   ;;  %v21896_v31 = vld [vmem:[%s31752_s20 + $0x1c8] ss:$52 sps:$4 sm:$0xff]  }
 0x157   :  { %3614 = vmatprep.subr.bf16.mxu0 %v21831_v32  ;;  %v21899_v32 = vld [vmem:[%s31752_s20 + $0xd30] ss:$52 sps:$4 sm:$0xff]  }
 0x159   :  { %3484 = vmatpush1.bf16.msra.mxu1 %v21826_v33  ;;  %v21902_v33 = vld [vmem:[%s31752_s20 + $0x234] ss:$52 sps:$4 sm:$0xff]  }
 0x15a   :  { %3615 = vmatpush1.bf16.msra.mxu0 %v21829_v34  ;;  %3485 = vmatprep.subr.bf16.mxu1 %v21834_v35  ;;  %v24025_v34 = vmov 0.0   ;;  %v21900_v35 = vld [vmem:[%s31752_s20 + $0x230] ss:$52 sps:$4 sm:$0xff]  }
 0x15b   :  { %3625 = vmatprep.subr.bf16.mxu0 %v21837_v37  ;;  %v21903_v37 = vld [vmem:[%s31752_s20 + $0xd98] ss:$52 sps:$4 sm:$0xff]  }
 0x15d   :  { %3617 = vmatmul.mubr.bf16.vlgmr.msra.gmra.mrb[8].mxu0 %v24347_v17  ;;  %3486 = vmatpush1.bf16.msra.mxu1 %v21832_v38  ;;  %v21906_v38 = vld [vmem:[%s31752_s20 + $0x29c] ss:$52 sps:$4 sm:$0xff]  }
 0x15e   :  { %3626 = vmatpush1.bf16.msra.mxu0 %v21835_v39  ;;  %3487 = vmatprep.subr.bf16.mxu1 %v21840_v40  ;;  %v21904_v39 = vld [vmem:[%s31752_s20 + $0x298] ss:$52 sps:$4 sm:$0xff]   ;;  %v21907_v40 = vld [vmem:[%s31752_s20 + $0xe00] ss:$52 sps:$4 sm:$0xff]  }
 0x15f   :  { %3627 = vmatprep.subr.bf16.mxu0 %v21843_v41  ;;  %3657 = vmatprep.mubr.bf16.mxu0 %v24024_v26  ;;  %v21910_v41 = vld [vmem:[%s31752_s20 + $0x304] ss:$52 sps:$4 sm:$0xff]  }
 0x161   :  { %3488 = vmatpush1.bf16.msra.mxu1 %v21838_v42  ;;  %v21908_v42 = vld [vmem:[%s31752_s20 + $0x300] ss:$52 sps:$4 sm:$0xff]  }
 0x162   :  { %3628 = vmatpush1.bf16.msra.mxu0 %v21841_v44  ;;  %3489 = vmatprep.subr.bf16.mxu1 %v21846_v45  ;;  %v3923_v44 = vmul.f32 0.01, %v25088_v51  ;;  %v21911_v45 = vld [vmem:[%s31752_s20 + $0xe68] ss:$52 sps:$4 sm:$0xff]  }
 0x163   :  { %3629 = vmatprep.subr.bf16.mxu0 %v21849_v46  ;;  %v21914_v46 = vld [vmem:[%s31752_s20 + $0x36c] ss:$52 sps:$4 sm:$0xff]  }
 0x165   :  { %3490 = vmatpush1.bf16.msra.mxu1 %v21844_v47  ;;  %v21917_v47 = vld [vmem:[%s31729_s4 + $0xc] ss:$16 sps:$4 sm:$0xff]  }
 0x166   :  { %3630 = vmatpush1.bf16.msra.mxu0 %v21847_v50  ;;  %3491 = vmatprep.subr.bf16.mxu1 %v21852_v52  ;;  %v21912_v50 = vld [vmem:[%s31752_s20 + $0x368] ss:$52 sps:$4 sm:$0xff]  }
 0x167   :  { %3631 = vmatprep.subr.bf16.mxu0 %v21855_v53  ;;  %v21915_v52 = vld [vmem:[%s31729_s4 + $0x8] ss:$16 sps:$4 sm:$0xff]   ;;  %v3936_v53 = vsel %vm3910_vm2, %v25088_v51, %v3923_v44 }
 0x168   :  { %v21921_v51 = vld [vmem:[%s31729_s4 + $0x28] ss:$16 sps:$4 sm:$0xff]  }
 0x169   :  { %3492 = vmatpush1.bf16.msra.mxu1 %v21850_v54  ;;  %v21920_v54 = vld [vmem:[%s31752_s20 + $0x3d4] ss:$52 sps:$4 sm:$0xff]  }
 0x16a   :  { %3632 = vmatpush1.bf16.msra.mxu0 %v21853_v55  ;;  %3502 = vmatprep.subr.bf16.mxu1 %v21858_v56  ;;  %v21923_v55 = vld [vmem:[%s31729_s4 + $0x2c] ss:$16 sps:$4 sm:$0xff]   ;;  %v25423_v56 = vpack.c.bf16 %v3936_v53, %v3936_v53 }
 0x16b   :  { %20785 = vmatprep.subr.bf16.mxu0 %v21859_v57  ;;  %v21918_v57 = vld [vmem:[%s31752_s20 + $0x3d0] ss:$52 sps:$4 sm:$0xff]   ;;  %v21986_v53 = vld [vmem:[%s31752_s20 + $0x84c] ss:$52 sps:$4 sm:$0xff]  }
 0x16c   :  { %3494 = vmatmul.mubr.bf16.vlgmr.msra.gmra.mrb[12].mxu1 %v24347_v17 }
 0x16d   :  { %18950 = vmatmul.mubr.msk.bf16.vlgmr.msra.gmra.mrb[8].mxu0 %vm3047_vm0, %v24404_v36  ;;  %3503 = vmatpush1.bf16.msra.mxu1 %v21856_v58  ;;  %v21926_v58 = vld [vmem:[%s31752_s20 + $0x43c] ss:$52 sps:$4 sm:$0xff]  }
 0x16e   :  { %20786 = vmatpush3.bf16.msra.mxu0 %v21860_v59  ;;  %3504 = vmatprep.subr.bf16.mxu1 %v21863_v60  ;;  %v21929_v59 = vld [vmem:[%s31729_s4 + $0x4c] ss:$16 sps:$4 sm:$0xff]  }
 0x16f   :  { %20787 = vmatprep.subr.bf16.mxu0 %v21864_v61  ;;  %3534 = vmatprep.mubr.bf16.mxu1 %v24024_v26  ;;  %v21924_v60 = vld [vmem:[%s31752_s20 + $0x438] ss:$52 sps:$4 sm:$0xff]  }
 0x170   :  { %3821 = vmatprep.mubr.bf16.mxu0 %v24294_v62  ;;  %v21927_v61 = vld [vmem:[%s31729_s4 + $0x48] ss:$16 sps:$4 sm:$0xff]  }
 0x171   :  { %3505 = vmatpush1.bf16.msra.mxu1 %v21861_v63  ;;  %v21932_v63 = vld [vmem:[%s31752_s20 + $0x4a4] ss:$52 sps:$4 sm:$0xff]  }
 0x172   :  { %20788 = vmatpush3.bf16.msra.mxu0 %v21865_v0  ;;  %3506 = vmatprep.subr.bf16.mxu1 %v21868_v1  ;;  %v21935_v0 = vld [vmem:[%s31729_s4 + $0x6c] ss:$16 sps:$4 sm:$0xff]   ;;  %v21930_v1 = vld [vmem:[%s31752_s20 + $0x4a0] ss:$52 sps:$4 sm:$0xff]  }
 0x173   :  { %20789 = vmatprep.subr.bf16.mxu0 %v21869_v4  ;;  %v21933_v4 = vld [vmem:[%s31729_s4 + $0x68] ss:$16 sps:$4 sm:$0xff]  }
 0x175   :  { %3507 = vmatpush1.bf16.msra.mxu1 %v21866_v6  ;;  %v21938_v6 = vld [vmem:[%s31752_s20 + $0x50c] ss:$52 sps:$4 sm:$0xff]  }
 0x176   :  { %20790 = vmatpush3.bf16.msra.mxu0 %v21870_v7  ;;  %3508 = vmatprep.subr.bf16.mxu1 %v21873_v8  ;;  %v21941_v7 = vld [vmem:[%s31729_s4 + $0x8c] ss:$16 sps:$4 sm:$0xff]  }
 0x177   :  { %20791 = vmatprep.subr.bf16.mxu0 %v21874_v9  ;;  %v21936_v8 = vld [vmem:[%s31752_s20 + $0x508] ss:$52 sps:$4 sm:$0xff]  }
 0x178   :  { %v21939_v9 = vld [vmem:[%s31729_s4 + $0x88] ss:$16 sps:$4 sm:$0xff]  }
 0x179   :  { %3509 = vmatpush1.bf16.msra.mxu1 %v21871_v10  ;;  %v21944_v10 = vld [vmem:[%s31752_s20 + $0x574] ss:$52 sps:$4 sm:$0xff]  }
 0x17a   :  { %20792 = vmatpush3.bf16.msra.mxu0 %v21875_v11  ;;  %3666 = vmatprep.subr.bf16.mxu1 %v21878_v12  ;;  %v21947_v11 = vld [vmem:[%s31729_s4 + $0xac] ss:$16 sps:$4 sm:$0xff]   ;;  %v21942_v12 = vld [vmem:[%s31752_s20 + $0x570] ss:$52 sps:$4 sm:$0xff]  }
 0x17b   :  { %20793 = vmatprep.subr.bf16.mxu0 %v21879_v13  ;;  %v21945_v13 = vld [vmem:[%s31729_s4 + $0xa8] ss:$16 sps:$4 sm:$0xff]  }
 0x17c   :  { %18949 = vmatmul.mubr.msk.bf16.vlgmr.msra.gmra.mrb[12].mxu1 %vm3047_vm0, %v24404_v36 }
 0x17d   :  { %3667 = vmatpush1.bf16.msra.mxu1 %v21876_v14  ;;  %3698 = vmatprep.mubr.bf16.mxu1 %v24294_v62  ;;  %v21894_v62 = vld [vmem:[%s31752_s20 + $0x648] ss:$52 sps:$4 sm:$0xff]  }
 0x17e   :  { %20794 = vmatpush3.bf16.msra.mxu0 %v21880_v15  ;;  %3668 = vmatprep.subr.bf16.mxu1 %v21883_v18  ;;  %v21950_v14 = vld [vmem:[%s31752_s20 + $0x5dc] ss:$52 sps:$4 sm:$0xff]   ;;  %v21948_v18 = vld [vmem:[%s31752_s20 + $0x5d8] ss:$52 sps:$4 sm:$0xff]  }
 0x17f   :  { %20795 = vmatprep.subr.bf16.mxu0 %v21884_v19  ;;  %v21953_v15 = vld [vmem:[%s31729_s4 + $0xcc] ss:$16 sps:$4 sm:$0xff]   ;;  %v21951_v19 = vld [vmem:[%s31729_s4 + $0xc8] ss:$16 sps:$4 sm:$0xff]  }
 0x181   :  { %3669 = vmatpush1.bf16.msra.mxu1 %v21881_v20 }
 0x182   :  { %20796 = vmatpush3.bf16.msra.mxu0 %v21885_v21  ;;  %3670 = vmatprep.subr.bf16.mxu1 %v21888_v22 }
 0x183   :  { %20797 = vmatprep.subr.bf16.mxu0 %v21889_v23  ;;  %v21956_v23 = vld [vmem:[%s31752_s20 + $0x644] ss:$52 sps:$4 sm:$0xff]  }
 0x185   :  { %3671 = vmatpush1.bf16.msra.mxu1 %v21886_v24  ;;  %v21959_v24 = vld [vmem:[%s31729_s4 + $0xec] ss:$16 sps:$4 sm:$0xff]  }
 0x186   :  { %20798 = vmatpush3.bf16.msra.mxu0 %v21890_v25  ;;  %3672 = vmatprep.subr.bf16.mxu1 %v21893_v27  ;;  %v21954_v27 = vld [vmem:[%s31752_s20 + $0x640] ss:$52 sps:$4 sm:$0xff]  }
 0x187   :  { %20799 = vmatprep.subr.bf16.mxu0 %v21894_v62  ;;  %v21957_v62 = vld [vmem:[%s31729_s4 + $0xe8] ss:$16 sps:$4 sm:$0xff]  }
 0x189   :  { %3673 = vmatpush1.bf16.msra.mxu1 %v21891_v28  ;;  %v21962_v28 = vld [vmem:[%s31752_s20 + $0x6ac] ss:$52 sps:$4 sm:$0xff]  }
 0x18a   :  { %20800 = vmatpush3.bf16.msra.mxu0 %v21895_v29  ;;  %3674 = vmatprep.subr.bf16.mxu1 %v21898_v30  ;;  %v21965_v29 = vld [vmem:[%s31729_s4 + $0x10c] ss:$16 sps:$4 sm:$0xff]  }
 0x18b   :  { %21023 = vmatprep.subr.bf16.mxu0 %v24025_v34  ;;  %v21960_v30 = vld [vmem:[%s31752_s20 + $0x6a8] ss:$52 sps:$4 sm:$0xff]  }
 0x18d   :  { %3822 = vmatmul.mubr.bf16.vlgmr.msra.gmra.mrb[12].mxu0 %v24345_v16  ;;  %3675 = vmatpush1.bf16.msra.mxu1 %v21896_v31  ;;  %v21963_v31 = vld [vmem:[%s31729_s4 + $0x108] ss:$16 sps:$4 sm:$0xff]  }
 0x18e   :  { %21024 = vmatpush3.bf16.msra.mxu0 %v21899_v32  ;;  %3676 = vmatprep.subr.bf16.mxu1 %v21902_v33  ;;  %v21968_v32 = vld [vmem:[%s31752_s20 + $0x714] ss:$52 sps:$4 sm:$0xff]   ;;  %v21971_v33 = vld [vmem:[%s31729_s4 + $0x12c] ss:$16 sps:$4 sm:$0xff]  }
 0x18f   :  { %21025 = vmatprep.subr.bf16.mxu0 %v24025_v34  ;;  %21031 = vmatprep.mubr.msk.bf16.mxu0 %vm24026_vm1, %v24025_v34 }
 0x191   :  { %3677 = vmatpush1.bf16.msra.mxu1 %v21900_v35  ;;  %v21966_v35 = vld [vmem:[%s31752_s20 + $0x710] ss:$52 sps:$4 sm:$0xff]  }
 0x192   :  { %21026 = vmatpush3.bf16.msra.mxu0 %v21903_v37  ;;  %3678 = vmatprep.subr.bf16.mxu1 %v21906_v38  ;;  %v21969_v37 = vld [vmem:[%s31729_s4 + $0x128] ss:$16 sps:$4 sm:$0xff]   ;;  %v21974_v38 = vld [vmem:[%s31752_s20 + $0x77c] ss:$52 sps:$4 sm:$0xff]  }
 0x193   :  { %21027 = vmatprep.subr.bf16.mxu0 %v24025_v34 }
 0x195   :  { %3679 = vmatpush1.bf16.msra.mxu1 %v21904_v39  ;;  %v21977_v39 = vld [vmem:[%s31729_s4 + $0x14c] ss:$16 sps:$4 sm:$0xff]  }
 0x196   :  { %21028 = vmatpush3.bf16.msra.mxu0 %v21907_v40  ;;  %3680 = vmatprep.subr.bf16.mxu1 %v21910_v41  ;;  %v21972_v41 = vld [vmem:[%s31752_s20 + $0x778] ss:$52 sps:$4 sm:$0xff]  }
 0x197   :  { %21029 = vmatprep.subr.bf16.mxu0 %v24025_v34 }
 0x199   :  { %3681 = vmatpush1.bf16.msra.mxu1 %v21908_v42 }
 0x19a   :  { %21030 = vmatpush3.bf16.msra.mxu0 %v21911_v45  ;;  %3682 = vmatprep.subr.bf16.mxu1 %v21914_v46  ;;  %v21980_v46 = vld [vmem:[%s31752_s20 + $0x7e4] ss:$52 sps:$4 sm:$0xff]  }
 0x19b   :  { %6673 = vmatprep.subr.bf16.mxu0 %v21917_v47  ;;  %v21983_v47 = vld [vmem:[%s31729_s4 + $0x16c] ss:$16 sps:$4 sm:$0xff]  }
 0x19d   :  { %21032 = vmatmul.mubr.msk.bf16.vlgmr.msra.gmra.mrb[16].mxu0 %vm3047_vm0, %v24404_v36  ;;  %3683 = vmatpush1.bf16.msra.mxu1 %v21912_v50  ;;  %v21978_v50 = vld [vmem:[%s31752_s20 + $0x7e0] ss:$52 sps:$4 sm:$0xff]  }
 0x19e   :  { %6674 = vmatpush1.bf16.msra.mxu0 %v21915_v52  ;;  %6705 = vmatprep.mubr.bf16.mxu0 %v25423_v56  ;;  %v21981_v52 = vld [vmem:[%s31729_s4 + $0x168] ss:$16 sps:$4 sm:$0xff]  }
 0x19f   :  { %3684 = vmatprep.subr.bf16.mxu1 %v21920_v54  ;;  %6675 = vmatprep.subr.bf16.mxu0 %v21923_v55  ;;  %v21989_v54 = vld [vmem:[%s31729_s4 + $0x18c] ss:$16 sps:$4 sm:$0xff]  }
 0x1a0   :  { %v21984_v55 = vld [vmem:[%s31752_s20 + $0x848] ss:$52 sps:$4 sm:$0xff]  }
 0x1a1   :  { %3685 = vmatpush1.bf16.msra.mxu1 %v21918_v57  ;;  %v21987_v57 = vld [vmem:[%s31729_s4 + $0x188] ss:$16 sps:$4 sm:$0xff]  }
 0x1a2   :  { %6676 = vmatpush1.bf16.msra.mxu0 %v21921_v51  ;;  %3686 = vmatprep.subr.bf16.mxu1 %v21926_v58  ;;  %v25573_v51 = vsub.s32 3, %v24248_v43  ;;  %v21992_v58 = vld [vmem:[%s31752_s20 + $0x8b4] ss:$52 sps:$4 sm:$0xff]  }
 0x1a3   :  { %6677 = vmatprep.subr.bf16.mxu0 %v21929_v59  ;;  %v21995_v59 = vld [vmem:[%s31729_s4 + $0x1ac] ss:$16 sps:$4 sm:$0xff]  }
 0x1a5   :  { %3687 = vmatpush1.bf16.msra.mxu1 %v21924_v60  ;;  %v21990_v60 = vld [vmem:[%s31752_s20 + $0x8b0] ss:$52 sps:$4 sm:$0xff]  }
 0x1a6   :  { %6678 = vmatpush1.bf16.msra.mxu0 %v21927_v61  ;;  %3688 = vmatprep.subr.bf16.mxu1 %v21932_v63  ;;  %v21993_v61 = vld [vmem:[%s31729_s4 + $0x1a8] ss:$16 sps:$4 sm:$0xff]   ;;  %v21998_v63 = vld [vmem:[%s31752_s20 + $0x91c] ss:$52 sps:$4 sm:$0xff]  }
 0x1a7   :  { %6679 = vmatprep.subr.bf16.mxu0 %v21935_v0  ;;  %v22001_v0 = vld [vmem:[%s31729_s4 + $0x1cc] ss:$16 sps:$4 sm:$0xff]  }
 0x1a9   :  { %3689 = vmatpush1.bf16.msra.mxu1 %v21930_v1  ;;  %v25596_v1 = vld [vmem:[%s31754_s22] sm:$0xff] }
 0x1aa   :  { %6680 = vmatpush1.bf16.msra.mxu0 %v21933_v4  ;;  %3690 = vmatprep.subr.bf16.mxu1 %v21938_v6  ;;  %v621_v4 = vrot.slane %v25596_v1, %v25573_v51  ;;  %v21996_v6 = vld [vmem:[%s31752_s20 + $0x918] ss:$52 sps:$4 sm:$0xff]  }
 0x1ab   :  { %6681 = vmatprep.subr.bf16.mxu0 %v21941_v7  ;;  %v21999_v7 = vld [vmem:[%s31729_s4 + $0x1c8] ss:$16 sps:$4 sm:$0xff]  }
 0x1ad   :  { %3691 = vmatpush1.bf16.msra.mxu1 %v21936_v8  ;;  %v22004_v8 = vld [vmem:[%s31752_s20 + $0x984] ss:$52 sps:$4 sm:$0xff]  }
 0x1ae   :  { %6682 = vmatpush1.bf16.msra.mxu0 %v21939_v9  ;;  %3692 = vmatprep.subr.bf16.mxu1 %v21944_v10  ;;  %v22007_v9 = vld [vmem:[%s31729_s4 + $0x1ec] ss:$16 sps:$4 sm:$0xff]  }
 0x1af   :  { %6683 = vmatprep.subr.bf16.mxu0 %v21947_v11  ;;  %v3922_v11 = vmul.f32 0.01, %v25086_v48 }
 0x1b0   :  { %v25492_v20 = vpop.f32.mrb[4].mxu0 }
 0x1b1   :  { %v25494_v21 = vpop.f32.mrb[5].mxu0  ;;  %3693 = vmatpush1.bf16.msra.mxu1 %v21942_v12  ;;  %v22002_v12 = vld [vmem:[%s31752_s20 + $0x980] ss:$52 sps:$4 sm:$0xff]  }
 0x1b2   :  { %6684 = vmatpush1.bf16.msra.mxu0 %v21945_v13  ;;  %v3417_v22 = vpop.f32.mrb[6].mxu0  ;;  %3694 = vmatprep.subr.bf16.mxu1 %v21950_v14  ;;  %v22005_v13 = vld [vmem:[%s31729_s4 + $0x1e8] ss:$16 sps:$4 sm:$0xff]  }
 0x1b3   :  { %6685 = vmatprep.subr.bf16.mxu0 %v21953_v15  ;;  %v3418_v25 = vpop.f32.mrb[7].mxu0  ;;  %v22010_v15 = vld [vmem:[%s31752_s20 + $0x9ec] ss:$52 sps:$4 sm:$0xff]   ;;  %v22008_v22 = vld [vmem:[%s31752_s20 + $0x9e8] ss:$52 sps:$4 sm:$0xff]  }
 0x1b5   :  { %3695 = vmatpush1.bf16.msra.mxu1 %v21948_v18  ;;  %v22013_v18 = vld [vmem:[%s31729_s4 + $0x20c] ss:$16 sps:$4 sm:$0xff]  }
 0x1b6   :  { %6686 = vmatpush1.bf16.msra.mxu0 %v21951_v19  ;;  %3696 = vmatprep.subr.bf16.mxu1 %v21956_v23  ;;  %v3935_v19 = vsel %vm3909_vm3, %v25086_v48, %v3922_v11  ;;  %v22011_v23 = vld [vmem:[%s31729_s4 + $0x208] ss:$16 sps:$4 sm:$0xff]   ;;  %v22014_v48 = vld [vmem:[%s31752_s20 + $0xa50] ss:$52 sps:$4 sm:$0xff]   ;;  %v22073_v11 = vld [vmem:[%s31729_s4 + $0x34c] ss:$16 sps:$4 sm:$0xff]  }
 0x1b7   :  { %6687 = vmatprep.subr.bf16.mxu0 %v21959_v24  ;;  %v25633_v25 = vpack.c.bf16 %v3935_v19, %v3935_v19  ;;  %v22077_v19 = vld [vmem:[%s31729_s4 + $0x368] ss:$16 sps:$4 sm:$0xff]  }
 0x1b9   :  { %3697 = vmatpush1.bf16.msra.mxu1 %v21954_v27  ;;  %v22016_v27 = vld [vmem:[%s31752_s20 + $0xa54] ss:$52 sps:$4 sm:$0xff]  }
 0x1ba   :  { %6688 = vmatpush1.bf16.msra.mxu0 %v21957_v62  ;;  %3707 = vmatprep.subr.bf16.mxu1 %v21962_v28  ;;  %v22019_v62 = vld [vmem:[%s31729_s4 + $0x22c] ss:$16 sps:$4 sm:$0xff]  }
 0x1bb   :  { %6689 = vmatprep.subr.bf16.mxu0 %v21965_v29  ;;  %v22017_v29 = vld [vmem:[%s31729_s4 + $0x228] ss:$16 sps:$4 sm:$0xff]  }
 0x1bc   :  { %3699 = vmatmul.mubr.bf16.vlgmr.msra.gmra.mrb[16].mxu1 %v24345_v16  ;;  %v21975_v16 = vld [vmem:[%s31729_s4 + $0x148] ss:$16 sps:$4 sm:$0xff]  }
 0x1bd   :  { %3708 = vmatpush1.bf16.msra.mxu1 %v21960_v30  ;;  %3739 = vmatprep.mubr.bf16.mxu1 %v24305_v3  ;;  %v22022_v30 = vld [vmem:[%s31752_s20 + $0xabc] ss:$52 sps:$4 sm:$0xff]  }
 0x1be   :  { %6690 = vmatpush1.bf16.msra.mxu0 %v21963_v31  ;;  %3709 = vmatprep.subr.bf16.mxu1 %v21968_v32  ;;  %v22025_v31 = vld [vmem:[%s31729_s4 + $0x24c] ss:$16 sps:$4 sm:$0xff]  }
 0x1bf   :  { %6691 = vmatprep.subr.bf16.mxu0 %v21971_v33  ;;  %v25539_v40 = vpop.f32.mrb[8].mxu1  ;;  %v22020_v32 = vld [vmem:[%s31752_s20 + $0xab8] ss:$52 sps:$4 sm:$0xff]  }
 0x1c0   :  { %v3292_v42 = vpop.f32.mrb[9].mxu1  ;;  %v22023_v33 = vld [vmem:[%s31729_s4 + $0x248] ss:$16 sps:$4 sm:$0xff]  }
 0x1c1   :  { %v3294_v44 = vpop.f32.mrb[10].mxu1  ;;  %3710 = vmatpush1.bf16.msra.mxu1 %v21966_v35  ;;  %v21074_v10 = vadd.f32 %v3292_v42, %v621_v4  ;;  %v22028_v35 = vld [vmem:[%s31752_s20 + $0xb24] ss:$52 sps:$4 sm:$0xff]   ;;  %v22032_v42 = vld [vmem:[%s31752_s20 + $0xb88] ss:$52 sps:$4 sm:$0xff]  }
 0x1c2   :  { %6692 = vmatpush1.bf16.msra.mxu0 %v21969_v37  ;;  %v3295_v45 = vpop.f32.mrb[11].mxu1  ;;  %3711 = vmatprep.subr.bf16.mxu1 %v21974_v38  ;;  %v22031_v37 = vld [vmem:[%s31729_s4 + $0x26c] ss:$16 sps:$4 sm:$0xff]   ;;  %v22026_v38 = vld [vmem:[%s31752_s20 + $0xb20] ss:$52 sps:$4 sm:$0xff]  }
 0x1c3   :  { %6693 = vmatprep.subr.bf16.mxu0 %v21977_v39  ;;  %v3925_v14 = vmul.f32 0.01, %v21074_v10  ;;  %vm3912_vm4 = vcmp.gt.f32.partialorder %v21074_v10, 0.0  ;;  %v22029_v39 = vld [vmem:[%s31729_s4 + $0x268] ss:$16 sps:$4 sm:$0xff]  }
 0x1c4   :  { %v22035_v44 = vld [vmem:[%s31729_s4 + $0x288] ss:$16 sps:$4 sm:$0xff]  }
 0x1c5   :  { %3712 = vmatpush1.bf16.msra.mxu1 %v21972_v41  ;;  %v3938_v24 = vsel %vm3912_vm4, %v21074_v10, %v3925_v14  ;;  %v22034_v41 = vld [vmem:[%s31752_s20 + $0xb8c] ss:$52 sps:$4 sm:$0xff]   ;;  %v22040_v45 = vld [vmem:[%s31752_s20 + $0xbf4] ss:$52 sps:$4 sm:$0xff]   ;;  %v22070_v10 = vld [vmem:[%s31752_s20 + $0xdfc] ss:$52 sps:$4 sm:$0xff]  }
 0x1c6   :  { %6694 = vmatpush1.bf16.msra.mxu0 %v21975_v16  ;;  %3713 = vmatprep.subr.bf16.mxu1 %v21980_v46  ;;  %v25645_v28 = vpack.c.bf16 %v3938_v24, %v3938_v24  ;;  %v22037_v16 = vld [vmem:[%s31729_s4 + $0x28c] ss:$16 sps:$4 sm:$0xff]   ;;  %v22059_v4 = vld [vmem:[%s31729_s4 + $0x308] ss:$16 sps:$4 sm:$0xff]   ;;  %v25780_v24 = vsub.s32 2, %v24248_v43 }
 0x1c7   :  { %6695 = vmatprep.subr.bf16.mxu0 %v21983_v47  ;;  %v22043_v46 = vld [vmem:[%s31729_s4 + $0x2ac] ss:$16 sps:$4 sm:$0xff]   ;;  %v22038_v47 = vld [vmem:[%s31752_s20 + $0xbf0] ss:$52 sps:$4 sm:$0xff]  }
 0x1c8   :  { %v22076_v14 = vld [vmem:[%s31752_s20 + $0xe64] ss:$52 sps:$4 sm:$0xff]  }
 0x1c9   :  { %3714 = vmatpush1.bf16.msra.mxu1 %v21978_v50  ;;  %v22041_v50 = vld [vmem:[%s31729_s4 + $0x2a8] ss:$16 sps:$4 sm:$0xff]  }
 0x1ca   :  { %6696 = vmatpush1.bf16.msra.mxu0 %v21981_v52  ;;  %3715 = vmatprep.subr.bf16.mxu1 %v21986_v53  ;;  %v22046_v52 = vld [vmem:[%s31752_s20 + $0xc5c] ss:$52 sps:$4 sm:$0xff]  }
 0x1cb   :  { %6697 = vmatprep.subr.bf16.mxu0 %v21989_v54  ;;  %v22049_v53 = vld [vmem:[%s31729_s4 + $0x2cc] ss:$16 sps:$4 sm:$0xff]  }
 0x1cc   :  { %v22044_v54 = vld [vmem:[%s31752_s20 + $0xc58] ss:$52 sps:$4 sm:$0xff]  }
 0x1cd   :  { %3716 = vmatpush1.bf16.msra.mxu1 %v21984_v55  ;;  %v22047_v55 = vld [vmem:[%s31729_s4 + $0x2c8] ss:$16 sps:$4 sm:$0xff]  }
 0x1ce   :  { %6698 = vmatpush1.bf16.msra.mxu0 %v21987_v57  ;;  %3717 = vmatprep.subr.bf16.mxu1 %v21992_v58  ;;  %v22052_v57 = vld [vmem:[%s31752_s20 + $0xcc4] ss:$52 sps:$4 sm:$0xff]   ;;  %v22055_v58 = vld [vmem:[%s31729_s4 + $0x2ec] ss:$16 sps:$4 sm:$0xff]  }
 0x1cf   :  { %6699 = vmatprep.subr.bf16.mxu0 %v21995_v59  ;;  %v22050_v59 = vld [vmem:[%s31752_s20 + $0xcc0] ss:$52 sps:$4 sm:$0xff]  }
 0x1d1   :  { %3718 = vmatpush1.bf16.msra.mxu1 %v21990_v60  ;;  %v22053_v60 = vld [vmem:[%s31729_s4 + $0x2e8] ss:$16 sps:$4 sm:$0xff]  }
 0x1d2   :  { %6700 = vmatpush1.bf16.msra.mxu0 %v21993_v61  ;;  %3719 = vmatprep.subr.bf16.mxu1 %v21998_v63  ;;  %v22058_v61 = vld [vmem:[%s31752_s20 + $0xd2c] ss:$52 sps:$4 sm:$0xff]  }
 0x1d3   :  { %6701 = vmatprep.subr.bf16.mxu0 %v22001_v0  ;;  %v22061_v63 = vld [vmem:[%s31729_s4 + $0x30c] ss:$16 sps:$4 sm:$0xff]  }
 0x1d4   :  { %v22056_v0 = vld [vmem:[%s31752_s20 + $0xd28] ss:$52 sps:$4 sm:$0xff]  }
 0x1d5   :  { %3720 = vmatpush1.bf16.msra.mxu1 %v21996_v6  ;;  %v22064_v6 = vld [vmem:[%s31752_s20 + $0xd94] ss:$52 sps:$4 sm:$0xff]  }
 0x1d6   :  { %6702 = vmatpush1.bf16.msra.mxu0 %v21999_v7  ;;  %3721 = vmatprep.subr.bf16.mxu1 %v22004_v8  ;;  %v22067_v7 = vld [vmem:[%s31729_s4 + $0x32c] ss:$16 sps:$4 sm:$0xff]   ;;  %v22062_v8 = vld [vmem:[%s31752_s20 + $0xd90] ss:$52 sps:$4 sm:$0xff]  }
 0x1d7   :  { %6703 = vmatprep.subr.bf16.mxu0 %v22007_v9  ;;  %v22065_v9 = vld [vmem:[%s31729_s4 + $0x328] ss:$16 sps:$4 sm:$0xff]  }
 0x1d9   :  { %3722 = vmatpush1.bf16.msra.mxu1 %v22002_v12  ;;  %v22068_v12 = vld [vmem:[%s31752_s20 + $0xdf8] ss:$52 sps:$4 sm:$0xff]  }
 0x1da   :  { %6704 = vmatpush1.bf16.msra.mxu0 %v22005_v13  ;;  %3723 = vmatprep.subr.bf16.mxu1 %v22010_v15  ;;  %v22071_v13 = vld [vmem:[%s31729_s4 + $0x348] ss:$16 sps:$4 sm:$0xff]   ;;  %v22079_v15 = vld [vmem:[%s31729_s4 + $0x36c] ss:$16 sps:$4 sm:$0xff]  }
 0x1db   :  { %6714 = vmatprep.subr.bf16.mxu0 %v22013_v18  ;;  %v22074_v18 = vld [vmem:[%s31752_s20 + $0xe60] ss:$52 sps:$4 sm:$0xff]  }
 0x1dd   :  { %6706 = vmatmul.mubr.bf16.vlgmr.msra.gmra.mrb[20].mxu0 %v25633_v25  ;;  %3724 = vmatpush1.bf16.msra.mxu1 %v22008_v22  ;;  %v22080_v22 = vld [vmem:[%s31752_s20 + $0x9f0] ss:$52 sps:$4 sm:$0xff]  }
 0x1de   :  { %6715 = vmatpush1.bf16.msra.mxu0 %v22011_v23  ;;  %6746 = vmatprep.mubr.bf16.mxu0 %v25645_v28  ;;  %v22083_v23 = vld [vmem:[%s31729_s4 + $0x38c] ss:$16 sps:$4 sm:$0xff]  }
 0x1df   :  { %3725 = vmatprep.subr.bf16.mxu1 %v22016_v27  ;;  %6716 = vmatprep.subr.bf16.mxu0 %v22019_v62  ;;  %v22081_v27 = vld [vmem:[%s31729_s4 + $0x388] ss:$16 sps:$4 sm:$0xff]   ;;  %v25789_v62 = vsub.s32 5, %v24248_v43 }
 0x1e1   :  { %3726 = vmatpush1.bf16.msra.mxu1 %v22014_v48  ;;  %v22084_v48 = vld [vmem:[%s31752_s20 + $0x6b0] ss:$52 sps:$4 sm:$0xff]  }
 0x1e2   :  { %6717 = vmatpush1.bf16.msra.mxu0 %v22017_v29  ;;  %3727 = vmatprep.subr.bf16.mxu1 %v22022_v30  ;;  %v22085_v29 = vld [vmem:[%s31752_s20 + $0xa58] ss:$52 sps:$4 sm:$0xff]  }
 0x1e3   :  { %6718 = vmatprep.subr.bf16.mxu0 %v22025_v31  ;;  %v22088_v30 = vld [vmem:[%s31729_s4 + $0x3ac] ss:$16 sps:$4 sm:$0xff]   ;;  %v617_v31 = vrot.slane %v25596_v1, %v25780_v24 }
 0x1e5   :  { %3728 = vmatpush1.bf16.msra.mxu1 %v22020_v32  ;;  %v22086_v32 = vld [vmem:[%s31729_s4 + $0x3a8] ss:$16 sps:$4 sm:$0xff]  }
 0x1e6   :  { %6719 = vmatpush1.bf16.msra.mxu0 %v22023_v33  ;;  %3729 = vmatprep.subr.bf16.mxu1 %v22028_v35  ;;  %v22089_v33 = vld [vmem:[%s31752_s20 + $0x718] ss:$52 sps:$4 sm:$0xff]   ;;  %v629_v35 = vrot.slane %v25596_v1, %v25789_v62  ;;  %v22094_v1 = vld [vmem:[%s31752_s20 + $0x780] ss:$52 sps:$4 sm:$0xff]  }
 0x1e7   :  { %6720 = vmatprep.subr.bf16.mxu0 %v22031_v37  ;;  %v22090_v37 = vld [vmem:[%s31752_s20 + $0xac0] ss:$52 sps:$4 sm:$0xff]  }
 0x1e9   :  { %3730 = vmatpush1.bf16.msra.mxu1 %v22026_v38  ;;  %v22093_v38 = vld [vmem:[%s31729_s4 + $0x3cc] ss:$16 sps:$4 sm:$0xff]  }
 0x1ea   :  { %6721 = vmatpush1.bf16.msra.mxu0 %v22029_v39  ;;  %3731 = vmatprep.subr.bf16.mxu1 %v22034_v41  ;;  %v21073_v39 = vadd.f32 %v25539_v40, %v617_v31  ;;  %v21076_v41 = vadd.f32 %v25494_v21, %v629_v35  ;;  %v22095_v40 = vld [vmem:[%s31752_s20 + $0xb28] ss:$52 sps:$4 sm:$0xff]   ;;  %v22146_v31 = vld [vmem:[%s31729_s4 + $0x84] ss:$16 sps:$4 sm:$0xff]  }
 0x1eb   :  { %6722 = vmatprep.subr.bf16.mxu0 %v22037_v16  ;;  %v22098_v16 = vld [vmem:[%s31729_s4 + $0x3ec] ss:$16 sps:$4 sm:$0xff]   ;;  %v22147_v35 = vld [vmem:[%s31729_s4 + $0x508] ss:$16 sps:$4 sm:$0xff]  }
 0x1ec   :  { %vm3911_vm5 = vcmp.gt.f32.partialorder %v21073_v39, 0.0  ;;  %v3927_v21 = vmul.f32 0.01, %v21076_v41  ;;  %vm3914_vm6 = vcmp.gt.f32.partialorder %v21076_v41, 0.0 }
 0x1ed   :  { %3732 = vmatpush1.bf16.msra.mxu1 %v22032_v42  ;;  %v3924_v42 = vmul.f32 0.01, %v21073_v39 }
 0x1ee   :  { %6723 = vmatpush1.bf16.msra.mxu0 %v22035_v44  ;;  %3733 = vmatprep.subr.bf16.mxu1 %v22040_v45  ;;  %v22096_v44 = vld [vmem:[%s31729_s4 + $0x3e8] ss:$16 sps:$4 sm:$0xff]   ;;  %v22100_v45 = vld [vmem:[%s31752_s20 + $0xb90] ss:$52 sps:$4 sm:$0xff]  }
 0x1ef   :  { %6724 = vmatprep.subr.bf16.mxu0 %v22043_v46  ;;  %v22103_v46 = vld [vmem:[%s31729_s4 + $0x40c] ss:$16 sps:$4 sm:$0xff]  }
 0x1f1   :  { %3734 = vmatpush1.bf16.msra.mxu1 %v22038_v47  ;;  %v3937_v47 = vsel %vm3911_vm5, %v21073_v39, %v3924_v42  ;;  %v22155_v39 = vld [vmem:[%s31729_s4 + $0x52c] ss:$16 sps:$4 sm:$0xff]  }
 0x1f2   :  { %6725 = vmatpush1.bf16.msra.mxu0 %v22041_v50  ;;  %3735 = vmatprep.subr.bf16.mxu1 %v22046_v52  ;;  %v22101_v50 = vld [vmem:[%s31729_s4 + $0x408] ss:$16 sps:$4 sm:$0xff]   ;;  %v22104_v52 = vld [vmem:[%s31752_s20 + $0x850] ss:$52 sps:$4 sm:$0xff]  }
 0x1f3   :  { %6726 = vmatprep.subr.bf16.mxu0 %v22049_v53  ;;  %v3940_v53 = vsel %vm3914_vm6, %v21076_v41, %v3927_v21  ;;  %v22156_v41 = vld [vmem:[%s31729_s4 + $0xc0] ss:$16 sps:$4 sm:$0xff]   ;;  %v22164_v21 = vld [vmem:[%s31729_s4 + $0xe4] ss:$16 sps:$4 sm:$0xff]  }
 0x1f5   :  { %3736 = vmatpush1.bf16.msra.mxu1 %v22044_v54  ;;  %v25848_v54 = vpack.c.bf16 %v3937_v47, %v3937_v47  ;;  %v22162_v47 = vld [vmem:[%s31729_s4 + $0xe0] ss:$16 sps:$4 sm:$0xff]  }
 0x1f6   :  { %6727 = vmatpush1.bf16.msra.mxu0 %v22047_v55  ;;  %3737 = vmatprep.subr.bf16.mxu1 %v22052_v57  ;;  %v22105_v55 = vld [vmem:[%s31752_s20 + $0xbf8] ss:$52 sps:$4 sm:$0xff]  }
 0x1f7   :  { %6728 = vmatprep.subr.bf16.mxu0 %v22055_v58  ;;  %v22108_v57 = vld [vmem:[%s31729_s4 + $0x42c] ss:$16 sps:$4 sm:$0xff]   ;;  %v22106_v58 = vld [vmem:[%s31729_s4 + $0x428] ss:$16 sps:$4 sm:$0xff]  }
 0x1f9   :  { %3738 = vmatpush1.bf16.msra.mxu1 %v22050_v59  ;;  %v25859_v59 = vpack.c.bf16 %v3940_v53, %v3940_v53  ;;  %v22168_v53 = vld [vmem:[%s31729_s4 + $0x100] ss:$16 sps:$4 sm:$0xff]  }
 0x1fa   :  { %6729 = vmatpush1.bf16.msra.mxu0 %v22053_v60  ;;  %3748 = vmatprep.subr.bf16.mxu1 %v22058_v61  ;;  %v22109_v60 = vld [vmem:[%s31752_s20 + $0x8b8] ss:$52 sps:$4 sm:$0xff]   ;;  %v22110_v61 = vld [vmem:[%s31752_s20 + $0xc60] ss:$52 sps:$4 sm:$0xff]  }
 0x1fb   :  { %6730 = vmatprep.subr.bf16.mxu0 %v22061_v63  ;;  %v22113_v63 = vld [vmem:[%s31729_s4 + $0x44c] ss:$16 sps:$4 sm:$0xff]  }
 0x1fc   :  { %3740 = vmatmul.mubr.bf16.vlgmr.msra.gmra.mrb[16].mxu1 %v24347_v17 }
 0x1fd   :  { %3749 = vmatpush1.bf16.msra.mxu1 %v22056_v0  ;;  %3780 = vmatprep.mubr.bf16.mxu1 %v24024_v26  ;;  %v22111_v0 = vld [vmem:[%s31729_s4 + $0x448] ss:$16 sps:$4 sm:$0xff]  }
 0x1fe   :  { %6731 = vmatpush1.bf16.msra.mxu0 %v22059_v4  ;;  %3750 = vmatprep.subr.bf16.mxu1 %v22064_v6  ;;  %v22114_v4 = vld [vmem:[%s31752_s20 + $0x920] ss:$52 sps:$4 sm:$0xff]   ;;  %v22115_v6 = vld [vmem:[%s31752_s20 + $0xcc8] ss:$52 sps:$4 sm:$0xff]  }
 0x1ff   :  { %6732 = vmatprep.subr.bf16.mxu0 %v22067_v7  ;;  %v22118_v7 = vld [vmem:[%s31729_s4 + $0x46c] ss:$16 sps:$4 sm:$0xff]  }
 0x201   :  { %3751 = vmatpush1.bf16.msra.mxu1 %v22062_v8  ;;  %v22116_v8 = vld [vmem:[%s31729_s4 + $0x468] ss:$16 sps:$4 sm:$0xff]  }
 0x202   :  { %6733 = vmatpush1.bf16.msra.mxu0 %v22065_v9  ;;  %3752 = vmatprep.subr.bf16.mxu1 %v22070_v10  ;;  %v22119_v9 = vld [vmem:[%s31752_s20 + $0x988] ss:$52 sps:$4 sm:$0xff]   ;;  %v22122_v10 = vld [vmem:[%s31729_s4 + $0x4] ss:$16 sps:$4 sm:$0xff]  }
 0x203   :  { %6734 = vmatprep.subr.bf16.mxu0 %v22073_v11  ;;  %v22125_v11 = vld [vmem:[%s31729_s4 + $0x48c] ss:$16 sps:$4 sm:$0xff]  }
 0x205   :  { %3753 = vmatpush1.bf16.msra.mxu1 %v22068_v12  ;;  %v22120_v12 = vld [vmem:[%s31729_s4] ss:$16 sps:$4 sm:$0xff]  }
 0x206   :  { %6735 = vmatpush1.bf16.msra.mxu0 %v22071_v13  ;;  %3754 = vmatprep.subr.bf16.mxu1 %v22076_v14  ;;  %v22123_v13 = vld [vmem:[%s31729_s4 + $0x488] ss:$16 sps:$4 sm:$0xff]   ;;  %v22128_v14 = vld [vmem:[%s31729_s4 + $0x24] ss:$16 sps:$4 sm:$0xff]  }
 0x207   :  { %6736 = vmatprep.subr.bf16.mxu0 %v22079_v15  ;;  %v22131_v15 = vld [vmem:[%s31729_s4 + $0x4ac] ss:$16 sps:$4 sm:$0xff]  }
 0x209   :  { %3755 = vmatpush1.bf16.msra.mxu1 %v22074_v18  ;;  %v22126_v18 = vld [vmem:[%s31729_s4 + $0x20] ss:$16 sps:$4 sm:$0xff]  }
 0x20a   :  { %6737 = vmatpush1.bf16.msra.mxu0 %v22077_v19  ;;  %20807 = vmatprep.subr.bf16.mxu1 %v22080_v22  ;;  %v22129_v19 = vld [vmem:[%s31729_s4 + $0x4a8] ss:$16 sps:$4 sm:$0xff]   ;;  %v22134_v22 = vld [vmem:[%s31729_s4 + $0x44] ss:$16 sps:$4 sm:$0xff]  }
 0x20b   :  { %6738 = vmatprep.subr.bf16.mxu0 %v22083_v23  ;;  %v22137_v23 = vld [vmem:[%s31729_s4 + $0x4cc] ss:$16 sps:$4 sm:$0xff]  }
 0x20c   :  { %18951 = vmatmul.mubr.msk.bf16.vlgmr.msra.gmra.mrb[16].mxu1 %vm3047_vm0, %v24404_v36  ;;  %v22091_v36 = vld [vmem:[%s31729_s4 + $0x3c8] ss:$16 sps:$4 sm:$0xff]  }
 0x20d   :  { %20808 = vmatpush3.bf16.msra.mxu1 %v22084_v48  ;;  %3861 = vmatprep.mubr.bf16.mxu1 %v24305_v3  ;;  %v22099_v3 = vld [vmem:[%s31752_s20 + $0x7e8] ss:$52 sps:$4 sm:$0xff]   ;;  %v22138_v48 = vld [vmem:[%s31729_s4 + $0x60] ss:$16 sps:$4 sm:$0xff]  }
 0x20e   :  { %6739 = vmatpush1.bf16.msra.mxu0 %v22081_v27  ;;  %20809 = vmatprep.subr.bf16.mxu1 %v22085_v29  ;;  %v22140_v27 = vld [vmem:[%s31729_s4 + $0x64] ss:$16 sps:$4 sm:$0xff]   ;;  %v22143_v29 = vld [vmem:[%s31729_s4 + $0x4ec] ss:$16 sps:$4 sm:$0xff]  }
 0x20f   :  { %6740 = vmatprep.subr.bf16.mxu0 %v22088_v30  ;;  %v22141_v30 = vld [vmem:[%s31729_s4 + $0x4e8] ss:$16 sps:$4 sm:$0xff]  }
 0x211   :  { %20810 = vmatpush3.bf16.msra.mxu1 %v22089_v33  ;;  %v22149_v33 = vld [vmem:[%s31729_s4 + $0x50c] ss:$16 sps:$4 sm:$0xff]  }
 0x212   :  { %6741 = vmatpush1.bf16.msra.mxu0 %v22086_v32  ;;  %20811 = vmatprep.subr.bf16.mxu1 %v22090_v37  ;;  %v22144_v32 = vld [vmem:[%s31729_s4 + $0x80] ss:$16 sps:$4 sm:$0xff]   ;;  %v22152_v37 = vld [vmem:[%s31729_s4 + $0xa4] ss:$16 sps:$4 sm:$0xff]  }
 0x213   :  { %6742 = vmatprep.subr.bf16.mxu0 %v22093_v38  ;;  %v22150_v38 = vld [vmem:[%s31729_s4 + $0xa0] ss:$16 sps:$4 sm:$0xff]  }
 0x215   :  { %20812 = vmatpush3.bf16.msra.mxu1 %v22094_v1  ;;  %v22158_v1 = vld [vmem:[%s31729_s4 + $0xc4] ss:$16 sps:$4 sm:$0xff]  }
 0x216   :  { %6743 = vmatpush1.bf16.msra.mxu0 %v22091_v36  ;;  %20813 = vmatprep.subr.bf16.mxu1 %v22095_v40  ;;  %v22153_v36 = vld [vmem:[%s31729_s4 + $0x528] ss:$16 sps:$4 sm:$0xff]   ;;  %v22161_v40 = vld [vmem:[%s31729_s4 + $0x54c] ss:$16 sps:$4 sm:$0xff]  }
 0x217   :  { %6744 = vmatprep.subr.bf16.mxu0 %v22098_v16 }
 0x219   :  { %20814 = vmatpush3.bf16.msra.mxu1 %v22099_v3  ;;  %v22159_v3 = vld [vmem:[%s31729_s4 + $0x548] ss:$16 sps:$4 sm:$0xff]  }
 0x21a   :  { %6745 = vmatpush1.bf16.msra.mxu0 %v22096_v44  ;;  %20815 = vmatprep.subr.bf16.mxu1 %v22100_v45 }
 0x21b   :  { %6755 = vmatprep.subr.bf16.mxu0 %v22103_v46  ;;  %v22167_v46 = vld [vmem:[%s31729_s4 + $0x56c] ss:$16 sps:$4 sm:$0xff]  }
 0x21d   :  { %6747 = vmatmul.mubr.bf16.vlgmr.msra.gmra.mrb[20].mxu0 %v25848_v54  ;;  %20816 = vmatpush3.bf16.msra.mxu1 %v22104_v52  ;;  %v22170_v52 = vld [vmem:[%s31729_s4 + $0x104] ss:$16 sps:$4 sm:$0xff]  }
 0x21e   :  { %6756 = vmatpush1.bf16.msra.mxu0 %v22101_v50  ;;  %20817 = vmatprep.subr.bf16.mxu1 %v22105_v55  ;;  %v22165_v50 = vld [vmem:[%s31729_s4 + $0x568] ss:$16 sps:$4 sm:$0xff]   ;;  %v22173_v55 = vld [vmem:[%s31729_s4 + $0x58c] ss:$16 sps:$4 sm:$0xff]  }
 0x21f   :  { %6757 = vmatprep.subr.bf16.mxu0 %v22108_v57  ;;  %6787 = vmatprep.mubr.bf16.mxu0 %v25859_v59  ;;  %v26002_v57 = vsub.s32 4, %v24248_v43 }
 0x221   :  { %20818 = vmatpush3.bf16.msra.mxu1 %v22109_v60  ;;  %v22171_v60 = vld [vmem:[%s31729_s4 + $0x588] ss:$16 sps:$4 sm:$0xff]  }
 0x222   :  { %6758 = vmatpush1.bf16.msra.mxu0 %v22106_v58  ;;  %20819 = vmatprep.subr.bf16.mxu1 %v22110_v61  ;;  %v26005_v58 = vsub.s32 7, %v24248_v43  ;;  %v22176_v61 = vld [vmem:[%s31729_s4 + $0x124] ss:$16 sps:$4 sm:$0xff]  }
 0x223   :  { %6759 = vmatprep.subr.bf16.mxu0 %v22113_v63  ;;  %v22179_v63 = vld [vmem:[%s31729_s4 + $0x5ac] ss:$16 sps:$4 sm:$0xff]  }
 0x225   :  { %20820 = vmatpush3.bf16.msra.mxu1 %v22114_v4  ;;  %v26022_v4 = vld [vmem:[%s31754_s22] sm:$0xff] }
 0x226   :  { %6760 = vmatpush1.bf16.msra.mxu0 %v22111_v0  ;;  %20821 = vmatprep.subr.bf16.mxu1 %v22115_v6  ;;  %v22174_v0 = vld [vmem:[%s31729_s4 + $0x120] ss:$16 sps:$4 sm:$0xff]   ;;  %v625_v6 = vrot.slane %v26022_v4, %v26002_v57 }
 0x227   :  { %6761 = vmatprep.subr.bf16.mxu0 %v22118_v7  ;;  %v637_v7 = vrot.slane %v26022_v4, %v26005_v58 }
 0x229   :  { %20822 = vmatpush3.bf16.msra.mxu1 %v22119_v9  ;;  %v22182_v9 = vld [vmem:[%s31729_s4 + $0x144] ss:$16 sps:$4 sm:$0xff]  }
 0x22a   :  { %6762 = vmatpush1.bf16.msra.mxu0 %v22116_v8  ;;  %6386 = vmatprep.subr.bf16.mxu1 %v22122_v10  ;;  %v22177_v8 = vld [vmem:[%s31729_s4 + $0x5a8] ss:$16 sps:$4 sm:$0xff]   ;;  %v22185_v10 = vld [vmem:[%s31729_s4 + $0x5cc] ss:$16 sps:$4 sm:$0xff]  }
 0x22b   :  { %6763 = vmatprep.subr.bf16.mxu0 %v22125_v11 }
 0x22c   :  { %3862 = vmatmul.mubr.bf16.vlgmr.msra.gmra.mrb[20].mxu1 %v24347_v17  ;;  %v22132_v17 = vld [vmem:[%s31729_s4 + $0x40] ss:$16 sps:$4 sm:$0xff]  }
 0x22d   :  { %6387 = vmatpush1.bf16.msra.mxu1 %v22120_v12  ;;  %6418 = vmatprep.mubr.bf16.mxu1 %v25423_v56  ;;  %v22135_v56 = vld [vmem:[%s31729_s4 + $0x4c8] ss:$16 sps:$4 sm:$0xff]   ;;  %v22180_v12 = vld [vmem:[%s31729_s4 + $0x140] ss:$16 sps:$4 sm:$0xff]  }
 0x22e   :  { %6764 = vmatpush1.bf16.msra.mxu0 %v22123_v13  ;;  %6388 = vmatprep.subr.bf16.mxu1 %v22128_v14  ;;  %v21075_v13 = vadd.f32 %v25492_v20, %v625_v6  ;;  %v22191_v20 = vld [vmem:[%s31729_s4 + $0x5ec] ss:$16 sps:$4 sm:$0xff]   ;;  %v22225_v6 = vld [vmem:[%s31729_s4 + $0x6a8] ss:$16 sps:$4 sm:$0xff]  }
 0x22f   :  { %6765 = vmatprep.subr.bf16.mxu0 %v22131_v15 }
 0x230   :  { %vm3913_vm7 = vcmp.gt.f32.partialorder %v21075_v13, 0.0 }
 0x231   :  { %6389 = vmatpush1.bf16.msra.mxu1 %v22126_v18 }
 0x232   :  { %6766 = vmatpush1.bf16.msra.mxu0 %v22129_v19  ;;  %6390 = vmatprep.subr.bf16.mxu1 %v22134_v22  ;;  %v22183_v22 = vld [vmem:[%s31729_s4 + $0x5c8] ss:$16 sps:$4 sm:$0xff]  }
 0x233   :  { %6767 = vmatprep.subr.bf16.mxu0 %v22137_v23  ;;  %v3926_v23 = vmul.f32 0.01, %v21075_v13 }
 0x235   :  { %6391 = vmatpush1.bf16.msra.mxu1 %v22132_v17  ;;  %v22188_v17 = vld [vmem:[%s31729_s4 + $0x164] ss:$16 sps:$4 sm:$0xff]  }
 0x236   :  { %6768 = vmatpush1.bf16.msra.mxu0 %v22135_v56  ;;  %6392 = vmatprep.subr.bf16.mxu1 %v22140_v27  ;;  %v22186_v56 = vld [vmem:[%s31729_s4 + $0x160] ss:$16 sps:$4 sm:$0xff]  }
 0x237   :  { %6769 = vmatprep.subr.bf16.mxu0 %v22143_v29  ;;  %v22194_v29 = vld [vmem:[%s31729_s4 + $0x184] ss:$16 sps:$4 sm:$0xff]  }
 0x239   :  { %6393 = vmatpush1.bf16.msra.mxu1 %v22138_v48  ;;  %v22189_v48 = vld [vmem:[%s31729_s4 + $0x5e8] ss:$16 sps:$4 sm:$0xff]  }
 0x23a   :  { %6770 = vmatpush1.bf16.msra.mxu0 %v22141_v30  ;;  %6394 = vmatprep.subr.bf16.mxu1 %v22146_v31  ;;  %v22192_v30 = vld [vmem:[%s31729_s4 + $0x180] ss:$16 sps:$4 sm:$0xff]   ;;  %v22197_v31 = vld [vmem:[%s31729_s4 + $0x60c] ss:$16 sps:$4 sm:$0xff]  }
 0x23b   :  { %6771 = vmatprep.subr.bf16.mxu0 %v22149_v33 }
 0x23d   :  { %6395 = vmatpush1.bf16.msra.mxu1 %v22144_v32  ;;  %v3939_v32 = vsel %vm3913_vm7, %v21075_v13, %v3926_v23  ;;  %v22237_v13 = vld [vmem:[%s31729_s4 + $0x6e8] ss:$16 sps:$4 sm:$0xff]  }
 0x23e   :  { %6772 = vmatpush1.bf16.msra.mxu0 %v22147_v35  ;;  %6396 = vmatprep.subr.bf16.mxu1 %v22152_v37  ;;  %v22195_v35 = vld [vmem:[%s31729_s4 + $0x608] ss:$16 sps:$4 sm:$0xff]   ;;  %v22200_v37 = vld [vmem:[%s31729_s4 + $0x1a4] ss:$16 sps:$4 sm:$0xff]  }
 0x23f   :  { %6773 = vmatprep.subr.bf16.mxu0 %v22155_v39  ;;  %v22198_v39 = vld [vmem:[%s31729_s4 + $0x1a0] ss:$16 sps:$4 sm:$0xff]  }
 0x240   :  { %v25973_v16 = vpop.f32.mrb[8].mxu0 }
 0x241   :  { %v25975_v42 = vpop.f32.mrb[9].mxu0  ;;  %6397 = vmatpush1.bf16.msra.mxu1 %v22150_v38  ;;  %v26073_v38 = vpack.c.bf16 %v3939_v32, %v3939_v32 }
 0x242   :  { %v3663_v44 = vpop.f32.mrb[10].mxu0  ;;  %6774 = vmatpush1.bf16.msra.mxu0 %v22153_v36  ;;  %6398 = vmatprep.subr.bf16.mxu1 %v22158_v1  ;;  %v22203_v36 = vld [vmem:[%s31729_s4 + $0x62c] ss:$16 sps:$4 sm:$0xff]  }
 0x243   :  { %v3664_v45 = vpop.f32.mrb[11].mxu0  ;;  %6775 = vmatprep.subr.bf16.mxu0 %v22161_v40  ;;  %v22206_v40 = vld [vmem:[%s31729_s4 + $0x1c4] ss:$16 sps:$4 sm:$0xff]   ;;  %v22204_v44 = vld [vmem:[%s31729_s4 + $0x1c0] ss:$16 sps:$4 sm:$0xff]  }
 0x244   :  { %v22212_v45 = vld [vmem:[%s31729_s4 + $0x1e4] ss:$16 sps:$4 sm:$0xff]  }
 0x245   :  { %6399 = vmatpush1.bf16.msra.mxu1 %v22156_v41  ;;  %v22201_v41 = vld [vmem:[%s31729_s4 + $0x628] ss:$16 sps:$4 sm:$0xff]  }
 0x246   :  { %6776 = vmatpush1.bf16.msra.mxu0 %v22159_v3  ;;  %6400 = vmatprep.subr.bf16.mxu1 %v22164_v21  ;;  %v22209_v3 = vld [vmem:[%s31729_s4 + $0x64c] ss:$16 sps:$4 sm:$0xff]   ;;  %v22207_v21 = vld [vmem:[%s31729_s4 + $0x648] ss:$16 sps:$4 sm:$0xff]  }
 0x247   :  { %6777 = vmatprep.subr.bf16.mxu0 %v22167_v46  ;;  %v22215_v46 = vld [vmem:[%s31729_s4 + $0x66c] ss:$16 sps:$4 sm:$0xff]  }
 0x249   :  { %6401 = vmatpush1.bf16.msra.mxu1 %v22162_v47  ;;  %v22210_v47 = vld [vmem:[%s31729_s4 + $0x1e0] ss:$16 sps:$4 sm:$0xff]  }
 0x24a   :  { %6778 = vmatpush1.bf16.msra.mxu0 %v22165_v50  ;;  %6402 = vmatprep.subr.bf16.mxu1 %v22170_v52  ;;  %v22213_v50 = vld [vmem:[%s31729_s4 + $0x668] ss:$16 sps:$4 sm:$0xff]   ;;  %v22218_v52 = vld [vmem:[%s31729_s4 + $0x204] ss:$16 sps:$4 sm:$0xff]  }
 0x24b   :  { %6779 = vmatprep.subr.bf16.mxu0 %v22173_v55  ;;  %v22216_v55 = vld [vmem:[%s31729_s4 + $0x200] ss:$16 sps:$4 sm:$0xff]  }
 0x24d   :  { %6403 = vmatpush1.bf16.msra.mxu1 %v22168_v53  ;;  %v22221_v53 = vld [vmem:[%s31729_s4 + $0x68c] ss:$16 sps:$4 sm:$0xff]  }
 0x24e   :  { %6780 = vmatpush1.bf16.msra.mxu0 %v22171_v60  ;;  %6404 = vmatprep.subr.bf16.mxu1 %v22176_v61  ;;  %v22219_v60 = vld [vmem:[%s31729_s4 + $0x688] ss:$16 sps:$4 sm:$0xff]   ;;  %v22224_v61 = vld [vmem:[%s31729_s4 + $0x224] ss:$16 sps:$4 sm:$0xff]  }
 0x24f   :  { %v26037_v11 = vpop.f32.mrb[12].mxu1  ;;  %6781 = vmatprep.subr.bf16.mxu0 %v22179_v63  ;;  %v22227_v63 = vld [vmem:[%s31729_s4 + $0x6ac] ss:$16 sps:$4 sm:$0xff]  }
 0x250   :  { %v3538_v14 = vpop.f32.mrb[13].mxu1 }
 0x251   :  { %v21078_v15 = vadd.f32 %v3538_v14, %v637_v7  ;;  %v3540_v18 = vpop.f32.mrb[14].mxu1  ;;  %6405 = vmatpush1.bf16.msra.mxu1 %v22174_v0  ;;  %v22222_v0 = vld [vmem:[%s31729_s4 + $0x220] ss:$16 sps:$4 sm:$0xff]   ;;  %v22230_v7 = vld [vmem:[%s31729_s4 + $0x244] ss:$16 sps:$4 sm:$0xff]  }
 0x252   :  { %6782 = vmatpush1.bf16.msra.mxu0 %v22177_v8  ;;  %v3541_v19 = vpop.f32.mrb[15].mxu1  ;;  %6406 = vmatprep.subr.bf16.mxu1 %v22182_v9  ;;  %v22233_v8 = vld [vmem:[%s31729_s4 + $0x6cc] ss:$16 sps:$4 sm:$0xff]   ;;  %v22236_v9 = vld [vmem:[%s31729_s4 + $0x264] ss:$16 sps:$4 sm:$0xff]  }
 0x253   :  { %6783 = vmatprep.subr.bf16.mxu0 %v22185_v10  ;;  %v3929_v27 = vmul.f32 0.01, %v21078_v15  ;;  %vm3916_vm8 = vcmp.gt.f32.partialorder %v21078_v15, 0.0  ;;  %v22234_v10 = vld [vmem:[%s31729_s4 + $0x260] ss:$16 sps:$4 sm:$0xff]  }
 0x254   :  { %v22242_v14 = vld [vmem:[%s31729_s4 + $0x284] ss:$16 sps:$4 sm:$0xff]   ;;  %v22245_v18 = vld [vmem:[%s31729_s4 + $0x70c] ss:$16 sps:$4 sm:$0xff]   ;;  %v22243_v19 = vld [vmem:[%s31729_s4 + $0x708] ss:$16 sps:$4 sm:$0xff]  }
 0x255   :  { %6407 = vmatpush1.bf16.msra.mxu1 %v22180_v12  ;;  %v3942_v33 = vsel %vm3916_vm8, %v21078_v15, %v3929_v27  ;;  %v22239_v12 = vld [vmem:[%s31729_s4 + $0x6ec] ss:$16 sps:$4 sm:$0xff]   ;;  %v22240_v15 = vld [vmem:[%s31729_s4 + $0x280] ss:$16 sps:$4 sm:$0xff]   ;;  %v22254_v27 = vld [vmem:[%s31729_s4 + $0x2c4] ss:$16 sps:$4 sm:$0xff]  }
 0x256   :  { %6784 = vmatpush1.bf16.msra.mxu0 %v22183_v22  ;;  %6408 = vmatprep.subr.bf16.mxu1 %v22188_v17  ;;  %v26081_v1 = vpack.c.bf16 %v3942_v33, %v3942_v33  ;;  %v22248_v22 = vld [vmem:[%s31729_s4 + $0x2a4] ss:$16 sps:$4 sm:$0xff]   ;;  %v22246_v17 = vld [vmem:[%s31729_s4 + $0x2a0] ss:$16 sps:$4 sm:$0xff]   ;;  %v22255_v33 = vld [vmem:[%s31729_s4 + $0x748] ss:$16 sps:$4 sm:$0xff]  }
 0x257   :  { %6785 = vmatprep.subr.bf16.mxu0 %v22191_v20  ;;  %v22251_v20 = vld [vmem:[%s31729_s4 + $0x72c] ss:$16 sps:$4 sm:$0xff]  }
 0x259   :  { %6409 = vmatpush1.bf16.msra.mxu1 %v22186_v56  ;;  %v22249_v56 = vld [vmem:[%s31729_s4 + $0x728] ss:$16 sps:$4 sm:$0xff]  }
 0x25a   :  { %6786 = vmatpush1.bf16.msra.mxu0 %v22189_v48  ;;  %6410 = vmatprep.subr.bf16.mxu1 %v22194_v29  ;;  %v22252_v29 = vld [vmem:[%s31729_s4 + $0x2c0] ss:$16 sps:$4 sm:$0xff]  }
 0x25b   :  { %6796 = vmatprep.subr.bf16.mxu0 %v22197_v31 }
 0x25d   :  { %6788 = vmatmul.mubr.bf16.vlgmr.msra.gmra.mrb[20].mxu0 %v26073_v38  ;;  %6411 = vmatpush1.bf16.msra.mxu1 %v22192_v30  ;;  %v22257_v30 = vld [vmem:[%s31729_s4 + $0x74c] ss:$16 sps:$4 sm:$0xff]  }
 0x25e   :  { %6797 = vmatpush1.bf16.msra.mxu0 %v22195_v35  ;;  %6828 = vmatprep.mubr.bf16.mxu0 %v26081_v1  ;;  %v22260_v35 = vld [vmem:[%s31729_s4 + $0x2e4] ss:$16 sps:$4 sm:$0xff]  }
 0x25f   :  { %6412 = vmatprep.subr.bf16.mxu1 %v22200_v37  ;;  %6798 = vmatprep.subr.bf16.mxu0 %v22203_v36  ;;  %v22263_v36 = vld [vmem:[%s31729_s4 + $0x76c] ss:$16 sps:$4 sm:$0xff]  }
 0x260   :  { %v20801_v23 = vpop.f32.mrb[12].mxu0 }
 0x261   :  { %6413 = vmatpush1.bf16.msra.mxu1 %v22198_v39  ;;  %v20802_v48 = vpop.f32.mrb[13].mxu0  ;;  %v22258_v39 = vld [vmem:[%s31729_s4 + $0x2e0] ss:$16 sps:$4 sm:$0xff]  }
 0x262   :  { %6799 = vmatpush1.bf16.msra.mxu0 %v22201_v41  ;;  %6414 = vmatprep.subr.bf16.mxu1 %v22206_v40  ;;  %v26195_v31 = vadd.f32 %v20802_v48, %v20801_v23  ;;  %v20804_v32 = vpop.f32.mrb[14].mxu0  ;;  %v22261_v40 = vld [vmem:[%s31729_s4 + $0x768] ss:$16 sps:$4 sm:$0xff]   ;;  %v22294_v48 = vld [vmem:[%s31729_s4 + $0x3a0] ss:$16 sps:$4 sm:$0xff]  }
 0x263   :  { %6800 = vmatprep.subr.bf16.mxu0 %v22209_v3  ;;  %v20805_v37 = vpop.f32.mrb[15].mxu0  ;;  %v22300_v32 = vld [vmem:[%s31729_s4 + $0x3c0] ss:$16 sps:$4 sm:$0xff]  }
 0x264   :  { %v22308_v37 = vld [vmem:[%s31729_s4 + $0x3e4] ss:$16 sps:$4 sm:$0xff]  }
 0x265   :  { %6415 = vmatpush1.bf16.msra.mxu1 %v22204_v44  ;;  %v22266_v44 = vld [vmem:[%s31729_s4 + $0x304] ss:$16 sps:$4 sm:$0xff]  }
 0x266   :  { %6801 = vmatpush1.bf16.msra.mxu0 %v22207_v21  ;;  %6416 = vmatprep.subr.bf16.mxu1 %v22212_v45 }
 0x267   :  { %6802 = vmatprep.subr.bf16.mxu0 %v22215_v46  ;;  %v22269_v46 = vld [vmem:[%s31729_s4 + $0x78c] ss:$16 sps:$4 sm:$0xff]  }
 0x269   :  { %6417 = vmatpush1.bf16.msra.mxu1 %v22210_v47  ;;  %v26221_v47 = vsub.s32 6, %v24248_v43  ;;  %v22272_v43 = vld [vmem:[%s31729_s4 + $0x324] ss:$16 sps:$4 sm:$0xff]  }
 0x26a   :  { %6803 = vmatpush1.bf16.msra.mxu0 %v22213_v50  ;;  %6427 = vmatprep.subr.bf16.mxu1 %v22218_v52  ;;  %v22264_v50 = vld [vmem:[%s31729_s4 + $0x300] ss:$16 sps:$4 sm:$0xff]   ;;  %v26229_v52 = vld [vmem:[%s31754_s22 + $0x8] sm:$0x1f] }
 0x26b   :  { %6804 = vmatprep.subr.bf16.mxu0 %v22221_v53  ;;  %v22267_v53 = vld [vmem:[%s31729_s4 + $0x788] ss:$16 sps:$4 sm:$0xff]  }
 0x26c   :  { %6419 = vmatmul.mubr.bf16.vlgmr.msra.gmra.mrb[24].mxu1 %v25633_v25  ;;  %v22228_v25 = vld [vmem:[%s31729_s4 + $0x240] ss:$16 sps:$4 sm:$0xff]  }
 0x26d   :  { %6428 = vmatpush1.bf16.msra.mxu1 %v22216_v55  ;;  %6459 = vmatprep.mubr.bf16.mxu1 %v25645_v28  ;;  %v22231_v28 = vld [vmem:[%s31729_s4 + $0x6c8] ss:$16 sps:$4 sm:$0xff]   ;;  %v22270_v55 = vld [vmem:[%s31729_s4 + $0x320] ss:$16 sps:$4 sm:$0xff]  }
 0x26e   :  { %6805 = vmatpush1.bf16.msra.mxu0 %v22219_v60  ;;  %6429 = vmatprep.subr.bf16.mxu1 %v22224_v61  ;;  %v22275_v60 = vld [vmem:[%s31729_s4 + $0x7ac] ss:$16 sps:$4 sm:$0xff]   ;;  %v645_v61 = vrot.slane %v26229_v52, %v25012_v5 }
 0x26f   :  { %6806 = vmatprep.subr.bf16.mxu0 %v22227_v63  ;;  %v633_v63 = vrot.slane %v26022_v4, %v26221_v47  ;;  %v22281_v4 = vld [vmem:[%s31729_s4 + $0x7cc] ss:$16 sps:$4 sm:$0xff]  }
 0x270   :  { %v26209_v41 = vpop.f32.mrb[16].mxu0 }
 0x271   :  { %6430 = vmatpush1.bf16.msra.mxu1 %v22222_v0  ;;  %v21033_v3 = vpop.f32.mrb[17].mxu0  ;;  %v22273_v0 = vld [vmem:[%s31729_s4 + $0x7a8] ss:$16 sps:$4 sm:$0xff]  }
 0x272   :  { %6807 = vmatpush1.bf16.msra.mxu0 %v22225_v6  ;;  %6431 = vmatprep.subr.bf16.mxu1 %v22230_v7  ;;  %v3906_v21 = vpop.f32.mrb[18].mxu0  ;;  %v22278_v6 = vld [vmem:[%s31729_s4 + $0x344] ss:$16 sps:$4 sm:$0xff]   ;;  %v22276_v7 = vld [vmem:[%s31729_s4 + $0x340] ss:$16 sps:$4 sm:$0xff]  }
 0x273   :  { %6808 = vmatprep.subr.bf16.mxu0 %v22233_v8  ;;  %v21034_v45 = vpop.f32.mrb[19].mxu0  ;;  %v21077_v8 = vadd.f32 %v26037_v11, %v633_v63  ;;  %v22317_v3 = vld [vmem:[%s31729_s4 + $0x88c] ss:$16 sps:$4 sm:$0xff]   ;;  %v22312_v21 = vld [vmem:[%s31729_s4 + $0x400] ss:$16 sps:$4 sm:$0xff]  }
 0x274   :  { %v22315_v45 = vld [vmem:[%s31729_s4 + $0x888] ss:$16 sps:$4 sm:$0xff]   ;;  %v22335_v63 = vld [vmem:[%s31729_s4 + $0x8ec] ss:$16 sps:$4 sm:$0xff]  }
 0x275   :  { %6432 = vmatpush1.bf16.msra.mxu1 %v22228_v25  ;;  %v21080_v25 = vadd.f32 %v25975_v42, %v645_v61  ;;  %v22287_v42 = vld [vmem:[%s31729_s4 + $0x7ec] ss:$16 sps:$4 sm:$0xff]   ;;  %vm3915_vm9 = vcmp.gt.f32.partialorder %v21077_v8, 0.0  ;;  %v22327_v61 = vld [vmem:[%s31729_s4 + $0x8c8] ss:$16 sps:$4 sm:$0xff]  }
 0x276   :  { %6809 = vmatpush1.bf16.msra.mxu0 %v22231_v28  ;;  %6433 = vmatprep.subr.bf16.mxu1 %v22236_v9  ;;  %v22279_v28 = vld [vmem:[%s31729_s4 + $0x7c8] ss:$16 sps:$4 sm:$0xff]   ;;  %v22284_v9 = vld [vmem:[%s31729_s4 + $0x364] ss:$16 sps:$4 sm:$0xff]  }
 0x277   :  { %6810 = vmatprep.subr.bf16.mxu0 %v22239_v12  ;;  %v3931_v11 = vmul.f32 0.01, %v21080_v25  ;;  %v3928_v12 = vmul.f32 0.01, %v21077_v8  ;;  %vm3918_vm10 = vcmp.gt.f32.partialorder %v21080_v25, 0.0 }
 0x279   :  { %6434 = vmatpush1.bf16.msra.mxu1 %v22234_v10  ;;  %v22282_v10 = vld [vmem:[%s31729_s4 + $0x360] ss:$16 sps:$4 sm:$0xff]  }
 0x27a   :  { %6811 = vmatpush1.bf16.msra.mxu0 %v22237_v13  ;;  %6435 = vmatprep.subr.bf16.mxu1 %v22242_v14  ;;  %v22285_v13 = vld [vmem:[%s31729_s4 + $0x7e8] ss:$16 sps:$4 sm:$0xff]   ;;  %v22290_v14 = vld [vmem:[%s31729_s4 + $0x384] ss:$16 sps:$4 sm:$0xff]  }
 0x27b   :  { %6812 = vmatprep.subr.bf16.mxu0 %v22245_v18  ;;  %v22293_v18 = vld [vmem:[%s31729_s4 + $0x80c] ss:$16 sps:$4 sm:$0xff]  }
 0x27d   :  { %6436 = vmatpush1.bf16.msra.mxu1 %v22240_v15  ;;  %v22288_v15 = vld [vmem:[%s31729_s4 + $0x380] ss:$16 sps:$4 sm:$0xff]  }
 0x27e   :  { %6813 = vmatpush1.bf16.msra.mxu0 %v22243_v19  ;;  %6437 = vmatprep.subr.bf16.mxu1 %v22248_v22  ;;  %v3941_v19 = vsel %vm3915_vm9, %v21077_v8, %v3928_v12  ;;  %v3944_v22 = vsel %vm3918_vm10, %v21080_v25, %v3931_v11  ;;  %v22336_v25 = vld [vmem:[%s31729_s4 + $0x480] ss:$16 sps:$4 sm:$0xff]   ;;  %v22339_v8 = vld [vmem:[%s31729_s4 + $0x908] ss:$16 sps:$4 sm:$0xff]   ;;  %v22350_v11 = vld [vmem:[%s31729_s4 + $0x4c4] ss:$16 sps:$4 sm:$0xff]  }
 0x27f   :  { %6814 = vmatprep.subr.bf16.mxu0 %v22251_v20  ;;  %v22296_v20 = vld [vmem:[%s31729_s4 + $0x3a4] ss:$16 sps:$4 sm:$0xff]   ;;  %v26291_v23 = vpack.c.bf16 %v3941_v19, %v3941_v19  ;;  %v22353_v12 = vld [vmem:[%s31729_s4 + $0x94c] ss:$16 sps:$4 sm:$0xff]   ;;  %v22354_v19 = vld [vmem:[%s31729_s4 + $0x4e0] ss:$16 sps:$4 sm:$0xff]  }
 0x281   :  { %6438 = vmatpush1.bf16.msra.mxu1 %v22246_v17  ;;  %v22291_v17 = vld [vmem:[%s31729_s4 + $0x808] ss:$16 sps:$4 sm:$0xff]  }
 0x282   :  { %6815 = vmatpush1.bf16.msra.mxu0 %v22249_v56  ;;  %6439 = vmatprep.subr.bf16.mxu1 %v22254_v27  ;;  %v22299_v56 = vld [vmem:[%s31729_s4 + $0x82c] ss:$16 sps:$4 sm:$0xff]   ;;  %v26296_v27 = vpack.c.bf16 %v3944_v22, %v3944_v22  ;;  %v22357_v22 = vld [vmem:[%s31729_s4 + $0x968] ss:$16 sps:$4 sm:$0xff]  }
 0x283   :  { %6816 = vmatprep.subr.bf16.mxu0 %v22257_v30  ;;  %v22302_v30 = vld [vmem:[%s31729_s4 + $0x3c4] ss:$16 sps:$4 sm:$0xff]  }
 0x285   :  { %6440 = vmatpush1.bf16.msra.mxu1 %v22252_v29  ;;  %v22297_v29 = vld [vmem:[%s31729_s4 + $0x828] ss:$16 sps:$4 sm:$0xff]  }
 0x286   :  { %6817 = vmatpush1.bf16.msra.mxu0 %v22255_v33  ;;  %6441 = vmatprep.subr.bf16.mxu1 %v22260_v35  ;;  %v22305_v33 = vld [vmem:[%s31729_s4 + $0x84c] ss:$16 sps:$4 sm:$0xff]   ;;  %v22303_v35 = vld [vmem:[%s31729_s4 + $0x848] ss:$16 sps:$4 sm:$0xff]  }
 0x287   :  { %6818 = vmatprep.subr.bf16.mxu0 %v22263_v36  ;;  %v22311_v36 = vld [vmem:[%s31729_s4 + $0x86c] ss:$16 sps:$4 sm:$0xff]  }
 0x289   :  { %6442 = vmatpush1.bf16.msra.mxu1 %v22258_v39  ;;  %v22306_v39 = vld [vmem:[%s31729_s4 + $0x3e0] ss:$16 sps:$4 sm:$0xff]  }
 0x28a   :  { %6819 = vmatpush1.bf16.msra.mxu0 %v22261_v40  ;;  %6443 = vmatprep.subr.bf16.mxu1 %v22266_v44  ;;  %v22309_v40 = vld [vmem:[%s31729_s4 + $0x868] ss:$16 sps:$4 sm:$0xff]   ;;  %v22314_v44 = vld [vmem:[%s31729_s4 + $0x404] ss:$16 sps:$4 sm:$0xff]  }
 0x28b   :  { %6820 = vmatprep.subr.bf16.mxu0 %v22269_v46  ;;  %v22320_v46 = vld [vmem:[%s31729_s4 + $0x424] ss:$16 sps:$4 sm:$0xff]  }
 0x28d   :  { %6444 = vmatpush1.bf16.msra.mxu1 %v22264_v50  ;;  %v22318_v50 = vld [vmem:[%s31729_s4 + $0x420] ss:$16 sps:$4 sm:$0xff]  }
 0x28e   :  { %6821 = vmatpush1.bf16.msra.mxu0 %v22267_v53  ;;  %6445 = vmatprep.subr.bf16.mxu1 %v22272_v43  ;;  %v22323_v53 = vld [vmem:[%s31729_s4 + $0x8ac] ss:$16 sps:$4 sm:$0xff]   ;;  %v22321_v43 = vld [vmem:[%s31729_s4 + $0x8a8] ss:$16 sps:$4 sm:$0xff]  }
 0x28f   :  { %6822 = vmatprep.subr.bf16.mxu0 %v22275_v60  ;;  %v22329_v60 = vld [vmem:[%s31729_s4 + $0x8cc] ss:$16 sps:$4 sm:$0xff]  }
 0x291   :  { %6446 = vmatpush1.bf16.msra.mxu1 %v22270_v55  ;;  %v22326_v55 = vld [vmem:[%s31729_s4 + $0x444] ss:$16 sps:$4 sm:$0xff]  }
 0x292   :  { %6823 = vmatpush1.bf16.msra.mxu0 %v22273_v0  ;;  %6447 = vmatprep.subr.bf16.mxu1 %v22278_v6  ;;  %v22330_v0 = vld [vmem:[%s31729_s4 + $0x460] ss:$16 sps:$4 sm:$0xff]   ;;  %v22333_v6 = vld [vmem:[%s31729_s4 + $0x8e8] ss:$16 sps:$4 sm:$0xff]  }
 0x293   :  { %6824 = vmatprep.subr.bf16.mxu0 %v22281_v4  ;;  %v22341_v4 = vld [vmem:[%s31729_s4 + $0x90c] ss:$16 sps:$4 sm:$0xff]  }
 0x295   :  { %6448 = vmatpush1.bf16.msra.mxu1 %v22276_v7  ;;  %v22338_v7 = vld [vmem:[%s31729_s4 + $0x484] ss:$16 sps:$4 sm:$0xff]  }
 0x296   :  { %6825 = vmatpush1.bf16.msra.mxu0 %v22279_v28  ;;  %6449 = vmatprep.subr.bf16.mxu1 %v22284_v9  ;;  %v22344_v28 = vld [vmem:[%s31729_s4 + $0x4a4] ss:$16 sps:$4 sm:$0xff]   ;;  %v22347_v9 = vld [vmem:[%s31729_s4 + $0x92c] ss:$16 sps:$4 sm:$0xff]  }
 0x297   :  { %6826 = vmatprep.subr.bf16.mxu0 %v22287_v42  ;;  %v22345_v42 = vld [vmem:[%s31729_s4 + $0x928] ss:$16 sps:$4 sm:$0xff]  }
 0x299   :  { %6450 = vmatpush1.bf16.msra.mxu1 %v22282_v10  ;;  %v22342_v10 = vld [vmem:[%s31729_s4 + $0x4a0] ss:$16 sps:$4 sm:$0xff]  }
 0x29a   :  { %6827 = vmatpush1.bf16.msra.mxu0 %v22285_v13  ;;  %6451 = vmatprep.subr.bf16.mxu1 %v22290_v14  ;;  %v22348_v13 = vld [vmem:[%s31729_s4 + $0x4c0] ss:$16 sps:$4 sm:$0xff]   ;;  %v22351_v14 = vld [vmem:[%s31729_s4 + $0x948] ss:$16 sps:$4 sm:$0xff]  }
 0x29b   :  { %6837 = vmatprep.subr.bf16.mxu0 %v22293_v18  ;;  %v22359_v18 = vld [vmem:[%s31729_s4 + $0x96c] ss:$16 sps:$4 sm:$0xff]  }
 0x29d   :  { %6829 = vmatmul.mubr.bf16.vlgmr.msra.gmra.mrb[20].mxu0 %v26291_v23  ;;  %6452 = vmatpush1.bf16.msra.mxu1 %v22288_v15  ;;  %v22356_v15 = vld [vmem:[%s31729_s4 + $0x4e4] ss:$16 sps:$4 sm:$0xff]  }
 0x29e   :  { %6838 = vmatpush1.bf16.msra.mxu0 %v22291_v17  ;;  %6453 = vmatprep.subr.bf16.mxu1 %v22296_v20  ;;  %v22362_v17 = vld [vmem:[%s31729_s4 + $0x504] ss:$16 sps:$4 sm:$0xff]   ;;  %v22365_v20 = vld [vmem:[%s31729_s4 + $0x98c] ss:$16 sps:$4 sm:$0xff]  }
 0x29f   :  { %6839 = vmatprep.subr.bf16.mxu0 %v22299_v56  ;;  %6869 = vmatprep.mubr.bf16.mxu0 %v26296_v27  ;;  %v22360_v56 = vld [vmem:[%s31729_s4 + $0x500] ss:$16 sps:$4 sm:$0xff]  }
 0x2a1   :  { %6454 = vmatpush1.bf16.msra.mxu1 %v22294_v48  ;;  %v22363_v48 = vld [vmem:[%s31729_s4 + $0x988] ss:$16 sps:$4 sm:$0xff]  }
 0x2a2   :  { %6840 = vmatpush1.bf16.msra.mxu0 %v22297_v29  ;;  %6455 = vmatprep.subr.bf16.mxu1 %v22302_v30  ;;  %v22368_v29 = vld [vmem:[%s31729_s4 + $0x524] ss:$16 sps:$4 sm:$0xff]   ;;  %v22371_v30 = vld [vmem:[%s31729_s4 + $0x9ac] ss:$16 sps:$4 sm:$0xff]  }
 0x2a3   :  { %6841 = vmatprep.subr.bf16.mxu0 %v22305_v33  ;;  %v641_v33 = vrot.slane %v26229_v52, %v25006_v2 }
 0x2a5   :  { %6456 = vmatpush1.bf16.msra.mxu1 %v22300_v32  ;;  %v22366_v32 = vld [vmem:[%s31729_s4 + $0x520] ss:$16 sps:$4 sm:$0xff]  }
 0x2a6   :  { %6842 = vmatpush1.bf16.msra.mxu0 %v22303_v35  ;;  %6457 = vmatprep.subr.bf16.mxu1 %v22308_v37  ;;  %v22369_v35 = vld [vmem:[%s31729_s4 + $0x9a8] ss:$16 sps:$4 sm:$0xff]   ;;  %v22374_v37 = vld [vmem:[%s31729_s4 + $0x544] ss:$16 sps:$4 sm:$0xff]  }
 0x2a7   :  { %6843 = vmatprep.subr.bf16.mxu0 %v22311_v36  ;;  %v22372_v36 = vld [vmem:[%s31729_s4 + $0x540] ss:$16 sps:$4 sm:$0xff]  }
 0x2a9   :  { %6458 = vmatpush1.bf16.msra.mxu1 %v22306_v39  ;;  %v22377_v39 = vld [vmem:[%s31729_s4 + $0x9cc] ss:$16 sps:$4 sm:$0xff]  }
 0x2aa   :  { %6844 = vmatpush1.bf16.msra.mxu0 %v22309_v40  ;;  %6468 = vmatprep.subr.bf16.mxu1 %v22314_v44  ;;  %v21079_v40 = vadd.f32 %v25973_v16, %v641_v33  ;;  %v22375_v44 = vld [vmem:[%s31729_s4 + $0x9c8] ss:$16 sps:$4 sm:$0xff]   ;;  %v22378_v16 = vld [vmem:[%s31729_s4 + $0x560] ss:$16 sps:$4 sm:$0xff]   ;;  %v22422_v33 = vld [vmem:[%s31729_s4 + $0x644] ss:$16 sps:$4 sm:$0xff]  }
 0x2ab   :  { %6845 = vmatprep.subr.bf16.mxu0 %v22317_v3  ;;  %v22380_v3 = vld [vmem:[%s31729_s4 + $0x564] ss:$16 sps:$4 sm:$0xff]  }
 0x2ac   :  { %6460 = vmatmul.mubr.bf16.vlgmr.msra.gmra.mrb[24].mxu1 %v25848_v54  ;;  %v22324_v54 = vld [vmem:[%s31729_s4 + $0x440] ss:$16 sps:$4 sm:$0xff]   ;;  %vm3917_vm11 = vcmp.gt.f32.partialorder %v21079_v40, 0.0 }
 0x2ad   :  { %6469 = vmatpush1.bf16.msra.mxu1 %v22312_v21  ;;  %6500 = vmatprep.mubr.bf16.mxu1 %v25859_v59  ;;  %v22332_v59 = vld [vmem:[%s31729_s4 + $0x464] ss:$16 sps:$4 sm:$0xff]   ;;  %v22383_v21 = vld [vmem:[%s31729_s4 + $0x9ec] ss:$16 sps:$4 sm:$0xff]  }
 0x2ae   :  { %6846 = vmatpush1.bf16.msra.mxu0 %v22315_v45  ;;  %6470 = vmatprep.subr.bf16.mxu1 %v22320_v46  ;;  %v3930_v45 = vmul.f32 0.01, %v21079_v40  ;;  %v22381_v46 = vld [vmem:[%s31729_s4 + $0x9e8] ss:$16 sps:$4 sm:$0xff]  }
 0x2af   :  { %6847 = vmatprep.subr.bf16.mxu0 %v22323_v53  ;;  %v22389_v53 = vld [vmem:[%s31729_s4 + $0xa0c] ss:$16 sps:$4 sm:$0xff]  }
 0x2b1   :  { %6471 = vmatpush1.bf16.msra.mxu1 %v22318_v50  ;;  %v22386_v50 = vld [vmem:[%s31729_s4 + $0x584] ss:$16 sps:$4 sm:$0xff]  }
 0x2b2   :  { %6848 = vmatpush1.bf16.msra.mxu0 %v22321_v43  ;;  %6472 = vmatprep.subr.bf16.mxu1 %v22326_v55  ;;  %v22384_v43 = vld [vmem:[%s31729_s4 + $0x580] ss:$16 sps:$4 sm:$0xff]   ;;  %v3943_v55 = vsel %vm3917_vm11, %v21079_v40, %v3930_v45  ;;  %v22429_v40 = vld [vmem:[%s31729_s4 + $0xae8] ss:$16 sps:$4 sm:$0xff]   ;;  %v22440_v45 = vld [vmem:[%s31729_s4 + $0x6a4] ss:$16 sps:$4 sm:$0xff]  }
 0x2b3   :  { %6849 = vmatprep.subr.bf16.mxu0 %v22329_v60  ;;  %v22387_v60 = vld [vmem:[%s31729_s4 + $0xa08] ss:$16 sps:$4 sm:$0xff]  }
 0x2b5   :  { %6473 = vmatpush1.bf16.msra.mxu1 %v22324_v54  ;;  %v22392_v54 = vld [vmem:[%s31729_s4 + $0x5a4] ss:$16 sps:$4 sm:$0xff]  }
 0x2b6   :  { %6850 = vmatpush1.bf16.msra.mxu0 %v22327_v61  ;;  %6474 = vmatprep.subr.bf16.mxu1 %v22332_v59  ;;  %v22395_v61 = vld [vmem:[%s31729_s4 + $0xa2c] ss:$16 sps:$4 sm:$0xff]   ;;  %v26497_v59 = vpack.c.bf16 %v3943_v55, %v3943_v55  ;;  %v22441_v55 = vld [vmem:[%s31729_s4 + $0xb28] ss:$16 sps:$4 sm:$0xff]  }
 0x2b7   :  { %6851 = vmatprep.subr.bf16.mxu0 %v22335_v63  ;;  %v22390_v63 = vld [vmem:[%s31729_s4 + $0x5a0] ss:$16 sps:$4 sm:$0xff]  }
 0x2b9   :  { %6475 = vmatpush1.bf16.msra.mxu1 %v22330_v0  ;;  %v22393_v0 = vld [vmem:[%s31729_s4 + $0xa28] ss:$16 sps:$4 sm:$0xff]  }
 0x2ba   :  { %6852 = vmatpush1.bf16.msra.mxu0 %v22333_v6  ;;  %6476 = vmatprep.subr.bf16.mxu1 %v22338_v7  ;;  %v653_v6 = vrot.slane %v26229_v52, %v25573_v51  ;;  %v22398_v7 = vld [vmem:[%s31729_s4 + $0x5c4] ss:$16 sps:$4 sm:$0xff]  }
 0x2bb   :  { %6853 = vmatprep.subr.bf16.mxu0 %v22341_v4  ;;  %v22401_v4 = vld [vmem:[%s31729_s4 + $0xa4c] ss:$16 sps:$4 sm:$0xff]  }
 0x2bd   :  { %6477 = vmatpush1.bf16.msra.mxu1 %v22336_v25 }
 0x2be   :  { %6854 = vmatpush1.bf16.msra.mxu0 %v22339_v8  ;;  %6478 = vmatprep.subr.bf16.mxu1 %v22344_v28  ;;  %v22396_v8 = vld [vmem:[%s31729_s4 + $0x5c0] ss:$16 sps:$4 sm:$0xff]  }
 0x2bf   :  { %6855 = vmatprep.subr.bf16.mxu0 %v22347_v9 }
 0x2c1   :  { %6479 = vmatpush1.bf16.msra.mxu1 %v22342_v10  ;;  %v22399_v10 = vld [vmem:[%s31729_s4 + $0xa48] ss:$16 sps:$4 sm:$0xff]  }
 0x2c2   :  { %6856 = vmatpush1.bf16.msra.mxu0 %v22345_v42  ;;  %6480 = vmatprep.subr.bf16.mxu1 %v22350_v11  ;;  %v22404_v42 = vld [vmem:[%s31729_s4 + $0x5e4] ss:$16 sps:$4 sm:$0xff]  }
 0x2c3   :  { %6857 = vmatprep.subr.bf16.mxu0 %v22353_v12  ;;  %v22407_v12 = vld [vmem:[%s31729_s4 + $0xa6c] ss:$16 sps:$4 sm:$0xff]  }
 0x2c5   :  { %6481 = vmatpush1.bf16.msra.mxu1 %v22348_v13 }
 0x2c6   :  { %6858 = vmatpush1.bf16.msra.mxu0 %v22351_v14  ;;  %6482 = vmatprep.subr.bf16.mxu1 %v22356_v15  ;;  %v22402_v14 = vld [vmem:[%s31729_s4 + $0x5e0] ss:$16 sps:$4 sm:$0xff]   ;;  %v22405_v15 = vld [vmem:[%s31729_s4 + $0xa68] ss:$16 sps:$4 sm:$0xff]  }
 0x2c7   :  { %6859 = vmatprep.subr.bf16.mxu0 %v22359_v18 }
 0x2c9   :  { %6483 = vmatpush1.bf16.msra.mxu1 %v22354_v19  ;;  %v22410_v19 = vld [vmem:[%s31729_s4 + $0x604] ss:$16 sps:$4 sm:$0xff]  }
 0x2ca   :  { %6860 = vmatpush1.bf16.msra.mxu0 %v22357_v22  ;;  %6484 = vmatprep.subr.bf16.mxu1 %v22362_v17  ;;  %v22413_v22 = vld [vmem:[%s31729_s4 + $0xa8c] ss:$16 sps:$4 sm:$0xff]  }
 0x2cb   :  { %6861 = vmatprep.subr.bf16.mxu0 %v22365_v20  ;;  %v22408_v20 = vld [vmem:[%s31729_s4 + $0x600] ss:$16 sps:$4 sm:$0xff]  }
 0x2cd   :  { %6485 = vmatpush1.bf16.msra.mxu1 %v22360_v56  ;;  %v22411_v56 = vld [vmem:[%s31729_s4 + $0xa88] ss:$16 sps:$4 sm:$0xff]  }
 0x2ce   :  { %6862 = vmatpush1.bf16.msra.mxu0 %v22363_v48  ;;  %6486 = vmatprep.subr.bf16.mxu1 %v22368_v29  ;;  %v22416_v48 = vld [vmem:[%s31729_s4 + $0x624] ss:$16 sps:$4 sm:$0xff]   ;;  %v22414_v29 = vld [vmem:[%s31729_s4 + $0x620] ss:$16 sps:$4 sm:$0xff]  }
 0x2cf   :  { %6863 = vmatprep.subr.bf16.mxu0 %v22371_v30  ;;  %v22419_v30 = vld [vmem:[%s31729_s4 + $0xaac] ss:$16 sps:$4 sm:$0xff]  }
 0x2d1   :  { %6487 = vmatpush1.bf16.msra.mxu1 %v22366_v32  ;;  %v22417_v32 = vld [vmem:[%s31729_s4 + $0xaa8] ss:$16 sps:$4 sm:$0xff]  }
 0x2d2   :  { %6864 = vmatpush1.bf16.msra.mxu0 %v22369_v35  ;;  %6488 = vmatprep.subr.bf16.mxu1 %v22374_v37  ;;  %v22425_v35 = vld [vmem:[%s31729_s4 + $0xacc] ss:$16 sps:$4 sm:$0xff]   ;;  %v22423_v37 = vld [vmem:[%s31729_s4 + $0xac8] ss:$16 sps:$4 sm:$0xff]  }
 0x2d3   :  { %6865 = vmatprep.subr.bf16.mxu0 %v22377_v39  ;;  %v22431_v39 = vld [vmem:[%s31729_s4 + $0xaec] ss:$16 sps:$4 sm:$0xff]  }
 0x2d5   :  { %6489 = vmatpush1.bf16.msra.mxu1 %v22372_v36  ;;  %v22426_v36 = vld [vmem:[%s31729_s4 + $0x660] ss:$16 sps:$4 sm:$0xff]  }
 0x2d6   :  { %6866 = vmatpush1.bf16.msra.mxu0 %v22375_v44  ;;  %6490 = vmatprep.subr.bf16.mxu1 %v22380_v3  ;;  %v22434_v44 = vld [vmem:[%s31729_s4 + $0x684] ss:$16 sps:$4 sm:$0xff]   ;;  %v22437_v3 = vld [vmem:[%s31729_s4 + $0xb0c] ss:$16 sps:$4 sm:$0xff]  }
 0x2d7   :  { %6867 = vmatprep.subr.bf16.mxu0 %v22383_v21  ;;  %v22432_v21 = vld [vmem:[%s31729_s4 + $0x680] ss:$16 sps:$4 sm:$0xff]  }
 0x2d9   :  { %6491 = vmatpush1.bf16.msra.mxu1 %v22378_v16  ;;  %v22435_v16 = vld [vmem:[%s31729_s4 + $0xb08] ss:$16 sps:$4 sm:$0xff]  }
 0x2da   :  { %6868 = vmatpush1.bf16.msra.mxu0 %v22381_v46  ;;  %6492 = vmatprep.subr.bf16.mxu1 %v22386_v50  ;;  %v22443_v46 = vld [vmem:[%s31729_s4 + $0xb2c] ss:$16 sps:$4 sm:$0xff]  }
 0x2db   :  { %6878 = vmatprep.subr.bf16.mxu0 %v22389_v53  ;;  %v23950_v50 = vld [vmem:[%s31754_s22 + $0x8] sm:$0x1f] }
 0x2dc   :  { %v657_v53 = vrot.slane %v23950_v50, %v26002_v57 }
 0x2dd   :  { %6870 = vmatmul.mubr.bf16.vlgmr.msra.gmra.mrb[20].mxu0 %v26497_v59  ;;  %6493 = vmatpush1.bf16.msra.mxu1 %v22384_v43  ;;  %v22438_v43 = vld [vmem:[%s31729_s4 + $0x6a0] ss:$16 sps:$4 sm:$0xff]  }
 0x2de   :  { %6879 = vmatpush1.bf16.msra.mxu0 %v22387_v60  ;;  %6494 = vmatprep.subr.bf16.mxu1 %v22392_v54  ;;  %v22446_v60 = vld [vmem:[%s31729_s4 + $0x6c4] ss:$16 sps:$4 sm:$0xff]   ;;  %v22449_v54 = vld [vmem:[%s31729_s4 + $0xb4c] ss:$16 sps:$4 sm:$0xff]  }
 0x2df   :  { %v26514_v25 = vpop.f32.mrb[16].mxu1  ;;  %6880 = vmatprep.subr.bf16.mxu0 %v22395_v61  ;;  %v3824_v61 = vadd.f32 %v26195_v31, %v657_v53  ;;  %v22455_v31 = vld [vmem:[%s31729_s4 + $0xb6c] ss:$16 sps:$4 sm:$0xff]  }
 0x2e0   :  { %v3784_v28 = vpop.f32.mrb[17].mxu1  ;;  %v22497_v53 = vld [vmem:[%s31729_s4 + $0xc4c] ss:$16 sps:$4 sm:$0xff]  }
 0x2e1   :  { %v21082_v9 = vadd.f32 %v3784_v28, %v653_v6  ;;  %v3786_v52 = vpop.f32.mrb[18].mxu1  ;;  %6495 = vmatpush1.bf16.msra.mxu1 %v22390_v63  ;;  %v22452_v28 = vld [vmem:[%s31729_s4 + $0x6e4] ss:$16 sps:$4 sm:$0xff]  }
 0x2e2   :  { %6881 = vmatpush1.bf16.msra.mxu0 %v22393_v0  ;;  %v3787_v11 = vpop.f32.mrb[19].mxu1  ;;  %6496 = vmatprep.subr.bf16.mxu1 %v22398_v7  ;;  %v22444_v0 = vld [vmem:[%s31729_s4 + $0x6c0] ss:$16 sps:$4 sm:$0xff]   ;;  %v22447_v7 = vld [vmem:[%s31729_s4 + $0xb48] ss:$16 sps:$4 sm:$0xff]  }
 0x2e3   :  { %vm3920_vm12 = vcmp.gt.f32.partialorder %v21082_v9, 0.0  ;;  %v3933_v13 = vmul.f32 0.01, %v21082_v9  ;;  %6882 = vmatprep.subr.bf16.mxu0 %v22401_v4 }
 0x2e5   :  { %6497 = vmatpush1.bf16.msra.mxu1 %v22396_v8  ;;  %v3946_v18 = vsel %vm3920_vm12, %v21082_v9, %v3933_v13  ;;  %v22461_v13 = vld [vmem:[%s31729_s4 + $0xb8c] ss:$16 sps:$4 sm:$0xff]  }
 0x2e6   :  { %6883 = vmatpush1.bf16.msra.mxu0 %v22399_v10  ;;  %6498 = vmatprep.subr.bf16.mxu1 %v22404_v42  ;;  %v26540_v17 = vpack.c.bf16 %v3946_v18, %v3946_v18  ;;  %v22450_v10 = vld [vmem:[%s31729_s4 + $0x6e0] ss:$16 sps:$4 sm:$0xff]   ;;  %v22453_v42 = vld [vmem:[%s31729_s4 + $0xb68] ss:$16 sps:$4 sm:$0xff]   ;;  %v22467_v18 = vld [vmem:[%s31729_s4 + $0xbac] ss:$16 sps:$4 sm:$0xff]  }
 0x2e7   :  { %6884 = vmatprep.subr.bf16.mxu0 %v22407_v12  ;;  %v22458_v12 = vld [vmem:[%s31729_s4 + $0x704] ss:$16 sps:$4 sm:$0xff]  }
 0x2e8   :  { %6910 = vmatprep.mubr.bf16.mxu0 %v26540_v17 }
 0x2e9   :  { %6499 = vmatpush1.bf16.msra.mxu1 %v22402_v14  ;;  %v22456_v14 = vld [vmem:[%s31729_s4 + $0x700] ss:$16 sps:$4 sm:$0xff]  }
 0x2ea   :  { %6885 = vmatpush1.bf16.msra.mxu0 %v22405_v15  ;;  %6509 = vmatprep.subr.bf16.mxu1 %v22410_v19  ;;  %v22464_v15 = vld [vmem:[%s31729_s4 + $0x724] ss:$16 sps:$4 sm:$0xff]   ;;  %v649_v19 = vrot.slane %v23950_v50, %v25780_v24 }
 0x2eb   :  { %6886 = vmatprep.subr.bf16.mxu0 %v22413_v22  ;;  %v22462_v22 = vld [vmem:[%s31729_s4 + $0x720] ss:$16 sps:$4 sm:$0xff]   ;;  %v22494_v50 = vld [vmem:[%s31729_s4 + $0x7c4] ss:$16 sps:$4 sm:$0xff]  }
 0x2ec   :  { %6501 = vmatmul.mubr.bf16.vlgmr.msra.gmra.mrb[24].mxu1 %v26073_v38  ;;  %v22420_v38 = vld [vmem:[%s31729_s4 + $0x640] ss:$16 sps:$4 sm:$0xff]  }
 0x2ed   :  { %6510 = vmatpush1.bf16.msra.mxu1 %v22408_v20  ;;  %6541 = vmatprep.mubr.bf16.mxu1 %v26081_v1  ;;  %v22428_v1 = vld [vmem:[%s31729_s4 + $0x664] ss:$16 sps:$4 sm:$0xff]   ;;  %v22465_v20 = vld [vmem:[%s31729_s4 + $0xba8] ss:$16 sps:$4 sm:$0xff]  }
 0x2ee   :  { %6887 = vmatpush1.bf16.msra.mxu0 %v22411_v56  ;;  %6511 = vmatprep.subr.bf16.mxu1 %v22416_v48  ;;  %v22470_v56 = vld [vmem:[%s31729_s4 + $0x744] ss:$16 sps:$4 sm:$0xff]   ;;  %v22473_v48 = vld [vmem:[%s31729_s4 + $0xbcc] ss:$16 sps:$4 sm:$0xff]  }
 0x2ef   :  { %6888 = vmatprep.subr.bf16.mxu0 %v22419_v30  ;;  %v22468_v30 = vld [vmem:[%s31729_s4 + $0x740] ss:$16 sps:$4 sm:$0xff]  }
 0x2f1   :  { %6512 = vmatpush1.bf16.msra.mxu1 %v22414_v29  ;;  %v21081_v29 = vadd.f32 %v26514_v25, %v649_v19  ;;  %v22528_v19 = vld [vmem:[%s31729_s4 + $0x900] ss:$16 sps:$4 sm:$0xff]  }
 0x2f2   :  { %6889 = vmatpush1.bf16.msra.mxu0 %v22417_v32  ;;  %6513 = vmatprep.subr.bf16.mxu1 %v22422_v33  ;;  %v22471_v32 = vld [vmem:[%s31729_s4 + $0xbc8] ss:$16 sps:$4 sm:$0xff]   ;;  %v22476_v33 = vld [vmem:[%s31729_s4 + $0x764] ss:$16 sps:$4 sm:$0xff]  }
 0x2f3   :  { %6890 = vmatprep.subr.bf16.mxu0 %v22425_v35  ;;  %v22479_v35 = vld [vmem:[%s31729_s4 + $0xbec] ss:$16 sps:$4 sm:$0xff]   ;;  %v3932_v25 = vmul.f32 0.01, %v21081_v29  ;;  %vm3919_vm13 = vcmp.gt.f32.partialorder %v21081_v29, 0.0 }
 0x2f5   :  { %6514 = vmatpush1.bf16.msra.mxu1 %v22420_v38  ;;  %v22474_v38 = vld [vmem:[%s31729_s4 + $0x760] ss:$16 sps:$4 sm:$0xff]  }
 0x2f6   :  { %6891 = vmatpush1.bf16.msra.mxu0 %v22423_v37  ;;  %6515 = vmatprep.subr.bf16.mxu1 %v22428_v1  ;;  %v22477_v37 = vld [vmem:[%s31729_s4 + $0xbe8] ss:$16 sps:$4 sm:$0xff]   ;;  %v22482_v1 = vld [vmem:[%s31729_s4 + $0x784] ss:$16 sps:$4 sm:$0xff]  }
 0x2f7   :  { %6892 = vmatprep.subr.bf16.mxu0 %v22431_v39  ;;  %v22485_v39 = vld [vmem:[%s31729_s4 + $0xc0c] ss:$16 sps:$4 sm:$0xff]  }
 0x2f9   :  { %6516 = vmatpush1.bf16.msra.mxu1 %v22426_v36  ;;  %v22480_v36 = vld [vmem:[%s31729_s4 + $0x780] ss:$16 sps:$4 sm:$0xff]  }
 0x2fa   :  { %6893 = vmatpush1.bf16.msra.mxu0 %v22429_v40  ;;  %6517 = vmatprep.subr.bf16.mxu1 %v22434_v44  ;;  %v3945_v40 = vsel %vm3919_vm13, %v21081_v29, %v3932_v25  ;;  %v22483_v44 = vld [vmem:[%s31729_s4 + $0xc08] ss:$16 sps:$4 sm:$0xff]   ;;  %v22539_v29 = vld [vmem:[%s31729_s4 + $0x964] ss:$16 sps:$4 sm:$0xff]   ;;  %v22543_v25 = vld [vmem:[%s31729_s4 + $0x9a0] ss:$16 sps:$4 sm:$0xff]  }
 0x2fb   :  { %6894 = vmatprep.subr.bf16.mxu0 %v22437_v3  ;;  %v22488_v3 = vld [vmem:[%s31729_s4 + $0x7a4] ss:$16 sps:$4 sm:$0xff]  }
 0x2fd   :  { %6518 = vmatpush1.bf16.msra.mxu1 %v22432_v21  ;;  %v22491_v21 = vld [vmem:[%s31729_s4 + $0xc2c] ss:$16 sps:$4 sm:$0xff]  }
 0x2fe   :  { %6895 = vmatpush1.bf16.msra.mxu0 %v22435_v16  ;;  %6519 = vmatprep.subr.bf16.mxu1 %v22440_v45  ;;  %v26711_v16 = vpack.c.bf16 %v3945_v40, %v3945_v40  ;;  %v22486_v45 = vld [vmem:[%s31729_s4 + $0x7a0] ss:$16 sps:$4 sm:$0xff]  }
 0x2ff   :  { %v20823_v63 = vpop.f32.mrb[20].mxu1  ;;  %6896 = vmatprep.subr.bf16.mxu0 %v22443_v46  ;;  %v22489_v46 = vld [vmem:[%s31729_s4 + $0xc28] ss:$16 sps:$4 sm:$0xff]   ;;  %v22552_v40 = vld [vmem:[%s31729_s4 + $0xa00] ss:$16 sps:$4 sm:$0xff]  }
 0x300   :  { %v20824_v6 = vpop.f32.mrb[21].mxu1 }
 0x301   :  { %v20825_v4 = vadd.f32 %v20824_v6, %v20823_v63  ;;  %v20826_v8 = vpop.f32.mrb[22].mxu1  ;;  %6520 = vmatpush1.bf16.msra.mxu1 %v22438_v43  ;;  %v22492_v43 = vld [vmem:[%s31729_s4 + $0x7c0] ss:$16 sps:$4 sm:$0xff]   ;;  %v22506_v6 = vld [vmem:[%s31729_s4 + $0x804] ss:$16 sps:$4 sm:$0xff]  }
 0x302   :  { %6897 = vmatpush1.bf16.msra.mxu0 %v22441_v55  ;;  %v20827_v9 = vpop.f32.mrb[23].mxu1  ;;  %6521 = vmatprep.subr.bf16.mxu1 %v22446_v60  ;;  %v22495_v55 = vld [vmem:[%s31729_s4 + $0xc48] ss:$16 sps:$4 sm:$0xff]   ;;  %v22500_v60 = vld [vmem:[%s31729_s4 + $0x7e4] ss:$16 sps:$4 sm:$0xff]  }
 0x303   :  { %v3864_v52 = vadd.f32 %v20825_v4, %v3824_v61  ;;  %6898 = vmatprep.subr.bf16.mxu0 %v22449_v54  ;;  %v22503_v61 = vld [vmem:[%s31729_s4 + $0xc6c] ss:$16 sps:$4 sm:$0xff]   ;;  %v22498_v63 = vld [vmem:[%s31729_s4 + $0x7e0] ss:$16 sps:$4 sm:$0xff]   ;;  %v22509_v8 = vld [vmem:[%s31729_s4 + $0x824] ss:$16 sps:$4 sm:$0xff]  }
 0x304   :  { %v22512_v9 = vld [vmem:[%s31729_s4 + $0x844] ss:$16 sps:$4 sm:$0xff]  }
 0x305   :  { %v26641_v11 = vadd.f32 %v26209_v41, %v3864_v52  ;;  %6522 = vmatpush1.bf16.msra.mxu1 %v22444_v0  ;;  %v22459_v41 = vld [vmem:[%s31729_s4 + $0xb88] ss:$16 sps:$4 sm:$0xff]   ;;  %v22515_v52 = vld [vmem:[%s31729_s4 + $0x864] ss:$16 sps:$4 sm:$0xff]  }
 0x306   :  { %6899 = vmatpush1.bf16.msra.mxu0 %v22447_v7  ;;  %6523 = vmatprep.subr.bf16.mxu1 %v22452_v28  ;;  %v22501_v0 = vld [vmem:[%s31729_s4 + $0xc68] ss:$16 sps:$4 sm:$0xff]   ;;  %v22504_v7 = vld [vmem:[%s31729_s4 + $0x800] ss:$16 sps:$4 sm:$0xff]  }
 0x307   :  { %6900 = vmatprep.subr.bf16.mxu0 %v22455_v31  ;;  %v3934_v54 = vmul.f32 0.01, %v26641_v11  ;;  %vm3921_vm14 = vcmp.gt.f32.partialorder %v26641_v11, 0.0  ;;  %v22507_v31 = vld [vmem:[%s31729_s4 + $0x820] ss:$16 sps:$4 sm:$0xff]  }
 0x309   :  { %6524 = vmatpush1.bf16.msra.mxu1 %v22450_v10  ;;  %v3947_v4 = vsel %vm3921_vm14, %v26641_v11, %v3934_v54  ;;  %v22513_v10 = vld [vmem:[%s31729_s4 + $0x860] ss:$16 sps:$4 sm:$0xff]   ;;  %v22521_v11 = vld [vmem:[%s31729_s4 + $0x8a4] ss:$16 sps:$4 sm:$0xff]  }
 0x30a   :  { %6901 = vmatpush1.bf16.msra.mxu0 %v22453_v42  ;;  %6525 = vmatprep.subr.bf16.mxu1 %v22458_v12  ;;  %v26757_v28 = vpack.c.bf16 %v3947_v4, %v3947_v4  ;;  %v22516_v42 = vld [vmem:[%s31729_s4 + $0x880] ss:$16 sps:$4 sm:$0xff]   ;;  %v22575_v54 = vld [vmem:[%s31729_s4 + $0xae4] ss:$16 sps:$4 sm:$0xff]  }
 0x30b   :  { %6902 = vmatprep.subr.bf16.mxu0 %v22461_v13  ;;  %v22519_v12 = vld [vmem:[%s31729_s4 + $0x8a0] ss:$16 sps:$4 sm:$0xff]   ;;  %v22524_v13 = vld [vmem:[%s31729_s4 + $0x8c4] ss:$16 sps:$4 sm:$0xff]  }
 0x30c   :  { %v22584_v4 = vld [vmem:[%s31729_s4 + $0xb44] ss:$16 sps:$4 sm:$0xff]  }
 0x30d   :  { %6526 = vmatpush1.bf16.msra.mxu1 %v22456_v14  ;;  %v22522_v14 = vld [vmem:[%s31729_s4 + $0x8c0] ss:$16 sps:$4 sm:$0xff]  }
 0x30e   :  { %6903 = vmatpush1.bf16.msra.mxu0 %v22459_v41  ;;  %6527 = vmatprep.subr.bf16.mxu1 %v22464_v15  ;;  %v22527_v41 = vld [vmem:[%s31729_s4 + $0x8e4] ss:$16 sps:$4 sm:$0xff]   ;;  %v22525_v15 = vld [vmem:[%s31729_s4 + $0x8e0] ss:$16 sps:$4 sm:$0xff]  }
 0x30f   :  { %6904 = vmatprep.subr.bf16.mxu0 %v22467_v18  ;;  %v22530_v18 = vld [vmem:[%s31729_s4 + $0x904] ss:$16 sps:$4 sm:$0xff]  }
 0x311   :  { %6528 = vmatpush1.bf16.msra.mxu1 %v22462_v22  ;;  %v22533_v22 = vld [vmem:[%s31729_s4 + $0x924] ss:$16 sps:$4 sm:$0xff]  }
 0x312   :  { %6905 = vmatpush1.bf16.msra.mxu0 %v22465_v20  ;;  %6529 = vmatprep.subr.bf16.mxu1 %v22470_v56  ;;  %v22531_v20 = vld [vmem:[%s31729_s4 + $0x920] ss:$16 sps:$4 sm:$0xff]   ;;  %v22536_v56 = vld [vmem:[%s31729_s4 + $0x944] ss:$16 sps:$4 sm:$0xff]  }
 0x313   :  { %6906 = vmatprep.subr.bf16.mxu0 %v22473_v48  ;;  %v22534_v48 = vld [vmem:[%s31729_s4 + $0x940] ss:$16 sps:$4 sm:$0xff]  }
 0x315   :  { %6530 = vmatpush1.bf16.msra.mxu1 %v22468_v30  ;;  %v22537_v30 = vld [vmem:[%s31729_s4 + $0x960] ss:$16 sps:$4 sm:$0xff]  }
 0x316   :  { %6907 = vmatpush1.bf16.msra.mxu0 %v22471_v32  ;;  %6531 = vmatprep.subr.bf16.mxu1 %v22476_v33  ;;  %v22542_v32 = vld [vmem:[%s31729_s4 + $0x984] ss:$16 sps:$4 sm:$0xff]   ;;  %v22540_v33 = vld [vmem:[%s31729_s4 + $0x980] ss:$16 sps:$4 sm:$0xff]  }
 0x317   :  { %6908 = vmatprep.subr.bf16.mxu0 %v22479_v35  ;;  %v22545_v35 = vld [vmem:[%s31729_s4 + $0x9a4] ss:$16 sps:$4 sm:$0xff]  }
 0x319   :  { %6532 = vmatpush1.bf16.msra.mxu1 %v22474_v38  ;;  %v22548_v38 = vld [vmem:[%s31729_s4 + $0x9c4] ss:$16 sps:$4 sm:$0xff]  }
 0x31a   :  { %6909 = vmatpush1.bf16.msra.mxu0 %v22477_v37  ;;  %6533 = vmatprep.subr.bf16.mxu1 %v22482_v1  ;;  %v22546_v37 = vld [vmem:[%s31729_s4 + $0x9c0] ss:$16 sps:$4 sm:$0xff]   ;;  %v22551_v1 = vld [vmem:[%s31729_s4 + $0x9e4] ss:$16 sps:$4 sm:$0xff]  }
 0x31b   :  { %6919 = vmatprep.subr.bf16.mxu0 %v22485_v39  ;;  %v22549_v39 = vld [vmem:[%s31729_s4 + $0x9e0] ss:$16 sps:$4 sm:$0xff]  }
 0x31d   :  { %6911 = vmatmul.mubr.bf16.vlgmr.msra.gmra.mrb[20].mxu0 %v26711_v16  ;;  %6534 = vmatpush1.bf16.msra.mxu1 %v22480_v36  ;;  %v22554_v36 = vld [vmem:[%s31729_s4 + $0xa04] ss:$16 sps:$4 sm:$0xff]  }
 0x31e   :  { %6920 = vmatpush1.bf16.msra.mxu0 %v22483_v44  ;;  %6535 = vmatprep.subr.bf16.mxu1 %v22488_v3  ;;  %v22557_v44 = vld [vmem:[%s31729_s4 + $0xa24] ss:$16 sps:$4 sm:$0xff]   ;;  %v22555_v3 = vld [vmem:[%s31729_s4 + $0xa20] ss:$16 sps:$4 sm:$0xff]  }
 0x31f   :  { %6921 = vmatprep.subr.bf16.mxu0 %v22491_v21  ;;  %6951 = vmatprep.mubr.bf16.mxu0 %v24024_v26  ;;  %v22560_v21 = vld [vmem:[%s31729_s4 + $0xa44] ss:$16 sps:$4 sm:$0xff]  }
 0x321   :  { %6536 = vmatpush1.bf16.msra.mxu1 %v22486_v45  ;;  %v22558_v45 = vld [vmem:[%s31729_s4 + $0xa40] ss:$16 sps:$4 sm:$0xff]  }
 0x322   :  { %6922 = vmatpush1.bf16.msra.mxu0 %v22489_v46  ;;  %6537 = vmatprep.subr.bf16.mxu1 %v22494_v50  ;;  %v22563_v46 = vld [vmem:[%s31729_s4 + $0xa64] ss:$16 sps:$4 sm:$0xff]  }
 0x323   :  { %6923 = vmatprep.subr.bf16.mxu0 %v22497_v53  ;;  %v22566_v50 = vld [vmem:[%s31729_s4 + $0xa84] ss:$16 sps:$4 sm:$0xff]  }
 0x324   :  { %v22569_v53 = vld [vmem:[%s31729_s4 + $0xaa4] ss:$16 sps:$4 sm:$0xff]  }
 0x325   :  { %6538 = vmatpush1.bf16.msra.mxu1 %v22492_v43  ;;  %v22567_v43 = vld [vmem:[%s31729_s4 + $0xaa0] ss:$16 sps:$4 sm:$0xff]  }
 0x326   :  { %6924 = vmatpush1.bf16.msra.mxu0 %v22495_v55  ;;  %6539 = vmatprep.subr.bf16.mxu1 %v22500_v60  ;;  %v22572_v55 = vld [vmem:[%s31729_s4 + $0xac4] ss:$16 sps:$4 sm:$0xff]   ;;  %v22570_v60 = vld [vmem:[%s31729_s4 + $0xac0] ss:$16 sps:$4 sm:$0xff]  }
 0x327   :  { %6925 = vmatprep.subr.bf16.mxu0 %v22503_v61  ;;  %v22573_v61 = vld [vmem:[%s31729_s4 + $0xae0] ss:$16 sps:$4 sm:$0xff]  }
 0x329   :  { %6540 = vmatpush1.bf16.msra.mxu1 %v22498_v63  ;;  %v22578_v63 = vld [vmem:[%s31729_s4 + $0xb04] ss:$16 sps:$4 sm:$0xff]  }
 0x32a   :  { %6926 = vmatpush1.bf16.msra.mxu0 %v22501_v0  ;;  %6550 = vmatprep.subr.bf16.mxu1 %v22506_v6  ;;  %v22576_v0 = vld [vmem:[%s31729_s4 + $0xb00] ss:$16 sps:$4 sm:$0xff]   ;;  %v22581_v6 = vld [vmem:[%s31729_s4 + $0xb24] ss:$16 sps:$4 sm:$0xff]  }
 0x32c   :  { %6542 = vmatmul.mubr.bf16.vlgmr.msra.gmra.mrb[24].mxu1 %v26291_v23  ;;  %v22510_v23 = vld [vmem:[%s31729_s4 + $0x840] ss:$16 sps:$4 sm:$0xff]  }
 0x32d   :  { %19354 = vmatmul.mubr.msk.bf16.vlgmr.msra.gmra.mrb[20].mxu0 %vm3047_vm0, %v26757_v28  ;;  %6551 = vmatpush1.bf16.msra.mxu1 %v22504_v7  ;;  %v22579_v7 = vld [vmem:[%s31729_s4 + $0xb20] ss:$16 sps:$4 sm:$0xff]  }
 0x32e   :  { %6582 = vmatprep.mubr.bf16.mxu1 %v26296_v27  ;;  %6552 = vmatprep.subr.bf16.mxu1 %v22509_v8  ;;  %v22518_v27 = vld [vmem:[%s31729_s4 + $0x884] ss:$16 sps:$4 sm:$0xff]   ;;  %v22582_v8 = vld [vmem:[%s31729_s4 + $0xb40] ss:$16 sps:$4 sm:$0xff]  }
 0x331   :  { %6553 = vmatpush1.bf16.msra.mxu1 %v22507_v31  ;;  %v22587_v31 = vld [vmem:[%s31729_s4 + $0xb64] ss:$16 sps:$4 sm:$0xff]  }
 0x332   :  { %6554 = vmatprep.subr.bf16.mxu1 %v22512_v9  ;;  %v22585_v9 = vld [vmem:[%s31729_s4 + $0xb60] ss:$16 sps:$4 sm:$0xff]  }
 0x335   :  { %6555 = vmatpush1.bf16.msra.mxu1 %v22510_v23  ;;  %v22590_v23 = vld [vmem:[%s31729_s4 + $0xb84] ss:$16 sps:$4 sm:$0xff]  }
 0x336   :  { %6556 = vmatprep.subr.bf16.mxu1 %v22515_v52  ;;  %v22588_v52 = vld [vmem:[%s31729_s4 + $0xb80] ss:$16 sps:$4 sm:$0xff]  }
 0x339   :  { %6557 = vmatpush1.bf16.msra.mxu1 %v22513_v10  ;;  %v22593_v10 = vld [vmem:[%s31729_s4 + $0xba4] ss:$16 sps:$4 sm:$0xff]  }
 0x33a   :  { %6558 = vmatprep.subr.bf16.mxu1 %v22518_v27  ;;  %v22591_v27 = vld [vmem:[%s31729_s4 + $0xba0] ss:$16 sps:$4 sm:$0xff]  }
 0x33d   :  { %6559 = vmatpush1.bf16.msra.mxu1 %v22516_v42  ;;  %v22596_v42 = vld [vmem:[%s31729_s4 + $0xbc4] ss:$16 sps:$4 sm:$0xff]  }
 0x33e   :  { %6560 = vmatprep.subr.bf16.mxu1 %v22521_v11  ;;  %v22594_v11 = vld [vmem:[%s31729_s4 + $0xbc0] ss:$16 sps:$4 sm:$0xff]  }
 0x341   :  { %6561 = vmatpush1.bf16.msra.mxu1 %v22519_v12  ;;  %v22599_v12 = vld [vmem:[%s31729_s4 + $0xbe4] ss:$16 sps:$4 sm:$0xff]  }
 0x342   :  { %6562 = vmatprep.subr.bf16.mxu1 %v22524_v13  ;;  %v22597_v13 = vld [vmem:[%s31729_s4 + $0xbe0] ss:$16 sps:$4 sm:$0xff]  }
 0x345   :  { %6563 = vmatpush1.bf16.msra.mxu1 %v22522_v14  ;;  %v22602_v14 = vld [vmem:[%s31729_s4 + $0xc04] ss:$16 sps:$4 sm:$0xff]  }
 0x346   :  { %6564 = vmatprep.subr.bf16.mxu1 %v22527_v41  ;;  %v22600_v41 = vld [vmem:[%s31729_s4 + $0xc00] ss:$16 sps:$4 sm:$0xff]  }
 0x349   :  { %6565 = vmatpush1.bf16.msra.mxu1 %v22525_v15  ;;  %v22605_v15 = vld [vmem:[%s31729_s4 + $0xc24] ss:$16 sps:$4 sm:$0xff]  }
 0x34a   :  { %6566 = vmatprep.subr.bf16.mxu1 %v22530_v18  ;;  %v22603_v18 = vld [vmem:[%s31729_s4 + $0xc20] ss:$16 sps:$4 sm:$0xff]  }
 0x34d   :  { %6567 = vmatpush1.bf16.msra.mxu1 %v22528_v19  ;;  %v22608_v19 = vld [vmem:[%s31729_s4 + $0xc44] ss:$16 sps:$4 sm:$0xff]  }
 0x34e   :  { %6568 = vmatprep.subr.bf16.mxu1 %v22533_v22  ;;  %v22606_v22 = vld [vmem:[%s31729_s4 + $0xc40] ss:$16 sps:$4 sm:$0xff]  }
 0x351   :  { %6569 = vmatpush1.bf16.msra.mxu1 %v22531_v20  ;;  %v22611_v20 = vld [vmem:[%s31729_s4 + $0xc64] ss:$16 sps:$4 sm:$0xff]  }
 0x352   :  { %6570 = vmatprep.subr.bf16.mxu1 %v22536_v56  ;;  %v22614_v56 = vld [vmem:[%s31731_s6 + $0x4] ss:$8 sps:$4 sm:$0xff]  }
 0x355   :  { %6571 = vmatpush1.bf16.msra.mxu1 %v22534_v48  ;;  %v22612_v48 = vld [vmem:[%s31731_s6] ss:$8 sps:$4 sm:$0xff]  }
 0x356   :  { %6572 = vmatprep.subr.bf16.mxu1 %v22539_v29  ;;  %v22617_v29 = vld [vmem:[%s31731_s6 + $0x14] ss:$8 sps:$4 sm:$0xff]  }
 0x359   :  { %6573 = vmatpush1.bf16.msra.mxu1 %v22537_v30  ;;  %v22615_v30 = vld [vmem:[%s31731_s6 + $0x10] ss:$8 sps:$4 sm:$0xff]  }
 0x35a   :  { %6574 = vmatprep.subr.bf16.mxu1 %v22542_v32  ;;  %v22620_v32 = vld [vmem:[%s31731_s6 + $0x24] ss:$8 sps:$4 sm:$0xff]  }
 0x35d   :  { %6575 = vmatpush1.bf16.msra.mxu1 %v22540_v33 }
 0x35e   :  { %6576 = vmatprep.subr.bf16.mxu1 %v22545_v35 }
 0x361   :  { %6577 = vmatpush1.bf16.msra.mxu1 %v22543_v25 }
 0x362   :  { %6578 = vmatprep.subr.bf16.mxu1 %v22548_v38 }
 0x365   :  { %6579 = vmatpush1.bf16.msra.mxu1 %v22546_v37 }
 0x366   :  { %6580 = vmatprep.subr.bf16.mxu1 %v22551_v1 }
 0x369   :  { %6581 = vmatpush1.bf16.msra.mxu1 %v22549_v39 }
 0x36a   :  { %6591 = vmatprep.subr.bf16.mxu1 %v22554_v36 }
 0x36c   :  { %6583 = vmatmul.mubr.bf16.vlgmr.msra.gmra.mrb[24].mxu1 %v26497_v59  ;;  %v22561_v59 = vld [vmem:[%s31729_s4 + $0xa60] ss:$16 sps:$4 sm:$0xff]  }
 0x36d   :  { %6592 = vmatpush1.bf16.msra.mxu1 %v22552_v40  ;;  %6623 = vmatprep.mubr.bf16.mxu1 %v26540_v17  ;;  %v22564_v17 = vld [vmem:[%s31729_s4 + $0xa80] ss:$16 sps:$4 sm:$0xff]  }
 0x36e   :  { %6593 = vmatprep.subr.bf16.mxu1 %v22557_v44 }
 0x371   :  { %6594 = vmatpush1.bf16.msra.mxu1 %v22555_v3 }
 0x372   :  { %6595 = vmatprep.subr.bf16.mxu1 %v22560_v21 }
 0x375   :  { %6596 = vmatpush1.bf16.msra.mxu1 %v22558_v45 }
 0x376   :  { %6597 = vmatprep.subr.bf16.mxu1 %v22563_v46 }
 0x379   :  { %6598 = vmatpush1.bf16.msra.mxu1 %v22561_v59 }
 0x37a   :  { %6599 = vmatprep.subr.bf16.mxu1 %v22566_v50 }
 0x37d   :  { %6600 = vmatpush1.bf16.msra.mxu1 %v22564_v17 }
 0x37e   :  { %6601 = vmatprep.subr.bf16.mxu1 %v22569_v53 }
 0x381   :  { %6602 = vmatpush1.bf16.msra.mxu1 %v22567_v43 }
 0x382   :  { %6603 = vmatprep.subr.bf16.mxu1 %v22572_v55 }
 0x385   :  { %6604 = vmatpush1.bf16.msra.mxu1 %v22570_v60 }
 0x386   :  { %6605 = vmatprep.subr.bf16.mxu1 %v22575_v54 }
 0x389   :  { %6606 = vmatpush1.bf16.msra.mxu1 %v22573_v61 }
 0x38a   :  { %6607 = vmatprep.subr.bf16.mxu1 %v22578_v63 }
 0x38d   :  { %6608 = vmatpush1.bf16.msra.mxu1 %v22576_v0 }
 0x38e   :  { %6609 = vmatprep.subr.bf16.mxu1 %v22581_v6 }
 0x391   :  { %6610 = vmatpush1.bf16.msra.mxu1 %v22579_v7 }
 0x392   :  { %6611 = vmatprep.subr.bf16.mxu1 %v22584_v4 }
 0x395   :  { %6612 = vmatpush1.bf16.msra.mxu1 %v22582_v8 }
 0x396   :  { %6613 = vmatprep.subr.bf16.mxu1 %v22587_v31 }
 0x399   :  { %6614 = vmatpush1.bf16.msra.mxu1 %v22585_v9 }
 0x39a   :  { %6615 = vmatprep.subr.bf16.mxu1 %v22590_v23 }
 0x39d   :  { %6616 = vmatpush1.bf16.msra.mxu1 %v22588_v52 }
 0x39e   :  { %6617 = vmatprep.subr.bf16.mxu1 %v22593_v10 }
 0x3a1   :  { %6618 = vmatpush1.bf16.msra.mxu1 %v22591_v27 }
 0x3a2   :  { %6619 = vmatprep.subr.bf16.mxu1 %v22596_v42 }
 0x3a5   :  { %6620 = vmatpush1.bf16.msra.mxu1 %v22594_v11 }
 0x3a6   :  { %6621 = vmatprep.subr.bf16.mxu1 %v22599_v12 }
 0x3a9   :  { %6622 = vmatpush1.bf16.msra.mxu1 %v22597_v13 }
 0x3aa   :  { %6632 = vmatprep.subr.bf16.mxu1 %v22602_v14 }
 0x3ac   :  { %6624 = vmatmul.mubr.bf16.vlgmr.msra.gmra.mrb[24].mxu1 %v26711_v16  ;;  %v22609_v16 = vld [vmem:[%s31729_s4 + $0xc60] ss:$16 sps:$4 sm:$0xff]  }
 0x3ad   :  { %6633 = vmatpush1.bf16.msra.mxu1 %v22600_v41  ;;  %6664 = vmatprep.mubr.bf16.mxu1 %v24024_v26 }
 0x3ae   :  { %6634 = vmatprep.subr.bf16.mxu1 %v22605_v15 }
 0x3b1   :  { %6635 = vmatpush1.bf16.msra.mxu1 %v22603_v18 }
 0x3b2   :  { %6636 = vmatprep.subr.bf16.mxu1 %v22608_v19 }
 0x3b5   :  { %6637 = vmatpush1.bf16.msra.mxu1 %v22606_v22 }
 0x3b6   :  { %6638 = vmatprep.subr.bf16.mxu1 %v22611_v20 }
 0x3b9   :  { %6639 = vmatpush1.bf16.msra.mxu1 %v22609_v16 }
 0x3ba   :  { %7372 = vmatprep.subr.bf16.mxu1 %v22614_v56 }
 0x3bc   :  { %19353 = vmatmul.mubr.msk.bf16.vlgmr.msra.gmra.mrb[24].mxu1 %vm3047_vm0, %v26757_v28 }
 0x3bd   :  { %7373 = vmatpush1.bf16.msra.mxu1 %v22612_v48 }
 0x3be   :  { %7374 = vmatprep.subr.bf16.mxu1 %v22617_v29 }
 0x3bf   :  { %26 = vsyncpa [#allocation5], 0  ;;  %v22618_v33 = vld [vmem:[%s31731_s6 + $0x20] ss:$8 sps:$4 sm:$0xff]   ;;  %v22623_v35 = vld [vmem:[%s31731_s6 + $0x34] ss:$8 sps:$4 sm:$0xff]  }
 0x3c0   :  { %v22621_v28 = vld [vmem:[%s31731_s6 + $0x30] ss:$8 sps:$4 sm:$0xff]   ;;  %v22626_v25 = vld [vmem:[%s31731_s6 + $0x44] ss:$8 sps:$4 sm:$0xff]   ;;  %v22624_v38 = vld [vmem:[%s31731_s6 + $0x40] ss:$8 sps:$4 sm:$0xff]  }
 0x3c1   :  { %7375 = vmatpush1.bf16.msra.mxu1 %v22615_v30  ;;  %v22629_v37 = vld [vmem:[%s31731_s6 + $0x54] ss:$8 sps:$4 sm:$0xff]   ;;  %v22627_v1 = vld [vmem:[%s31731_s6 + $0x50] ss:$8 sps:$4 sm:$0xff]   ;;  %v22632_v39 = vld [vmem:[%s31731_s6 + $0x64] ss:$8 sps:$4 sm:$0xff]  }
 0x3c2   :  { %7376 = vmatprep.subr.bf16.mxu1 %v22620_v32  ;;  %v22630_v36 = vld [vmem:[%s31731_s6 + $0x60] ss:$8 sps:$4 sm:$0xff]   ;;  %v22635_v40 = vld [vmem:[%s31731_s6 + $0x74] ss:$8 sps:$4 sm:$0xff]   ;;  %v22633_v44 = vld [vmem:[%s31731_s6 + $0x70] ss:$8 sps:$4 sm:$0xff]  }
 0x3c3   :  { %v22638_v3 = vld [vmem:[%s31731_s6 + $0x84] ss:$8 sps:$4 sm:$0xff]   ;;  %v22636_v21 = vld [vmem:[%s31731_s6 + $0x80] ss:$8 sps:$4 sm:$0xff]   ;;  %v22641_v45 = vld [vmem:[%s31731_s6 + $0x94] ss:$8 sps:$4 sm:$0xff]  }
 0x3c4   :  { %v22639_v46 = vld [vmem:[%s31731_s6 + $0x90] ss:$8 sps:$4 sm:$0xff]   ;;  %v22644_v59 = vld [vmem:[%s31731_s6 + $0xa4] ss:$8 sps:$4 sm:$0xff]   ;;  %v22642_v50 = vld [vmem:[%s31731_s6 + $0xa0] ss:$8 sps:$4 sm:$0xff]  }
 0x3c5   :  { %7377 = vmatpush1.bf16.msra.mxu1 %v22618_v33  ;;  %v22647_v17 = vld [vmem:[%s31731_s6 + $0xb4] ss:$8 sps:$4 sm:$0xff]   ;;  %v22645_v53 = vld [vmem:[%s31731_s6 + $0xb0] ss:$8 sps:$4 sm:$0xff]   ;;  %v22650_v43 = vld [vmem:[%s31731_s6 + $0xc4] ss:$8 sps:$4 sm:$0xff]  }
 0x3c6   :  { %7378 = vmatprep.subr.bf16.mxu1 %v22623_v35  ;;  %v22648_v55 = vld [vmem:[%s31731_s6 + $0xc0] ss:$8 sps:$4 sm:$0xff]   ;;  %v22653_v60 = vld [vmem:[%s31731_s6 + $0xd4] ss:$8 sps:$4 sm:$0xff]   ;;  %v22651_v54 = vld [vmem:[%s31731_s6 + $0xd0] ss:$8 sps:$4 sm:$0xff]  }
 0x3c7   :  { %v22656_v7 = vld [vmem:[%s31731_s6 + $0xe4] ss:$8 sps:$4 sm:$0xff]   ;;  %v22654_v4 = vld [vmem:[%s31731_s6 + $0xe0] ss:$8 sps:$4 sm:$0xff]   ;;  %v22659_v8 = vld [vmem:[%s31731_s6 + $0xf4] ss:$8 sps:$4 sm:$0xff]  }
 0x3c8   :  { %v22657_v31 = vld [vmem:[%s31731_s6 + $0xf0] ss:$8 sps:$4 sm:$0xff]   ;;  %v22662_v9 = vld [vmem:[%s31731_s6 + $0x104] ss:$8 sps:$4 sm:$0xff]   ;;  %vm7579_vm5 = vcmask 58368   ;;  %s24027_s27 = smov 120  }
 0x3c9   :  { %7379 = vmatpush1.bf16.msra.mxu1 %v22621_v28  ;;  %v7476_v23 = vld [vmem:[%s31733_s8 + $0x80] sm:$0xff]  ;;  %v7477_v52 = vld [vmem:[%s31733_s8 + $0x88] sm:$0xff]  ;;  %v7478_v11 = vld [vmem:[%s31733_s8 + $0x90] sm:$0xff]  ;;  %s31755_s2 = sld [smem:[#allocation10_spill]]  ;;  %vm7613_vm6 = vcmask 64512   ;;  %s24028_s30 = smov [#allocation4]  }
 0x3ca   :  { %7380 = vmatprep.subr.bf16.mxu1 %v22626_v25  ;;  %v7460_v10 = vld [vmem:[%s31733_s8] sm:$0xff]  ;;  %v21035_v27 = vpack.c.bf16 %v7477_v52, %v7476_v23  ;;  %v7461_v42 = vld [vmem:[%s31733_s8 + $0x8] sm:$0xff]  ;;  %v7479_v12 = vld [vmem:[%s31733_s8 + $0x98] sm:$0xff] }
 0x3cb   :  { %v21037_v13 = vpack.c.bf16 %v7461_v42, %v7460_v10  ;;  %v21039_v14 = vpack.c.bf16 %v7479_v12, %v7478_v11  ;;  %v7462_v41 = vld [vmem:[%s31733_s8 + $0x10] sm:$0xff]  ;;  %v7463_v15 = vld [vmem:[%s31733_s8 + $0x18] sm:$0xff]  ;;  %v7480_v18 = vld [vmem:[%s31733_s8 + $0xa0] sm:$0xff] }
 0x3cc   :  { %21036 = vmatprep.subr.bf16.mxu0 %v21035_v27  ;;  %v7481_v19 = vld [vmem:[%s31733_s8 + $0xa8] sm:$0xff]  ;;  %v21041_v22 = vpack.c.bf16 %v7463_v15, %v7462_v41  ;;  %v7464_v16 = vld [vmem:[%s31733_s8 + $0x20] sm:$0xff]  ;;  %v7482_v48 = vld [vmem:[%s31733_s8 + $0xb0] sm:$0xff] }
 0x3cd   :  { %7381 = vmatpush1.bf16.msra.mxu1 %v22624_v38  ;;  %21038 = vmatpush3.bf16.msra.mxu0 %v21037_v13  ;;  %v21043_v20 = vpack.c.bf16 %v7481_v19, %v7480_v18  ;;  %v7465_v56 = vld [vmem:[%s31733_s8 + $0x28] sm:$0xff]  ;;  %v7483_v29 = vld [vmem:[%s31733_s8 + $0xb8] sm:$0xff]  ;;  %v7466_v33 = vld [vmem:[%s31733_s8 + $0x30] sm:$0xff] }
 0x3ce   :  { %7382 = vmatprep.subr.bf16.mxu1 %v22629_v37  ;;  %21040 = vmatprep.subr.bf16.mxu0 %v21039_v14  ;;  %v21045_v30 = vpack.c.bf16 %v7465_v56, %v7464_v16  ;;  %v21047_v32 = vpack.c.bf16 %v7483_v29, %v7482_v48  ;;  %v7467_v35 = vld [vmem:[%s31733_s8 + $0x38] sm:$0xff]  ;;  %v7484_v28 = vld [vmem:[%s31733_s8 + $0xc0] sm:$0xff]  ;;  %v7485_v25 = vld [vmem:[%s31733_s8 + $0xc8] sm:$0xff] }
 0x3cf   :  { %v21049_v38 = vpack.c.bf16 %v7467_v35, %v7466_v33  ;;  %v21051_v37 = vpack.c.bf16 %v7485_v25, %v7484_v28  ;;  %v22665_v42 = vld [vmem:[%s31731_s6 + $0x114] ss:$8 sps:$4 sm:$0xff]   ;;  %v22663_v12 = vld [vmem:[%s31731_s6 + $0x110] ss:$8 sps:$4 sm:$0xff]   ;;  %v22668_v13 = vld [vmem:[%s31731_s6 + $0x124] ss:$8 sps:$4 sm:$0xff]  }
 0x3d0   :  { %v22666_v14 = vld [vmem:[%s31731_s6 + $0x120] ss:$8 sps:$4 sm:$0xff]   ;;  %v22671_v41 = vld [vmem:[%s31731_s6 + $0x134] ss:$8 sps:$4 sm:$0xff]   ;;  %v22669_v15 = vld [vmem:[%s31731_s6 + $0x130] ss:$8 sps:$4 sm:$0xff]  }
 0x3d1   :  { %7383 = vmatpush1.bf16.msra.mxu1 %v22627_v1  ;;  %21042 = vmatpush3.bf16.msra.mxu0 %v21041_v22  ;;  %v7468_v1 = vld [vmem:[%s31733_s8 + $0x40] sm:$0xff]  ;;  %v22677_v22 = vld [vmem:[%s31731_s6 + $0x154] ss:$8 sps:$4 sm:$0xff]   ;;  %v22681_v29 = vld [vmem:[%s31731_s6 + $0x170] ss:$8 sps:$4 sm:$0xff]  }
 0x3d2   :  { %7384 = vmatprep.subr.bf16.mxu1 %v22632_v39  ;;  %21044 = vmatprep.subr.bf16.mxu0 %v21043_v20  ;;  %v7469_v39 = vld [vmem:[%s31733_s8 + $0x48] sm:$0xff]  ;;  %v22675_v20 = vld [vmem:[%s31731_s6 + $0x150] ss:$8 sps:$4 sm:$0xff]   ;;  %v22683_v48 = vld [vmem:[%s31731_s6 + $0x174] ss:$8 sps:$4 sm:$0xff]  }
 0x3d3   :  { %v22674_v18 = vld [vmem:[%s31731_s6 + $0x144] ss:$8 sps:$4 sm:$0xff]   ;;  %v22672_v19 = vld [vmem:[%s31731_s6 + $0x140] ss:$8 sps:$4 sm:$0xff]   ;;  %v22689_v33 = vld [vmem:[%s31731_s6 + $0x194] ss:$8 sps:$4 sm:$0xff]  }
 0x3d4   :  { %v22680_v16 = vld [vmem:[%s31731_s6 + $0x164] ss:$8 sps:$4 sm:$0xff]   ;;  %v22678_v56 = vld [vmem:[%s31731_s6 + $0x160] ss:$8 sps:$4 sm:$0xff]   ;;  %v22687_v35 = vld [vmem:[%s31731_s6 + $0x190] ss:$8 sps:$4 sm:$0xff]  }
 0x3d5   :  { %7385 = vmatpush1.bf16.msra.mxu1 %v22630_v36  ;;  %21046 = vmatpush3.bf16.msra.mxu0 %v21045_v30  ;;  %v7486_v36 = vld [vmem:[%s31733_s8 + $0xd0] sm:$0xff]  ;;  %v22686_v30 = vld [vmem:[%s31731_s6 + $0x184] ss:$8 sps:$4 sm:$0xff]   ;;  %v22690_v25 = vld [vmem:[%s31731_s6 + $0x1a0] ss:$8 sps:$4 sm:$0xff]  }
 0x3d6   :  { %7386 = vmatprep.subr.bf16.mxu1 %v22635_v40  ;;  %21048 = vmatprep.subr.bf16.mxu0 %v21047_v32  ;;  %v7487_v40 = vld [vmem:[%s31733_s8 + $0xd8] sm:$0xff]  ;;  %v22684_v32 = vld [vmem:[%s31731_s6 + $0x180] ss:$8 sps:$4 sm:$0xff]   ;;  %v22692_v28 = vld [vmem:[%s31731_s6 + $0x1a4] ss:$8 sps:$4 sm:$0xff]  }
 0x3d9   :  { %7387 = vmatpush1.bf16.msra.mxu1 %v22633_v44  ;;  %21050 = vmatpush3.bf16.msra.mxu0 %v21049_v38  ;;  %v21053_v44 = vpack.c.bf16 %v7469_v39, %v7468_v1  ;;  %v22695_v38 = vld [vmem:[%s31731_s6 + $0x1b4] ss:$8 sps:$4 sm:$0xff]   ;;  %v22698_v1 = vld [vmem:[%s31731_s6 + $0x1c4] ss:$8 sps:$4 sm:$0xff]   ;;  %v22696_v39 = vld [vmem:[%s31731_s6 + $0x1c0] ss:$8 sps:$4 sm:$0xff]  }
 0x3da   :  { %7388 = vmatprep.subr.bf16.mxu1 %v22638_v3  ;;  %21052 = vmatprep.subr.bf16.mxu0 %v21051_v37  ;;  %v21055_v3 = vpack.c.bf16 %v7487_v40, %v7486_v36  ;;  %v22693_v37 = vld [vmem:[%s31731_s6 + $0x1b0] ss:$8 sps:$4 sm:$0xff]   ;;  %v22701_v36 = vld [vmem:[%s31731_s6 + $0x1d4] ss:$8 sps:$4 sm:$0xff]  }
 0x3dd   :  { %7389 = vmatpush1.bf16.msra.mxu1 %v22636_v21  ;;  %v7470_v21 = vld [vmem:[%s31733_s8 + $0x50] sm:$0xff]  ;;  %21054 = vmatpush3.bf16.msra.mxu0 %v21053_v44 }
 0x3de   :  { %7390 = vmatprep.subr.bf16.mxu1 %v22641_v45  ;;  %v7471_v45 = vld [vmem:[%s31733_s8 + $0x58] sm:$0xff]  ;;  %21056 = vmatprep.subr.bf16.mxu0 %v21055_v3  ;;  %v22704_v3 = vld [vmem:[%s31731_s6 + $0x1e4] ss:$8 sps:$4 sm:$0xff]  }
 0x3df   :  { %v22699_v44 = vld [vmem:[%s31731_s6 + $0x1d0] ss:$8 sps:$4 sm:$0xff]  }
 0x3e1   :  { %7391 = vmatpush1.bf16.msra.mxu1 %v22639_v46  ;;  %v21057_v46 = vpack.c.bf16 %v7471_v45, %v7470_v21  ;;  %v22702_v45 = vld [vmem:[%s31731_s6 + $0x1e0] ss:$8 sps:$4 sm:$0xff]  }
 0x3e2   :  { %7392 = vmatprep.subr.bf16.mxu1 %v22644_v59  ;;  %v27154_v59 = vld [vmem:[%s31730_s5] sm:$0xf] }
 0x3e3   :  { %21058 = vmatpush3.bf16.msra.mxu0 %v21057_v46  ;;  %v4374_v40 = vrot.slane %v27154_v59, %v25780_v24  ;;  %v22707_v46 = vld [vmem:[%s31731_s6 + $0x1f4] ss:$8 sps:$4 sm:$0xff]  }
 0x3e5   :  { %7393 = vmatpush1.bf16.msra.mxu1 %v22642_v50  ;;  %v4378_v50 = vrot.slane %v27154_v59, %v25573_v51 }
 0x3e6   :  { %7394 = vmatprep.subr.bf16.mxu1 %v22647_v17  ;;  %v4366_v17 = vrot.slane %v27154_v59, %v25006_v2 }
 0x3e9   :  { %7395 = vmatpush1.bf16.msra.mxu1 %v22645_v53 }
 0x3ea   :  { %7396 = vmatprep.subr.bf16.mxu1 %v22650_v43  ;;  %v4370_v43 = vrot.slane %v27154_v59, %v25012_v5 }
 0x3ed   :  { %7397 = vmatpush1.bf16.msra.mxu1 %v22648_v55 }
 0x3ee   :  { %7398 = vmatprep.subr.bf16.mxu1 %v22653_v60 }
 0x3f1   :  { %7399 = vmatpush1.bf16.msra.mxu1 %v22651_v54 }
 0x3f2   :  { %7400 = vmatprep.subr.bf16.mxu1 %v22656_v7 }
 0x3f5   :  { %7401 = vmatpush1.bf16.msra.mxu1 %v22654_v4 }
 0x3f6   :  { %7402 = vmatprep.subr.bf16.mxu1 %v22659_v8 }
 0x3f9   :  { %7403 = vmatpush1.bf16.msra.mxu1 %v22657_v31 }
 0x3fa   :  { %7413 = vmatprep.subr.bf16.mxu1 %v22662_v9 }
 0x400   :  { %v27060_v61 = vpop.f32.mrb[20].mxu0 }
 0x401   :  { %v27062_v63 = vpop.f32.mrb[21].mxu0  ;;  %v21085_v21 = vadd.f32 %v27060_v61, %v4374_v40 }
 0x402   :  { %v6957_v0 = vpop.f32.mrb[22].mxu0  ;;  %v21086_v53 = vadd.f32 %v27062_v63, %v4378_v50  ;;  %v22660_v63 = vld [vmem:[%s31731_s6 + $0x100] ss:$8 sps:$4 sm:$0xff]   ;;  %v22705_v50 = vld [vmem:[%s31731_s6 + $0x1f0] ss:$8 sps:$4 sm:$0xff]  }
 0x403   :  { %v6958_v6 = vpop.f32.mrb[23].mxu0  ;;  %v6966_v59 = vmul.f32 0.01, %v21085_v21  ;;  %vm6962_vm2 = vcmp.gt.f32.partialorder %v21085_v21, 0.0 }
 0x404   :  { %v6967_v0 = vmul.f32 0.01, %v21086_v53  ;;  %vm6963_vm15 = vcmp.gt.f32.partialorder %v21086_v53, 0.0 }
 0x406   :  { %v6971_v52 = vsel %vm6963_vm15, %v21086_v53, %v6967_v0  ;;  %v7488_v53 = vld [vmem:[%s31733_s8 + $0xe0] sm:$0xff] }
 0x407   :  { %v7039_v11 = vpack.c.bf16 %v6971_v52, %v6971_v52 }
 0x48f   :  { %v6666_v55 = vpop.f32.mrb[24].mxu1 }
 0x490   :  { %v21083_v60 = vadd.f32 %v6666_v55, %v4366_v17  ;;  %v6668_v54 = vpop.f32.mrb[25].mxu1  ;;  %v6970_v17 = vsel %vm6962_vm2, %v21085_v21, %v6966_v59  ;;  %v7828_v59 = vld [vmem:[%s31737_s12 + $0x1c8] sm:$0xff] }
 0x491   :  { %v21084_v6 = vadd.f32 %v6668_v54, %v4370_v43  ;;  %v6670_v7 = vpop.f32.mrb[26].mxu1  ;;  %v7038_v61 = vpack.c.bf16 %v6970_v17, %v6970_v17  ;;  %v7489_v43 = vld [vmem:[%s31733_s8 + $0xe8] sm:$0xff] }
 0x492   :  { %vm6960_vm0 = vcmp.gt.f32.partialorder %v21083_v60, 0.0  ;;  %v6964_v4 = vmul.f32 0.01, %v21083_v60  ;;  %v6671_v8 = vpop.f32.mrb[27].mxu1  ;;  %v21059_v55 = vpack.c.bf16 %v7489_v43, %v7488_v53  ;;  %v7473_v54 = vld [vmem:[%s31733_s8 + $0x68] sm:$0xff]  ;;  %v7491_v7 = vld [vmem:[%s31733_s8 + $0xf8] sm:$0xff] }
 0x493   :  { %vm6961_vm1 = vcmp.gt.f32.partialorder %v21084_v6, 0.0  ;;  %v6965_v31 = vmul.f32 0.01, %v21084_v6  ;;  %v7474_v8 = vld [vmem:[%s31733_s8 + $0x70] sm:$0xff]  ;;  %v7844_v53 = vld [vmem:[%s31737_s12 + $0x248] sm:$0xff] }
 0x494   :  { %v6968_v9 = vsel %vm6960_vm0, %v21083_v60, %v6964_v4  ;;  %v7472_v60 = vld [vmem:[%s31733_s8 + $0x60] sm:$0xff]  ;;  %21060 = vmatprep.subr.bf16.mxu0 %v21059_v55 }
 0x495   :  { %v6969_v23 = vsel %vm6961_vm1, %v21084_v6, %v6965_v31  ;;  %v7036_v27 = vpack.c.bf16 %v6968_v9, %v6968_v9  ;;  %v21061_v0 = vpack.c.bf16 %v7473_v54, %v7472_v60  ;;  %v7490_v6 = vld [vmem:[%s31733_s8 + $0xf0] sm:$0xff]  ;;  %v7475_v31 = vld [vmem:[%s31733_s8 + $0x78] sm:$0xff]  ;;  %v7852_v60 = vld [vmem:[%s31737_s12 + $0x288] sm:$0xff] }
 0x496   :  { %v7037_v10 = vpack.c.bf16 %v6969_v23, %v6969_v23  ;;  %v21063_v4 = vpack.c.bf16 %v7491_v7, %v7490_v6  ;;  %v21065_v9 = vpack.c.bf16 %v7475_v31, %v7474_v8  ;;  %v7040_v23 = vld [vmem:[%s31732_s7] sm:$0x3]  ;;  %v7860_v54 = vld [vmem:[%s31737_s12 + $0x2c8] sm:$0xff]  ;;  %s18448_s7 = sshll.u32 %s24028_s30, 4  ;;  %s18449_s7 = int_to_ptr.vmem [resolvable:$true] %s18448_s7 }
 0x497   :  { %21062 = vmatpush3.bf16.msra.mxu0 %v21061_v0  ;;  %v7045_v52 = vrot.slane %v7040_v23, %v25006_v2  ;;  %v19505_v0 = vcombine.high %v7852_v60, %v7860_v54  ;;  %v19504_v6 = vcombine.low %v7852_v60, %v7860_v54  ;;  %v7868_v7 = vld [vmem:[%s31737_s12 + $0x308] sm:$0xff]  ;;  %v7827_v60 = vld [vmem:[%s31737_s12 + $0x1c0] sm:$0xff]  ;;  %s23953_s21 = scalar_lea.vmem %s18449_s7, 32  ;;  %p23958_p1 = scmp.lt.s32.totalorder %s18449_s7, %s18449_s7 }
 0x498   :  { %7404 = vmatprep.mubr.bf16.mxu1 %v7037_v10  ;;  %21064 = vmatprep.subr.bf16.mxu0 %v21063_v4  ;;  %v7049_v10 = vrot.slane %v7040_v23, %v25012_v5  ;;  %v7876_v4 = vld [vmem:[%s31737_s12 + $0x348] sm:$0xff]  ;;  %p23954_p0 = scmp.ne.s32.totalorder %s18449_s7, %s23953_s21  ;;  %p23959_p2 = scmp.lt.s32.totalorder %s23953_s21, %s23953_s21 }
 0x499   :  { %7405 = vmatmul.mubr.bf16.vlgmr.msra.gmra.mrb[28].mxu1 %v7036_v27  ;;  %v19521_v8 = vcombine.high %v7868_v7, %v7876_v4  ;;  %v19520_v31 = vcombine.low %v7868_v7, %v7876_v4  ;;  %v7892_v23 = vld [vmem:[%s31737_s12 + $0x3c8] sm:$0xff]  ;;  %v7843_v7 = vld [vmem:[%s31737_s12 + $0x240] sm:$0xff] }
 0x49a   :  { %7414 = vmatpush1.bf16.msra.mxu1 %v22660_v63  ;;  %7445 = vmatprep.mubr.bf16.mxu1 %v7039_v11  ;;  %p23960_p3 = por %p23959_p2, %p23958_p1 }
 0x49b   :  { %7415 = vmatprep.subr.bf16.mxu1 %v22665_v42  ;;  %21066 = vmatpush3.bf16.msra.mxu0 %v21065_v9  ;;  %v7884_v9 = vld [vmem:[%s31737_s12 + $0x388] sm:$0xff] }
 0x49c   :  { %p23961_p4 = pnand %p23960_p3, %p23954_p0 }
 0x49e   :  { %7416 = vmatpush1.bf16.msra.mxu1 %v22663_v12 }
 0x49f   :  { %7417 = vmatprep.subr.bf16.mxu1 %v22668_v13 }
 0x4a2   :  { %7418 = vmatpush1.bf16.msra.mxu1 %v22666_v14 }
 0x4a3   :  { %7419 = vmatprep.subr.bf16.mxu1 %v22671_v41 }
 0x4a6   :  { %7420 = vmatpush1.bf16.msra.mxu1 %v22669_v15 }
 0x4a7   :  { %7421 = vmatprep.subr.bf16.mxu1 %v22674_v18 }
 0x4aa   :  { %7422 = vmatpush1.bf16.msra.mxu1 %v22672_v19  ;;  %v7588_v19 = vld [vmem:[%s31735_s10 + $0x8] sm:$0xff] }
 0x4ab   :  { %7423 = vmatprep.subr.bf16.mxu1 %v22677_v22  ;;  %7617 = vmatprep.subr.mxu0 %v7588_v19 }
 0x4ae   :  { %7424 = vmatpush1.bf16.msra.mxu1 %v22675_v20  ;;  %v19419_v20 = vld [vmem:[%s31734_s9] ss:$0 sm:$0xff] }
 0x4af   :  { %7425 = vmatprep.subr.bf16.mxu1 %v22680_v16 }
 0x4b2   :  { %7426 = vmatpush1.bf16.msra.mxu1 %v22678_v56 }
 0x4b3   :  { %7427 = vmatprep.subr.bf16.mxu1 %v22683_v48 }
 0x4b6   :  { %7428 = vmatpush1.bf16.msra.mxu1 %v22681_v29 }
 0x4b7   :  { %7429 = vmatprep.subr.bf16.mxu1 %v22686_v30 }
 0x4ba   :  { %7430 = vmatpush1.bf16.msra.mxu1 %v22684_v32  ;;  %v7587_v32 = vld [vmem:[%s31735_s10] sm:$0xff] }
 0x4bb   :  { %7431 = vmatprep.subr.bf16.mxu1 %v22689_v33  ;;  %v7590_v33 = vld [vmem:[%s31735_s10 + $0x18] sm:$0xff] }
 0x4be   :  { %7432 = vmatpush1.bf16.msra.mxu1 %v22687_v35  ;;  %v7772_v35 = vld [vmem:[%s31737_s12 + $0x8] sm:$0xff] }
 0x4bf   :  { %7433 = vmatprep.subr.bf16.mxu1 %v22692_v28  ;;  %v7780_v28 = vld [vmem:[%s31737_s12 + $0x48] sm:$0xff] }
 0x4c2   :  { %7434 = vmatpush1.bf16.msra.mxu1 %v22690_v25  ;;  %v19424_v25 = vcombine.low %v7772_v35, %v7780_v28 }
 0x4c3   :  { %7435 = vmatprep.subr.bf16.mxu1 %v22695_v38  ;;  %v19425_v38 = vcombine.high %v7772_v35, %v7780_v28  ;;  %v7980_v28 = vld [vmem:[%s31737_s12 + $0x688] sm:$0xff] }
 0x4c6   :  { %7436 = vmatpush1.bf16.msra.mxu1 %v22693_v37  ;;  %v7788_v37 = vld [vmem:[%s31737_s12 + $0x88] sm:$0xff] }
 0x4c7   :  { %7437 = vmatprep.subr.bf16.mxu1 %v22698_v1  ;;  %v7796_v1 = vld [vmem:[%s31737_s12 + $0xc8] sm:$0xff] }
 0x4c8   :  { %v19440_v40 = vcombine.low %v7788_v37, %v7796_v1 }
 0x4ca   :  { %7438 = vmatpush1.bf16.msra.mxu1 %v22696_v39  ;;  %v19441_v39 = vcombine.high %v7788_v37, %v7796_v1  ;;  %v7569_v1 = vld [vmem:[%s31755_s2] sm:$0x3] }
 0x4cb   :  { %7439 = vmatprep.subr.bf16.mxu1 %v22701_v36 }
 0x4ce   :  { %7440 = vmatpush1.bf16.msra.mxu1 %v22699_v44  ;;  %v7804_v44 = vld [vmem:[%s31737_s12 + $0x108] sm:$0xff] }
 0x4cf   :  { %7441 = vmatprep.subr.bf16.mxu1 %v22704_v3  ;;  %v7812_v3 = vld [vmem:[%s31737_s12 + $0x148] sm:$0xff] }
 0x4d0   :  { %v19457_v21 = vcombine.high %v7804_v44, %v7812_v3 }
 0x4d2   :  { %7442 = vmatpush1.bf16.msra.mxu1 %v22702_v45  ;;  %v19456_v45 = vcombine.low %v7804_v44, %v7812_v3 }
 0x4d3   :  { %7443 = vmatprep.subr.bf16.mxu1 %v22707_v46  ;;  %v7820_v46 = vld [vmem:[%s31737_s12 + $0x188] sm:$0xff] }
 0x4d4   :  { %v19472_v17 = vcombine.low %v7820_v46, %v7828_v59 }
 0x4d6   :  { %7444 = vmatpush1.bf16.msra.mxu1 %v22705_v50  ;;  %v19473_v50 = vcombine.high %v7820_v46, %v7828_v59  ;;  %v7787_v59 = vld [vmem:[%s31737_s12 + $0x80] sm:$0xff] }
 0x4d7   :  { %11013 = vmatprep.subr.bf16.mxu1 %v19425_v38 }
 0x4d9   :  { %7446 = vmatmul.mubr.bf16.vlgmr.msra.gmra.mrb[28].mxu1 %v7038_v61  ;;  %v7836_v61 = vld [vmem:[%s31737_s12 + $0x208] sm:$0xff] }
 0x4da   :  { %11014 = vmatpush1.bf16.msra.mxu1 %v19424_v25  ;;  %v19489_v43 = vcombine.high %v7836_v61, %v7844_v53  ;;  %v19488_v55 = vcombine.low %v7836_v61, %v7844_v53  ;;  %v7988_v25 = vld [vmem:[%s31737_s12 + $0x6c8] sm:$0xff]  ;;  %v7803_v61 = vld [vmem:[%s31737_s12 + $0x100] sm:$0xff] }
 0x4db   :  { %11015 = vmatprep.subr.bf16.mxu1 %v19441_v39  ;;  %v19633_v38 = vcombine.high %v7980_v28, %v7988_v25  ;;  %v19632_v37 = vcombine.low %v7980_v28, %v7988_v25  ;;  %v7811_v53 = vld [vmem:[%s31737_s12 + $0x140] sm:$0xff] }
 0x4dc   :  { %v19454_v54 = vcombine.low %v7803_v61, %v7811_v53  ;;  %v7955_v28 = vld [vmem:[%s31737_s12 + $0x5c0] sm:$0xff] }
 0x4de   :  { %11016 = vmatpush1.bf16.msra.mxu1 %v19440_v40  ;;  %v7779_v40 = vld [vmem:[%s31737_s12 + $0x40] sm:$0xff] }
 0x4df   :  { %11017 = vmatprep.subr.bf16.mxu1 %v19457_v21  ;;  %v7589_v21 = vld [vmem:[%s31735_s10 + $0x10] sm:$0xff] }
 0x4e2   :  { %11018 = vmatpush1.bf16.msra.mxu1 %v19456_v45 }
 0x4e3   :  { %11019 = vmatprep.subr.bf16.mxu1 %v19473_v50  ;;  %v7795_v50 = vld [vmem:[%s31737_s12 + $0xc0] sm:$0xff] }
 0x4e6   :  { %11020 = vmatpush1.bf16.msra.mxu1 %v19472_v17  ;;  %v19439_v17 = vcombine.high %v7787_v59, %v7795_v50 }
 0x4e7   :  { %11021 = vmatprep.subr.bf16.mxu1 %v19489_v43  ;;  %v19438_v43 = vcombine.low %v7787_v59, %v7795_v50  ;;  %v8003_v59 = vld [vmem:[%s31737_s12 + $0x740] sm:$0xff]  ;;  %v7996_v50 = vld [vmem:[%s31737_s12 + $0x708] sm:$0xff] }
 0x4ea   :  { %11022 = vmatpush1.bf16.msra.mxu1 %v19488_v55  ;;  %v19455_v55 = vcombine.high %v7803_v61, %v7811_v53 }
 0x4eb   :  { %11023 = vmatprep.subr.bf16.mxu1 %v19505_v0 }
 0x4ee   :  { %11024 = vmatpush1.bf16.msra.mxu1 %v19504_v6  ;;  %v7835_v6 = vld [vmem:[%s31737_s12 + $0x200] sm:$0xff] }
 0x4ef   :  { %11025 = vmatprep.subr.bf16.mxu1 %v19521_v8  ;;  %v19487_v8 = vcombine.high %v7835_v6, %v7843_v7 }
 0x4f2   :  { %11026 = vmatpush1.bf16.msra.mxu1 %v19520_v31  ;;  %v7851_v31 = vld [vmem:[%s31737_s12 + $0x280] sm:$0xff] }
 0x5ac   :  { %v7447_v63 = vpop.f32.mrb[28].mxu1 }
 0x5ad   :  { %v21087_v27 = vadd.f32 %v7447_v63, %v7045_v52  ;;  %v7449_v42 = vpop.f32.mrb[29].mxu1  ;;  %v19537_v52 = vcombine.high %v7884_v9, %v7892_v23  ;;  %v7900_v63 = vld [vmem:[%s31737_s12 + $0x408] sm:$0xff] }
 0x5ae   :  { %v21088_v11 = vadd.f32 %v7449_v42, %v7049_v10  ;;  %v7451_v12 = vpop.f32.mrb[30].mxu1  ;;  %v19536_v10 = vcombine.low %v7884_v9, %v7892_v23  ;;  %v7859_v9 = vld [vmem:[%s31737_s12 + $0x2c0] sm:$0xff]  ;;  %v19486_v23 = vcombine.low %v7835_v6, %v7843_v7 }
 0x5af   :  { %v7456_v13 = vmul.f32 0.01, %v21087_v27  ;;  %v7452_v14 = vpop.f32.mrb[31].mxu1  ;;  %vm7454_vm3 = vcmp.gt.f32.partialorder %v21087_v27, 0.0  ;;  %11027 = vmatprep.subr.bf16.mxu1 %v19537_v52  ;;  %v7916_v12 = vld [vmem:[%s31737_s12 + $0x488] sm:$0xff]  ;;  %v19503_v52 = vcombine.high %v7851_v31, %v7859_v9 }
 0x5b0   :  { %v7457_v41 = vmul.f32 0.01, %v21088_v11  ;;  %vm7455_vm4 = vcmp.gt.f32.partialorder %v21088_v11, 0.0  ;;  %11028 = vmatpush1.bf16.msra.mxu1 %v19536_v10  ;;  %v7867_v10 = vld [vmem:[%s31737_s12 + $0x300] sm:$0xff] }
 0x5b1   :  { %v7458_v18 = vsel %vm7454_vm3, %v21087_v27, %v7456_v13  ;;  %v7908_v27 = vld [vmem:[%s31737_s12 + $0x448] sm:$0xff] }
 0x5b2   :  { %v7459_v15 = vsel %vm7455_vm4, %v21088_v11, %v7457_v41  ;;  %v19553_v42 = vcombine.high %v7900_v63, %v7908_v27  ;;  %v19552_v11 = vcombine.low %v7900_v63, %v7908_v27  ;;  %v7924_v13 = vld [vmem:[%s31737_s12 + $0x4c8] sm:$0xff]  ;;  %v7875_v63 = vld [vmem:[%s31737_s12 + $0x340] sm:$0xff]  ;;  %v19502_v27 = vcombine.low %v7851_v31, %v7859_v9 }
 0x5b3   :  { %7563 = vmatprep.mubr.f32.mxu0 %v7459_v15  ;;  %v19569_v14 = vcombine.high %v7916_v12, %v7924_v13  ;;  %v19568_v41 = vcombine.low %v7916_v12, %v7924_v13  ;;  %v7932_v15 = vld [vmem:[%s31737_s12 + $0x508] sm:$0xff]  ;;  %v7891_v12 = vld [vmem:[%s31737_s12 + $0x3c0] sm:$0xff]  ;;  %v19518_v13 = vcombine.low %v7867_v10, %v7875_v63 }
 0x5b4   :  { %7564 = vmatmul.mubr.f32.vlgmr.msra.gmra.mrb[24].mxu0 %v7458_v18  ;;  %11029 = vmatprep.subr.bf16.mxu1 %v19553_v42  ;;  %v7940_v18 = vld [vmem:[%s31737_s12 + $0x548] sm:$0xff]  ;;  %v19519_v42 = vcombine.high %v7867_v10, %v7875_v63  ;;  %v8035_v31 = vld [vmem:[%s31737_s12 + $0x840] sm:$0xff] }
 0x5b5   :  { %7681 = vmatprep.mubr.f32.mxu0 %v24025_v34  ;;  %7618 = vmatpush1.msra.mxu0 %v7587_v32  ;;  %v19585_v19 = vcombine.high %v7932_v15, %v7940_v18  ;;  %v7972_v32 = vld [vmem:[%s31737_s12 + $0x648] sm:$0xff] }
 0x5b6   :  { %7688 = vmatprep.subr.mxu0 %v7590_v33  ;;  %11030 = vmatpush1.bf16.msra.mxu1 %v19552_v11  ;;  %v7883_v11 = vld [vmem:[%s31737_s12 + $0x380] sm:$0xff]  ;;  %v8028_v9 = vld [vmem:[%s31737_s12 + $0x808] sm:$0xff] }
 0x5b7   :  { %11031 = vmatprep.subr.bf16.mxu1 %v19569_v14  ;;  %v19535_v14 = vcombine.high %v7883_v11, %v7891_v12 }
 0x5ba   :  { %11032 = vmatpush1.bf16.msra.mxu1 %v19568_v41  ;;  %v7899_v41 = vld [vmem:[%s31737_s12 + $0x400] sm:$0xff] }
 0x5bb   :  { %11033 = vmatprep.subr.bf16.mxu1 %v19585_v19 }
 0x687   :  { %v20866_v22 = vpop.f32.mrb[24].mxu0 }
 0x688   :  { %v20867_v16 = vpop.f32.mrb[25].mxu0 }
 0x689   :  { %v20868_v56 = vadd.f32 %v20867_v16, %v20866_v22  ;;  %v19584_v22 = vcombine.low %v7932_v15, %v7940_v18  ;;  %v7956_v16 = vld [vmem:[%s31737_s12 + $0x5c8] sm:$0xff]  ;;  %v7907_v15 = vld [vmem:[%s31737_s12 + $0x440] sm:$0xff]  ;;  %v19534_v18 = vcombine.low %v7883_v11, %v7891_v12 }
 0x68a   :  { %v19551_v19 = vcombine.high %v7899_v41, %v7907_v15 }
 0x68b   :  { %v27295_v48 = vadd.f32 %v20868_v56, %v19419_v20  ;;  %v7948_v20 = vld [vmem:[%s31737_s12 + $0x588] sm:$0xff]  ;;  %11034 = vmatpush1.bf16.msra.mxu1 %v19584_v22  ;;  %v7915_v22 = vld [vmem:[%s31737_s12 + $0x480] sm:$0xff] }
 0x68c   :  { %v19601_v56 = vcombine.high %v7948_v20, %v7956_v16 }
 0x68d   :  { %v7570_v29 = vmul.f32 0.5, %v27295_v48  ;;  %7580 = vst.msk [vmem:[#allocation2] sm:$0x3] %vm7579_vm5, %v27295_v48 }
 0x68e   :  { %11035 = vmatprep.subr.bf16.mxu1 %v19601_v56 }
 0x68f   :  { %v7571_v30 = vmul.f32 1.442695, %v7570_v29  ;;  %v19600_v29 = vcombine.low %v7948_v20, %v7956_v16  ;;  %v7923_v20 = vld [vmem:[%s31737_s12 + $0x4c0] sm:$0xff]  ;;  %v19550_v16 = vcombine.low %v7899_v41, %v7907_v15 }
 0x690   :  { %v19567_v56 = vcombine.high %v7915_v22, %v7923_v20 }
 0x691   :  { %23918 = vpow2.f32 %v7571_v30  ;;  %v7964_v30 = vld [vmem:[%s31737_s12 + $0x608] sm:$0xff]  ;;  %11036 = vmatpush1.bf16.msra.mxu1 %v19600_v29  ;;  %v7931_v29 = vld [vmem:[%s31737_s12 + $0x500] sm:$0xff] }
 0x692   :  { %v19617_v33 = vcombine.high %v7964_v30, %v7972_v32  ;;  %v19616_v35 = vcombine.low %v7964_v30, %v7972_v32  ;;  %v7939_v30 = vld [vmem:[%s31737_s12 + $0x540] sm:$0xff]  ;;  %v19566_v32 = vcombine.low %v7915_v22, %v7923_v20 }
 0x693   :  { %v19582_v25 = vcombine.low %v7931_v29, %v7939_v30 }
 0x694   :  { %11037 = vmatprep.subr.bf16.mxu1 %v19617_v33  ;;  %v19583_v33 = vcombine.high %v7931_v29, %v7939_v30 }
 0x695   :  { %11038 = vmatpush1.bf16.msra.mxu1 %v19616_v35  ;;  %v7947_v35 = vld [vmem:[%s31737_s12 + $0x580] sm:$0xff] }
 0x696   :  { %11039 = vmatprep.subr.bf16.mxu1 %v19633_v38  ;;  %v19599_v38 = vcombine.high %v7947_v35, %v7955_v28 }
 0x699   :  { %11040 = vmatpush1.bf16.msra.mxu1 %v19632_v37  ;;  %v7963_v37 = vld [vmem:[%s31737_s12 + $0x600] sm:$0xff] }
 0x69b   :  { %v23919_v36 = vpop.eup %23918 }
 0x69c   :  { %7574 = vrot.lane.b32.xlu0 %v23919_v36, %s24027_s27  ;;  %v7771_v36 = vld [vmem:[%s31737_s12] sm:$0xff] }
 0x69d   :  { %v19423_v45 = vcombine.high %v7771_v36, %v7779_v40 }
 0x6a0   :  { %7582 = vrot.lane.b32.xlu0 %v27295_v48, %s24027_s27 }
 0x70e   :  { %v7575_v39 = vpop.permute.xlu0 %7574 }
 0x70f   :  { %v7577_v44 = vmul.f32 %v7575_v39, %v7569_v1  ;;  %v7971_v1 = vld [vmem:[%s31737_s12 + $0x640] sm:$0xff]  ;;  %v19598_v39 = vcombine.low %v7947_v35, %v7955_v28 }
 0x711   :  { %v7578_v3 = vadd.f32 %v7577_v44, %v27295_v48  ;;  %v19422_v48 = vcombine.low %v7771_v36, %v7779_v40  ;;  %v19615_v36 = vcombine.high %v7963_v37, %v7971_v1  ;;  %v7979_v40 = vld [vmem:[%s31737_s12 + $0x680] sm:$0xff] }
 0x712   :  { %v7583_v46 = vpop.permute.xlu0 %7582  ;;  %v7987_v44 = vld [vmem:[%s31737_s12 + $0x6c0] sm:$0xff] }
 0x713   :  { %7585 = vst.msk [vmem:[#allocation4] sm:$0x3] %vm7579_vm5, %v7583_v46  ;;  %7586 = vst.msk [vmem:[#allocation6] sm:$0x3] %vm7579_vm5, %v7578_v3  ;;  %19420 = vmatmul.mubr.msk.f32.vlgmr.msra.gmra.mrb[26].mxu0 %vm7613_vm6, %v7578_v3  ;;  %v7995_v46 = vld [vmem:[%s31737_s12 + $0x700] sm:$0xff] }
 0x714   :  { %7689 = vmatpush1.msra.mxu0 %v7589_v21  ;;  %7752 = vmatprep.mubr.f32.mxu0 %v24025_v34  ;;  %v7819_v34 = vld [vmem:[%s31737_s12 + $0x180] sm:$0xff]  ;;  %v19631_v21 = vcombine.high %v7979_v40, %v7987_v44  ;;  %v19646_v61 = vcombine.low %v7995_v46, %v8003_v59 }
 0x715   :  { %10931 = vmatprep.subr.bf16.mxu0 %v19423_v45  ;;  %v19471_v0 = vcombine.high %v7819_v34, %v7827_v60  ;;  %v19470_v4 = vcombine.low %v7819_v34, %v7827_v60  ;;  %v19630_v45 = vcombine.low %v7979_v40, %v7987_v44  ;;  %v8019_v34 = vld [vmem:[%s31737_s12 + $0x7c0] sm:$0xff]  ;;  %v8012_v60 = vld [vmem:[%s31737_s12 + $0x788] sm:$0xff] }
 0x716   :  { %v8067_v40 = vld [vmem:[%s31737_s12 + $0x940] sm:$0xff]  ;;  %v8060_v44 = vld [vmem:[%s31737_s12 + $0x908] sm:$0xff] }
 0x717   :  { %19421 = vmatmul.mubr.msk.f32.vlgmr.msra.gmra.mrb[28].mxu0 %vm7613_vm6, %v7578_v3  ;;  %v19614_v3 = vcombine.low %v7963_v37, %v7971_v1 }
 0x718   :  { %10932 = vmatpush1.bf16.msra.mxu0 %v19422_v48  ;;  %v19647_v48 = vcombine.high %v7995_v46, %v8003_v59 }
 0x719   :  { %10933 = vmatprep.subr.bf16.mxu0 %v19439_v17  ;;  %v8004_v17 = vld [vmem:[%s31737_s12 + $0x748] sm:$0xff] }
 0x71a   :  { %v19648_v53 = vcombine.low %v7996_v50, %v8004_v17 }
 0x71c   :  { %10934 = vmatpush1.bf16.msra.mxu0 %v19438_v43  ;;  %v19649_v43 = vcombine.high %v7996_v50, %v8004_v17  ;;  %v8075_v17 = vld [vmem:[%s31737_s12 + $0x980] sm:$0xff] }
 0x71d   :  { %10935 = vmatprep.subr.bf16.mxu0 %v19455_v55  ;;  %v8011_v55 = vld [vmem:[%s31737_s12 + $0x780] sm:$0xff] }
 0x71e   :  { %11041 = vmatprep.subr.bf16.mxu1 %v19649_v43  ;;  %v19662_v6 = vcombine.low %v8011_v55, %v8019_v34  ;;  %v8084_v43 = vld [vmem:[%s31737_s12 + $0x9c8] sm:$0xff] }
 0x71f   :  { %11042 = vmatpush1.bf16.msra.mxu1 %v19648_v53  ;;  %v8076_v53 = vld [vmem:[%s31737_s12 + $0x988] sm:$0xff] }
 0x720   :  { %10936 = vmatpush1.bf16.msra.mxu0 %v19454_v54  ;;  %v19663_v54 = vcombine.high %v8011_v55, %v8019_v34 }
 0x721   :  { %10937 = vmatprep.subr.bf16.mxu0 %v19471_v0  ;;  %v8020_v0 = vld [vmem:[%s31737_s12 + $0x7c8] sm:$0xff] }
 0x722   :  { %v19664_v7 = vcombine.low %v8012_v60, %v8020_v0 }
 0x724   :  { %10938 = vmatpush1.bf16.msra.mxu0 %v19470_v4  ;;  %v19665_v4 = vcombine.high %v8012_v60, %v8020_v0  ;;  %v8091_v0 = vld [vmem:[%s31737_s12 + $0xa00] sm:$0xff] }
 0x725   :  { %10939 = vmatprep.subr.bf16.mxu0 %v19487_v8  ;;  %v8027_v8 = vld [vmem:[%s31737_s12 + $0x800] sm:$0xff] }
 0x726   :  { %11043 = vmatprep.subr.bf16.mxu1 %v19665_v4  ;;  %v19678_v10 = vcombine.low %v8027_v8, %v8035_v31  ;;  %v8100_v4 = vld [vmem:[%s31737_s12 + $0xa48] sm:$0xff] }
 0x727   :  { %11044 = vmatpush1.bf16.msra.mxu1 %v19664_v7  ;;  %v8092_v7 = vld [vmem:[%s31737_s12 + $0xa08] sm:$0xff] }
 0x728   :  { %10940 = vmatpush1.bf16.msra.mxu0 %v19486_v23  ;;  %v19679_v23 = vcombine.high %v8027_v8, %v8035_v31  ;;  %v19728_v31 = vcombine.low %v8076_v53, %v8084_v43 }
 0x729   :  { %10941 = vmatprep.subr.bf16.mxu0 %v19503_v52  ;;  %v8036_v52 = vld [vmem:[%s31737_s12 + $0x848] sm:$0xff] }
 0x72a   :  { %v19680_v63 = vcombine.low %v8028_v9, %v8036_v52 }
 0x72c   :  { %10942 = vmatpush1.bf16.msra.mxu0 %v19502_v27  ;;  %v19681_v27 = vcombine.high %v8028_v9, %v8036_v52  ;;  %v8107_v52 = vld [vmem:[%s31737_s12 + $0xa80] sm:$0xff] }
 0x72d   :  { %10943 = vmatprep.subr.bf16.mxu0 %v19519_v42  ;;  %v27526_v42 = vld [vmem:[%s31736_s11] sm:$0xf]  ;;  %s24029_s11 = smov [#allocation2]  }
 0x72e   :  { %11054 = vmatprep.subr.bf16.mxu1 %v19681_v27  ;;  %v7596_v11 = vrot.slane %v27526_v42, %v25006_v2  ;;  %v7600_v12 = vrot.slane %v27526_v42, %v25012_v5  ;;  %v8116_v27 = vld [vmem:[%s31737_s12 + $0xac8] sm:$0xff]  ;;  %s18438_s8 = sshll.u32 %s24029_s11, 4  ;;  %s18439_s8 = int_to_ptr.vmem [resolvable:$true] %s18438_s8 }
 0x730   :  { %10944 = vmatpush1.bf16.msra.mxu0 %v19518_v13 }
 0x731   :  { %10945 = vmatprep.subr.bf16.mxu0 %v19535_v14 }
 0x734   :  { %10946 = vmatpush1.bf16.msra.mxu0 %v19534_v18  ;;  %v7608_v18 = vrot.slane %v27526_v42, %v25573_v51 }
 0x735   :  { %10947 = vmatprep.subr.bf16.mxu0 %v19551_v19 }
 0x738   :  { %10948 = vmatpush1.bf16.msra.mxu0 %v19550_v16  ;;  %v8043_v16 = vld [vmem:[%s31737_s12 + $0x880] sm:$0xff] }
 0x739   :  { %10949 = vmatprep.subr.bf16.mxu0 %v19567_v56  ;;  %v8051_v56 = vld [vmem:[%s31737_s12 + $0x8c0] sm:$0xff] }
 0x73a   :  { %v19694_v46 = vcombine.low %v8043_v16, %v8051_v56 }
 0x73c   :  { %10950 = vmatpush1.bf16.msra.mxu0 %v19566_v32  ;;  %v8044_v32 = vld [vmem:[%s31737_s12 + $0x888] sm:$0xff] }
 0x73d   :  { %10951 = vmatprep.subr.bf16.mxu0 %v19583_v33  ;;  %v8052_v33 = vld [vmem:[%s31737_s12 + $0x8c8] sm:$0xff] }
 0x73e   :  { %v19696_v59 = vcombine.low %v8044_v32, %v8052_v33 }
 0x740   :  { %10952 = vmatpush1.bf16.msra.mxu0 %v19582_v25 }
 0x741   :  { %10953 = vmatprep.subr.bf16.mxu0 %v19599_v38  ;;  %v19695_v38 = vcombine.high %v8043_v16, %v8051_v56 }
 0x744   :  { %10954 = vmatpush1.bf16.msra.mxu0 %v19598_v39  ;;  %v19697_v39 = vcombine.high %v8044_v32, %v8052_v33  ;;  %v8147_v32 = vld [vmem:[%s31737_s12 + $0xbc0] sm:$0xff]  ;;  %v8140_v33 = vld [vmem:[%s31737_s12 + $0xb88] sm:$0xff] }
 0x745   :  { %10955 = vmatprep.subr.bf16.mxu0 %v19615_v36  ;;  %v8059_v36 = vld [vmem:[%s31737_s12 + $0x900] sm:$0xff] }
 0x746   :  { %v19711_v50 = vcombine.high %v8059_v36, %v8067_v40  ;;  %v19710_v55 = vcombine.low %v8059_v36, %v8067_v40  ;;  %v8155_v36 = vld [vmem:[%s31737_s12 + $0xc00] sm:$0xff] }
 0x747   :  { %v8163_v40 = vld [vmem:[%s31737_s12 + $0xc40] sm:$0xff] }
 0x748   :  { %10956 = vmatpush1.bf16.msra.mxu0 %v19614_v3  ;;  %v8068_v3 = vld [vmem:[%s31737_s12 + $0x948] sm:$0xff] }
 0x749   :  { %10957 = vmatprep.subr.bf16.mxu0 %v19631_v21  ;;  %v19712_v34 = vcombine.low %v8060_v44, %v8068_v3 }
 0x74c   :  { %10958 = vmatpush1.bf16.msra.mxu0 %v19630_v45 }
 0x74d   :  { %10959 = vmatprep.subr.bf16.mxu0 %v19647_v48  ;;  %v19713_v48 = vcombine.high %v8060_v44, %v8068_v3  ;;  %v8156_v44 = vld [vmem:[%s31737_s12 + $0xc08] sm:$0xff] }
 0x74e   :  { %v8164_v3 = vld [vmem:[%s31737_s12 + $0xc48] sm:$0xff] }
 0x750   :  { %10960 = vmatpush1.bf16.msra.mxu0 %v19646_v61  ;;  %v8083_v61 = vld [vmem:[%s31737_s12 + $0x9c0] sm:$0xff] }
 0x751   :  { %10961 = vmatprep.subr.bf16.mxu0 %v19663_v54  ;;  %v19727_v60 = vcombine.high %v8075_v17, %v8083_v61  ;;  %v19729_v54 = vcombine.high %v8076_v53, %v8084_v43  ;;  %v19726_v8 = vcombine.low %v8075_v17, %v8083_v61  ;;  %v8179_v17 = vld [vmem:[%s31737_s12 + $0xcc0] sm:$0xff]  ;;  %v8172_v61 = vld [vmem:[%s31737_s12 + $0xc88] sm:$0xff]  ;;  %v19806_v43 = vcombine.low %v8155_v36, %v8163_v40 }
 0x752   :  { %v8180_v53 = vld [vmem:[%s31737_s12 + $0xcc8] sm:$0xff] }
 0x754   :  { %10962 = vmatpush1.bf16.msra.mxu0 %v19662_v6  ;;  %v8099_v6 = vld [vmem:[%s31737_s12 + $0xa40] sm:$0xff] }
 0x755   :  { %10972 = vmatprep.subr.bf16.mxu0 %v19679_v23  ;;  %v19743_v9 = vcombine.high %v8091_v0, %v8099_v6  ;;  %v19745_v23 = vcombine.high %v8092_v7, %v8100_v4 }
 0x7e6   :  { %v7683_v13 = vpop.f32.mrb[26].mxu0 }
 0x7e7   :  { %v7684_v14 = vadd.f32 %v7683_v13, %v7596_v11  ;;  %v7685_v41 = vpop.f32.mrb[27].mxu0  ;;  %v19742_v11 = vcombine.low %v8091_v0, %v8099_v6  ;;  %v8195_v0 = vld [vmem:[%s31737_s12 + $0xd40] sm:$0xff]  ;;  %v8188_v6 = vld [vmem:[%s31737_s12 + $0xd08] sm:$0xff] }
 0x7e8   :  { %v7686_v15 = vadd.f32 %v7685_v41, %v7600_v12  ;;  %v19744_v12 = vcombine.low %v8092_v7, %v8100_v4  ;;  %v8123_v41 = vld [vmem:[%s31737_s12 + $0xb00] sm:$0xff]  ;;  %v8196_v7 = vld [vmem:[%s31737_s12 + $0xd48] sm:$0xff] }
 0x7e9   :  { %vm7759_vm7 = vcmp.gt.f32.partialorder %v7684_v14, 0.0  ;;  %v7763_v19 = vmul.f32 0.01, %v7684_v14 }
 0x7ea   :  { %vm7760_vm8 = vcmp.gt.f32.partialorder %v7686_v15, 0.0  ;;  %v7764_v22 = vmul.f32 0.01, %v7686_v15  ;;  %v27534_v20 = vpop.f32.mrb[28].mxu0 }
 0x7eb   :  { %v7767_v29 = vsel %vm7759_vm7, %v7684_v14, %v7763_v19  ;;  %v7756_v30 = vpop.f32.mrb[29].mxu0  ;;  %v8132_v19 = vld [vmem:[%s31737_s12 + $0xb48] sm:$0xff] }
 0x7ec   :  { %v7768_v35 = vsel %vm7760_vm8, %v7686_v15, %v7764_v22  ;;  %v7757_v28 = vadd.f32 %v7756_v30, %v7608_v18  ;;  %v27550_v37 = vpack.c.bf16 %v7767_v29, %v7767_v29  ;;  %v8131_v15 = vld [vmem:[%s31737_s12 + $0xb40] sm:$0xff]  ;;  %v8124_v18 = vld [vmem:[%s31737_s12 + $0xb08] sm:$0xff] }
 0x7ed   :  { %v27548_v25 = vpack.c.bf16 %v7768_v35, %v7768_v35  ;;  %v19775_v56 = vcombine.high %v8123_v41, %v8131_v15  ;;  %v19777_v29 = vcombine.high %v8124_v18, %v8132_v19  ;;  %v8139_v30 = vld [vmem:[%s31737_s12 + $0xb80] sm:$0xff]  ;;  %v8148_v35 = vld [vmem:[%s31737_s12 + $0xbc8] sm:$0xff] }
 0x7ee   :  { %vm7762_vm9 = vcmp.gt.f32.partialorder %v7757_v28, 0.0  ;;  %v7766_v1 = vmul.f32 0.01, %v7757_v28 }
 0x7ef   :  { %10963 = vmatprep.mubr.bf16.mxu0 %v27548_v25  ;;  %11045 = vmatprep.mubr.bf16.mxu1 %v27548_v25 }
 0x7f0   :  { %v7770_v21 = vsel %vm7762_vm9, %v7757_v28, %v7766_v1  ;;  %10964 = vmatmul.mubr.bf16.vlgmr.msra.gmra.mrb[32].mxu0 %v27550_v37  ;;  %11046 = vmatmul.mubr.bf16.vlgmr.msra.gmra.mrb[32].mxu1 %v27550_v37  ;;  %v19774_v28 = vcombine.low %v8123_v41, %v8131_v15  ;;  %v19791_v1 = vcombine.high %v8139_v30, %v8147_v32  ;;  %v8227_v41 = vld [vmem:[%s31737_s12 + $0xe40] sm:$0xff]  ;;  %v8220_v15 = vld [vmem:[%s31737_s12 + $0xe08] sm:$0xff] }
 0x7f1   :  { %v27568_v45 = vpack.c.bf16 %v7770_v21, %v7770_v21  ;;  %10973 = vmatpush1.bf16.msra.mxu0 %v19678_v10  ;;  %11055 = vmatpush1.bf16.msra.mxu1 %v19680_v63  ;;  %v8115_v10 = vld [vmem:[%s31737_s12 + $0xac0] sm:$0xff]  ;;  %v8108_v63 = vld [vmem:[%s31737_s12 + $0xa88] sm:$0xff]  ;;  %v19790_v21 = vcombine.low %v8139_v30, %v8147_v32 }
 0x7f2   :  { %10974 = vmatprep.subr.bf16.mxu0 %v19695_v38  ;;  %11056 = vmatprep.subr.bf16.mxu1 %v19697_v39  ;;  %v19759_v13 = vcombine.high %v8107_v52, %v8115_v10  ;;  %v19761_v14 = vcombine.high %v8108_v63, %v8116_v27  ;;  %v19758_v22 = vcombine.low %v8107_v52, %v8115_v10  ;;  %v8211_v52 = vld [vmem:[%s31737_s12 + $0xdc0] sm:$0xff]  ;;  %v8204_v10 = vld [vmem:[%s31737_s12 + $0xd88] sm:$0xff] }
 0x7f3   :  { %11004 = vmatprep.mubr.bf16.mxu0 %v27568_v45  ;;  %11086 = vmatprep.mubr.bf16.mxu1 %v27568_v45  ;;  %v19760_v16 = vcombine.low %v8108_v63, %v8116_v27  ;;  %v19776_v38 = vcombine.low %v8124_v18, %v8132_v19  ;;  %v19793_v39 = vcombine.high %v8140_v33, %v8148_v35  ;;  %v8212_v63 = vld [vmem:[%s31737_s12 + $0xdc8] sm:$0xff]  ;;  %v8243_v30 = vld [vmem:[%s31737_s12 + $0xec0] sm:$0xff] }
 0x7f4   :  { %v8228_v18 = vld [vmem:[%s31737_s12 + $0xe48] sm:$0xff] }
 0x7f5   :  { %10975 = vmatpush1.bf16.msra.mxu0 %v19694_v46  ;;  %11057 = vmatpush1.bf16.msra.mxu1 %v19696_v59  ;;  %v19792_v46 = vcombine.low %v8140_v33, %v8148_v35  ;;  %v19807_v59 = vcombine.high %v8155_v36, %v8163_v40  ;;  %v8236_v32 = vld [vmem:[%s31737_s12 + $0xe88] sm:$0xff]  ;;  %v7604_v36 = vrot.slane %v27526_v42, %v25780_v24  ;;  %v8259_v40 = vld [vmem:[%s31737_s12 + $0xf40] sm:$0xff] }
 0x7f6   :  { %10976 = vmatprep.subr.bf16.mxu0 %v19711_v50  ;;  %11058 = vmatprep.subr.bf16.mxu1 %v19713_v48  ;;  %v19809_v50 = vcombine.high %v8156_v44, %v8164_v3  ;;  %v8171_v48 = vld [vmem:[%s31737_s12 + $0xc80] sm:$0xff]  ;;  %v8244_v33 = vld [vmem:[%s31737_s12 + $0xec8] sm:$0xff] }
 0x7f7   :  { %v19822_v4 = vcombine.low %v8171_v48, %v8179_v17 }
 0x7f9   :  { %10977 = vmatpush1.bf16.msra.mxu0 %v19710_v55  ;;  %11059 = vmatpush1.bf16.msra.mxu1 %v19712_v34  ;;  %v19808_v55 = vcombine.low %v8156_v44, %v8164_v3  ;;  %v19823_v34 = vcombine.high %v8171_v48, %v8179_v17  ;;  %v8252_v44 = vld [vmem:[%s31737_s12 + $0xf08] sm:$0xff]  ;;  %v7755_v48 = vadd.f32 %v27534_v20, %v7604_v36  ;;  %v8275_v17 = vld [vmem:[%s31737_s12 + $0xfc0] sm:$0xff] }
 0x7fa   :  { %10978 = vmatprep.subr.bf16.mxu0 %v19727_v60  ;;  %11060 = vmatprep.subr.bf16.mxu1 %v19729_v54  ;;  %v19825_v60 = vcombine.high %v8172_v61, %v8180_v53  ;;  %v8187_v54 = vld [vmem:[%s31737_s12 + $0xd00] sm:$0xff]  ;;  %v8260_v3 = vld [vmem:[%s31737_s12 + $0xf48] sm:$0xff] }
 0x7fb   :  { %v19838_v27 = vcombine.low %v8187_v54, %v8195_v0  ;;  %v19905_v42 = vcombine.high %v8252_v44, %v8260_v3  ;;  %vm7761_vm10 = vcmp.gt.f32.partialorder %v7755_v48, 0.0 }
 0x7fd   :  { %10979 = vmatpush1.bf16.msra.mxu0 %v19726_v8  ;;  %11061 = vmatpush1.bf16.msra.mxu1 %v19728_v31  ;;  %v19824_v8 = vcombine.low %v8172_v61, %v8180_v53  ;;  %v19839_v31 = vcombine.high %v8187_v54, %v8195_v0  ;;  %v8268_v61 = vld [vmem:[%s31737_s12 + $0xf88] sm:$0xff]  ;;  %v7765_v54 = vmul.f32 0.01, %v7755_v48  ;;  %v7781_v0 = vld [vmem:[%s31737_s12 + $0x50] sm:$0xff] }
 0x7fe   :  { %10980 = vmatprep.subr.bf16.mxu0 %v19743_v9  ;;  %11062 = vmatprep.subr.bf16.mxu1 %v19745_v23  ;;  %v19841_v9 = vcombine.high %v8188_v6, %v8196_v7  ;;  %v8203_v23 = vld [vmem:[%s31737_s12 + $0xd80] sm:$0xff]  ;;  %v8276_v53 = vld [vmem:[%s31737_s12 + $0xfc8] sm:$0xff] }
 0x7ff   :  { %v19854_v19 = vcombine.low %v8203_v23, %v8211_v52  ;;  %v19921_v20 = vcombine.high %v8268_v61, %v8276_v53 }
 0x801   :  { %10981 = vmatpush1.bf16.msra.mxu0 %v19742_v11  ;;  %11063 = vmatpush1.bf16.msra.mxu1 %v19744_v12  ;;  %v19840_v11 = vcombine.low %v8188_v6, %v8196_v7  ;;  %v19855_v12 = vcombine.high %v8203_v23, %v8211_v52  ;;  %v7774_v6 = vld [vmem:[%s31737_s12 + $0x18] sm:$0xff]  ;;  %v7769_v23 = vsel %vm7761_vm10, %v7755_v48, %v7765_v54  ;;  %v7789_v52 = vld [vmem:[%s31737_s12 + $0x90] sm:$0xff]  ;;  %vm17012_vm10 = vcmask 130048  }
 0x802   :  { %10982 = vmatprep.subr.bf16.mxu0 %v19759_v13  ;;  %11064 = vmatprep.subr.bf16.mxu1 %v19761_v14  ;;  %v19857_v13 = vcombine.high %v8204_v10, %v8212_v63  ;;  %v8219_v14 = vld [vmem:[%s31737_s12 + $0xe00] sm:$0xff]  ;;  %v7782_v7 = vld [vmem:[%s31737_s12 + $0x58] sm:$0xff]  ;;  %v7853_v48 = vld [vmem:[%s31737_s12 + $0x290] sm:$0xff] }
 0x803   :  { %v19870_v35 = vcombine.low %v8219_v14, %v8227_v41  ;;  %v7877_v54 = vld [vmem:[%s31737_s12 + $0x350] sm:$0xff] }
 0x805   :  { %10983 = vmatpush1.bf16.msra.mxu0 %v19758_v22  ;;  %11065 = vmatpush1.bf16.msra.mxu1 %v19760_v16  ;;  %v19856_v22 = vcombine.low %v8204_v10, %v8212_v63  ;;  %v19871_v16 = vcombine.high %v8219_v14, %v8227_v41  ;;  %v7797_v10 = vld [vmem:[%s31737_s12 + $0xd0] sm:$0xff]  ;;  %v7790_v63 = vld [vmem:[%s31737_s12 + $0x98] sm:$0xff] }
 0x806   :  { %10984 = vmatprep.subr.bf16.mxu0 %v19775_v56  ;;  %11066 = vmatprep.subr.bf16.mxu1 %v19777_v29  ;;  %v19873_v56 = vcombine.high %v8220_v15, %v8228_v18  ;;  %v8235_v29 = vld [vmem:[%s31737_s12 + $0xe80] sm:$0xff]  ;;  %v19443_v14 = vcombine.high %v7789_v52, %v7797_v10 }
 0x809   :  { %10985 = vmatpush1.bf16.msra.mxu0 %v19774_v28  ;;  %11067 = vmatpush1.bf16.msra.mxu1 %v19776_v38  ;;  %v19872_v28 = vcombine.low %v8220_v15, %v8228_v18  ;;  %v19887_v38 = vcombine.high %v8235_v29, %v8243_v30  ;;  %v7805_v15 = vld [vmem:[%s31737_s12 + $0x110] sm:$0xff] }
 0x80a   :  { %10986 = vmatprep.subr.bf16.mxu0 %v19791_v1  ;;  %11068 = vmatprep.subr.bf16.mxu1 %v19793_v39  ;;  %v19889_v1 = vcombine.high %v8236_v32, %v8244_v33  ;;  %v8251_v39 = vld [vmem:[%s31737_s12 + $0xf00] sm:$0xff]  ;;  %v7813_v18 = vld [vmem:[%s31737_s12 + $0x150] sm:$0xff] }
 0x80d   :  { %10987 = vmatpush1.bf16.msra.mxu0 %v19790_v21  ;;  %11069 = vmatpush1.bf16.msra.mxu1 %v19792_v46  ;;  %v19886_v21 = vcombine.low %v8235_v29, %v8243_v30  ;;  %v19888_v46 = vcombine.low %v8236_v32, %v8244_v33  ;;  %v19459_v29 = vcombine.high %v7805_v15, %v7813_v18  ;;  %v7821_v32 = vld [vmem:[%s31737_s12 + $0x190] sm:$0xff] }
 0x80e   :  { %10988 = vmatprep.subr.bf16.mxu0 %v19807_v59  ;;  %11070 = vmatprep.subr.bf16.mxu1 %v19809_v50  ;;  %v19903_v59 = vcombine.high %v8251_v39, %v8259_v40  ;;  %v8267_v50 = vld [vmem:[%s31737_s12 + $0xf80] sm:$0xff]  ;;  %v7829_v33 = vld [vmem:[%s31737_s12 + $0x1d0] sm:$0xff] }
 0x811   :  { %10989 = vmatpush1.bf16.msra.mxu0 %v19806_v43  ;;  %11071 = vmatpush1.bf16.msra.mxu1 %v19808_v55  ;;  %v19902_v43 = vcombine.low %v8251_v39, %v8259_v40  ;;  %v19904_v55 = vcombine.low %v8252_v44, %v8260_v3  ;;  %v19475_v39 = vcombine.high %v7821_v32, %v7829_v33  ;;  %v7837_v40 = vld [vmem:[%s31737_s12 + $0x210] sm:$0xff]  ;;  %v7838_v3 = vld [vmem:[%s31737_s12 + $0x218] sm:$0xff] }
 0x812   :  { %10990 = vmatprep.subr.bf16.mxu0 %v19823_v34  ;;  %11072 = vmatprep.subr.bf16.mxu1 %v19825_v60  ;;  %v19919_v34 = vcombine.high %v8267_v50, %v8275_v17  ;;  %v7773_v60 = vld [vmem:[%s31737_s12 + $0x10] sm:$0xff] }
 0x813   :  { %v7845_v44 = vld [vmem:[%s31737_s12 + $0x250] sm:$0xff] }
 0x815   :  { %10991 = vmatpush1.bf16.msra.mxu0 %v19822_v4  ;;  %11073 = vmatpush1.bf16.msra.mxu1 %v19824_v8  ;;  %v19918_v4 = vcombine.low %v8267_v50, %v8275_v17  ;;  %v19920_v8 = vcombine.low %v8268_v61, %v8276_v53  ;;  %v7861_v17 = vld [vmem:[%s31737_s12 + $0x2d0] sm:$0xff]  ;;  %v7854_v61 = vld [vmem:[%s31737_s12 + $0x298] sm:$0xff] }
 0x816   :  { %10992 = vmatprep.subr.bf16.mxu0 %v19839_v31  ;;  %11074 = vmatprep.subr.bf16.mxu1 %v19841_v9  ;;  %v19427_v31 = vcombine.high %v7773_v60, %v7781_v0  ;;  %v19429_v9 = vcombine.high %v7774_v6, %v7782_v7  ;;  %v7862_v53 = vld [vmem:[%s31737_s12 + $0x2d8] sm:$0xff] }
 0x819   :  { %10993 = vmatpush1.bf16.msra.mxu0 %v19838_v27  ;;  %11075 = vmatpush1.bf16.msra.mxu1 %v19840_v11  ;;  %v7798_v27 = vld [vmem:[%s31737_s12 + $0xd8] sm:$0xff]  ;;  %v19426_v11 = vcombine.low %v7773_v60, %v7781_v0  ;;  %v7869_v60 = vld [vmem:[%s31737_s12 + $0x310] sm:$0xff] }
 0x81a   :  { %10994 = vmatprep.subr.bf16.mxu0 %v19855_v12  ;;  %11076 = vmatprep.subr.bf16.mxu1 %v19857_v13  ;;  %v27755_v12 = vpack.c.bf16 %v7769_v23, %v7769_v23  ;;  %v19428_v13 = vcombine.low %v7774_v6, %v7782_v7  ;;  %v19445_v41 = vcombine.high %v7790_v63, %v7798_v27  ;;  %v7870_v0 = vld [vmem:[%s31737_s12 + $0x318] sm:$0xff]  ;;  %v7893_v23 = vld [vmem:[%s31737_s12 + $0x3d0] sm:$0xff] }
 0x81b   :  { %v7878_v6 = vld [vmem:[%s31737_s12 + $0x358] sm:$0xff]  ;;  %v19506_v7 = vcombine.low %v7853_v48, %v7861_v17 }
 0x81d   :  { %10995 = vmatpush1.bf16.msra.mxu0 %v19854_v19  ;;  %11077 = vmatpush1.bf16.msra.mxu1 %v19856_v22  ;;  %v7806_v19 = vld [vmem:[%s31737_s12 + $0x118] sm:$0xff] }
 0x81e   :  { %10996 = vmatprep.subr.bf16.mxu0 %v19871_v16  ;;  %11078 = vmatprep.subr.bf16.mxu1 %v19873_v56  ;;  %v7814_v22 = vld [vmem:[%s31737_s12 + $0x158] sm:$0xff]  ;;  %v19442_v16 = vcombine.low %v7789_v52, %v7797_v10  ;;  %v19444_v56 = vcombine.low %v7790_v63, %v7798_v27  ;;  %v19522_v63 = vcombine.low %v7869_v60, %v7877_v54 }
 0x81f   :  { %v19461_v30 = vcombine.high %v7806_v19, %v7814_v22  ;;  %v7886_v52 = vld [vmem:[%s31737_s12 + $0x398] sm:$0xff]  ;;  %v19524_v27 = vcombine.low %v7870_v0, %v7878_v6 }
 0x820   :  { %v7894_v10 = vld [vmem:[%s31737_s12 + $0x3d8] sm:$0xff] }
 0x821   :  { %10997 = vmatpush1.bf16.msra.mxu0 %v19870_v35  ;;  %11079 = vmatpush1.bf16.msra.mxu1 %v19872_v28  ;;  %v7822_v35 = vld [vmem:[%s31737_s12 + $0x198] sm:$0xff] }
 0x822   :  { %10998 = vmatprep.subr.bf16.mxu0 %v19887_v38  ;;  %11080 = vmatprep.subr.bf16.mxu1 %v19889_v1  ;;  %v7830_v28 = vld [vmem:[%s31737_s12 + $0x1d8] sm:$0xff]  ;;  %v19458_v38 = vcombine.low %v7805_v15, %v7813_v18  ;;  %v19460_v1 = vcombine.low %v7806_v19, %v7814_v22  ;;  %v19540_v22 = vcombine.low %v7886_v52, %v7894_v10 }
 0x823   :  { %v19477_v36 = vcombine.high %v7822_v35, %v7830_v28  ;;  %v7902_v15 = vld [vmem:[%s31737_s12 + $0x418] sm:$0xff] }
 0x824   :  { %v7910_v18 = vld [vmem:[%s31737_s12 + $0x458] sm:$0xff] }
 0x825   :  { %10999 = vmatpush1.bf16.msra.mxu0 %v19886_v21  ;;  %11081 = vmatpush1.bf16.msra.mxu1 %v19888_v46  ;;  %v7846_v21 = vld [vmem:[%s31737_s12 + $0x258] sm:$0xff]  ;;  %v19474_v46 = vcombine.low %v7821_v32, %v7829_v33 }
 0x826   :  { %11000 = vmatprep.subr.bf16.mxu0 %v19903_v59  ;;  %11082 = vmatprep.subr.bf16.mxu1 %v19905_v42  ;;  %v19476_v59 = vcombine.low %v7822_v35, %v7830_v28  ;;  %v19491_v42 = vcombine.high %v7837_v40, %v7845_v44  ;;  %v19493_v50 = vcombine.high %v7838_v3, %v7846_v21  ;;  %v7918_v32 = vld [vmem:[%s31737_s12 + $0x498] sm:$0xff] }
 0x827   :  { %v7926_v33 = vld [vmem:[%s31737_s12 + $0x4d8] sm:$0xff]  ;;  %v19556_v28 = vcombine.low %v7902_v15, %v7910_v18 }
 0x829   :  { %11001 = vmatpush1.bf16.msra.mxu0 %v19902_v43  ;;  %11083 = vmatpush1.bf16.msra.mxu1 %v19904_v55  ;;  %v19490_v43 = vcombine.low %v7837_v40, %v7845_v44  ;;  %v19492_v55 = vcombine.low %v7838_v3, %v7846_v21  ;;  %v7934_v40 = vld [vmem:[%s31737_s12 + $0x518] sm:$0xff]  ;;  %v19572_v21 = vcombine.low %v7918_v32, %v7926_v33 }
 0x82a   :  { %11002 = vmatprep.subr.bf16.mxu0 %v19919_v34  ;;  %11084 = vmatprep.subr.bf16.mxu1 %v19921_v20  ;;  %v19507_v34 = vcombine.high %v7853_v48, %v7861_v17  ;;  %v19509_v20 = vcombine.high %v7854_v61, %v7862_v53  ;;  %v7942_v44 = vld [vmem:[%s31737_s12 + $0x558] sm:$0xff] }
 0x82b   :  { %v7950_v48 = vld [vmem:[%s31737_s12 + $0x598] sm:$0xff] }
 0x82c   :  { %v7958_v17 = vld [vmem:[%s31737_s12 + $0x5d8] sm:$0xff] }
 0x82d   :  { %11003 = vmatpush1.bf16.msra.mxu0 %v19918_v4  ;;  %11085 = vmatpush1.bf16.msra.mxu1 %v19920_v8  ;;  %v19508_v4 = vcombine.low %v7854_v61, %v7862_v53  ;;  %v19523_v8 = vcombine.high %v7869_v60, %v7877_v54  ;;  %v19588_v53 = vcombine.low %v7934_v40, %v7942_v44  ;;  %v7966_v60 = vld [vmem:[%s31737_s12 + $0x618] sm:$0xff] }
 0x82e   :  { %11095 = vmatprep.subr.bf16.mxu0 %v19427_v31  ;;  %11177 = vmatprep.subr.bf16.mxu1 %v19429_v9  ;;  %v19525_v31 = vcombine.high %v7870_v0, %v7878_v6  ;;  %v7885_v9 = vld [vmem:[%s31737_s12 + $0x390] sm:$0xff]  ;;  %v7974_v54 = vld [vmem:[%s31737_s12 + $0x658] sm:$0xff]  ;;  %v19604_v6 = vcombine.low %v7950_v48, %v7958_v17 }
 0x82f   :  { %v19538_v19 = vcombine.low %v7885_v9, %v7893_v23 }
 0x830   :  { %11005 = vmatmul.mubr.bf16.vlgmr.msra.gmra.mrb[32].mxu0 %v27755_v12  ;;  %11087 = vmatmul.mubr.bf16.vlgmr.msra.gmra.mrb[32].mxu1 %v27755_v12 }
 0x831   :  { %11096 = vmatpush1.bf16.msra.mxu0 %v19426_v11  ;;  %11127 = vmatprep.mubr.bf16.mxu0 %v27548_v25  ;;  %v19539_v11 = vcombine.high %v7885_v9, %v7893_v23  ;;  %v7982_v9 = vld [vmem:[%s31737_s12 + $0x698] sm:$0xff] }
 0x832   :  { %11178 = vmatpush1.bf16.msra.mxu1 %v19428_v13  ;;  %11209 = vmatprep.mubr.bf16.mxu1 %v27548_v25  ;;  %v19541_v13 = vcombine.high %v7886_v52, %v7894_v10  ;;  %v7990_v23 = vld [vmem:[%s31737_s12 + $0x6d8] sm:$0xff]  ;;  %v19620_v10 = vcombine.low %v7966_v60, %v7974_v54 }
 0x833   :  { %11097 = vmatprep.subr.bf16.mxu0 %v19443_v14  ;;  %11179 = vmatprep.subr.bf16.mxu1 %v19445_v41  ;;  %v7901_v14 = vld [vmem:[%s31737_s12 + $0x410] sm:$0xff] }
 0x834   :  { %v7909_v41 = vld [vmem:[%s31737_s12 + $0x450] sm:$0xff] }
 0x835   :  { %11098 = vmatpush1.bf16.msra.mxu0 %v19442_v16  ;;  %v19555_v16 = vcombine.high %v7901_v14, %v7909_v41  ;;  %v19554_v35 = vcombine.low %v7901_v14, %v7909_v41  ;;  %v7998_v14 = vld [vmem:[%s31737_s12 + $0x718] sm:$0xff] }
 0x836   :  { %11180 = vmatpush1.bf16.msra.mxu1 %v19444_v56  ;;  %11099 = vmatprep.subr.bf16.mxu0 %v19459_v29  ;;  %v19557_v56 = vcombine.high %v7902_v15, %v7910_v18  ;;  %v7917_v29 = vld [vmem:[%s31737_s12 + $0x490] sm:$0xff]  ;;  %v8006_v41 = vld [vmem:[%s31737_s12 + $0x758] sm:$0xff]  ;;  %v19636_v18 = vcombine.low %v7982_v9, %v7990_v23 }
 0x837   :  { %11181 = vmatprep.subr.bf16.mxu1 %v19461_v30  ;;  %v7925_v30 = vld [vmem:[%s31737_s12 + $0x4d0] sm:$0xff] }
 0x838   :  { %v19570_v3 = vcombine.low %v7917_v29, %v7925_v30 }
 0x839   :  { %11100 = vmatpush1.bf16.msra.mxu0 %v19458_v38  ;;  %v19571_v38 = vcombine.high %v7917_v29, %v7925_v30  ;;  %v8014_v29 = vld [vmem:[%s31737_s12 + $0x798] sm:$0xff] }
 0x83a   :  { %11182 = vmatpush1.bf16.msra.mxu1 %v19460_v1  ;;  %11101 = vmatprep.subr.bf16.mxu0 %v19475_v39  ;;  %v19573_v1 = vcombine.high %v7918_v32, %v7926_v33  ;;  %v7933_v39 = vld [vmem:[%s31737_s12 + $0x510] sm:$0xff]  ;;  %v8022_v30 = vld [vmem:[%s31737_s12 + $0x7d8] sm:$0xff]  ;;  %v19652_v33 = vcombine.low %v7998_v14, %v8006_v41 }
 0x83b   :  { %11183 = vmatprep.subr.bf16.mxu1 %v19477_v36  ;;  %v7941_v36 = vld [vmem:[%s31737_s12 + $0x550] sm:$0xff] }
 0x83c   :  { %v19586_v61 = vcombine.low %v7933_v39, %v7941_v36 }
 0x83d   :  { %11102 = vmatpush1.bf16.msra.mxu0 %v19474_v46  ;;  %v19587_v46 = vcombine.high %v7933_v39, %v7941_v36  ;;  %v8030_v39 = vld [vmem:[%s31737_s12 + $0x818] sm:$0xff] }
 0x83e   :  { %11184 = vmatpush1.bf16.msra.mxu1 %v19476_v59  ;;  %11103 = vmatprep.subr.bf16.mxu0 %v19491_v42  ;;  %v19589_v59 = vcombine.high %v7934_v40, %v7942_v44  ;;  %v7949_v42 = vld [vmem:[%s31737_s12 + $0x590] sm:$0xff]  ;;  %v8038_v36 = vld [vmem:[%s31737_s12 + $0x858] sm:$0xff]  ;;  %v19668_v44 = vcombine.low %v8014_v29, %v8022_v30 }
 0x83f   :  { %11185 = vmatprep.subr.bf16.mxu1 %v19493_v50  ;;  %v7957_v50 = vld [vmem:[%s31737_s12 + $0x5d0] sm:$0xff] }
 0x840   :  { %v19602_v0 = vcombine.low %v7949_v42, %v7957_v50 }
 0x841   :  { %11104 = vmatpush1.bf16.msra.mxu0 %v19490_v43  ;;  %v19603_v43 = vcombine.high %v7949_v42, %v7957_v50  ;;  %v8046_v50 = vld [vmem:[%s31737_s12 + $0x898] sm:$0xff] }
 0x842   :  { %11186 = vmatpush1.bf16.msra.mxu1 %v19492_v55  ;;  %11105 = vmatprep.subr.bf16.mxu0 %v19507_v34  ;;  %v19605_v55 = vcombine.high %v7950_v48, %v7958_v17  ;;  %v7965_v34 = vld [vmem:[%s31737_s12 + $0x610] sm:$0xff]  ;;  %v8054_v48 = vld [vmem:[%s31737_s12 + $0x8d8] sm:$0xff]  ;;  %v19684_v17 = vcombine.low %v8030_v39, %v8038_v36 }
 0x843   :  { %11187 = vmatprep.subr.bf16.mxu1 %v19509_v20  ;;  %v7973_v20 = vld [vmem:[%s31737_s12 + $0x650] sm:$0xff] }
 0x844   :  { %v19618_v52 = vcombine.low %v7965_v34, %v7973_v20 }
 0x845   :  { %11106 = vmatpush1.bf16.msra.mxu0 %v19506_v7  ;;  %v19619_v7 = vcombine.high %v7965_v34, %v7973_v20  ;;  %v8062_v34 = vld [vmem:[%s31737_s12 + $0x918] sm:$0xff] }
 0x846   :  { %11188 = vmatpush1.bf16.msra.mxu1 %v19508_v4  ;;  %11107 = vmatprep.subr.bf16.mxu0 %v19523_v8  ;;  %v19621_v4 = vcombine.high %v7966_v60, %v7974_v54  ;;  %v7981_v8 = vld [vmem:[%s31737_s12 + $0x690] sm:$0xff]  ;;  %v8070_v20 = vld [vmem:[%s31737_s12 + $0x958] sm:$0xff]  ;;  %v19700_v54 = vcombine.low %v8046_v50, %v8054_v48 }
 0x847   :  { %11189 = vmatprep.subr.bf16.mxu1 %v19525_v31  ;;  %v7989_v31 = vld [vmem:[%s31737_s12 + $0x6d0] sm:$0xff] }
 0x848   :  { %v19634_v15 = vcombine.low %v7981_v8, %v7989_v31 }
 0x849   :  { %11108 = vmatpush1.bf16.msra.mxu0 %v19522_v63  ;;  %v19635_v63 = vcombine.high %v7981_v8, %v7989_v31  ;;  %v8078_v8 = vld [vmem:[%s31737_s12 + $0x998] sm:$0xff] }
 0x84a   :  { %11190 = vmatpush1.bf16.msra.mxu1 %v19524_v27  ;;  %11109 = vmatprep.subr.bf16.mxu0 %v19539_v11  ;;  %v19637_v27 = vcombine.high %v7982_v9, %v7990_v23  ;;  %v7997_v11 = vld [vmem:[%s31737_s12 + $0x710] sm:$0xff]  ;;  %v8086_v31 = vld [vmem:[%s31737_s12 + $0x9d8] sm:$0xff]  ;;  %v19716_v23 = vcombine.low %v8062_v34, %v8070_v20 }
 0x84b   :  { %11191 = vmatprep.subr.bf16.mxu1 %v19541_v13  ;;  %v8005_v13 = vld [vmem:[%s31737_s12 + $0x750] sm:$0xff] }
 0x84c   :  { %v19650_v32 = vcombine.low %v7997_v11, %v8005_v13 }
 0x84d   :  { %11110 = vmatpush1.bf16.msra.mxu0 %v19538_v19  ;;  %v19651_v19 = vcombine.high %v7997_v11, %v8005_v13  ;;  %v8094_v11 = vld [vmem:[%s31737_s12 + $0xa18] sm:$0xff] }
 0x84e   :  { %11192 = vmatpush1.bf16.msra.mxu1 %v19540_v22  ;;  %11111 = vmatprep.subr.bf16.mxu0 %v19555_v16  ;;  %v19653_v22 = vcombine.high %v7998_v14, %v8006_v41  ;;  %v8013_v16 = vld [vmem:[%s31737_s12 + $0x790] sm:$0xff]  ;;  %v8102_v13 = vld [vmem:[%s31737_s12 + $0xa58] sm:$0xff]  ;;  %v19732_v41 = vcombine.low %v8078_v8, %v8086_v31 }
 0x84f   :  { %11193 = vmatprep.subr.bf16.mxu1 %v19557_v56  ;;  %v8021_v56 = vld [vmem:[%s31737_s12 + $0x7d0] sm:$0xff] }
 0x850   :  { %v19666_v40 = vcombine.low %v8013_v16, %v8021_v56 }
 0x851   :  { %11112 = vmatpush1.bf16.msra.mxu0 %v19554_v35  ;;  %v19667_v35 = vcombine.high %v8013_v16, %v8021_v56  ;;  %v8110_v16 = vld [vmem:[%s31737_s12 + $0xa98] sm:$0xff] }
 0x852   :  { %11194 = vmatpush1.bf16.msra.mxu1 %v19556_v28  ;;  %11113 = vmatprep.subr.bf16.mxu0 %v19571_v38  ;;  %v19669_v28 = vcombine.high %v8014_v29, %v8022_v30  ;;  %v8029_v38 = vld [vmem:[%s31737_s12 + $0x810] sm:$0xff]  ;;  %v8118_v56 = vld [vmem:[%s31737_s12 + $0xad8] sm:$0xff]  ;;  %v19748_v30 = vcombine.low %v8094_v11, %v8102_v13 }
 0x853   :  { %11195 = vmatprep.subr.bf16.mxu1 %v19573_v1  ;;  %v8037_v1 = vld [vmem:[%s31737_s12 + $0x850] sm:$0xff] }
 0x854   :  { %v19682_v42 = vcombine.low %v8029_v38, %v8037_v1 }
 0x855   :  { %11114 = vmatpush1.bf16.msra.mxu0 %v19570_v3  ;;  %v19683_v3 = vcombine.high %v8029_v38, %v8037_v1  ;;  %v8126_v38 = vld [vmem:[%s31737_s12 + $0xb18] sm:$0xff] }
 0x856   :  { %11196 = vmatpush1.bf16.msra.mxu1 %v19572_v21  ;;  %11115 = vmatprep.subr.bf16.mxu0 %v19587_v46  ;;  %v19685_v21 = vcombine.high %v8030_v39, %v8038_v36  ;;  %v8045_v46 = vld [vmem:[%s31737_s12 + $0x890] sm:$0xff]  ;;  %v8134_v1 = vld [vmem:[%s31737_s12 + $0xb58] sm:$0xff]  ;;  %v19764_v36 = vcombine.low %v8110_v16, %v8118_v56 }
 0x857   :  { %11197 = vmatprep.subr.bf16.mxu1 %v19589_v59  ;;  %v8053_v59 = vld [vmem:[%s31737_s12 + $0x8d0] sm:$0xff] }
 0x858   :  { %v19698_v60 = vcombine.low %v8045_v46, %v8053_v59 }
 0x859   :  { %11116 = vmatpush1.bf16.msra.mxu0 %v19586_v61  ;;  %v19699_v61 = vcombine.high %v8045_v46, %v8053_v59  ;;  %v8142_v46 = vld [vmem:[%s31737_s12 + $0xb98] sm:$0xff] }
 0x85a   :  { %11198 = vmatpush1.bf16.msra.mxu1 %v19588_v53  ;;  %11117 = vmatprep.subr.bf16.mxu0 %v19603_v43  ;;  %v8061_v53 = vld [vmem:[%s31737_s12 + $0x910] sm:$0xff]  ;;  %v8150_v59 = vld [vmem:[%s31737_s12 + $0xbd8] sm:$0xff] }
 0x85b   :  { %11199 = vmatprep.subr.bf16.mxu1 %v19605_v55  ;;  %v8069_v43 = vld [vmem:[%s31737_s12 + $0x950] sm:$0xff]  ;;  %v19701_v55 = vcombine.high %v8046_v50, %v8054_v48  ;;  %v19780_v50 = vcombine.low %v8126_v38, %v8134_v1 }
 0x85c   :  { %v19714_v9 = vcombine.low %v8061_v53, %v8069_v43 }
 0x85d   :  { %11118 = vmatpush1.bf16.msra.mxu0 %v19602_v0  ;;  %v19715_v0 = vcombine.high %v8061_v53, %v8069_v43  ;;  %v8165_v53 = vld [vmem:[%s31737_s12 + $0xc50] sm:$0xff]  ;;  %v8158_v43 = vld [vmem:[%s31737_s12 + $0xc18] sm:$0xff] }
 0x85e   :  { %11200 = vmatpush1.bf16.msra.mxu1 %v19604_v6  ;;  %11119 = vmatprep.subr.bf16.mxu0 %v19619_v7  ;;  %v19717_v6 = vcombine.high %v8062_v34, %v8070_v20  ;;  %v8077_v7 = vld [vmem:[%s31737_s12 + $0x990] sm:$0xff]  ;;  %v19796_v20 = vcombine.low %v8142_v46, %v8150_v59 }
 0x85f   :  { %11201 = vmatprep.subr.bf16.mxu1 %v19621_v4  ;;  %v8085_v4 = vld [vmem:[%s31737_s12 + $0x9d0] sm:$0xff] }
 0x860   :  { %v19730_v14 = vcombine.low %v8077_v7, %v8085_v4 }
 0x861   :  { %11120 = vmatpush1.bf16.msra.mxu0 %v19618_v52  ;;  %v19731_v52 = vcombine.high %v8077_v7, %v8085_v4  ;;  %v8174_v7 = vld [vmem:[%s31737_s12 + $0xc98] sm:$0xff] }
 0x862   :  { %11202 = vmatpush1.bf16.msra.mxu1 %v19620_v10  ;;  %11121 = vmatprep.subr.bf16.mxu0 %v19635_v63  ;;  %v19733_v10 = vcombine.high %v8078_v8, %v8086_v31  ;;  %v8093_v63 = vld [vmem:[%s31737_s12 + $0xa10] sm:$0xff]  ;;  %v8182_v4 = vld [vmem:[%s31737_s12 + $0xcd8] sm:$0xff] }
 0x863   :  { %11203 = vmatprep.subr.bf16.mxu1 %v19637_v27  ;;  %v8101_v27 = vld [vmem:[%s31737_s12 + $0xa50] sm:$0xff] }
 0x864   :  { %v19746_v29 = vcombine.low %v8093_v63, %v8101_v27 }
 0x865   :  { %11122 = vmatpush1.bf16.msra.mxu0 %v19634_v15  ;;  %v19747_v15 = vcombine.high %v8093_v63, %v8101_v27  ;;  %v8190_v63 = vld [vmem:[%s31737_s12 + $0xd18] sm:$0xff] }
 0x866   :  { %11204 = vmatpush1.bf16.msra.mxu1 %v19636_v18  ;;  %11123 = vmatprep.subr.bf16.mxu0 %v19651_v19  ;;  %v19749_v18 = vcombine.high %v8094_v11, %v8102_v13  ;;  %v8109_v19 = vld [vmem:[%s31737_s12 + $0xa90] sm:$0xff]  ;;  %v8198_v27 = vld [vmem:[%s31737_s12 + $0xd58] sm:$0xff]  ;;  %v19828_v13 = vcombine.low %v8174_v7, %v8182_v4 }
 0x867   :  { %11205 = vmatprep.subr.bf16.mxu1 %v19653_v22  ;;  %v8117_v22 = vld [vmem:[%s31737_s12 + $0xad0] sm:$0xff] }
 0x868   :  { %v19762_v39 = vcombine.low %v8109_v19, %v8117_v22 }
 0x869   :  { %11124 = vmatpush1.bf16.msra.mxu0 %v19650_v32  ;;  %v19763_v32 = vcombine.high %v8109_v19, %v8117_v22  ;;  %v8206_v19 = vld [vmem:[%s31737_s12 + $0xd98] sm:$0xff] }
 0x86a   :  { %11206 = vmatpush1.bf16.msra.mxu1 %v19652_v33  ;;  %11125 = vmatprep.subr.bf16.mxu0 %v19667_v35  ;;  %v19765_v33 = vcombine.high %v8110_v16, %v8118_v56  ;;  %v8125_v35 = vld [vmem:[%s31737_s12 + $0xb10] sm:$0xff]  ;;  %v8214_v22 = vld [vmem:[%s31737_s12 + $0xdd8] sm:$0xff]  ;;  %v19844_v56 = vcombine.low %v8190_v63, %v8198_v27 }
 0x86b   :  { %11207 = vmatprep.subr.bf16.mxu1 %v19669_v28  ;;  %v8133_v28 = vld [vmem:[%s31737_s12 + $0xb50] sm:$0xff] }
 0x86d   :  { %11126 = vmatpush1.bf16.msra.mxu0 %v19666_v40  ;;  %v19779_v40 = vcombine.high %v8125_v35, %v8133_v28 }
 0x86e   :  { %11208 = vmatpush1.bf16.msra.mxu1 %v19668_v44  ;;  %11136 = vmatprep.subr.bf16.mxu0 %v19683_v3  ;;  %v19781_v44 = vcombine.high %v8126_v38, %v8134_v1  ;;  %v8141_v3 = vld [vmem:[%s31737_s12 + $0xb90] sm:$0xff]  ;;  %v19860_v1 = vcombine.low %v8206_v19, %v8214_v22 }
 0x86f   :  { %11218 = vmatprep.subr.bf16.mxu1 %v19685_v21  ;;  %v8149_v21 = vld [vmem:[%s31737_s12 + $0xbd0] sm:$0xff] }
 0x870   :  { %11128 = vmatmul.mubr.bf16.vlgmr.msra.gmra.mrb[36].mxu0 %v27550_v37  ;;  %v19795_v48 = vcombine.high %v8141_v3, %v8149_v21  ;;  %v19794_v34 = vcombine.low %v8141_v3, %v8149_v21  ;;  %v8238_v3 = vld [vmem:[%s31737_s12 + $0xe98] sm:$0xff] }
 0x871   :  { %11210 = vmatmul.mubr.bf16.vlgmr.msra.gmra.mrb[36].mxu1 %v27550_v37  ;;  %11137 = vmatpush1.bf16.msra.mxu0 %v19682_v42  ;;  %v19778_v42 = vcombine.low %v8125_v35, %v8133_v28  ;;  %v8222_v35 = vld [vmem:[%s31737_s12 + $0xe18] sm:$0xff] }
 0x872   :  { %11168 = vmatprep.mubr.bf16.mxu0 %v27568_v45  ;;  %11219 = vmatpush1.bf16.msra.mxu1 %v19684_v17  ;;  %v19797_v17 = vcombine.high %v8142_v46, %v8150_v59  ;;  %v8230_v28 = vld [vmem:[%s31737_s12 + $0xe58] sm:$0xff] }
 0x873   :  { %11250 = vmatprep.mubr.bf16.mxu1 %v27568_v45  ;;  %11138 = vmatprep.subr.bf16.mxu0 %v19699_v61  ;;  %v8157_v61 = vld [vmem:[%s31737_s12 + $0xc10] sm:$0xff]  ;;  %v8246_v21 = vld [vmem:[%s31737_s12 + $0xed8] sm:$0xff]  ;;  %v19876_v59 = vcombine.low %v8222_v35, %v8230_v28 }
 0x874   :  { %11220 = vmatprep.subr.bf16.mxu1 %v19701_v55  ;;  %v8166_v55 = vld [vmem:[%s31737_s12 + $0xc58] sm:$0xff]  ;;  %v19810_v8 = vcombine.low %v8157_v61, %v8165_v53 }
 0x875   :  { %11139 = vmatpush1.bf16.msra.mxu0 %v19698_v60  ;;  %v19811_v60 = vcombine.high %v8157_v61, %v8165_v53  ;;  %v19812_v31 = vcombine.low %v8158_v43, %v8166_v55  ;;  %v8254_v61 = vld [vmem:[%s31737_s12 + $0xf18] sm:$0xff] }
 0x876   :  { %11221 = vmatpush1.bf16.msra.mxu1 %v19700_v54  ;;  %11140 = vmatprep.subr.bf16.mxu0 %v19715_v0  ;;  %v19813_v54 = vcombine.high %v8158_v43, %v8166_v55  ;;  %v8173_v0 = vld [vmem:[%s31737_s12 + $0xc90] sm:$0xff]  ;;  %v8262_v53 = vld [vmem:[%s31737_s12 + $0xf58] sm:$0xff]  ;;  %v19892_v55 = vcombine.low %v8238_v3, %v8246_v21 }
 0x877   :  { %11222 = vmatprep.subr.bf16.mxu1 %v19717_v6  ;;  %v8181_v6 = vld [vmem:[%s31737_s12 + $0xcd0] sm:$0xff] }
 0x878   :  { %v19826_v11 = vcombine.low %v8173_v0, %v8181_v6 }
 0x879   :  { %11141 = vmatpush1.bf16.msra.mxu0 %v19714_v9  ;;  %v19827_v9 = vcombine.high %v8173_v0, %v8181_v6  ;;  %v8270_v0 = vld [vmem:[%s31737_s12 + $0xf98] sm:$0xff] }
 0x87a   :  { %11223 = vmatpush1.bf16.msra.mxu1 %v19716_v23  ;;  %11142 = vmatprep.subr.bf16.mxu0 %v19731_v52  ;;  %v19829_v23 = vcombine.high %v8174_v7, %v8182_v4  ;;  %v8189_v52 = vld [vmem:[%s31737_s12 + $0xd10] sm:$0xff]  ;;  %v8278_v6 = vld [vmem:[%s31737_s12 + $0xfd8] sm:$0xff]  ;;  %v19908_v4 = vcombine.low %v8254_v61, %v8262_v53 }
 0x87b   :  { %11224 = vmatprep.subr.bf16.mxu1 %v19733_v10  ;;  %v8197_v10 = vld [vmem:[%s31737_s12 + $0xd50] sm:$0xff] }
 0x87c   :  { %v19842_v16 = vcombine.low %v8189_v52, %v8197_v10 }
 0x87d   :  { %11143 = vmatpush1.bf16.msra.mxu0 %v19730_v14  ;;  %v19843_v14 = vcombine.high %v8189_v52, %v8197_v10  ;;  %v7776_v52 = vld [vmem:[%s31737_s12 + $0x28] sm:$0xff] }
 0x87e   :  { %11225 = vmatpush1.bf16.msra.mxu1 %v19732_v41  ;;  %11144 = vmatprep.subr.bf16.mxu0 %v19747_v15  ;;  %v19845_v41 = vcombine.high %v8190_v63, %v8198_v27  ;;  %v8205_v15 = vld [vmem:[%s31737_s12 + $0xd90] sm:$0xff]  ;;  %v7784_v10 = vld [vmem:[%s31737_s12 + $0x68] sm:$0xff]  ;;  %v19924_v27 = vcombine.low %v8270_v0, %v8278_v6 }
 0x87f   :  { %11226 = vmatprep.subr.bf16.mxu1 %v19749_v18  ;;  %v8213_v18 = vld [vmem:[%s31737_s12 + $0xdd0] sm:$0xff] }
 0x880   :  { %v19858_v38 = vcombine.low %v8205_v15, %v8213_v18 }
 0x881   :  { %11145 = vmatpush1.bf16.msra.mxu0 %v19746_v29  ;;  %v19859_v29 = vcombine.high %v8205_v15, %v8213_v18  ;;  %v7792_v18 = vld [vmem:[%s31737_s12 + $0xa8] sm:$0xff] }
 0x882   :  { %11227 = vmatpush1.bf16.msra.mxu1 %v19748_v30  ;;  %11146 = vmatprep.subr.bf16.mxu0 %v19763_v32  ;;  %v19861_v30 = vcombine.high %v8206_v19, %v8214_v22  ;;  %v8221_v32 = vld [vmem:[%s31737_s12 + $0xe10] sm:$0xff]  ;;  %v7800_v19 = vld [vmem:[%s31737_s12 + $0xe8] sm:$0xff]  ;;  %v19432_v22 = vcombine.low %v7776_v52, %v7784_v10 }
 0x883   :  { %11228 = vmatprep.subr.bf16.mxu1 %v19765_v33  ;;  %v8229_v33 = vld [vmem:[%s31737_s12 + $0xe50] sm:$0xff] }
 0x884   :  { %v19874_v46 = vcombine.low %v8221_v32, %v8229_v33 }
 0x885   :  { %11147 = vmatpush1.bf16.msra.mxu0 %v19762_v39  ;;  %v19875_v39 = vcombine.high %v8221_v32, %v8229_v33  ;;  %v7808_v32 = vld [vmem:[%s31737_s12 + $0x128] sm:$0xff] }
 0x886   :  { %11229 = vmatpush1.bf16.msra.mxu1 %v19764_v36  ;;  %11148 = vmatprep.subr.bf16.mxu0 %v19779_v40  ;;  %v19877_v36 = vcombine.high %v8222_v35, %v8230_v28  ;;  %v8237_v40 = vld [vmem:[%s31737_s12 + $0xe90] sm:$0xff]  ;;  %v7816_v33 = vld [vmem:[%s31737_s12 + $0x168] sm:$0xff]  ;;  %v19448_v28 = vcombine.low %v7792_v18, %v7800_v19 }
 0x887   :  { %11230 = vmatprep.subr.bf16.mxu1 %v19781_v44  ;;  %v8245_v44 = vld [vmem:[%s31737_s12 + $0xed0] sm:$0xff] }
 0x888   :  { %v19890_v43 = vcombine.low %v8237_v40, %v8245_v44 }
 0x889   :  { %11149 = vmatpush1.bf16.msra.mxu0 %v19778_v42  ;;  %v19891_v42 = vcombine.high %v8237_v40, %v8245_v44  ;;  %v7824_v40 = vld [vmem:[%s31737_s12 + $0x1a8] sm:$0xff] }
 0x88a   :  { %11231 = vmatpush1.bf16.msra.mxu1 %v19780_v50  ;;  %11150 = vmatprep.subr.bf16.mxu0 %v19795_v48  ;;  %v19893_v50 = vcombine.high %v8238_v3, %v8246_v21  ;;  %v8253_v48 = vld [vmem:[%s31737_s12 + $0xf10] sm:$0xff]  ;;  %v7832_v44 = vld [vmem:[%s31737_s12 + $0x1e8] sm:$0xff]  ;;  %v19464_v21 = vcombine.low %v7808_v32, %v7816_v33 }
 0x88b   :  { %11232 = vmatprep.subr.bf16.mxu1 %v19797_v17  ;;  %v8261_v17 = vld [vmem:[%s31737_s12 + $0xf50] sm:$0xff] }
 0x88c   :  { %v19906_v7 = vcombine.low %v8253_v48, %v8261_v17 }
 0x88d   :  { %11151 = vmatpush1.bf16.msra.mxu0 %v19794_v34  ;;  %v19907_v34 = vcombine.high %v8253_v48, %v8261_v17  ;;  %v7840_v48 = vld [vmem:[%s31737_s12 + $0x228] sm:$0xff] }
 0x88e   :  { %11233 = vmatpush1.bf16.msra.mxu1 %v19796_v20  ;;  %11152 = vmatprep.subr.bf16.mxu0 %v19811_v60  ;;  %v19909_v20 = vcombine.high %v8254_v61, %v8262_v53  ;;  %v8269_v60 = vld [vmem:[%s31737_s12 + $0xf90] sm:$0xff]  ;;  %v7848_v17 = vld [vmem:[%s31737_s12 + $0x268] sm:$0xff]  ;;  %v19480_v53 = vcombine.low %v7824_v40, %v7832_v44 }
 0x88f   :  { %11234 = vmatprep.subr.bf16.mxu1 %v19813_v54  ;;  %v8277_v54 = vld [vmem:[%s31737_s12 + $0xfd0] sm:$0xff] }
 0x890   :  { %v19922_v63 = vcombine.low %v8269_v60, %v8277_v54 }
 0x891   :  { %11153 = vmatpush1.bf16.msra.mxu0 %v19810_v8  ;;  %v19923_v8 = vcombine.high %v8269_v60, %v8277_v54  ;;  %v7856_v60 = vld [vmem:[%s31737_s12 + $0x2a8] sm:$0xff] }
 0x892   :  { %11235 = vmatpush1.bf16.msra.mxu1 %v19812_v31  ;;  %11154 = vmatprep.subr.bf16.mxu0 %v19827_v9  ;;  %v19925_v31 = vcombine.high %v8270_v0, %v8278_v6  ;;  %v7775_v9 = vld [vmem:[%s31737_s12 + $0x20] sm:$0xff]  ;;  %v7864_v54 = vld [vmem:[%s31737_s12 + $0x2e8] sm:$0xff]  ;;  %v19496_v6 = vcombine.low %v7840_v48, %v7848_v17 }
 0x893   :  { %11236 = vmatprep.subr.bf16.mxu1 %v19829_v23  ;;  %v7783_v23 = vld [vmem:[%s31737_s12 + $0x60] sm:$0xff] }
 0x894   :  { %v19430_v15 = vcombine.low %v7775_v9, %v7783_v23 }
 0x895   :  { %11155 = vmatpush1.bf16.msra.mxu0 %v19826_v11  ;;  %v19431_v11 = vcombine.high %v7775_v9, %v7783_v23  ;;  %v7872_v9 = vld [vmem:[%s31737_s12 + $0x328] sm:$0xff] }
 0x896   :  { %11237 = vmatpush1.bf16.msra.mxu1 %v19828_v13  ;;  %11156 = vmatprep.subr.bf16.mxu0 %v19843_v14  ;;  %v19433_v13 = vcombine.high %v7776_v52, %v7784_v10  ;;  %v7791_v14 = vld [vmem:[%s31737_s12 + $0xa0] sm:$0xff]  ;;  %v7880_v23 = vld [vmem:[%s31737_s12 + $0x368] sm:$0xff]  ;;  %v19512_v10 = vcombine.low %v7856_v60, %v7864_v54 }
 0x897   :  { %11238 = vmatprep.subr.bf16.mxu1 %v19845_v41  ;;  %v7799_v41 = vld [vmem:[%s31737_s12 + $0xe0] sm:$0xff] }
 0x898   :  { %v19446_v35 = vcombine.low %v7791_v14, %v7799_v41 }
 0x899   :  { %11157 = vmatpush1.bf16.msra.mxu0 %v19842_v16  ;;  %v19447_v16 = vcombine.high %v7791_v14, %v7799_v41  ;;  %v7888_v14 = vld [vmem:[%s31737_s12 + $0x3a8] sm:$0xff] }
 0x89a   :  { %11239 = vmatpush1.bf16.msra.mxu1 %v19844_v56  ;;  %11158 = vmatprep.subr.bf16.mxu0 %v19859_v29  ;;  %v7807_v56 = vld [vmem:[%s31737_s12 + $0x120] sm:$0xff]  ;;  %v7896_v41 = vld [vmem:[%s31737_s12 + $0x3e8] sm:$0xff] }
 0x89b   :  { %11240 = vmatprep.subr.bf16.mxu1 %v19861_v30  ;;  %v7815_v29 = vld [vmem:[%s31737_s12 + $0x160] sm:$0xff]  ;;  %v19449_v30 = vcombine.high %v7792_v18, %v7800_v19  ;;  %v19528_v18 = vcombine.low %v7872_v9, %v7880_v23 }
 0x89c   :  { %v19462_v3 = vcombine.low %v7807_v56, %v7815_v29 }
 0x89d   :  { %11159 = vmatpush1.bf16.msra.mxu0 %v19858_v38  ;;  %v19463_v38 = vcombine.high %v7807_v56, %v7815_v29  ;;  %v7911_v56 = vld [vmem:[%s31737_s12 + $0x460] sm:$0xff]  ;;  %v7904_v29 = vld [vmem:[%s31737_s12 + $0x428] sm:$0xff] }
 0x89e   :  { %11241 = vmatpush1.bf16.msra.mxu1 %v19860_v1  ;;  %11160 = vmatprep.subr.bf16.mxu0 %v19875_v39  ;;  %v19465_v1 = vcombine.high %v7808_v32, %v7816_v33  ;;  %v7823_v39 = vld [vmem:[%s31737_s12 + $0x1a0] sm:$0xff]  ;;  %v19544_v33 = vcombine.low %v7888_v14, %v7896_v41 }
 0x89f   :  { %11242 = vmatprep.subr.bf16.mxu1 %v19877_v36  ;;  %v7831_v36 = vld [vmem:[%s31737_s12 + $0x1e0] sm:$0xff] }
 0x8a0   :  { %v19478_v61 = vcombine.low %v7823_v39, %v7831_v36 }
 0x8a1   :  { %11161 = vmatpush1.bf16.msra.mxu0 %v19874_v46  ;;  %v19479_v46 = vcombine.high %v7823_v39, %v7831_v36  ;;  %v7920_v39 = vld [vmem:[%s31737_s12 + $0x4a8] sm:$0xff] }
 0x8a2   :  { %11243 = vmatpush1.bf16.msra.mxu1 %v19876_v59  ;;  %11162 = vmatprep.subr.bf16.mxu0 %v19891_v42  ;;  %v19481_v59 = vcombine.high %v7824_v40, %v7832_v44  ;;  %v7839_v42 = vld [vmem:[%s31737_s12 + $0x220] sm:$0xff]  ;;  %v7928_v36 = vld [vmem:[%s31737_s12 + $0x4e8] sm:$0xff] }
 0x8a3   :  { %11244 = vmatprep.subr.bf16.mxu1 %v19893_v50  ;;  %v7847_v50 = vld [vmem:[%s31737_s12 + $0x260] sm:$0xff] }
 0x8a4   :  { %v19494_v0 = vcombine.low %v7839_v42, %v7847_v50 }
 0x8a5   :  { %11163 = vmatpush1.bf16.msra.mxu0 %v19890_v43  ;;  %v19495_v43 = vcombine.high %v7839_v42, %v7847_v50  ;;  %v7936_v42 = vld [vmem:[%s31737_s12 + $0x528] sm:$0xff] }
 0x8a6   :  { %11245 = vmatpush1.bf16.msra.mxu1 %v19892_v55  ;;  %11164 = vmatprep.subr.bf16.mxu0 %v19907_v34  ;;  %v19497_v55 = vcombine.high %v7840_v48, %v7848_v17  ;;  %v7855_v34 = vld [vmem:[%s31737_s12 + $0x2a0] sm:$0xff]  ;;  %v7944_v50 = vld [vmem:[%s31737_s12 + $0x568] sm:$0xff]  ;;  %v19576_v17 = vcombine.low %v7920_v39, %v7928_v36 }
 0x8a7   :  { %11246 = vmatprep.subr.bf16.mxu1 %v19909_v20  ;;  %v7863_v20 = vld [vmem:[%s31737_s12 + $0x2e0] sm:$0xff] }
 0x8a8   :  { %v19510_v52 = vcombine.low %v7855_v34, %v7863_v20 }
 0x8a9   :  { %11165 = vmatpush1.bf16.msra.mxu0 %v19906_v7  ;;  %v19511_v7 = vcombine.high %v7855_v34, %v7863_v20  ;;  %v7952_v34 = vld [vmem:[%s31737_s12 + $0x5a8] sm:$0xff] }
 0x8aa   :  { %11247 = vmatpush1.bf16.msra.mxu1 %v19908_v4  ;;  %11166 = vmatprep.subr.bf16.mxu0 %v19923_v8  ;;  %v19513_v4 = vcombine.high %v7856_v60, %v7864_v54  ;;  %v7871_v8 = vld [vmem:[%s31737_s12 + $0x320] sm:$0xff]  ;;  %v7960_v20 = vld [vmem:[%s31737_s12 + $0x5e8] sm:$0xff]  ;;  %v19592_v54 = vcombine.low %v7936_v42, %v7944_v50 }
 0x8ab   :  { %11248 = vmatprep.subr.bf16.mxu1 %v19925_v31  ;;  %v7879_v31 = vld [vmem:[%s31737_s12 + $0x360] sm:$0xff] }
 0x8ad   :  { %11167 = vmatpush1.bf16.msra.mxu0 %v19922_v63  ;;  %v19527_v63 = vcombine.high %v7871_v8, %v7879_v31 }
 0x8ae   :  { %11249 = vmatpush1.bf16.msra.mxu1 %v19924_v27  ;;  %11259 = vmatprep.subr.bf16.mxu0 %v19431_v11  ;;  %v19529_v27 = vcombine.high %v7872_v9, %v7880_v23  ;;  %v7887_v11 = vld [vmem:[%s31737_s12 + $0x3a0] sm:$0xff]  ;;  %v19608_v23 = vcombine.low %v7952_v34, %v7960_v20 }
 0x8af   :  { %11341 = vmatprep.subr.bf16.mxu1 %v19433_v13  ;;  %v7895_v13 = vld [vmem:[%s31737_s12 + $0x3e0] sm:$0xff] }
 0x8b0   :  { %11169 = vmatmul.mubr.bf16.vlgmr.msra.gmra.mrb[36].mxu0 %v27755_v12  ;;  %v19543_v19 = vcombine.high %v7887_v11, %v7895_v13  ;;  %v19542_v32 = vcombine.low %v7887_v11, %v7895_v13  ;;  %v7984_v11 = vld [vmem:[%s31737_s12 + $0x6a8] sm:$0xff] }
 0x8b1   :  { %11251 = vmatmul.mubr.bf16.vlgmr.msra.gmra.mrb[36].mxu1 %v27755_v12  ;;  %11260 = vmatpush1.bf16.msra.mxu0 %v19430_v15  ;;  %v19526_v15 = vcombine.low %v7871_v8, %v7879_v31  ;;  %v7968_v8 = vld [vmem:[%s31737_s12 + $0x628] sm:$0xff] }
 0x8b2   :  { %11291 = vmatprep.mubr.bf16.mxu0 %v27548_v25  ;;  %11342 = vmatpush1.bf16.msra.mxu1 %v19432_v22  ;;  %v19545_v22 = vcombine.high %v7888_v14, %v7896_v41  ;;  %v7976_v31 = vld [vmem:[%s31737_s12 + $0x668] sm:$0xff] }
 0x8b3   :  { %11373 = vmatprep.mubr.bf16.mxu1 %v27548_v25  ;;  %11261 = vmatprep.subr.bf16.mxu0 %v19447_v16  ;;  %v7903_v16 = vld [vmem:[%s31737_s12 + $0x420] sm:$0xff]  ;;  %v7992_v13 = vld [vmem:[%s31737_s12 + $0x6e8] sm:$0xff]  ;;  %v19624_v41 = vcombine.low %v7968_v8, %v7976_v31 }
 0x8b4   :  { %11343 = vmatprep.subr.bf16.mxu1 %v19449_v30  ;;  %v7912_v30 = vld [vmem:[%s31737_s12 + $0x468] sm:$0xff]  ;;  %v19558_v40 = vcombine.low %v7903_v16, %v7911_v56 }
 0x8b5   :  { %11262 = vmatpush1.bf16.msra.mxu0 %v19446_v35  ;;  %v19559_v35 = vcombine.high %v7903_v16, %v7911_v56  ;;  %v19560_v44 = vcombine.low %v7904_v29, %v7912_v30  ;;  %v8000_v16 = vld [vmem:[%s31737_s12 + $0x728] sm:$0xff] }
 0x8b6   :  { %11344 = vmatpush1.bf16.msra.mxu1 %v19448_v28  ;;  %11263 = vmatprep.subr.bf16.mxu0 %v19463_v38  ;;  %v19561_v28 = vcombine.high %v7904_v29, %v7912_v30  ;;  %v7919_v38 = vld [vmem:[%s31737_s12 + $0x4a0] sm:$0xff]  ;;  %v8008_v56 = vld [vmem:[%s31737_s12 + $0x768] sm:$0xff]  ;;  %v19640_v30 = vcombine.low %v7984_v11, %v7992_v13 }
 0x8b7   :  { %11345 = vmatprep.subr.bf16.mxu1 %v19465_v1  ;;  %v7927_v1 = vld [vmem:[%s31737_s12 + $0x4e0] sm:$0xff] }
 0x8b8   :  { %v19574_v48 = vcombine.low %v7919_v38, %v7927_v1 }
 0x8b9   :  { %11264 = vmatpush1.bf16.msra.mxu0 %v19462_v3  ;;  %v19575_v3 = vcombine.high %v7919_v38, %v7927_v1  ;;  %v8016_v38 = vld [vmem:[%s31737_s12 + $0x7a8] sm:$0xff] }
 0x8ba   :  { %11346 = vmatpush1.bf16.msra.mxu1 %v19464_v21  ;;  %11265 = vmatprep.subr.bf16.mxu0 %v19479_v46  ;;  %v19577_v21 = vcombine.high %v7920_v39, %v7928_v36  ;;  %v7935_v46 = vld [vmem:[%s31737_s12 + $0x520] sm:$0xff]  ;;  %v8024_v1 = vld [vmem:[%s31737_s12 + $0x7e8] sm:$0xff]  ;;  %v19656_v36 = vcombine.low %v8000_v16, %v8008_v56 }
 0x8bb   :  { %11347 = vmatprep.subr.bf16.mxu1 %v19481_v59  ;;  %v7943_v59 = vld [vmem:[%s31737_s12 + $0x560] sm:$0xff] }
 0x8bc   :  { %v19590_v60 = vcombine.low %v7935_v46, %v7943_v59 }
 0x8bd   :  { %11266 = vmatpush1.bf16.msra.mxu0 %v19478_v61  ;;  %v19591_v61 = vcombine.high %v7935_v46, %v7943_v59  ;;  %v8032_v46 = vld [vmem:[%s31737_s12 + $0x828] sm:$0xff] }
 0x8be   :  { %11348 = vmatpush1.bf16.msra.mxu1 %v19480_v53  ;;  %11267 = vmatprep.subr.bf16.mxu0 %v19495_v43  ;;  %v19593_v53 = vcombine.high %v7936_v42, %v7944_v50  ;;  %v7951_v43 = vld [vmem:[%s31737_s12 + $0x5a0] sm:$0xff]  ;;  %v8040_v59 = vld [vmem:[%s31737_s12 + $0x868] sm:$0xff]  ;;  %v19672_v50 = vcombine.low %v8016_v38, %v8024_v1 }
 0x8bf   :  { %11349 = vmatprep.subr.bf16.mxu1 %v19497_v55  ;;  %v7959_v55 = vld [vmem:[%s31737_s12 + $0x5e0] sm:$0xff] }
 0x8c0   :  { %v19606_v9 = vcombine.low %v7951_v43, %v7959_v55 }
 0x8c1   :  { %11268 = vmatpush1.bf16.msra.mxu0 %v19494_v0  ;;  %v19607_v0 = vcombine.high %v7951_v43, %v7959_v55  ;;  %v8048_v55 = vld [vmem:[%s31737_s12 + $0x8a8] sm:$0xff] }
 0x8c2   :  { %11350 = vmatpush1.bf16.msra.mxu1 %v19496_v6  ;;  %11269 = vmatprep.subr.bf16.mxu0 %v19511_v7  ;;  %v19609_v6 = vcombine.high %v7952_v34, %v7960_v20  ;;  %v7967_v7 = vld [vmem:[%s31737_s12 + $0x620] sm:$0xff]  ;;  %v8056_v34 = vld [vmem:[%s31737_s12 + $0x8e8] sm:$0xff]  ;;  %v19688_v20 = vcombine.low %v8032_v46, %v8040_v59 }
 0x8c3   :  { %11351 = vmatprep.subr.bf16.mxu1 %v19513_v4  ;;  %v7975_v4 = vld [vmem:[%s31737_s12 + $0x660] sm:$0xff] }
 0x8c4   :  { %v19622_v14 = vcombine.low %v7967_v7, %v7975_v4 }
 0x8c5   :  { %11270 = vmatpush1.bf16.msra.mxu0 %v19510_v52  ;;  %v19623_v52 = vcombine.high %v7967_v7, %v7975_v4  ;;  %v8064_v7 = vld [vmem:[%s31737_s12 + $0x928] sm:$0xff] }
 0x8c6   :  { %11352 = vmatpush1.bf16.msra.mxu1 %v19512_v10  ;;  %11271 = vmatprep.subr.bf16.mxu0 %v19527_v63  ;;  %v19625_v10 = vcombine.high %v7968_v8, %v7976_v31  ;;  %v7983_v63 = vld [vmem:[%s31737_s12 + $0x6a0] sm:$0xff]  ;;  %v8072_v4 = vld [vmem:[%s31737_s12 + $0x968] sm:$0xff]  ;;  %v19704_v31 = vcombine.low %v8048_v55, %v8056_v34 }
 0x8c7   :  { %11353 = vmatprep.subr.bf16.mxu1 %v19529_v27  ;;  %v7991_v27 = vld [vmem:[%s31737_s12 + $0x6e0] sm:$0xff] }
 0x8c8   :  { %v19638_v29 = vcombine.low %v7983_v63, %v7991_v27 }
 0x8c9   :  { %11272 = vmatpush1.bf16.msra.mxu0 %v19526_v15  ;;  %v19639_v15 = vcombine.high %v7983_v63, %v7991_v27  ;;  %v8080_v63 = vld [vmem:[%s31737_s12 + $0x9a8] sm:$0xff] }
 0x8ca   :  { %11354 = vmatpush1.bf16.msra.mxu1 %v19528_v18  ;;  %11273 = vmatprep.subr.bf16.mxu0 %v19543_v19  ;;  %v19641_v18 = vcombine.high %v7984_v11, %v7992_v13  ;;  %v7999_v19 = vld [vmem:[%s31737_s12 + $0x720] sm:$0xff]  ;;  %v8088_v27 = vld [vmem:[%s31737_s12 + $0x9e8] sm:$0xff]  ;;  %v19720_v13 = vcombine.low %v8064_v7, %v8072_v4 }
 0x8cb   :  { %11355 = vmatprep.subr.bf16.mxu1 %v19545_v22  ;;  %v8007_v22 = vld [vmem:[%s31737_s12 + $0x760] sm:$0xff] }
 0x8cc   :  { %v19654_v39 = vcombine.low %v7999_v19, %v8007_v22 }
 0x8cd   :  { %11274 = vmatpush1.bf16.msra.mxu0 %v19542_v32  ;;  %v19655_v32 = vcombine.high %v7999_v19, %v8007_v22  ;;  %v8096_v19 = vld [vmem:[%s31737_s12 + $0xa28] sm:$0xff] }
 0x8ce   :  { %11356 = vmatpush1.bf16.msra.mxu1 %v19544_v33  ;;  %11275 = vmatprep.subr.bf16.mxu0 %v19559_v35  ;;  %v19657_v33 = vcombine.high %v8000_v16, %v8008_v56  ;;  %v8015_v35 = vld [vmem:[%s31737_s12 + $0x7a0] sm:$0xff]  ;;  %v8104_v22 = vld [vmem:[%s31737_s12 + $0xa68] sm:$0xff]  ;;  %v19736_v56 = vcombine.low %v8080_v63, %v8088_v27 }
 0x8cf   :  { %11357 = vmatprep.subr.bf16.mxu1 %v19561_v28  ;;  %v8023_v28 = vld [vmem:[%s31737_s12 + $0x7e0] sm:$0xff] }
 0x8d0   :  { %v19670_v42 = vcombine.low %v8015_v35, %v8023_v28 }
 0x8d1   :  { %11276 = vmatpush1.bf16.msra.mxu0 %v19558_v40  ;;  %v19671_v40 = vcombine.high %v8015_v35, %v8023_v28  ;;  %v8112_v35 = vld [vmem:[%s31737_s12 + $0xaa8] sm:$0xff] }
 0x8d2   :  { %11358 = vmatpush1.bf16.msra.mxu1 %v19560_v44  ;;  %11277 = vmatprep.subr.bf16.mxu0 %v19575_v3  ;;  %v19673_v44 = vcombine.high %v8016_v38, %v8024_v1  ;;  %v8031_v3 = vld [vmem:[%s31737_s12 + $0x820] sm:$0xff]  ;;  %v8120_v28 = vld [vmem:[%s31737_s12 + $0xae8] sm:$0xff]  ;;  %v19752_v1 = vcombine.low %v8096_v19, %v8104_v22 }
 0x8d3   :  { %11359 = vmatprep.subr.bf16.mxu1 %v19577_v21  ;;  %v8039_v21 = vld [vmem:[%s31737_s12 + $0x860] sm:$0xff] }
 0x8d4   :  { %v19686_v43 = vcombine.low %v8031_v3, %v8039_v21 }
 0x8d5   :  { %11278 = vmatpush1.bf16.msra.mxu0 %v19574_v48  ;;  %v19687_v48 = vcombine.high %v8031_v3, %v8039_v21  ;;  %v8128_v3 = vld [vmem:[%s31737_s12 + $0xb28] sm:$0xff] }
 0x8d6   :  { %11360 = vmatpush1.bf16.msra.mxu1 %v19576_v17  ;;  %11279 = vmatprep.subr.bf16.mxu0 %v19591_v61  ;;  %v19689_v17 = vcombine.high %v8032_v46, %v8040_v59  ;;  %v8047_v61 = vld [vmem:[%s31737_s12 + $0x8a0] sm:$0xff]  ;;  %v8136_v21 = vld [vmem:[%s31737_s12 + $0xb68] sm:$0xff]  ;;  %v19768_v59 = vcombine.low %v8112_v35, %v8120_v28 }
 0x8d7   :  { %11361 = vmatprep.subr.bf16.mxu1 %v19593_v53  ;;  %v8055_v53 = vld [vmem:[%s31737_s12 + $0x8e0] sm:$0xff] }
 0x8d8   :  { %v19702_v8 = vcombine.low %v8047_v61, %v8055_v53 }
 0x8d9   :  { %11280 = vmatpush1.bf16.msra.mxu0 %v19590_v60  ;;  %v19703_v60 = vcombine.high %v8047_v61, %v8055_v53  ;;  %v8143_v61 = vld [vmem:[%s31737_s12 + $0xba0] sm:$0xff] }
 0x8da   :  { %11362 = vmatpush1.bf16.msra.mxu1 %v19592_v54  ;;  %11281 = vmatprep.subr.bf16.mxu0 %v19607_v0  ;;  %v8063_v54 = vld [vmem:[%s31737_s12 + $0x920] sm:$0xff] }
 0x8db   :  { %11363 = vmatprep.subr.bf16.mxu1 %v19609_v6  ;;  %v8071_v0 = vld [vmem:[%s31737_s12 + $0x960] sm:$0xff]  ;;  %v19705_v6 = vcombine.high %v8048_v55, %v8056_v34  ;;  %v8144_v34 = vld [vmem:[%s31737_s12 + $0xba8] sm:$0xff] }
 0x8dc   :  { %v19718_v11 = vcombine.low %v8063_v54, %v8071_v0  ;;  %v8151_v53 = vld [vmem:[%s31737_s12 + $0xbe0] sm:$0xff] }
 0x8dd   :  { %11282 = vmatpush1.bf16.msra.mxu0 %v19606_v9  ;;  %v19719_v9 = vcombine.high %v8063_v54, %v8071_v0 }
 0x8de   :  { %11364 = vmatpush1.bf16.msra.mxu1 %v19608_v23  ;;  %11283 = vmatprep.subr.bf16.mxu0 %v19623_v52  ;;  %v19721_v23 = vcombine.high %v8064_v7, %v8072_v4  ;;  %v8079_v52 = vld [vmem:[%s31737_s12 + $0x9a0] sm:$0xff]  ;;  %v19799_v7 = vcombine.high %v8143_v61, %v8151_v53 }
 0x8df   :  { %11365 = vmatprep.subr.bf16.mxu1 %v19625_v10  ;;  %v8087_v10 = vld [vmem:[%s31737_s12 + $0x9e0] sm:$0xff] }
 0x8e0   :  { %v19734_v16 = vcombine.low %v8079_v52, %v8087_v10 }
 0x8e1   :  { %11284 = vmatpush1.bf16.msra.mxu0 %v19622_v14  ;;  %v19735_v14 = vcombine.high %v8079_v52, %v8087_v10  ;;  %v8160_v52 = vld [vmem:[%s31737_s12 + $0xc28] sm:$0xff] }
 0x8e2   :  { %11366 = vmatpush1.bf16.msra.mxu1 %v19624_v41  ;;  %11285 = vmatprep.subr.bf16.mxu0 %v19639_v15  ;;  %v19737_v41 = vcombine.high %v8080_v63, %v8088_v27  ;;  %v8095_v15 = vld [vmem:[%s31737_s12 + $0xa20] sm:$0xff]  ;;  %v8168_v10 = vld [vmem:[%s31737_s12 + $0xc68] sm:$0xff]  ;;  %v19798_v63 = vcombine.low %v8143_v61, %v8151_v53 }
 0x8e3   :  { %11367 = vmatprep.subr.bf16.mxu1 %v19641_v18  ;;  %v8103_v18 = vld [vmem:[%s31737_s12 + $0xa60] sm:$0xff]  ;;  %v8224_v61 = vld [vmem:[%s31737_s12 + $0xe28] sm:$0xff] }
 0x8e4   :  { %v19750_v38 = vcombine.low %v8095_v15, %v8103_v18  ;;  %v8232_v53 = vld [vmem:[%s31737_s12 + $0xe68] sm:$0xff] }
 0x8e5   :  { %11286 = vmatpush1.bf16.msra.mxu0 %v19638_v29  ;;  %v19751_v29 = vcombine.high %v8095_v15, %v8103_v18  ;;  %v8176_v15 = vld [vmem:[%s31737_s12 + $0xca8] sm:$0xff] }
 0x8e6   :  { %11368 = vmatpush1.bf16.msra.mxu1 %v19640_v30  ;;  %11287 = vmatprep.subr.bf16.mxu0 %v19655_v32  ;;  %v19753_v30 = vcombine.high %v8096_v19, %v8104_v22  ;;  %v8111_v32 = vld [vmem:[%s31737_s12 + $0xaa0] sm:$0xff]  ;;  %v8184_v18 = vld [vmem:[%s31737_s12 + $0xce8] sm:$0xff]  ;;  %v19816_v22 = vcombine.low %v8160_v52, %v8168_v10 }
 0x8e7   :  { %11369 = vmatprep.subr.bf16.mxu1 %v19657_v33  ;;  %v8119_v33 = vld [vmem:[%s31737_s12 + $0xae0] sm:$0xff] }
 0x8e8   :  { %v19766_v46 = vcombine.low %v8111_v32, %v8119_v33 }
 0x8e9   :  { %11288 = vmatpush1.bf16.msra.mxu0 %v19654_v39  ;;  %v19767_v39 = vcombine.high %v8111_v32, %v8119_v33  ;;  %v8192_v32 = vld [vmem:[%s31737_s12 + $0xd28] sm:$0xff] }
 0x8ea   :  { %11370 = vmatpush1.bf16.msra.mxu1 %v19656_v36  ;;  %11289 = vmatprep.subr.bf16.mxu0 %v19671_v40  ;;  %v19769_v36 = vcombine.high %v8112_v35, %v8120_v28  ;;  %v8127_v40 = vld [vmem:[%s31737_s12 + $0xb20] sm:$0xff]  ;;  %v8200_v33 = vld [vmem:[%s31737_s12 + $0xd68] sm:$0xff]  ;;  %v19832_v28 = vcombine.low %v8176_v15, %v8184_v18 }
 0x8eb   :  { %11371 = vmatprep.subr.bf16.mxu1 %v19673_v44  ;;  %v8135_v44 = vld [vmem:[%s31737_s12 + $0xb60] sm:$0xff] }
 0x8ec   :  { %v19782_v0 = vcombine.low %v8127_v40, %v8135_v44 }
 0x8ed   :  { %11290 = vmatpush1.bf16.msra.mxu0 %v19670_v42  ;;  %v19783_v42 = vcombine.high %v8127_v40, %v8135_v44  ;;  %v8208_v40 = vld [vmem:[%s31737_s12 + $0xda8] sm:$0xff] }
 0x8ee   :  { %11372 = vmatpush1.bf16.msra.mxu1 %v19672_v50  ;;  %11300 = vmatprep.subr.bf16.mxu0 %v19687_v48  ;;  %v8216_v44 = vld [vmem:[%s31737_s12 + $0xde8] sm:$0xff] }
 0x8ef   :  { %11382 = vmatprep.subr.bf16.mxu1 %v19689_v17  ;;  %v19785_v17 = vcombine.high %v8128_v3, %v8136_v21 }
 0x8f0   :  { %11292 = vmatmul.mubr.bf16.vlgmr.msra.gmra.mrb[40].mxu0 %v27550_v37 }
 0x8f1   :  { %11374 = vmatmul.mubr.bf16.vlgmr.msra.gmra.mrb[40].mxu1 %v27550_v37  ;;  %11301 = vmatpush1.bf16.msra.mxu0 %v19686_v43 }
 0x8f2   :  { %11332 = vmatprep.mubr.bf16.mxu0 %v27568_v45  ;;  %11383 = vmatpush1.bf16.msra.mxu1 %v19688_v20  ;;  %v8152_v20 = vld [vmem:[%s31737_s12 + $0xbe8] sm:$0xff] }
 0x8f3   :  { %11414 = vmatprep.mubr.bf16.mxu1 %v27568_v45  ;;  %11302 = vmatprep.subr.bf16.mxu0 %v19703_v60  ;;  %v19801_v4 = vcombine.high %v8144_v34, %v8152_v20  ;;  %v19800_v27 = vcombine.low %v8144_v34, %v8152_v20  ;;  %v19864_v20 = vcombine.low %v8208_v40, %v8216_v44 }
 0x8f4   :  { %11384 = vmatprep.subr.bf16.mxu1 %v19705_v6  ;;  %v19784_v6 = vcombine.low %v8128_v3, %v8136_v21  ;;  %v19848_v21 = vcombine.low %v8192_v32, %v8200_v33 }
 0x8f5   :  { %11303 = vmatpush1.bf16.msra.mxu0 %v19702_v8  ;;  %v8159_v8 = vld [vmem:[%s31737_s12 + $0xc20] sm:$0xff] }
 0x8f6   :  { %11385 = vmatpush1.bf16.msra.mxu1 %v19704_v31  ;;  %11304 = vmatprep.subr.bf16.mxu0 %v19719_v9  ;;  %v8167_v31 = vld [vmem:[%s31737_s12 + $0xc60] sm:$0xff] }
 0x8f7   :  { %11386 = vmatprep.subr.bf16.mxu1 %v19721_v23  ;;  %v19814_v19 = vcombine.low %v8159_v8, %v8167_v31 }
 0x8f9   :  { %11305 = vmatpush1.bf16.msra.mxu0 %v19718_v11  ;;  %v19815_v11 = vcombine.high %v8159_v8, %v8167_v31  ;;  %v19880_v31 = vcombine.low %v8224_v61, %v8232_v53 }
 0x8fa   :  { %11387 = vmatpush1.bf16.msra.mxu1 %v19720_v13  ;;  %11306 = vmatprep.subr.bf16.mxu0 %v19735_v14  ;;  %v19817_v13 = vcombine.high %v8160_v52, %v8168_v10  ;;  %v8175_v14 = vld [vmem:[%s31737_s12 + $0xca0] sm:$0xff] }
 0x8fb   :  { %11388 = vmatprep.subr.bf16.mxu1 %v19737_v41  ;;  %v8183_v41 = vld [vmem:[%s31737_s12 + $0xce0] sm:$0xff] }
 0x8fc   :  { %v19830_v35 = vcombine.low %v8175_v14, %v8183_v41  ;;  %v8255_v52 = vld [vmem:[%s31737_s12 + $0xf20] sm:$0xff] }
 0x8fd   :  { %11307 = vmatpush1.bf16.msra.mxu0 %v19734_v16  ;;  %v19831_v16 = vcombine.high %v8175_v14, %v8183_v41  ;;  %v8263_v10 = vld [vmem:[%s31737_s12 + $0xf60] sm:$0xff] }
 0x8fe   :  { %11389 = vmatpush1.bf16.msra.mxu1 %v19736_v56  ;;  %11308 = vmatprep.subr.bf16.mxu0 %v19751_v29  ;;  %v19833_v56 = vcombine.high %v8176_v15, %v8184_v18  ;;  %v8191_v29 = vld [vmem:[%s31737_s12 + $0xd20] sm:$0xff]  ;;  %v19911_v14 = vcombine.high %v8255_v52, %v8263_v10 }
 0x8ff   :  { %11390 = vmatprep.subr.bf16.mxu1 %v19753_v30  ;;  %v8199_v30 = vld [vmem:[%s31737_s12 + $0xd60] sm:$0xff] }
 0x900   :  { %v19846_v3 = vcombine.low %v8191_v29, %v8199_v30  ;;  %v8271_v15 = vld [vmem:[%s31737_s12 + $0xfa0] sm:$0xff] }
 0x901   :  { %11309 = vmatpush1.bf16.msra.mxu0 %v19750_v38  ;;  %v19847_v38 = vcombine.high %v8191_v29, %v8199_v30  ;;  %v8279_v18 = vld [vmem:[%s31737_s12 + $0xfe0] sm:$0xff] }
 0x902   :  { %11391 = vmatpush1.bf16.msra.mxu1 %v19752_v1  ;;  %11310 = vmatprep.subr.bf16.mxu0 %v19767_v39  ;;  %v19849_v1 = vcombine.high %v8192_v32, %v8200_v33  ;;  %v8207_v39 = vld [vmem:[%s31737_s12 + $0xda0] sm:$0xff]  ;;  %v19927_v29 = vcombine.high %v8271_v15, %v8279_v18  ;;  %v7777_v32 = vld [vmem:[%s31737_s12 + $0x30] sm:$0xff] }
 0x903   :  { %v28409_v50 = vpop.f32.mrb[32].mxu0  ;;  %v28411_v48 = vpop.f32.mrb[32].mxu1  ;;  %11392 = vmatprep.subr.bf16.mxu1 %v19769_v36  ;;  %v8215_v36 = vld [vmem:[%s31737_s12 + $0xde0] sm:$0xff]  ;;  %v7785_v33 = vld [vmem:[%s31737_s12 + $0x70] sm:$0xff] }
 0x904   :  { %v28419_v43 = vpop.f32.mrb[33].mxu0  ;;  %v28421_v55 = vpop.f32.mrb[33].mxu1  ;;  %v19862_v34 = vcombine.low %v8207_v39, %v8215_v36 }
 0x905   :  { %v11010_v60 = vpop.f32.mrb[34].mxu0  ;;  %v11092_v54 = vpop.f32.mrb[34].mxu1  ;;  %11311 = vmatpush1.bf16.msra.mxu0 %v19766_v46  ;;  %v19863_v46 = vcombine.high %v8207_v39, %v8215_v36  ;;  %v19435_v39 = vcombine.high %v7777_v32, %v7785_v33 }
 0x906   :  { %11393 = vmatpush1.bf16.msra.mxu1 %v19768_v59  ;;  %11312 = vmatprep.subr.bf16.mxu0 %v19783_v42  ;;  %v11011_v9 = vpop.f32.mrb[35].mxu0  ;;  %v11093_v23 = vpop.f32.mrb[35].mxu1  ;;  %v19865_v59 = vcombine.high %v8208_v40, %v8216_v44  ;;  %v8223_v42 = vld [vmem:[%s31737_s12 + $0xe20] sm:$0xff]  ;;  %v19881_v54 = vcombine.high %v8224_v61, %v8232_v53  ;;  %v7793_v40 = vld [vmem:[%s31737_s12 + $0xb0] sm:$0xff] }
 0x907   :  { %11394 = vmatprep.subr.bf16.mxu1 %v19785_v17  ;;  %v8231_v17 = vld [vmem:[%s31737_s12 + $0xe60] sm:$0xff]  ;;  %v7801_v44 = vld [vmem:[%s31737_s12 + $0xf0] sm:$0xff] }
 0x908   :  { %v19879_v60 = vcombine.high %v8223_v42, %v8231_v17  ;;  %v19878_v8 = vcombine.low %v8223_v42, %v8231_v17  ;;  %v19451_v42 = vcombine.high %v7793_v40, %v7801_v44  ;;  %v7809_v17 = vld [vmem:[%s31737_s12 + $0x130] sm:$0xff] }
 0x909   :  { %11313 = vmatpush1.bf16.msra.mxu0 %v19782_v0  ;;  %v8239_v0 = vld [vmem:[%s31737_s12 + $0xea0] sm:$0xff]  ;;  %v7817_v61 = vld [vmem:[%s31737_s12 + $0x170] sm:$0xff] }
 0x90a   :  { %11395 = vmatpush1.bf16.msra.mxu1 %v19784_v6  ;;  %11314 = vmatprep.subr.bf16.mxu0 %v19799_v7  ;;  %v8247_v6 = vld [vmem:[%s31737_s12 + $0xee0] sm:$0xff]  ;;  %v8240_v7 = vld [vmem:[%s31737_s12 + $0xea8] sm:$0xff] }
 0x90b   :  { %11396 = vmatprep.subr.bf16.mxu1 %v19801_v4  ;;  %v8248_v4 = vld [vmem:[%s31737_s12 + $0xee8] sm:$0xff]  ;;  %v19895_v9 = vcombine.high %v8239_v0, %v8247_v6 }
 0x90c   :  { %v19897_v23 = vcombine.high %v8240_v7, %v8248_v4 }
 0x90d   :  { %11315 = vmatpush1.bf16.msra.mxu0 %v19798_v63  ;;  %v8256_v63 = vld [vmem:[%s31737_s12 + $0xf28] sm:$0xff] }
 0x90e   :  { %11397 = vmatpush1.bf16.msra.mxu1 %v19800_v27  ;;  %11316 = vmatprep.subr.bf16.mxu0 %v19815_v11  ;;  %v8264_v27 = vld [vmem:[%s31737_s12 + $0xf68] sm:$0xff]  ;;  %v19894_v11 = vcombine.low %v8239_v0, %v8247_v6  ;;  %v19467_v0 = vcombine.high %v7809_v17, %v7817_v61 }
 0x90f   :  { %11398 = vmatprep.subr.bf16.mxu1 %v19817_v13  ;;  %v19896_v13 = vcombine.low %v8240_v7, %v8248_v4  ;;  %v19913_v41 = vcombine.high %v8256_v63, %v8264_v27  ;;  %v7825_v7 = vld [vmem:[%s31737_s12 + $0x1b0] sm:$0xff] }
 0x910   :  { %v7833_v4 = vld [vmem:[%s31737_s12 + $0x1f0] sm:$0xff] }
 0x911   :  { %11317 = vmatpush1.bf16.msra.mxu0 %v19814_v19  ;;  %v8272_v19 = vld [vmem:[%s31737_s12 + $0xfa8] sm:$0xff] }
 0x912   :  { %11399 = vmatpush1.bf16.msra.mxu1 %v19816_v22  ;;  %11318 = vmatprep.subr.bf16.mxu0 %v19831_v16  ;;  %v8280_v22 = vld [vmem:[%s31737_s12 + $0xfe8] sm:$0xff]  ;;  %v19910_v16 = vcombine.low %v8255_v52, %v8263_v10  ;;  %v7841_v10 = vld [vmem:[%s31737_s12 + $0x230] sm:$0xff] }
 0x913   :  { %11400 = vmatprep.subr.bf16.mxu1 %v19833_v56  ;;  %v19912_v56 = vcombine.low %v8256_v63, %v8264_v27  ;;  %v19929_v30 = vcombine.high %v8272_v19, %v8280_v22  ;;  %v7849_v63 = vld [vmem:[%s31737_s12 + $0x270] sm:$0xff]  ;;  %v7842_v27 = vld [vmem:[%s31737_s12 + $0x238] sm:$0xff] }
 0x915   :  { %11319 = vmatpush1.bf16.msra.mxu0 %v19830_v35  ;;  %v7778_v35 = vld [vmem:[%s31737_s12 + $0x38] sm:$0xff] }
 0x916   :  { %11401 = vmatpush1.bf16.msra.mxu1 %v19832_v28  ;;  %11320 = vmatprep.subr.bf16.mxu0 %v19847_v38  ;;  %v7786_v28 = vld [vmem:[%s31737_s12 + $0x78] sm:$0xff]  ;;  %v19926_v38 = vcombine.low %v8271_v15, %v8279_v18  ;;  %v7857_v18 = vld [vmem:[%s31737_s12 + $0x2b0] sm:$0xff] }
 0x917   :  { %11402 = vmatprep.subr.bf16.mxu1 %v19849_v1  ;;  %v19928_v1 = vcombine.low %v8272_v19, %v8280_v22  ;;  %v19437_v36 = vcombine.high %v7778_v35, %v7786_v28  ;;  %v7865_v19 = vld [vmem:[%s31737_s12 + $0x2f0] sm:$0xff]  ;;  %v7858_v22 = vld [vmem:[%s31737_s12 + $0x2b8] sm:$0xff] }
 0x919   :  { %11321 = vmatpush1.bf16.msra.mxu0 %v19846_v3  ;;  %v19434_v3 = vcombine.low %v7777_v32, %v7785_v33  ;;  %v7873_v33 = vld [vmem:[%s31737_s12 + $0x330] sm:$0xff] }
 0x91a   :  { %11403 = vmatpush1.bf16.msra.mxu1 %v19848_v21  ;;  %11322 = vmatprep.subr.bf16.mxu0 %v19863_v46  ;;  %v7794_v21 = vld [vmem:[%s31737_s12 + $0xb8] sm:$0xff] }
 0x91b   :  { %11404 = vmatprep.subr.bf16.mxu1 %v19865_v59  ;;  %v7802_v46 = vld [vmem:[%s31737_s12 + $0xf8] sm:$0xff]  ;;  %v19436_v59 = vcombine.low %v7778_v35, %v7786_v28  ;;  %v7881_v35 = vld [vmem:[%s31737_s12 + $0x370] sm:$0xff] }
 0x91c   :  { %v19453_v53 = vcombine.high %v7794_v21, %v7802_v46  ;;  %v7874_v28 = vld [vmem:[%s31737_s12 + $0x338] sm:$0xff] }
 0x91d   :  { %11323 = vmatpush1.bf16.msra.mxu0 %v19862_v34  ;;  %v7810_v34 = vld [vmem:[%s31737_s12 + $0x138] sm:$0xff] }
 0x91e   :  { %11405 = vmatpush1.bf16.msra.mxu1 %v19864_v20  ;;  %11324 = vmatprep.subr.bf16.mxu0 %v19879_v60  ;;  %v7818_v20 = vld [vmem:[%s31737_s12 + $0x178] sm:$0xff]  ;;  %v19450_v60 = vcombine.low %v7793_v40, %v7801_v44  ;;  %v7889_v44 = vld [vmem:[%s31737_s12 + $0x3b0] sm:$0xff] }
 0x91f   :  { %11406 = vmatprep.subr.bf16.mxu1 %v19881_v54  ;;  %v19452_v54 = vcombine.low %v7794_v21, %v7802_v46  ;;  %v19469_v6 = vcombine.high %v7810_v34, %v7818_v20  ;;  %v7890_v21 = vld [vmem:[%s31737_s12 + $0x3b8] sm:$0xff] }
 0x920   :  { %v7898_v46 = vld [vmem:[%s31737_s12 + $0x3f8] sm:$0xff] }
 0x921   :  { %11325 = vmatpush1.bf16.msra.mxu0 %v19878_v8  ;;  %v7826_v8 = vld [vmem:[%s31737_s12 + $0x1b8] sm:$0xff] }
 0x922   :  { %11407 = vmatpush1.bf16.msra.mxu1 %v19880_v31  ;;  %11326 = vmatprep.subr.bf16.mxu0 %v19895_v9  ;;  %v7834_v31 = vld [vmem:[%s31737_s12 + $0x1f8] sm:$0xff]  ;;  %v19468_v9 = vcombine.low %v7810_v34, %v7818_v20  ;;  %v7913_v34 = vld [vmem:[%s31737_s12 + $0x470] sm:$0xff] }
 0x923   :  { %11408 = vmatprep.subr.bf16.mxu1 %v19897_v23  ;;  %v19483_v23 = vcombine.high %v7825_v7, %v7833_v4  ;;  %v19485_v52 = vcombine.high %v7826_v8, %v7834_v31  ;;  %v7906_v20 = vld [vmem:[%s31737_s12 + $0x438] sm:$0xff] }
 0x925   :  { %11327 = vmatpush1.bf16.msra.mxu0 %v19894_v11  ;;  %v7850_v11 = vld [vmem:[%s31737_s12 + $0x278] sm:$0xff] }
 0x926   :  { %11409 = vmatpush1.bf16.msra.mxu1 %v19896_v13  ;;  %11328 = vmatprep.subr.bf16.mxu0 %v19911_v14  ;;  %v19482_v13 = vcombine.low %v7825_v7, %v7833_v4  ;;  %v19484_v14 = vcombine.low %v7826_v8, %v7834_v31  ;;  %v19501_v15 = vcombine.high %v7842_v27, %v7850_v11  ;;  %v7921_v4 = vld [vmem:[%s31737_s12 + $0x4b0] sm:$0xff]  ;;  %v7922_v31 = vld [vmem:[%s31737_s12 + $0x4b8] sm:$0xff] }
 0x927   :  { %11410 = vmatprep.subr.bf16.mxu1 %v19913_v41  ;;  %v19499_v41 = vcombine.high %v7841_v10, %v7849_v63  ;;  %v7929_v8 = vld [vmem:[%s31737_s12 + $0x4f0] sm:$0xff] }
 0x929   :  { %11329 = vmatpush1.bf16.msra.mxu0 %v19910_v16  ;;  %v7866_v16 = vld [vmem:[%s31737_s12 + $0x2f8] sm:$0xff] }
 0x92a   :  { %11411 = vmatpush1.bf16.msra.mxu1 %v19912_v56  ;;  %11330 = vmatprep.subr.bf16.mxu0 %v19927_v29  ;;  %v19498_v56 = vcombine.low %v7841_v10, %v7849_v63  ;;  %v19500_v29 = vcombine.low %v7842_v27, %v7850_v11  ;;  %v19517_v32 = vcombine.high %v7858_v22, %v7866_v16  ;;  %v7937_v63 = vld [vmem:[%s31737_s12 + $0x530] sm:$0xff]  ;;  %v7938_v11 = vld [vmem:[%s31737_s12 + $0x538] sm:$0xff] }
 0x92b   :  { %11412 = vmatprep.subr.bf16.mxu1 %v19929_v30  ;;  %v19515_v30 = vcombine.high %v7857_v18, %v7865_v19  ;;  %v7945_v27 = vld [vmem:[%s31737_s12 + $0x570] sm:$0xff] }
 0x92d   :  { %11331 = vmatpush1.bf16.msra.mxu0 %v19926_v38  ;;  %v7882_v38 = vld [vmem:[%s31737_s12 + $0x378] sm:$0xff] }
 0x92e   :  { %11413 = vmatpush1.bf16.msra.mxu1 %v19928_v1  ;;  %11423 = vmatprep.subr.bf16.mxu0 %v19435_v39  ;;  %v19514_v1 = vcombine.low %v7857_v18, %v7865_v19  ;;  %v19516_v39 = vcombine.low %v7858_v22, %v7866_v16  ;;  %v19533_v40 = vcombine.high %v7874_v28, %v7882_v38  ;;  %v7953_v19 = vld [vmem:[%s31737_s12 + $0x5b0] sm:$0xff]  ;;  %v7954_v16 = vld [vmem:[%s31737_s12 + $0x5b8] sm:$0xff] }
 0x92f   :  { %11505 = vmatprep.subr.bf16.mxu1 %v19437_v36  ;;  %v19531_v36 = vcombine.high %v7873_v33, %v7881_v35  ;;  %v7961_v22 = vld [vmem:[%s31737_s12 + $0x5f0] sm:$0xff] }
 0x930   :  { %11333 = vmatmul.mubr.bf16.vlgmr.msra.gmra.mrb[40].mxu0 %v27755_v12 }
 0x931   :  { %11415 = vmatmul.mubr.bf16.vlgmr.msra.gmra.mrb[40].mxu1 %v27755_v12  ;;  %11424 = vmatpush1.bf16.msra.mxu0 %v19434_v3  ;;  %v7897_v3 = vld [vmem:[%s31737_s12 + $0x3f0] sm:$0xff] }
 0x932   :  { %11455 = vmatprep.mubr.bf16.mxu0 %v27548_v25  ;;  %11506 = vmatpush1.bf16.msra.mxu1 %v19436_v59  ;;  %v19530_v59 = vcombine.low %v7873_v33, %v7881_v35  ;;  %v7969_v35 = vld [vmem:[%s31737_s12 + $0x630] sm:$0xff] }
 0x933   :  { %11537 = vmatprep.mubr.bf16.mxu1 %v27548_v25  ;;  %11425 = vmatprep.subr.bf16.mxu0 %v19451_v42  ;;  %v19466_v25 = vcombine.low %v7809_v17, %v7817_v61  ;;  %v19532_v42 = vcombine.low %v7874_v28, %v7882_v38  ;;  %v19547_v17 = vcombine.high %v7889_v44, %v7897_v3  ;;  %v7977_v28 = vld [vmem:[%s31737_s12 + $0x670] sm:$0xff]  ;;  %v7970_v38 = vld [vmem:[%s31737_s12 + $0x638] sm:$0xff] }
 0x934   :  { %11507 = vmatprep.subr.bf16.mxu1 %v19453_v53  ;;  %v19549_v61 = vcombine.high %v7890_v21, %v7898_v46  ;;  %v7905_v53 = vld [vmem:[%s31737_s12 + $0x430] sm:$0xff] }
 0x935   :  { %11426 = vmatpush1.bf16.msra.mxu0 %v19450_v60  ;;  %v7914_v60 = vld [vmem:[%s31737_s12 + $0x478] sm:$0xff] }
 0x936   :  { %11508 = vmatpush1.bf16.msra.mxu1 %v19452_v54  ;;  %11427 = vmatprep.subr.bf16.mxu0 %v19467_v0  ;;  %v19546_v54 = vcombine.low %v7889_v44, %v7897_v3  ;;  %v19548_v0 = vcombine.low %v7890_v21, %v7898_v46  ;;  %v19565_v7 = vcombine.high %v7906_v20, %v7914_v60  ;;  %v7985_v3 = vld [vmem:[%s31737_s12 + $0x6b0] sm:$0xff]  ;;  %v7986_v46 = vld [vmem:[%s31737_s12 + $0x6b8] sm:$0xff] }
 0x937   :  { %11509 = vmatprep.subr.bf16.mxu1 %v19469_v6  ;;  %v19563_v6 = vcombine.high %v7905_v53, %v7913_v34  ;;  %v7993_v21 = vld [vmem:[%s31737_s12 + $0x6f0] sm:$0xff] }
 0x939   :  { %11428 = vmatpush1.bf16.msra.mxu0 %v19466_v25  ;;  %v7930_v25 = vld [vmem:[%s31737_s12 + $0x4f8] sm:$0xff] }
 0x93a   :  { %11510 = vmatpush1.bf16.msra.mxu1 %v19468_v9  ;;  %11429 = vmatprep.subr.bf16.mxu0 %v19483_v23  ;;  %v19562_v9 = vcombine.low %v7905_v53, %v7913_v34  ;;  %v19564_v23 = vcombine.low %v7906_v20, %v7914_v60  ;;  %v19581_v10 = vcombine.high %v7922_v31, %v7930_v25  ;;  %v8001_v34 = vld [vmem:[%s31737_s12 + $0x730] sm:$0xff]  ;;  %v8002_v60 = vld [vmem:[%s31737_s12 + $0x738] sm:$0xff] }
 0x93b   :  { %11511 = vmatprep.subr.bf16.mxu1 %v19485_v52  ;;  %v19579_v52 = vcombine.high %v7921_v4, %v7929_v8  ;;  %v8009_v20 = vld [vmem:[%s31737_s12 + $0x770] sm:$0xff] }
 0x93d   :  { %11430 = vmatpush1.bf16.msra.mxu0 %v19482_v13  ;;  %v7946_v13 = vld [vmem:[%s31737_s12 + $0x578] sm:$0xff] }
 0x93e   :  { %11512 = vmatpush1.bf16.msra.mxu1 %v19484_v14  ;;  %11431 = vmatprep.subr.bf16.mxu0 %v19499_v41  ;;  %v19578_v14 = vcombine.low %v7921_v4, %v7929_v8  ;;  %v19580_v41 = vcombine.low %v7922_v31, %v7930_v25  ;;  %v19597_v18 = vcombine.high %v7938_v11, %v7946_v13  ;;  %v8017_v8 = vld [vmem:[%s31737_s12 + $0x7b0] sm:$0xff]  ;;  %v8018_v25 = vld [vmem:[%s31737_s12 + $0x7b8] sm:$0xff] }
 0x93f   :  { %11513 = vmatprep.subr.bf16.mxu1 %v19501_v15  ;;  %v19595_v15 = vcombine.high %v7937_v63, %v7945_v27  ;;  %v8025_v31 = vld [vmem:[%s31737_s12 + $0x7f0] sm:$0xff] }
 0x941   :  { %11432 = vmatpush1.bf16.msra.mxu0 %v19498_v56  ;;  %v7962_v56 = vld [vmem:[%s31737_s12 + $0x5f8] sm:$0xff] }
 0x942   :  { %11514 = vmatpush1.bf16.msra.mxu1 %v19500_v29  ;;  %11433 = vmatprep.subr.bf16.mxu0 %v19515_v30  ;;  %v19594_v29 = vcombine.low %v7937_v63, %v7945_v27  ;;  %v19596_v30 = vcombine.low %v7938_v11, %v7946_v13  ;;  %v19613_v33 = vcombine.high %v7954_v16, %v7962_v56  ;;  %v8033_v27 = vld [vmem:[%s31737_s12 + $0x830] sm:$0xff]  ;;  %v8034_v13 = vld [vmem:[%s31737_s12 + $0x838] sm:$0xff] }
 0x943   :  { %11515 = vmatprep.subr.bf16.mxu1 %v19517_v32  ;;  %v19611_v32 = vcombine.high %v7953_v19, %v7961_v22  ;;  %v8041_v11 = vld [vmem:[%s31737_s12 + $0x870] sm:$0xff] }
 0x945   :  { %11434 = vmatpush1.bf16.msra.mxu0 %v19514_v1  ;;  %v7978_v1 = vld [vmem:[%s31737_s12 + $0x678] sm:$0xff] }
 0x946   :  { %11516 = vmatpush1.bf16.msra.mxu1 %v19516_v39  ;;  %11435 = vmatprep.subr.bf16.mxu0 %v19531_v36  ;;  %v19610_v39 = vcombine.low %v7953_v19, %v7961_v22  ;;  %v19612_v36 = vcombine.low %v7954_v16, %v7962_v56  ;;  %v19629_v44 = vcombine.high %v7970_v38, %v7978_v1  ;;  %v8049_v22 = vld [vmem:[%s31737_s12 + $0x8b0] sm:$0xff] }
 0x947   :  { %11517 = vmatprep.subr.bf16.mxu1 %v19533_v40  ;;  %v19627_v40 = vcombine.high %v7969_v35, %v7977_v28  ;;  %v8057_v16 = vld [vmem:[%s31737_s12 + $0x8f0] sm:$0xff]  ;;  %v19690_v56 = vcombine.low %v8033_v27, %v8041_v11 }
 0x949   :  { %11436 = vmatpush1.bf16.msra.mxu0 %v19530_v59  ;;  %v7994_v59 = vld [vmem:[%s31737_s12 + $0x6f8] sm:$0xff] }
 0x94a   :  { %11518 = vmatpush1.bf16.msra.mxu1 %v19532_v42  ;;  %11437 = vmatprep.subr.bf16.mxu0 %v19547_v17  ;;  %v19626_v42 = vcombine.low %v7969_v35, %v7977_v28  ;;  %v19628_v17 = vcombine.low %v7970_v38, %v7978_v1  ;;  %v19645_v53 = vcombine.high %v7986_v46, %v7994_v59  ;;  %v8065_v35 = vld [vmem:[%s31737_s12 + $0x930] sm:$0xff]  ;;  %v8066_v1 = vld [vmem:[%s31737_s12 + $0x938] sm:$0xff] }
 0x94b   :  { %11519 = vmatprep.subr.bf16.mxu1 %v19549_v61  ;;  %v19643_v61 = vcombine.high %v7985_v3, %v7993_v21  ;;  %v8073_v28 = vld [vmem:[%s31737_s12 + $0x970] sm:$0xff] }
 0x94d   :  { %11438 = vmatpush1.bf16.msra.mxu0 %v19546_v54  ;;  %v8010_v54 = vld [vmem:[%s31737_s12 + $0x778] sm:$0xff] }
 0x94e   :  { %11520 = vmatpush1.bf16.msra.mxu1 %v19548_v0  ;;  %11439 = vmatprep.subr.bf16.mxu0 %v19563_v6  ;;  %v19642_v0 = vcombine.low %v7985_v3, %v7993_v21  ;;  %v19644_v6 = vcombine.low %v7986_v46, %v7994_v59  ;;  %v19661_v4 = vcombine.high %v8002_v60, %v8010_v54  ;;  %v8081_v21 = vld [vmem:[%s31737_s12 + $0x9b0] sm:$0xff]  ;;  %v8090_v59 = vld [vmem:[%s31737_s12 + $0x9f8] sm:$0xff] }
 0x94f   :  { %11521 = vmatprep.subr.bf16.mxu1 %v19565_v7  ;;  %v19659_v7 = vcombine.high %v8001_v34, %v8009_v20  ;;  %v8089_v46 = vld [vmem:[%s31737_s12 + $0x9f0] sm:$0xff] }
 0x951   :  { %11440 = vmatpush1.bf16.msra.mxu0 %v19562_v9  ;;  %v8026_v9 = vld [vmem:[%s31737_s12 + $0x7f8] sm:$0xff] }
 0x952   :  { %11522 = vmatpush1.bf16.msra.mxu1 %v19564_v23  ;;  %11441 = vmatprep.subr.bf16.mxu0 %v19579_v52  ;;  %v19658_v23 = vcombine.low %v8001_v34, %v8009_v20  ;;  %v19660_v52 = vcombine.low %v8002_v60, %v8010_v54  ;;  %v19677_v63 = vcombine.high %v8018_v25, %v8026_v9  ;;  %v8105_v34 = vld [vmem:[%s31737_s12 + $0xa70] sm:$0xff]  ;;  %v8098_v20 = vld [vmem:[%s31737_s12 + $0xa38] sm:$0xff] }
 0x953   :  { %11523 = vmatprep.subr.bf16.mxu1 %v19581_v10  ;;  %v19675_v10 = vcombine.high %v8017_v8, %v8025_v31  ;;  %v8106_v60 = vld [vmem:[%s31737_s12 + $0xa78] sm:$0xff]  ;;  %v19738_v54 = vcombine.low %v8081_v21, %v8089_v46 }
 0x955   :  { %11442 = vmatpush1.bf16.msra.mxu0 %v19578_v14  ;;  %v8042_v14 = vld [vmem:[%s31737_s12 + $0x878] sm:$0xff] }
 0x956   :  { %11524 = vmatpush1.bf16.msra.mxu1 %v19580_v41  ;;  %11443 = vmatprep.subr.bf16.mxu0 %v19595_v15  ;;  %v19674_v41 = vcombine.low %v8017_v8, %v8025_v31  ;;  %v19676_v15 = vcombine.low %v8018_v25, %v8026_v9  ;;  %v19693_v19 = vcombine.high %v8034_v13, %v8042_v14  ;;  %v8121_v8 = vld [vmem:[%s31737_s12 + $0xaf0] sm:$0xff]  ;;  %v8114_v31 = vld [vmem:[%s31737_s12 + $0xab8] sm:$0xff] }
 0x957   :  { %11525 = vmatprep.subr.bf16.mxu1 %v19597_v18  ;;  %v19691_v18 = vcombine.high %v8033_v27, %v8041_v11  ;;  %v8122_v25 = vld [vmem:[%s31737_s12 + $0xaf8] sm:$0xff]  ;;  %v8137_v27 = vld [vmem:[%s31737_s12 + $0xb70] sm:$0xff] }
 0x958   :  { %v8130_v11 = vld [vmem:[%s31737_s12 + $0xb38] sm:$0xff] }
 0x959   :  { %11444 = vmatpush1.bf16.msra.mxu0 %v19594_v29  ;;  %v8050_v29 = vld [vmem:[%s31737_s12 + $0x8b8] sm:$0xff] }
 0x95a   :  { %11526 = vmatpush1.bf16.msra.mxu1 %v19596_v30  ;;  %11445 = vmatprep.subr.bf16.mxu0 %v19611_v32  ;;  %v8058_v30 = vld [vmem:[%s31737_s12 + $0x8f8] sm:$0xff]  ;;  %v19692_v32 = vcombine.low %v8034_v13, %v8042_v14 }
 0x95b   :  { %11527 = vmatprep.subr.bf16.mxu1 %v19613_v33  ;;  %v19707_v33 = vcombine.high %v8049_v22, %v8057_v16  ;;  %v19709_v38 = vcombine.high %v8050_v29, %v8058_v30  ;;  %v8138_v13 = vld [vmem:[%s31737_s12 + $0xb78] sm:$0xff] }
 0x95d   :  { %11446 = vmatpush1.bf16.msra.mxu0 %v19610_v39  ;;  %v8074_v39 = vld [vmem:[%s31737_s12 + $0x978] sm:$0xff] }
 0x95e   :  { %11528 = vmatpush1.bf16.msra.mxu1 %v19612_v36  ;;  %11447 = vmatprep.subr.bf16.mxu0 %v19627_v40  ;;  %v19706_v36 = vcombine.low %v8049_v22, %v8057_v16  ;;  %v19708_v40 = vcombine.low %v8050_v29, %v8058_v30  ;;  %v19725_v3 = vcombine.high %v8066_v1, %v8074_v39  ;;  %v8145_v22 = vld [vmem:[%s31737_s12 + $0xbb0] sm:$0xff]  ;;  %v8146_v30 = vld [vmem:[%s31737_s12 + $0xbb8] sm:$0xff] }
 0x95f   :  { %11529 = vmatprep.subr.bf16.mxu1 %v19629_v44  ;;  %v19723_v44 = vcombine.high %v8065_v35, %v8073_v28  ;;  %v8153_v16 = vld [vmem:[%s31737_s12 + $0xbf0] sm:$0xff] }
 0x961   :  { %11448 = vmatpush1.bf16.msra.mxu0 %v19626_v42  ;;  %v19724_v42 = vcombine.low %v8066_v1, %v8074_v39  ;;  %v19788_v39 = vcombine.low %v8130_v11, %v8138_v13 }
 0x962   :  { %11530 = vmatpush1.bf16.msra.mxu1 %v19628_v17  ;;  %11449 = vmatprep.subr.bf16.mxu0 %v19643_v61  ;;  %v19739_v17 = vcombine.high %v8081_v21, %v8089_v46  ;;  %v8162_v46 = vld [vmem:[%s31737_s12 + $0xc38] sm:$0xff] }
 0x963   :  { %11531 = vmatprep.subr.bf16.mxu1 %v19645_v53  ;;  %v8097_v53 = vld [vmem:[%s31737_s12 + $0xa30] sm:$0xff] }
 0x964   :  { %v19754_v9 = vcombine.low %v8097_v53, %v8105_v34 }
 0x965   :  { %11450 = vmatpush1.bf16.msra.mxu0 %v19642_v0 }
 0x966   :  { %11532 = vmatpush1.bf16.msra.mxu1 %v19644_v6  ;;  %11451 = vmatprep.subr.bf16.mxu0 %v19659_v7  ;;  %v19755_v6 = vcombine.high %v8097_v53, %v8105_v34  ;;  %v19757_v7 = vcombine.high %v8098_v20, %v8106_v60  ;;  %v8185_v53 = vld [vmem:[%s31737_s12 + $0xcf0] sm:$0xff]  ;;  %v8178_v34 = vld [vmem:[%s31737_s12 + $0xcb8] sm:$0xff] }
 0x967   :  { %11533 = vmatprep.subr.bf16.mxu1 %v19661_v4  ;;  %v8113_v4 = vld [vmem:[%s31737_s12 + $0xab0] sm:$0xff] }
 0x968   :  { %v19770_v14 = vcombine.low %v8113_v4, %v8121_v8 }
 0x969   :  { %11452 = vmatpush1.bf16.msra.mxu0 %v19658_v23  ;;  %v19756_v23 = vcombine.low %v8098_v20, %v8106_v60  ;;  %v8186_v20 = vld [vmem:[%s31737_s12 + $0xcf8] sm:$0xff] }
 0x96a   :  { %11534 = vmatpush1.bf16.msra.mxu1 %v19660_v52  ;;  %11453 = vmatprep.subr.bf16.mxu0 %v19675_v10  ;;  %v19771_v52 = vcombine.high %v8113_v4, %v8121_v8  ;;  %v19773_v10 = vcombine.high %v8114_v31, %v8122_v25  ;;  %v8201_v4 = vld [vmem:[%s31737_s12 + $0xd70] sm:$0xff]  ;;  %v8194_v8 = vld [vmem:[%s31737_s12 + $0xd38] sm:$0xff] }
 0x96b   :  { %11535 = vmatprep.subr.bf16.mxu1 %v19677_v63  ;;  %v8129_v63 = vld [vmem:[%s31737_s12 + $0xb30] sm:$0xff] }
 0x96d   :  { %11454 = vmatpush1.bf16.msra.mxu0 %v19674_v41  ;;  %v19772_v41 = vcombine.low %v8114_v31, %v8122_v25  ;;  %v8202_v31 = vld [vmem:[%s31737_s12 + $0xd78] sm:$0xff] }
 0x96e   :  { %11536 = vmatpush1.bf16.msra.mxu1 %v19676_v15  ;;  %11464 = vmatprep.subr.bf16.mxu0 %v19691_v18  ;;  %v19787_v15 = vcombine.high %v8129_v63, %v8137_v27 }
 0x96f   :  { %11546 = vmatprep.subr.bf16.mxu1 %v19693_v19  ;;  %v19789_v19 = vcombine.high %v8130_v11, %v8138_v13  ;;  %v8218_v11 = vld [vmem:[%s31737_s12 + $0xdf8] sm:$0xff] }
 0x970   :  { %11456 = vmatmul.mubr.bf16.vlgmr.msra.gmra.mrb[44].mxu0 %v27550_v37 }
 0x971   :  { %11538 = vmatmul.mubr.bf16.vlgmr.msra.gmra.mrb[44].mxu1 %v27550_v37  ;;  %11465 = vmatpush1.bf16.msra.mxu0 %v19690_v56  ;;  %v8082_v37 = vld [vmem:[%s31737_s12 + $0x9b8] sm:$0xff] }
 0x972   :  { %11496 = vmatprep.mubr.bf16.mxu0 %v27568_v45  ;;  %11547 = vmatpush1.bf16.msra.mxu1 %v19692_v32  ;;  %v19741_v61 = vcombine.high %v8082_v37, %v8090_v59  ;;  %v19740_v0 = vcombine.low %v8082_v37, %v8090_v59  ;;  %v8154_v32 = vld [vmem:[%s31737_s12 + $0xbf8] sm:$0xff]  ;;  %v19802_v59 = vcombine.low %v8145_v22, %v8153_v16 }
 0x973   :  { %11578 = vmatprep.mubr.bf16.mxu1 %v27568_v45  ;;  %11466 = vmatprep.subr.bf16.mxu0 %v19707_v33  ;;  %v19722_v45 = vcombine.low %v8065_v35, %v8073_v28  ;;  %v19786_v28 = vcombine.low %v8129_v63, %v8137_v27  ;;  %v8170_v37 = vld [vmem:[%s31737_s12 + $0xc78] sm:$0xff]  ;;  %v8217_v63 = vld [vmem:[%s31737_s12 + $0xdf0] sm:$0xff] }
 0x974   :  { %11548 = vmatprep.subr.bf16.mxu1 %v19709_v38  ;;  %v8210_v27 = vld [vmem:[%s31737_s12 + $0xdb8] sm:$0xff] }
 0x975   :  { %11467 = vmatpush1.bf16.msra.mxu0 %v19706_v36  ;;  %v19803_v36 = vcombine.high %v8145_v22, %v8153_v16  ;;  %v8233_v22 = vld [vmem:[%s31737_s12 + $0xe70] sm:$0xff]  ;;  %v8226_v16 = vld [vmem:[%s31737_s12 + $0xe38] sm:$0xff] }
 0x976   :  { %11549 = vmatpush1.bf16.msra.mxu1 %v19708_v40  ;;  %11468 = vmatprep.subr.bf16.mxu0 %v19723_v44  ;;  %v19805_v40 = vcombine.high %v8146_v30, %v8154_v32  ;;  %v8161_v44 = vld [vmem:[%s31737_s12 + $0xc30] sm:$0xff] }
 0x977   :  { %11550 = vmatprep.subr.bf16.mxu1 %v19725_v3  ;;  %v8169_v3 = vld [vmem:[%s31737_s12 + $0xc70] sm:$0xff] }
 0x978   :  { %v19818_v60 = vcombine.low %v8161_v44, %v8169_v3 }
 0x979   :  { %11469 = vmatpush1.bf16.msra.mxu0 %v19722_v45  ;;  %v19804_v45 = vcombine.low %v8146_v30, %v8154_v32  ;;  %v8234_v30 = vld [vmem:[%s31737_s12 + $0xe78] sm:$0xff] }
 0x97a   :  { %11551 = vmatpush1.bf16.msra.mxu1 %v19724_v42  ;;  %11470 = vmatprep.subr.bf16.mxu0 %v19739_v17  ;;  %v19819_v42 = vcombine.high %v8161_v44, %v8169_v3  ;;  %v19821_v17 = vcombine.high %v8162_v46, %v8170_v37  ;;  %v28904_v3 = vld [vmem:[%s31738_s13] sm:$0xff] }
 0x97b   :  { %11552 = vmatprep.subr.bf16.mxu1 %v19741_v61  ;;  %v8177_v61 = vld [vmem:[%s31737_s12 + $0xcb0] sm:$0xff] }
 0x97c   :  { %v19834_v25 = vcombine.low %v8177_v61, %v8185_v53 }
 0x97d   :  { %11471 = vmatpush1.bf16.msra.mxu0 %v19738_v54  ;;  %v19820_v54 = vcombine.low %v8162_v46, %v8170_v37 }
 0x97e   :  { %11553 = vmatpush1.bf16.msra.mxu1 %v19740_v0  ;;  %11472 = vmatprep.subr.bf16.mxu0 %v19755_v6  ;;  %v19835_v0 = vcombine.high %v8177_v61, %v8185_v53  ;;  %v19837_v6 = vcombine.high %v8178_v34, %v8186_v20  ;;  %v8298_v61 = vrot.slane %v28904_v3, %v25012_v5 }
 0x97f   :  { %11554 = vmatprep.subr.bf16.mxu1 %v19757_v7  ;;  %v8193_v7 = vld [vmem:[%s31737_s12 + $0xd30] sm:$0xff] }
 0x980   :  { %v19850_v13 = vcombine.low %v8193_v7, %v8201_v4 }
 0x981   :  { %11473 = vmatpush1.bf16.msra.mxu0 %v19754_v9  ;;  %v19836_v9 = vcombine.low %v8178_v34, %v8186_v20 }
 0x982   :  { %11555 = vmatpush1.bf16.msra.mxu1 %v19756_v23  ;;  %11474 = vmatprep.subr.bf16.mxu0 %v19771_v52  ;;  %v19851_v23 = vcombine.high %v8193_v7, %v8201_v4  ;;  %v19853_v52 = vcombine.high %v8194_v8, %v8202_v31  ;;  %v8282_v7 = vld [vmem:[%s31737_s12 + $0xff8] sm:$0xff]  ;;  %v21090_v4 = vadd.f32 %v28419_v43, %v8298_v61  ;;  %v22713_v43 = vld [vmem:[%s31739_s14 + $0xc] ss:$28 sps:$4 sm:$0xff]  }
 0x983   :  { %v28809_v18 = vpop.f32.mrb[36].mxu0  ;;  %11556 = vmatprep.subr.bf16.mxu1 %v19773_v10  ;;  %v8209_v10 = vld [vmem:[%s31737_s12 + $0xdb0] sm:$0xff] }
 0x984   :  { %v28817_v56 = vpop.f32.mrb[36].mxu1  ;;  %v28819_v29 = vpop.f32.mrb[37].mxu0  ;;  %v19866_v32 = vcombine.low %v8209_v10, %v8217_v63  ;;  %vm11588_vm11 = vcmp.gt.f32.partialorder %v21090_v4, 0.0  ;;  %v22747_v61 = vld [vmem:[%s31739_s14 + $0x158] ss:$28 sps:$4 sm:$0xff]  }
 0x985   :  { %v28827_v33 = vpop.f32.mrb[37].mxu1  ;;  %v11174_v35 = vpop.f32.mrb[38].mxu0  ;;  %11475 = vmatpush1.bf16.msra.mxu0 %v19770_v14  ;;  %v19852_v14 = vcombine.low %v8194_v8, %v8202_v31 }
 0x986   :  { %v11256_v38 = vpop.f32.mrb[38].mxu1  ;;  %11557 = vmatpush1.bf16.msra.mxu1 %v19772_v41  ;;  %v11175_v1 = vpop.f32.mrb[39].mxu0  ;;  %11476 = vmatprep.subr.bf16.mxu0 %v19787_v15  ;;  %v19867_v41 = vcombine.high %v8209_v10, %v8217_v63  ;;  %v19869_v15 = vcombine.high %v8210_v27, %v8218_v11  ;;  %v19868_v35 = vcombine.low %v8210_v27, %v8218_v11  ;;  %v22710_v63 = vld [vmem:[%s31739_s14 + $0x4] ss:$28 sps:$4 sm:$0xff]  }
 0x987   :  { %11558 = vmatprep.subr.bf16.mxu1 %v19789_v19  ;;  %v11257_v21 = vpop.f32.mrb[39].mxu1  ;;  %v8225_v19 = vld [vmem:[%s31737_s12 + $0xe30] sm:$0xff]  ;;  %v19885_v38 = vcombine.high %v8226_v16, %v8234_v30  ;;  %v22708_v11 = vld [vmem:[%s31739_s14] ss:$28 sps:$4 sm:$0xff]  }
 0x988   :  { %v8241_v1 = vld [vmem:[%s31737_s12 + $0xeb0] sm:$0xff]  ;;  %v19882_v44 = vcombine.low %v8225_v19, %v8233_v22  ;;  %v19884_v21 = vcombine.low %v8226_v16, %v8234_v30 }
 0x989   :  { %11477 = vmatpush1.bf16.msra.mxu0 %v19786_v28  ;;  %v19883_v28 = vcombine.high %v8225_v19, %v8233_v22  ;;  %v22714_v19 = vld [vmem:[%s31739_s14 + $0x38] ss:$28 sps:$4 sm:$0xff]   ;;  %v22717_v22 = vld [vmem:[%s31739_s14 + $0x40] ss:$28 sps:$4 sm:$0xff]   ;;  %v22720_v30 = vld [vmem:[%s31739_s14 + $0x70] ss:$28 sps:$4 sm:$0xff]  }
 0x98a   :  { %11559 = vmatpush1.bf16.msra.mxu1 %v19788_v39  ;;  %11478 = vmatprep.subr.bf16.mxu0 %v19803_v36  ;;  %v8249_v39 = vld [vmem:[%s31737_s12 + $0xef0] sm:$0xff]  ;;  %v8242_v36 = vld [vmem:[%s31737_s12 + $0xeb8] sm:$0xff] }
 0x98b   :  { %11560 = vmatprep.subr.bf16.mxu1 %v19805_v40  ;;  %v8250_v40 = vld [vmem:[%s31737_s12 + $0xef8] sm:$0xff]  ;;  %v19899_v46 = vcombine.high %v8241_v1, %v8249_v39  ;;  %v19898_v53 = vcombine.low %v8241_v1, %v8249_v39  ;;  %v22722_v16 = vld [vmem:[%s31739_s14 + $0x74] ss:$28 sps:$4 sm:$0xff]   ;;  %v22734_v39 = vld [vmem:[%s31739_s14 + $0xe4] ss:$28 sps:$4 sm:$0xff]  }
 0x98c   :  { %v19901_v37 = vcombine.high %v8242_v36, %v8250_v40  ;;  %v19900_v34 = vcombine.low %v8242_v36, %v8250_v40  ;;  %v22729_v1 = vld [vmem:[%s31739_s14 + $0xb0] ss:$28 sps:$4 sm:$0xff]   ;;  %v22732_v40 = vld [vmem:[%s31739_s14 + $0xe0] ss:$28 sps:$4 sm:$0xff]  }
 0x98d   :  { %11479 = vmatpush1.bf16.msra.mxu0 %v19802_v59  ;;  %v8257_v59 = vld [vmem:[%s31737_s12 + $0xf30] sm:$0xff]  ;;  %v22737_v36 = vld [vmem:[%s31739_s14 + $0xec] ss:$28 sps:$4 sm:$0xff]  }
 0x98e   :  { %11561 = vmatpush1.bf16.msra.mxu1 %v19804_v45  ;;  %11480 = vmatprep.subr.bf16.mxu0 %v19819_v42  ;;  %v8265_v45 = vld [vmem:[%s31737_s12 + $0xf70] sm:$0xff]  ;;  %v8258_v42 = vld [vmem:[%s31737_s12 + $0xf38] sm:$0xff] }
 0x98f   :  { %11562 = vmatprep.subr.bf16.mxu1 %v19821_v17  ;;  %v8266_v17 = vld [vmem:[%s31737_s12 + $0xf78] sm:$0xff]  ;;  %v19915_v20 = vcombine.high %v8257_v59, %v8265_v45  ;;  %v19914_v8 = vcombine.low %v8257_v59, %v8265_v45  ;;  %v22746_v45 = vld [vmem:[%s31739_s14 + $0x154] ss:$28 sps:$4 sm:$0xff]  }
 0x990   :  { %v19916_v31 = vcombine.low %v8258_v42, %v8266_v17  ;;  %v22741_v59 = vld [vmem:[%s31739_s14 + $0x120] ss:$28 sps:$4 sm:$0xff]  }
 0x991   :  { %11481 = vmatpush1.bf16.msra.mxu0 %v19818_v60  ;;  %v19917_v60 = vcombine.high %v8258_v42, %v8266_v17  ;;  %v22749_v42 = vld [vmem:[%s31739_s14 + $0x15c] ss:$28 sps:$4 sm:$0xff]   ;;  %v22744_v17 = vld [vmem:[%s31739_s14 + $0x150] ss:$28 sps:$4 sm:$0xff]  }
 0x992   :  { %11563 = vmatpush1.bf16.msra.mxu1 %v19820_v54  ;;  %11482 = vmatprep.subr.bf16.mxu0 %v19835_v0  ;;  %v8273_v54 = vld [vmem:[%s31737_s12 + $0xfb0] sm:$0xff] }
 0x993   :  { %11564 = vmatprep.subr.bf16.mxu1 %v19837_v6  ;;  %v8281_v0 = vld [vmem:[%s31737_s12 + $0xff0] sm:$0xff]  ;;  %v8274_v6 = vld [vmem:[%s31737_s12 + $0xfb8] sm:$0xff] }
 0x994   :  { %v19932_v10 = vcombine.low %v8274_v6, %v8282_v7 }
 0x995   :  { %11483 = vmatpush1.bf16.msra.mxu0 %v19834_v25  ;;  %v19931_v25 = vcombine.high %v8273_v54, %v8281_v0 }
 0x996   :  { %11565 = vmatpush1.bf16.msra.mxu1 %v19836_v9  ;;  %11484 = vmatprep.subr.bf16.mxu0 %v19851_v23  ;;  %v19933_v9 = vcombine.high %v8274_v6, %v8282_v7  ;;  %v11604_v23 = vmul.f32 0.01, %v21090_v4  ;;  %v22756_v6 = vld [vmem:[%s31739_s14 + $0x1c0] ss:$28 sps:$4 sm:$0xff]   ;;  %v22759_v7 = vld [vmem:[%s31739_s14 + $0x1c8] ss:$28 sps:$4 sm:$0xff]  }
 0x997   :  { %11566 = vmatprep.subr.bf16.mxu1 %v19853_v52  ;;  %v19930_v52 = vcombine.low %v8273_v54, %v8281_v0  ;;  %v22758_v54 = vld [vmem:[%s31739_s14 + $0x1c4] ss:$28 sps:$4 sm:$0xff]   ;;  %v22761_v0 = vld [vmem:[%s31739_s14 + $0x1cc] ss:$28 sps:$4 sm:$0xff]  }
 0x998   :  { %v11620_v27 = vsel %vm11588_vm11, %v21090_v4, %v11604_v23  ;;  %v22764_v4 = vld [vmem:[%s31739_s14 + $0x1fc] ss:$28 sps:$4 sm:$0xff]  }
 0x999   :  { %11485 = vmatpush1.bf16.msra.mxu0 %v19850_v13  ;;  %v22711_v13 = vld [vmem:[%s31739_s14 + $0x8] ss:$28 sps:$4 sm:$0xff]   ;;  %v22773_v23 = vld [vmem:[%s31739_s14 + $0x23c] ss:$28 sps:$4 sm:$0xff]  }
 0x99a   :  { %11567 = vmatpush1.bf16.msra.mxu1 %v19852_v14  ;;  %11486 = vmatprep.subr.bf16.mxu0 %v19867_v41  ;;  %v22716_v14 = vld [vmem:[%s31739_s14 + $0x3c] ss:$28 sps:$4 sm:$0xff]   ;;  %v28948_v41 = vpack.c.bf16 %v11620_v27, %v11620_v27  ;;  %v22774_v27 = vld [vmem:[%s31739_s14 + $0x268] ss:$28 sps:$4 sm:$0xff]  }
 0x99b   :  { %11568 = vmatprep.subr.bf16.mxu1 %v19869_v15  ;;  %v22719_v15 = vld [vmem:[%s31739_s14 + $0x44] ss:$28 sps:$4 sm:$0xff]  }
 0x99d   :  { %11487 = vmatpush1.bf16.msra.mxu0 %v19866_v32  ;;  %v22723_v32 = vld [vmem:[%s31739_s14 + $0x78] ss:$28 sps:$4 sm:$0xff]  }
 0x99e   :  { %11569 = vmatpush1.bf16.msra.mxu1 %v19868_v35  ;;  %11488 = vmatprep.subr.bf16.mxu0 %v19883_v28  ;;  %v22728_v35 = vld [vmem:[%s31739_s14 + $0xac] ss:$28 sps:$4 sm:$0xff]   ;;  %v22731_v28 = vld [vmem:[%s31739_s14 + $0xb4] ss:$28 sps:$4 sm:$0xff]  }
 0x99f   :  { %11570 = vmatprep.subr.bf16.mxu1 %v19885_v38  ;;  %v22726_v38 = vld [vmem:[%s31739_s14 + $0xa8] ss:$28 sps:$4 sm:$0xff]  }
 0x9a1   :  { %11489 = vmatpush1.bf16.msra.mxu0 %v19882_v44  ;;  %v22735_v44 = vld [vmem:[%s31739_s14 + $0xe8] ss:$28 sps:$4 sm:$0xff]  }
 0x9a2   :  { %11571 = vmatpush1.bf16.msra.mxu1 %v19884_v21  ;;  %11490 = vmatprep.subr.bf16.mxu0 %v19899_v46  ;;  %v22740_v21 = vld [vmem:[%s31739_s14 + $0x11c] ss:$28 sps:$4 sm:$0xff]   ;;  %v22743_v46 = vld [vmem:[%s31739_s14 + $0x124] ss:$28 sps:$4 sm:$0xff]  }
 0x9a3   :  { %11572 = vmatprep.subr.bf16.mxu1 %v19901_v37  ;;  %v22738_v37 = vld [vmem:[%s31739_s14 + $0x118] ss:$28 sps:$4 sm:$0xff]  }
 0x9a5   :  { %11491 = vmatpush1.bf16.msra.mxu0 %v19898_v53  ;;  %v22752_v53 = vld [vmem:[%s31739_s14 + $0x18c] ss:$28 sps:$4 sm:$0xff]  }
 0x9a6   :  { %11573 = vmatpush1.bf16.msra.mxu1 %v19900_v34  ;;  %11492 = vmatprep.subr.bf16.mxu0 %v19915_v20  ;;  %v22755_v34 = vld [vmem:[%s31739_s14 + $0x194] ss:$28 sps:$4 sm:$0xff]   ;;  %v22750_v20 = vld [vmem:[%s31739_s14 + $0x188] ss:$28 sps:$4 sm:$0xff]  }
 0x9a7   :  { %11574 = vmatprep.subr.bf16.mxu1 %v19917_v60  ;;  %v22753_v60 = vld [vmem:[%s31739_s14 + $0x190] ss:$28 sps:$4 sm:$0xff]  }
 0x9a9   :  { %11493 = vmatpush1.bf16.msra.mxu0 %v19914_v8  ;;  %v22767_v8 = vld [vmem:[%s31739_s14 + $0x204] ss:$28 sps:$4 sm:$0xff]  }
 0x9aa   :  { %11575 = vmatpush1.bf16.msra.mxu1 %v19916_v31  ;;  %11494 = vmatprep.subr.bf16.mxu0 %v19931_v25  ;;  %v22762_v31 = vld [vmem:[%s31739_s14 + $0x1f8] ss:$28 sps:$4 sm:$0xff]   ;;  %v22765_v25 = vld [vmem:[%s31739_s14 + $0x200] ss:$28 sps:$4 sm:$0xff]  }
 0x9ab   :  { %11576 = vmatprep.subr.bf16.mxu1 %v19933_v9  ;;  %v22770_v9 = vld [vmem:[%s31739_s14 + $0x234] ss:$28 sps:$4 sm:$0xff]  }
 0x9ad   :  { %11495 = vmatpush1.bf16.msra.mxu0 %v19930_v52  ;;  %v22768_v52 = vld [vmem:[%s31739_s14 + $0x230] ss:$28 sps:$4 sm:$0xff]  }
 0x9ae   :  { %11577 = vmatpush1.bf16.msra.mxu1 %v19932_v10  ;;  %17016 = vmatprep.subr.bf16.mxu0 %v22710_v63  ;;  %v22771_v10 = vld [vmem:[%s31739_s14 + $0x238] ss:$28 sps:$4 sm:$0xff]   ;;  %v22776_v63 = vld [vmem:[%s31739_s14 + $0x26c] ss:$28 sps:$4 sm:$0xff]  }
 0x9af   :  { %17344 = vmatprep.subr.bf16.mxu1 %v22713_v43  ;;  %v22779_v43 = vld [vmem:[%s31739_s14 + $0x274] ss:$28 sps:$4 sm:$0xff]  }
 0x9b0   :  { %11497 = vmatmul.mubr.bf16.vlgmr.msra.gmra.mrb[44].mxu0 %v27755_v12 }
 0x9b1   :  { %11579 = vmatmul.mubr.bf16.vlgmr.msra.gmra.mrb[44].mxu1 %v27755_v12  ;;  %17017 = vmatpush1.bf16.msra.mxu0 %v22708_v11  ;;  %v22725_v12 = vld [vmem:[%s31739_s14 + $0x7c] ss:$28 sps:$4 sm:$0xff]   ;;  %v22777_v11 = vld [vmem:[%s31739_s14 + $0x270] ss:$28 sps:$4 sm:$0xff]  }
 0x9b2   :  { %17048 = vmatprep.mubr.bf16.mxu0 %v28948_v41  ;;  %17345 = vmatpush1.bf16.msra.mxu1 %v22711_v13  ;;  %v22782_v13 = vld [vmem:[%s31739_s14 + $0x2a4] ss:$28 sps:$4 sm:$0xff]  }
 0x9b3   :  { %17376 = vmatprep.mubr.bf16.mxu1 %v28948_v41  ;;  %17018 = vmatprep.subr.bf16.mxu0 %v22716_v14  ;;  %v22785_v14 = vld [vmem:[%s31739_s14 + $0x2ac] ss:$28 sps:$4 sm:$0xff]  }
 0x9b4   :  { %17346 = vmatprep.subr.bf16.mxu1 %v22719_v15  ;;  %v22780_v15 = vld [vmem:[%s31739_s14 + $0x2a0] ss:$28 sps:$4 sm:$0xff]  }
 0x9b5   :  { %17019 = vmatpush1.bf16.msra.mxu0 %v22714_v19  ;;  %v22783_v19 = vld [vmem:[%s31739_s14 + $0x2a8] ss:$28 sps:$4 sm:$0xff]  }
 0x9b6   :  { %17347 = vmatpush1.bf16.msra.mxu1 %v22717_v22  ;;  %17020 = vmatprep.subr.bf16.mxu0 %v22722_v16  ;;  %v22788_v22 = vld [vmem:[%s31739_s14 + $0x2dc] ss:$28 sps:$4 sm:$0xff]   ;;  %v8294_v16 = vrot.slane %v28904_v3, %v25006_v2 }
 0x9b7   :  { %17348 = vmatprep.subr.bf16.mxu1 %v22725_v12  ;;  %v22791_v12 = vld [vmem:[%s31739_s14 + $0x2e4] ss:$28 sps:$4 sm:$0xff]  }
 0x9b9   :  { %17021 = vmatpush1.bf16.msra.mxu0 %v22720_v30  ;;  %v8306_v30 = vrot.slane %v28904_v3, %v25573_v51 }
 0x9ba   :  { %17349 = vmatpush1.bf16.msra.mxu1 %v22723_v32  ;;  %17022 = vmatprep.subr.bf16.mxu0 %v22728_v35  ;;  %v22786_v32 = vld [vmem:[%s31739_s14 + $0x2d8] ss:$28 sps:$4 sm:$0xff]   ;;  %v22789_v35 = vld [vmem:[%s31739_s14 + $0x2e0] ss:$28 sps:$4 sm:$0xff]  }
 0x9bb   :  { %17350 = vmatprep.subr.bf16.mxu1 %v22731_v28  ;;  %v22794_v28 = vld [vmem:[%s31739_s14 + $0x314] ss:$28 sps:$4 sm:$0xff]  }
 0x9bd   :  { %17023 = vmatpush1.bf16.msra.mxu0 %v22726_v38  ;;  %v21089_v38 = vadd.f32 %v28409_v50, %v8294_v16  ;;  %v22800_v50 = vld [vmem:[%s31739_s14 + $0x34c] ss:$28 sps:$4 sm:$0xff]   ;;  %v22845_v16 = vld [vmem:[%s31739_s14 + $0x4dc] ss:$28 sps:$4 sm:$0xff]  }
 0x9be   :  { %17351 = vmatpush1.bf16.msra.mxu1 %v22729_v1  ;;  %17024 = vmatprep.subr.bf16.mxu0 %v22734_v39  ;;  %v22797_v1 = vld [vmem:[%s31739_s14 + $0x31c] ss:$28 sps:$4 sm:$0xff]   ;;  %v21092_v39 = vadd.f32 %v28421_v55, %v8306_v30  ;;  %v22803_v55 = vld [vmem:[%s31739_s14 + $0x354] ss:$28 sps:$4 sm:$0xff]  }
 0x9bf   :  { %17352 = vmatprep.subr.bf16.mxu1 %v22737_v36  ;;  %v22792_v36 = vld [vmem:[%s31739_s14 + $0x310] ss:$28 sps:$4 sm:$0xff]   ;;  %vm11587_vm12 = vcmp.gt.f32.partialorder %v21089_v38, 0.0 }
 0x9c0   :  { %vm11590_vm13 = vcmp.gt.f32.partialorder %v21092_v39, 0.0 }
 0x9c1   :  { %17025 = vmatpush1.bf16.msra.mxu0 %v22732_v40  ;;  %v22795_v40 = vld [vmem:[%s31739_s14 + $0x318] ss:$28 sps:$4 sm:$0xff]  }
 0x9c2   :  { %17353 = vmatpush1.bf16.msra.mxu1 %v22735_v44  ;;  %17026 = vmatprep.subr.bf16.mxu0 %v22740_v21  ;;  %v11603_v44 = vmul.f32 0.01, %v21089_v38  ;;  %v11606_v21 = vmul.f32 0.01, %v21092_v39 }
 0x9c3   :  { %17354 = vmatprep.subr.bf16.mxu1 %v22743_v46  ;;  %v22798_v46 = vld [vmem:[%s31739_s14 + $0x348] ss:$28 sps:$4 sm:$0xff]  }
 0x9c5   :  { %17027 = vmatpush1.bf16.msra.mxu0 %v22738_v37  ;;  %v22801_v37 = vld [vmem:[%s31739_s14 + $0x350] ss:$28 sps:$4 sm:$0xff]  }
 0x9c6   :  { %17355 = vmatpush1.bf16.msra.mxu1 %v22741_v59  ;;  %17028 = vmatprep.subr.bf16.mxu0 %v22746_v45  ;;  %v22806_v59 = vld [vmem:[%s31739_s14 + $0x384] ss:$28 sps:$4 sm:$0xff]   ;;  %v11619_v45 = vsel %vm11587_vm12, %v21089_v38, %v11603_v44 }
 0x9c7   :  { %17356 = vmatprep.subr.bf16.mxu1 %v22749_v42  ;;  %v22809_v42 = vld [vmem:[%s31739_s14 + $0x38c] ss:$28 sps:$4 sm:$0xff]  }
 0x9c8   :  { %v22846_v44 = vld [vmem:[%s31739_s14 + $0x508] ss:$28 sps:$4 sm:$0xff]  }
 0x9c9   :  { %17029 = vmatpush1.bf16.msra.mxu0 %v22744_v17  ;;  %v11622_v17 = vsel %vm11590_vm13, %v21092_v39, %v11606_v21  ;;  %v22843_v39 = vld [vmem:[%s31739_s14 + $0x4d8] ss:$28 sps:$4 sm:$0xff]   ;;  %v22854_v21 = vld [vmem:[%s31739_s14 + $0x544] ss:$28 sps:$4 sm:$0xff]  }
 0x9ca   :  { %17357 = vmatpush1.bf16.msra.mxu1 %v22747_v61  ;;  %17030 = vmatprep.subr.bf16.mxu0 %v22752_v53  ;;  %v22804_v61 = vld [vmem:[%s31739_s14 + $0x380] ss:$28 sps:$4 sm:$0xff]   ;;  %v29146_v53 = vpack.c.bf16 %v11619_v45, %v11619_v45 }
 0x9cb   :  { %17358 = vmatprep.subr.bf16.mxu1 %v22755_v34  ;;  %v22807_v34 = vld [vmem:[%s31739_s14 + $0x388] ss:$28 sps:$4 sm:$0xff]   ;;  %v22860_v45 = vld [vmem:[%s31739_s14 + $0x57c] ss:$28 sps:$4 sm:$0xff]  }
 0x9cd   :  { %17031 = vmatpush1.bf16.msra.mxu0 %v22750_v20  ;;  %v22812_v20 = vld [vmem:[%s31739_s14 + $0x3bc] ss:$28 sps:$4 sm:$0xff]  }
 0x9ce   :  { %17359 = vmatpush1.bf16.msra.mxu1 %v22753_v60  ;;  %17032 = vmatprep.subr.bf16.mxu0 %v22758_v54  ;;  %v29154_v60 = vpack.c.bf16 %v11622_v17, %v11622_v17  ;;  %v22815_v54 = vld [vmem:[%s31739_s14 + $0x3c4] ss:$28 sps:$4 sm:$0xff]   ;;  %v22858_v17 = vld [vmem:[%s31739_s14 + $0x578] ss:$28 sps:$4 sm:$0xff]  }
 0x9cf   :  { %17360 = vmatprep.subr.bf16.mxu1 %v22761_v0  ;;  %v22810_v0 = vld [vmem:[%s31739_s14 + $0x3b8] ss:$28 sps:$4 sm:$0xff]  }
 0x9d1   :  { %17033 = vmatpush1.bf16.msra.mxu0 %v22756_v6  ;;  %v22813_v6 = vld [vmem:[%s31739_s14 + $0x3c0] ss:$28 sps:$4 sm:$0xff]  }
 0x9d2   :  { %17361 = vmatpush1.bf16.msra.mxu1 %v22759_v7  ;;  %17034 = vmatprep.subr.bf16.mxu0 %v22764_v4  ;;  %v22818_v7 = vld [vmem:[%s31739_s14 + $0x3f4] ss:$28 sps:$4 sm:$0xff]   ;;  %v22821_v4 = vld [vmem:[%s31739_s14 + $0x3fc] ss:$28 sps:$4 sm:$0xff]  }
 0x9d3   :  { %17362 = vmatprep.subr.bf16.mxu1 %v22767_v8  ;;  %v22816_v8 = vld [vmem:[%s31739_s14 + $0x3f0] ss:$28 sps:$4 sm:$0xff]  }
 0x9d5   :  { %17035 = vmatpush1.bf16.msra.mxu0 %v22762_v31  ;;  %v22819_v31 = vld [vmem:[%s31739_s14 + $0x3f8] ss:$28 sps:$4 sm:$0xff]  }
 0x9d6   :  { %17363 = vmatpush1.bf16.msra.mxu1 %v22765_v25  ;;  %17036 = vmatprep.subr.bf16.mxu0 %v22770_v9  ;;  %v22824_v25 = vld [vmem:[%s31739_s14 + $0x42c] ss:$28 sps:$4 sm:$0xff]   ;;  %v22827_v9 = vld [vmem:[%s31739_s14 + $0x434] ss:$28 sps:$4 sm:$0xff]  }
 0x9d7   :  { %17364 = vmatprep.subr.bf16.mxu1 %v22773_v23  ;;  %v22822_v23 = vld [vmem:[%s31739_s14 + $0x428] ss:$28 sps:$4 sm:$0xff]  }
 0x9d9   :  { %17037 = vmatpush1.bf16.msra.mxu0 %v22768_v52  ;;  %v22825_v52 = vld [vmem:[%s31739_s14 + $0x430] ss:$28 sps:$4 sm:$0xff]  }
 0x9da   :  { %17365 = vmatpush1.bf16.msra.mxu1 %v22771_v10  ;;  %17038 = vmatprep.subr.bf16.mxu0 %v22776_v63  ;;  %v22830_v10 = vld [vmem:[%s31739_s14 + $0x464] ss:$28 sps:$4 sm:$0xff]   ;;  %v22833_v63 = vld [vmem:[%s31739_s14 + $0x46c] ss:$28 sps:$4 sm:$0xff]  }
 0x9db   :  { %17366 = vmatprep.subr.bf16.mxu1 %v22779_v43  ;;  %v22828_v43 = vld [vmem:[%s31739_s14 + $0x460] ss:$28 sps:$4 sm:$0xff]  }
 0x9dd   :  { %17039 = vmatpush1.bf16.msra.mxu0 %v22774_v27  ;;  %v22831_v27 = vld [vmem:[%s31739_s14 + $0x468] ss:$28 sps:$4 sm:$0xff]  }
 0x9de   :  { %17367 = vmatpush1.bf16.msra.mxu1 %v22777_v11  ;;  %17040 = vmatprep.subr.bf16.mxu0 %v22782_v13  ;;  %v22836_v11 = vld [vmem:[%s31739_s14 + $0x49c] ss:$28 sps:$4 sm:$0xff]   ;;  %v22839_v13 = vld [vmem:[%s31739_s14 + $0x4a4] ss:$28 sps:$4 sm:$0xff]  }
 0x9df   :  { %17368 = vmatprep.subr.bf16.mxu1 %v22785_v14  ;;  %v22834_v14 = vld [vmem:[%s31739_s14 + $0x498] ss:$28 sps:$4 sm:$0xff]  }
 0x9e1   :  { %17041 = vmatpush1.bf16.msra.mxu0 %v22780_v15  ;;  %v22837_v15 = vld [vmem:[%s31739_s14 + $0x4a0] ss:$28 sps:$4 sm:$0xff]  }
 0x9e2   :  { %17369 = vmatpush1.bf16.msra.mxu1 %v22783_v19  ;;  %17042 = vmatprep.subr.bf16.mxu0 %v22788_v22  ;;  %v22842_v19 = vld [vmem:[%s31739_s14 + $0x4d4] ss:$28 sps:$4 sm:$0xff]  }
 0x9e3   :  { %17370 = vmatprep.subr.bf16.mxu1 %v22791_v12 }
 0x9e5   :  { %17043 = vmatpush1.bf16.msra.mxu0 %v22786_v32 }
 0x9e6   :  { %17371 = vmatpush1.bf16.msra.mxu1 %v22789_v35  ;;  %17044 = vmatprep.subr.bf16.mxu0 %v22794_v28  ;;  %v22840_v28 = vld [vmem:[%s31739_s14 + $0x4d0] ss:$28 sps:$4 sm:$0xff]  }
 0x9e7   :  { %17372 = vmatprep.subr.bf16.mxu1 %v22797_v1 }
 0x9e9   :  { %17045 = vmatpush1.bf16.msra.mxu0 %v22792_v36  ;;  %v22848_v36 = vld [vmem:[%s31739_s14 + $0x50c] ss:$28 sps:$4 sm:$0xff]  }
 0x9ea   :  { %17373 = vmatpush1.bf16.msra.mxu1 %v22795_v40  ;;  %17046 = vmatprep.subr.bf16.mxu0 %v22800_v50  ;;  %v22851_v40 = vld [vmem:[%s31739_s14 + $0x514] ss:$28 sps:$4 sm:$0xff]  }
 0x9eb   :  { %17374 = vmatprep.subr.bf16.mxu1 %v22803_v55  ;;  %v22849_v55 = vld [vmem:[%s31739_s14 + $0x510] ss:$28 sps:$4 sm:$0xff]  }
 0x9ed   :  { %17047 = vmatpush1.bf16.msra.mxu0 %v22798_v46  ;;  %v22857_v46 = vld [vmem:[%s31739_s14 + $0x54c] ss:$28 sps:$4 sm:$0xff]  }
 0x9ee   :  { %17375 = vmatpush1.bf16.msra.mxu1 %v22801_v37  ;;  %17057 = vmatprep.subr.bf16.mxu0 %v22806_v59  ;;  %v22852_v37 = vld [vmem:[%s31739_s14 + $0x540] ss:$28 sps:$4 sm:$0xff]   ;;  %v22855_v59 = vld [vmem:[%s31739_s14 + $0x548] ss:$28 sps:$4 sm:$0xff]  }
 0x9ef   :  { %17385 = vmatprep.subr.bf16.mxu1 %v22809_v42  ;;  %v22863_v42 = vld [vmem:[%s31739_s14 + $0x584] ss:$28 sps:$4 sm:$0xff]  }
 0x9f0   :  { %17049 = vmatmul.mubr.bf16.vlgmr.msra.gmra.mrb[48].mxu0 %v29146_v53 }
 0x9f1   :  { %17377 = vmatmul.mubr.bf16.vlgmr.msra.gmra.mrb[48].mxu1 %v29146_v53  ;;  %17058 = vmatpush1.bf16.msra.mxu0 %v22804_v61  ;;  %v22861_v61 = vld [vmem:[%s31739_s14 + $0x580] ss:$28 sps:$4 sm:$0xff]  }
 0x9f2   :  { %17089 = vmatprep.mubr.bf16.mxu0 %v29154_v60  ;;  %17386 = vmatpush1.bf16.msra.mxu1 %v22807_v34  ;;  %v22866_v34 = vld [vmem:[%s31739_s14 + $0x5b4] ss:$28 sps:$4 sm:$0xff]  }
 0x9f3   :  { %17417 = vmatprep.mubr.bf16.mxu1 %v29154_v60  ;;  %17059 = vmatprep.subr.bf16.mxu0 %v22812_v20  ;;  %v22869_v20 = vld [vmem:[%s31739_s14 + $0x5bc] ss:$28 sps:$4 sm:$0xff]  }
 0x9f4   :  { %17387 = vmatprep.subr.bf16.mxu1 %v22815_v54  ;;  %v22864_v54 = vld [vmem:[%s31739_s14 + $0x5b0] ss:$28 sps:$4 sm:$0xff]  }
 0x9f5   :  { %17060 = vmatpush1.bf16.msra.mxu0 %v22810_v0  ;;  %v22867_v0 = vld [vmem:[%s31739_s14 + $0x5b8] ss:$28 sps:$4 sm:$0xff]  }
 0x9f6   :  { %17388 = vmatpush1.bf16.msra.mxu1 %v22813_v6  ;;  %17061 = vmatprep.subr.bf16.mxu0 %v22818_v7  ;;  %v22872_v6 = vld [vmem:[%s31739_s14 + $0x5ec] ss:$28 sps:$4 sm:$0xff]   ;;  %v22875_v7 = vld [vmem:[%s31739_s14 + $0x5f4] ss:$28 sps:$4 sm:$0xff]  }
 0x9f7   :  { %17389 = vmatprep.subr.bf16.mxu1 %v22821_v4  ;;  %v22870_v4 = vld [vmem:[%s31739_s14 + $0x5e8] ss:$28 sps:$4 sm:$0xff]  }
 0x9f9   :  { %17062 = vmatpush1.bf16.msra.mxu0 %v22816_v8  ;;  %v22873_v8 = vld [vmem:[%s31739_s14 + $0x5f0] ss:$28 sps:$4 sm:$0xff]  }
 0x9fa   :  { %17390 = vmatpush1.bf16.msra.mxu1 %v22819_v31  ;;  %17063 = vmatprep.subr.bf16.mxu0 %v22824_v25  ;;  %v22878_v31 = vld [vmem:[%s31739_s14 + $0x624] ss:$28 sps:$4 sm:$0xff]   ;;  %v22881_v25 = vld [vmem:[%s31739_s14 + $0x62c] ss:$28 sps:$4 sm:$0xff]  }
 0x9fb   :  { %17391 = vmatprep.subr.bf16.mxu1 %v22827_v9  ;;  %v22876_v9 = vld [vmem:[%s31739_s14 + $0x620] ss:$28 sps:$4 sm:$0xff]  }
 0x9fd   :  { %17064 = vmatpush1.bf16.msra.mxu0 %v22822_v23  ;;  %v22879_v23 = vld [vmem:[%s31739_s14 + $0x628] ss:$28 sps:$4 sm:$0xff]  }
 0x9fe   :  { %17392 = vmatpush1.bf16.msra.mxu1 %v22825_v52  ;;  %17065 = vmatprep.subr.bf16.mxu0 %v22830_v10  ;;  %v22884_v52 = vld [vmem:[%s31739_s14 + $0x65c] ss:$28 sps:$4 sm:$0xff]   ;;  %v8302_v10 = vrot.slane %v28904_v3, %v25780_v24 }
 0x9ff   :  { %17393 = vmatprep.subr.bf16.mxu1 %v22833_v63  ;;  %v22887_v63 = vld [vmem:[%s31739_s14 + $0x664] ss:$28 sps:$4 sm:$0xff]  }
 0xa01   :  { %17066 = vmatpush1.bf16.msra.mxu0 %v22828_v43  ;;  %v8314_v43 = vrot.slane %v28904_v3, %v25789_v62 }
 0xa02   :  { %17394 = vmatpush1.bf16.msra.mxu1 %v22831_v27  ;;  %17067 = vmatprep.subr.bf16.mxu0 %v22836_v11  ;;  %v22882_v27 = vld [vmem:[%s31739_s14 + $0x658] ss:$28 sps:$4 sm:$0xff]   ;;  %v22885_v11 = vld [vmem:[%s31739_s14 + $0x660] ss:$28 sps:$4 sm:$0xff]  }
 0xa03   :  { %v29220_v22 = vpop.f32.mrb[40].mxu0  ;;  %17395 = vmatprep.subr.bf16.mxu1 %v22839_v13  ;;  %v22890_v13 = vld [vmem:[%s31739_s14 + $0x694] ss:$28 sps:$4 sm:$0xff]  }
 0xa04   :  { %v29225_v12 = vpop.f32.mrb[40].mxu1  ;;  %v29227_v30 = vpop.f32.mrb[41].mxu0 }
 0xa05   :  { %v29229_v32 = vpop.f32.mrb[41].mxu1  ;;  %v11338_v35 = vpop.f32.mrb[42].mxu0  ;;  %17068 = vmatpush1.bf16.msra.mxu0 %v22834_v14  ;;  %v21091_v14 = vadd.f32 %v28411_v48, %v8302_v10  ;;  %v22896_v48 = vld [vmem:[%s31739_s14 + $0x6cc] ss:$28 sps:$4 sm:$0xff]   ;;  %v22930_v10 = vld [vmem:[%s31739_s14 + $0x818] ss:$28 sps:$4 sm:$0xff]  }
 0xa06   :  { %v11420_v38 = vpop.f32.mrb[42].mxu1  ;;  %17396 = vmatpush1.bf16.msra.mxu1 %v22837_v15  ;;  %v11339_v1 = vpop.f32.mrb[43].mxu0  ;;  %17069 = vmatprep.subr.bf16.mxu0 %v22842_v19  ;;  %v22893_v15 = vld [vmem:[%s31739_s14 + $0x69c] ss:$28 sps:$4 sm:$0xff]   ;;  %v21094_v19 = vadd.f32 %v28819_v29, %v8314_v43  ;;  %v22899_v29 = vld [vmem:[%s31739_s14 + $0x6d4] ss:$28 sps:$4 sm:$0xff]  }
 0xa07   :  { %17397 = vmatprep.subr.bf16.mxu1 %v22845_v16  ;;  %v11421_v50 = vpop.f32.mrb[43].mxu1  ;;  %v22888_v16 = vld [vmem:[%s31739_s14 + $0x690] ss:$28 sps:$4 sm:$0xff]   ;;  %v22891_v35 = vld [vmem:[%s31739_s14 + $0x698] ss:$28 sps:$4 sm:$0xff]   ;;  %vm11589_vm14 = vcmp.gt.f32.partialorder %v21091_v14, 0.0 }
 0xa08   :  { %v11608_v38 = vmul.f32 0.01, %v21094_v19  ;;  %v22894_v1 = vld [vmem:[%s31739_s14 + $0x6c8] ss:$28 sps:$4 sm:$0xff]   ;;  %vm11592_vm15 = vcmp.gt.f32.partialorder %v21094_v19, 0.0 }
 0xa09   :  { %17070 = vmatpush1.bf16.msra.mxu0 %v22840_v28  ;;  %v11605_v28 = vmul.f32 0.01, %v21091_v14  ;;  %v22905_v50 = vld [vmem:[%s31739_s14 + $0x70c] ss:$28 sps:$4 sm:$0xff]   ;;  %v22938_v43 = vld [vmem:[%s31739_s14 + $0x854] ss:$28 sps:$4 sm:$0xff]  }
 0xa0a   :  { %17398 = vmatpush1.bf16.msra.mxu1 %v22843_v39  ;;  %17071 = vmatprep.subr.bf16.mxu0 %v22848_v36  ;;  %v22897_v39 = vld [vmem:[%s31739_s14 + $0x6d0] ss:$28 sps:$4 sm:$0xff]   ;;  %v22902_v36 = vld [vmem:[%s31739_s14 + $0x704] ss:$28 sps:$4 sm:$0xff]  }
 0xa0b   :  { %17399 = vmatprep.subr.bf16.mxu1 %v22851_v40  ;;  %v11621_v40 = vsel %vm11589_vm14, %v21091_v14, %v11605_v28  ;;  %v22944_v14 = vld [vmem:[%s31739_s14 + $0x88c] ss:$28 sps:$4 sm:$0xff]   ;;  %v22948_v28 = vld [vmem:[%s31739_s14 + $0x8c0] ss:$28 sps:$4 sm:$0xff]  }
 0xa0d   :  { %17072 = vmatpush1.bf16.msra.mxu0 %v22846_v44  ;;  %v11624_v44 = vsel %vm11592_vm15, %v21094_v19, %v11608_v38  ;;  %v22942_v19 = vld [vmem:[%s31739_s14 + $0x888] ss:$28 sps:$4 sm:$0xff]   ;;  %v22956_v38 = vld [vmem:[%s31739_s14 + $0x8fc] ss:$28 sps:$4 sm:$0xff]  }
 0xa0e   :  { %17400 = vmatpush1.bf16.msra.mxu1 %v22849_v55  ;;  %17073 = vmatprep.subr.bf16.mxu0 %v22854_v21  ;;  %v22900_v55 = vld [vmem:[%s31739_s14 + $0x700] ss:$28 sps:$4 sm:$0xff]   ;;  %v29360_v21 = vpack.c.bf16 %v11621_v40, %v11621_v40  ;;  %v22962_v40 = vld [vmem:[%s31739_s14 + $0x934] ss:$28 sps:$4 sm:$0xff]  }
 0xa0f   :  { %17401 = vmatprep.subr.bf16.mxu1 %v22857_v46  ;;  %v22903_v46 = vld [vmem:[%s31739_s14 + $0x708] ss:$28 sps:$4 sm:$0xff]  }
 0xa11   :  { %17074 = vmatpush1.bf16.msra.mxu0 %v22852_v37  ;;  %v22908_v37 = vld [vmem:[%s31739_s14 + $0x73c] ss:$28 sps:$4 sm:$0xff]  }
 0xa12   :  { %17402 = vmatpush1.bf16.msra.mxu1 %v22855_v59  ;;  %17075 = vmatprep.subr.bf16.mxu0 %v22860_v45  ;;  %v29368_v59 = vpack.c.bf16 %v11624_v44, %v11624_v44  ;;  %v22911_v45 = vld [vmem:[%s31739_s14 + $0x744] ss:$28 sps:$4 sm:$0xff]   ;;  %v22960_v44 = vld [vmem:[%s31739_s14 + $0x930] ss:$28 sps:$4 sm:$0xff]  }
 0xa13   :  { %17403 = vmatprep.subr.bf16.mxu1 %v22863_v42  ;;  %v22906_v42 = vld [vmem:[%s31739_s14 + $0x738] ss:$28 sps:$4 sm:$0xff]  }
 0xa15   :  { %17076 = vmatpush1.bf16.msra.mxu0 %v22858_v17  ;;  %v22909_v17 = vld [vmem:[%s31739_s14 + $0x740] ss:$28 sps:$4 sm:$0xff]  }
 0xa16   :  { %17404 = vmatpush1.bf16.msra.mxu1 %v22861_v61  ;;  %17077 = vmatprep.subr.bf16.mxu0 %v22866_v34  ;;  %v22914_v61 = vld [vmem:[%s31739_s14 + $0x774] ss:$28 sps:$4 sm:$0xff]   ;;  %v22917_v34 = vld [vmem:[%s31739_s14 + $0x77c] ss:$28 sps:$4 sm:$0xff]  }
 0xa17   :  { %17405 = vmatprep.subr.bf16.mxu1 %v22869_v20  ;;  %v22912_v20 = vld [vmem:[%s31739_s14 + $0x770] ss:$28 sps:$4 sm:$0xff]  }
 0xa19   :  { %17078 = vmatpush1.bf16.msra.mxu0 %v22864_v54  ;;  %v22915_v54 = vld [vmem:[%s31739_s14 + $0x778] ss:$28 sps:$4 sm:$0xff]  }
 0xa1a   :  { %17406 = vmatpush1.bf16.msra.mxu1 %v22867_v0  ;;  %17079 = vmatprep.subr.bf16.mxu0 %v22872_v6  ;;  %v22920_v0 = vld [vmem:[%s31739_s14 + $0x7ac] ss:$28 sps:$4 sm:$0xff]   ;;  %v22923_v6 = vld [vmem:[%s31739_s14 + $0x7b4] ss:$28 sps:$4 sm:$0xff]  }
 0xa1b   :  { %17407 = vmatprep.subr.bf16.mxu1 %v22875_v7  ;;  %v22918_v7 = vld [vmem:[%s31739_s14 + $0x7a8] ss:$28 sps:$4 sm:$0xff]  }
 0xa1d   :  { %17080 = vmatpush1.bf16.msra.mxu0 %v22870_v4  ;;  %v22921_v4 = vld [vmem:[%s31739_s14 + $0x7b0] ss:$28 sps:$4 sm:$0xff]  }
 0xa1e   :  { %17408 = vmatpush1.bf16.msra.mxu1 %v22873_v8  ;;  %17081 = vmatprep.subr.bf16.mxu0 %v22878_v31  ;;  %v22926_v8 = vld [vmem:[%s31739_s14 + $0x7e4] ss:$28 sps:$4 sm:$0xff]   ;;  %v22929_v31 = vld [vmem:[%s31739_s14 + $0x7ec] ss:$28 sps:$4 sm:$0xff]  }
 0xa1f   :  { %17409 = vmatprep.subr.bf16.mxu1 %v22881_v25  ;;  %v22924_v25 = vld [vmem:[%s31739_s14 + $0x7e0] ss:$28 sps:$4 sm:$0xff]  }
 0xa21   :  { %17082 = vmatpush1.bf16.msra.mxu0 %v22876_v9  ;;  %v22927_v9 = vld [vmem:[%s31739_s14 + $0x7e8] ss:$28 sps:$4 sm:$0xff]  }
 0xa22   :  { %17410 = vmatpush1.bf16.msra.mxu1 %v22879_v23  ;;  %17083 = vmatprep.subr.bf16.mxu0 %v22884_v52  ;;  %v22932_v23 = vld [vmem:[%s31739_s14 + $0x81c] ss:$28 sps:$4 sm:$0xff]   ;;  %v22935_v52 = vld [vmem:[%s31739_s14 + $0x824] ss:$28 sps:$4 sm:$0xff]  }
 0xa23   :  { %17411 = vmatprep.subr.bf16.mxu1 %v22887_v63  ;;  %v22933_v63 = vld [vmem:[%s31739_s14 + $0x820] ss:$28 sps:$4 sm:$0xff]  }
 0xa25   :  { %17084 = vmatpush1.bf16.msra.mxu0 %v22882_v27  ;;  %v22941_v27 = vld [vmem:[%s31739_s14 + $0x85c] ss:$28 sps:$4 sm:$0xff]  }
 0xa26   :  { %17412 = vmatpush1.bf16.msra.mxu1 %v22885_v11  ;;  %17085 = vmatprep.subr.bf16.mxu0 %v22890_v13  ;;  %v22936_v11 = vld [vmem:[%s31739_s14 + $0x850] ss:$28 sps:$4 sm:$0xff]   ;;  %v22939_v13 = vld [vmem:[%s31739_s14 + $0x858] ss:$28 sps:$4 sm:$0xff]  }
 0xa27   :  { %17413 = vmatprep.subr.bf16.mxu1 %v22893_v15  ;;  %v22947_v15 = vld [vmem:[%s31739_s14 + $0x894] ss:$28 sps:$4 sm:$0xff]  }
 0xa29   :  { %17086 = vmatpush1.bf16.msra.mxu0 %v22888_v16  ;;  %v22945_v16 = vld [vmem:[%s31739_s14 + $0x890] ss:$28 sps:$4 sm:$0xff]  }
 0xa2a   :  { %17414 = vmatpush1.bf16.msra.mxu1 %v22891_v35  ;;  %17087 = vmatprep.subr.bf16.mxu0 %v22896_v48  ;;  %v22950_v35 = vld [vmem:[%s31739_s14 + $0x8c4] ss:$28 sps:$4 sm:$0xff]   ;;  %v22953_v48 = vld [vmem:[%s31739_s14 + $0x8cc] ss:$28 sps:$4 sm:$0xff]  }
 0xa2b   :  { %17415 = vmatprep.subr.bf16.mxu1 %v22899_v29  ;;  %v22951_v29 = vld [vmem:[%s31739_s14 + $0x8c8] ss:$28 sps:$4 sm:$0xff]  }
 0xa2d   :  { %17088 = vmatpush1.bf16.msra.mxu0 %v22894_v1  ;;  %v22959_v1 = vld [vmem:[%s31739_s14 + $0x904] ss:$28 sps:$4 sm:$0xff]  }
 0xa2e   :  { %17416 = vmatpush1.bf16.msra.mxu1 %v22897_v39  ;;  %17098 = vmatprep.subr.bf16.mxu0 %v22902_v36  ;;  %v22954_v39 = vld [vmem:[%s31739_s14 + $0x8f8] ss:$28 sps:$4 sm:$0xff]   ;;  %v22957_v36 = vld [vmem:[%s31739_s14 + $0x900] ss:$28 sps:$4 sm:$0xff]  }
 0xa2f   :  { %17426 = vmatprep.subr.bf16.mxu1 %v22905_v50  ;;  %v22965_v50 = vld [vmem:[%s31739_s14 + $0x93c] ss:$28 sps:$4 sm:$0xff]  }
 0xa30   :  { %17090 = vmatmul.mubr.bf16.vlgmr.msra.gmra.mrb[48].mxu0 %v29360_v21 }
 0xa31   :  { %17418 = vmatmul.mubr.bf16.vlgmr.msra.gmra.mrb[48].mxu1 %v29360_v21  ;;  %17099 = vmatpush1.bf16.msra.mxu0 %v22900_v55  ;;  %v22963_v55 = vld [vmem:[%s31739_s14 + $0x938] ss:$28 sps:$4 sm:$0xff]  }
 0xa32   :  { %17130 = vmatprep.mubr.bf16.mxu0 %v29368_v59  ;;  %17427 = vmatpush1.bf16.msra.mxu1 %v22903_v46  ;;  %v22968_v46 = vld [vmem:[%s31739_s14 + $0x96c] ss:$28 sps:$4 sm:$0xff]  }
 0xa33   :  { %17458 = vmatprep.mubr.bf16.mxu1 %v29368_v59  ;;  %17100 = vmatprep.subr.bf16.mxu0 %v22908_v37  ;;  %v22971_v37 = vld [vmem:[%s31739_s14 + $0x974] ss:$28 sps:$4 sm:$0xff]  }
 0xa34   :  { %17428 = vmatprep.subr.bf16.mxu1 %v22911_v45  ;;  %v22966_v45 = vld [vmem:[%s31739_s14 + $0x968] ss:$28 sps:$4 sm:$0xff]  }
 0xa35   :  { %17101 = vmatpush1.bf16.msra.mxu0 %v22906_v42  ;;  %v22969_v42 = vld [vmem:[%s31739_s14 + $0x970] ss:$28 sps:$4 sm:$0xff]  }
 0xa36   :  { %17429 = vmatpush1.bf16.msra.mxu1 %v22909_v17  ;;  %17102 = vmatprep.subr.bf16.mxu0 %v22914_v61  ;;  %v22974_v17 = vld [vmem:[%s31739_s14 + $0x9a4] ss:$28 sps:$4 sm:$0xff]   ;;  %v22977_v61 = vld [vmem:[%s31739_s14 + $0x9ac] ss:$28 sps:$4 sm:$0xff]  }
 0xa37   :  { %17430 = vmatprep.subr.bf16.mxu1 %v22917_v34  ;;  %v22972_v34 = vld [vmem:[%s31739_s14 + $0x9a0] ss:$28 sps:$4 sm:$0xff]  }
 0xa39   :  { %17103 = vmatpush1.bf16.msra.mxu0 %v22912_v20  ;;  %v22975_v20 = vld [vmem:[%s31739_s14 + $0x9a8] ss:$28 sps:$4 sm:$0xff]  }
 0xa3a   :  { %17431 = vmatpush1.bf16.msra.mxu1 %v22915_v54  ;;  %17104 = vmatprep.subr.bf16.mxu0 %v22920_v0  ;;  %v22980_v54 = vld [vmem:[%s31739_s14 + $0x9dc] ss:$28 sps:$4 sm:$0xff]   ;;  %v8310_v0 = vrot.slane %v28904_v3, %v26002_v57 }
 0xa3b   :  { %17432 = vmatprep.subr.bf16.mxu1 %v22923_v6  ;;  %v22983_v6 = vld [vmem:[%s31739_s14 + $0x9e4] ss:$28 sps:$4 sm:$0xff]  }
 0xa3d   :  { %17105 = vmatpush1.bf16.msra.mxu0 %v22918_v7  ;;  %v8322_v7 = vrot.slane %v28904_v3, %v26005_v58  ;;  %v22989_v3 = vld [vmem:[%s31739_s14 + $0xa1c] ss:$28 sps:$4 sm:$0xff]  }
 0xa3e   :  { %17433 = vmatpush1.bf16.msra.mxu1 %v22921_v4  ;;  %17106 = vmatprep.subr.bf16.mxu0 %v22926_v8  ;;  %v22978_v4 = vld [vmem:[%s31739_s14 + $0x9d8] ss:$28 sps:$4 sm:$0xff]   ;;  %v22981_v8 = vld [vmem:[%s31739_s14 + $0x9e0] ss:$28 sps:$4 sm:$0xff]  }
 0xa3f   :  { %17434 = vmatprep.subr.bf16.mxu1 %v22929_v31  ;;  %v22986_v31 = vld [vmem:[%s31739_s14 + $0xa14] ss:$28 sps:$4 sm:$0xff]  }
 0xa41   :  { %17107 = vmatpush1.bf16.msra.mxu0 %v22924_v25  ;;  %v21093_v25 = vadd.f32 %v28809_v18, %v8310_v0  ;;  %v22992_v18 = vld [vmem:[%s31739_s14 + $0xa4c] ss:$28 sps:$4 sm:$0xff]   ;;  %v23029_v0 = vld [vmem:[%s31739_s14 + $0xba0] ss:$28 sps:$4 sm:$0xff]  }
 0xa42   :  { %17435 = vmatpush1.bf16.msra.mxu1 %v22927_v9  ;;  %17108 = vmatprep.subr.bf16.mxu0 %v22932_v23  ;;  %v21096_v9 = vadd.f32 %v28827_v33, %v8322_v7  ;;  %v22984_v23 = vld [vmem:[%s31739_s14 + $0xa10] ss:$28 sps:$4 sm:$0xff]  }
 0xa43   :  { %17436 = vmatprep.subr.bf16.mxu1 %v22935_v52  ;;  %v22987_v52 = vld [vmem:[%s31739_s14 + $0xa18] ss:$28 sps:$4 sm:$0xff]   ;;  %vm11591_vm0 = vcmp.gt.f32.partialorder %v21093_v25, 0.0 }
 0xa44   :  { %v22995_v33 = vld [vmem:[%s31739_s14 + $0xa54] ss:$28 sps:$4 sm:$0xff]   ;;  %vm11594_vm1 = vcmp.gt.f32.partialorder %v21096_v9, 0.0 }
 0xa45   :  { %17109 = vmatpush1.bf16.msra.mxu0 %v22930_v10  ;;  %v11607_v10 = vmul.f32 0.01, %v21093_v25 }
 0xa46   :  { %17437 = vmatpush1.bf16.msra.mxu1 %v22933_v63  ;;  %17110 = vmatprep.subr.bf16.mxu0 %v22938_v43  ;;  %v11610_v63 = vmul.f32 0.01, %v21096_v9  ;;  %v22990_v43 = vld [vmem:[%s31739_s14 + $0xa48] ss:$28 sps:$4 sm:$0xff]  }
 0xa47   :  { %17438 = vmatprep.subr.bf16.mxu1 %v22941_v27  ;;  %v22993_v27 = vld [vmem:[%s31739_s14 + $0xa50] ss:$28 sps:$4 sm:$0xff]  }
 0xa49   :  { %17111 = vmatpush1.bf16.msra.mxu0 %v22936_v11  ;;  %v22998_v11 = vld [vmem:[%s31739_s14 + $0xa84] ss:$28 sps:$4 sm:$0xff]  }
 0xa4a   :  { %17439 = vmatpush1.bf16.msra.mxu1 %v22939_v13  ;;  %17112 = vmatprep.subr.bf16.mxu0 %v22944_v14  ;;  %v11623_v13 = vsel %vm11591_vm0, %v21093_v25, %v11607_v10  ;;  %v23001_v14 = vld [vmem:[%s31739_s14 + $0xa8c] ss:$28 sps:$4 sm:$0xff]  }
 0xa4b   :  { %17440 = vmatprep.subr.bf16.mxu1 %v22947_v15  ;;  %v11626_v15 = vsel %vm11594_vm1, %v21096_v9, %v11610_v63  ;;  %v23032_v9 = vld [vmem:[%s31739_s14 + $0xbd0] ss:$28 sps:$4 sm:$0xff]  }
 0xa4c   :  { %v23040_v10 = vld [vmem:[%s31739_s14 + $0xc0c] ss:$28 sps:$4 sm:$0xff]  }
 0xa4d   :  { %17113 = vmatpush1.bf16.msra.mxu0 %v22942_v19  ;;  %v22996_v19 = vld [vmem:[%s31739_s14 + $0xa80] ss:$28 sps:$4 sm:$0xff]  }
 0xa4e   :  { %17441 = vmatpush1.bf16.msra.mxu1 %v22945_v16  ;;  %17114 = vmatprep.subr.bf16.mxu0 %v22950_v35  ;;  %v29566_v16 = vpack.c.bf16 %v11623_v13, %v11623_v13  ;;  %v22999_v35 = vld [vmem:[%s31739_s14 + $0xa88] ss:$28 sps:$4 sm:$0xff]  }
 0xa4f   :  { %17442 = vmatprep.subr.bf16.mxu1 %v22953_v48  ;;  %v23004_v48 = vld [vmem:[%s31739_s14 + $0xabc] ss:$28 sps:$4 sm:$0xff]   ;;  %v23049_v13 = vld [vmem:[%s31739_s14 + $0xc4c] ss:$28 sps:$4 sm:$0xff]  }
 0xa51   :  { %17115 = vmatpush1.bf16.msra.mxu0 %v22948_v28  ;;  %v29574_v28 = vpack.c.bf16 %v11626_v15, %v11626_v15  ;;  %v23047_v15 = vld [vmem:[%s31739_s14 + $0xc48] ss:$28 sps:$4 sm:$0xff]  }
 0xa52   :  { %17443 = vmatpush1.bf16.msra.mxu1 %v22951_v29  ;;  %17116 = vmatprep.subr.bf16.mxu0 %v22956_v38  ;;  %v23007_v29 = vld [vmem:[%s31739_s14 + $0xac4] ss:$28 sps:$4 sm:$0xff]   ;;  %v23002_v38 = vld [vmem:[%s31739_s14 + $0xab8] ss:$28 sps:$4 sm:$0xff]  }
 0xa53   :  { %17444 = vmatprep.subr.bf16.mxu1 %v22959_v1  ;;  %v23005_v1 = vld [vmem:[%s31739_s14 + $0xac0] ss:$28 sps:$4 sm:$0xff]  }
 0xa55   :  { %17117 = vmatpush1.bf16.msra.mxu0 %v22954_v39  ;;  %v23010_v39 = vld [vmem:[%s31739_s14 + $0xaf4] ss:$28 sps:$4 sm:$0xff]  }
 0xa56   :  { %17445 = vmatpush1.bf16.msra.mxu1 %v22957_v36  ;;  %17118 = vmatprep.subr.bf16.mxu0 %v22962_v40  ;;  %v23013_v36 = vld [vmem:[%s31739_s14 + $0xafc] ss:$28 sps:$4 sm:$0xff]   ;;  %v23008_v40 = vld [vmem:[%s31739_s14 + $0xaf0] ss:$28 sps:$4 sm:$0xff]  }
 0xa57   :  { %17446 = vmatprep.subr.bf16.mxu1 %v22965_v50  ;;  %v23011_v50 = vld [vmem:[%s31739_s14 + $0xaf8] ss:$28 sps:$4 sm:$0xff]  }
 0xa59   :  { %17119 = vmatpush1.bf16.msra.mxu0 %v22960_v44  ;;  %v23016_v44 = vld [vmem:[%s31739_s14 + $0xb2c] ss:$28 sps:$4 sm:$0xff]  }
 0xa5a   :  { %17447 = vmatpush1.bf16.msra.mxu1 %v22963_v55  ;;  %17120 = vmatprep.subr.bf16.mxu0 %v22968_v46  ;;  %v23019_v55 = vld [vmem:[%s31739_s14 + $0xb34] ss:$28 sps:$4 sm:$0xff]   ;;  %v23014_v46 = vld [vmem:[%s31739_s14 + $0xb28] ss:$28 sps:$4 sm:$0xff]  }
 0xa5b   :  { %17448 = vmatprep.subr.bf16.mxu1 %v22971_v37  ;;  %v23017_v37 = vld [vmem:[%s31739_s14 + $0xb30] ss:$28 sps:$4 sm:$0xff]  }
 0xa5d   :  { %17121 = vmatpush1.bf16.msra.mxu0 %v22966_v45  ;;  %v23022_v45 = vld [vmem:[%s31739_s14 + $0xb64] ss:$28 sps:$4 sm:$0xff]  }
 0xa5e   :  { %17449 = vmatpush1.bf16.msra.mxu1 %v22969_v42  ;;  %17122 = vmatprep.subr.bf16.mxu0 %v22974_v17  ;;  %v23025_v42 = vld [vmem:[%s31739_s14 + $0xb6c] ss:$28 sps:$4 sm:$0xff]   ;;  %v23020_v17 = vld [vmem:[%s31739_s14 + $0xb60] ss:$28 sps:$4 sm:$0xff]  }
 0xa5f   :  { %17450 = vmatprep.subr.bf16.mxu1 %v22977_v61  ;;  %v23023_v61 = vld [vmem:[%s31739_s14 + $0xb68] ss:$28 sps:$4 sm:$0xff]  }
 0xa61   :  { %17123 = vmatpush1.bf16.msra.mxu0 %v22972_v34  ;;  %v23028_v34 = vld [vmem:[%s31739_s14 + $0xb9c] ss:$28 sps:$4 sm:$0xff]  }
 0xa62   :  { %17451 = vmatpush1.bf16.msra.mxu1 %v22975_v20  ;;  %17124 = vmatprep.subr.bf16.mxu0 %v22980_v54  ;;  %v23031_v20 = vld [vmem:[%s31739_s14 + $0xba4] ss:$28 sps:$4 sm:$0xff]   ;;  %v23026_v54 = vld [vmem:[%s31739_s14 + $0xb98] ss:$28 sps:$4 sm:$0xff]  }
 0xa63   :  { %17452 = vmatprep.subr.bf16.mxu1 %v22983_v6  ;;  %v23034_v6 = vld [vmem:[%s31739_s14 + $0xbd4] ss:$28 sps:$4 sm:$0xff]  }
 0xa65   :  { %17125 = vmatpush1.bf16.msra.mxu0 %v22978_v4  ;;  %v23037_v4 = vld [vmem:[%s31739_s14 + $0xbdc] ss:$28 sps:$4 sm:$0xff]  }
 0xa66   :  { %17453 = vmatpush1.bf16.msra.mxu1 %v22981_v8  ;;  %17126 = vmatprep.subr.bf16.mxu0 %v22986_v31 }
 0xa67   :  { %17454 = vmatprep.subr.bf16.mxu1 %v22989_v3 }
 0xa69   :  { %17127 = vmatpush1.bf16.msra.mxu0 %v22984_v23 }
 0xa6a   :  { %17455 = vmatpush1.bf16.msra.mxu1 %v22987_v52  ;;  %17128 = vmatprep.subr.bf16.mxu0 %v22992_v18  ;;  %v23035_v18 = vld [vmem:[%s31739_s14 + $0xbd8] ss:$28 sps:$4 sm:$0xff]  }
 0xa6b   :  { %17456 = vmatprep.subr.bf16.mxu1 %v22995_v33  ;;  %v23043_v33 = vld [vmem:[%s31739_s14 + $0xc14] ss:$28 sps:$4 sm:$0xff]  }
 0xa6d   :  { %17129 = vmatpush1.bf16.msra.mxu0 %v22990_v43  ;;  %v23038_v43 = vld [vmem:[%s31739_s14 + $0xc08] ss:$28 sps:$4 sm:$0xff]  }
 0xa6e   :  { %17457 = vmatpush1.bf16.msra.mxu1 %v22993_v27  ;;  %17139 = vmatprep.subr.bf16.mxu0 %v22998_v11  ;;  %v23041_v27 = vld [vmem:[%s31739_s14 + $0xc10] ss:$28 sps:$4 sm:$0xff]   ;;  %v23046_v11 = vld [vmem:[%s31739_s14 + $0xc44] ss:$28 sps:$4 sm:$0xff]  }
 0xa6f   :  { %17467 = vmatprep.subr.bf16.mxu1 %v23001_v14  ;;  %v23044_v14 = vld [vmem:[%s31739_s14 + $0xc40] ss:$28 sps:$4 sm:$0xff]  }
 0xa70   :  { %17131 = vmatmul.mubr.bf16.vlgmr.msra.gmra.mrb[48].mxu0 %v29566_v16 }
 0xa71   :  { %17459 = vmatmul.mubr.bf16.vlgmr.msra.gmra.mrb[48].mxu1 %v29566_v16  ;;  %17140 = vmatpush1.bf16.msra.mxu0 %v22996_v19  ;;  %v23052_v19 = vld [vmem:[%s31739_s14 + $0xc7c] ss:$28 sps:$4 sm:$0xff]  }
 0xa72   :  { %17171 = vmatprep.mubr.bf16.mxu0 %v29574_v28  ;;  %17468 = vmatpush1.bf16.msra.mxu1 %v22999_v35  ;;  %v23055_v35 = vld [vmem:[%s31739_s14 + $0xc84] ss:$28 sps:$4 sm:$0xff]  }
 0xa73   :  { %17499 = vmatprep.mubr.bf16.mxu1 %v29574_v28  ;;  %17141 = vmatprep.subr.bf16.mxu0 %v23004_v48  ;;  %v23050_v48 = vld [vmem:[%s31739_s14 + $0xc78] ss:$28 sps:$4 sm:$0xff]  }
 0xa74   :  { %17469 = vmatprep.subr.bf16.mxu1 %v23007_v29  ;;  %v23053_v29 = vld [vmem:[%s31739_s14 + $0xc80] ss:$28 sps:$4 sm:$0xff]  }
 0xa75   :  { %17142 = vmatpush1.bf16.msra.mxu0 %v23002_v38  ;;  %v23058_v38 = vld [vmem:[%s31739_s14 + $0xcb4] ss:$28 sps:$4 sm:$0xff]  }
 0xa76   :  { %17470 = vmatpush1.bf16.msra.mxu1 %v23005_v1  ;;  %17143 = vmatprep.subr.bf16.mxu0 %v23010_v39  ;;  %v23061_v1 = vld [vmem:[%s31739_s14 + $0xcbc] ss:$28 sps:$4 sm:$0xff]   ;;  %v23056_v39 = vld [vmem:[%s31739_s14 + $0xcb0] ss:$28 sps:$4 sm:$0xff]  }
 0xa77   :  { %17471 = vmatprep.subr.bf16.mxu1 %v23013_v36  ;;  %v23059_v36 = vld [vmem:[%s31739_s14 + $0xcb8] ss:$28 sps:$4 sm:$0xff]  }
 0xa79   :  { %17144 = vmatpush1.bf16.msra.mxu0 %v23008_v40  ;;  %v23064_v40 = vld [vmem:[%s31739_s14 + $0xcec] ss:$28 sps:$4 sm:$0xff]  }
 0xa7a   :  { %17472 = vmatpush1.bf16.msra.mxu1 %v23011_v50  ;;  %17145 = vmatprep.subr.bf16.mxu0 %v23016_v44  ;;  %v23067_v50 = vld [vmem:[%s31739_s14 + $0xcf4] ss:$28 sps:$4 sm:$0xff]   ;;  %v23062_v44 = vld [vmem:[%s31739_s14 + $0xce8] ss:$28 sps:$4 sm:$0xff]  }
 0xa7b   :  { %17473 = vmatprep.subr.bf16.mxu1 %v23019_v55  ;;  %v23065_v55 = vld [vmem:[%s31739_s14 + $0xcf0] ss:$28 sps:$4 sm:$0xff]  }
 0xa7d   :  { %17146 = vmatpush1.bf16.msra.mxu0 %v23014_v46  ;;  %v23070_v46 = vld [vmem:[%s31739_s14 + $0xd24] ss:$28 sps:$4 sm:$0xff]  }
 0xa7e   :  { %17474 = vmatpush1.bf16.msra.mxu1 %v23017_v37  ;;  %17147 = vmatprep.subr.bf16.mxu0 %v23022_v45  ;;  %v23073_v37 = vld [vmem:[%s31739_s14 + $0xd2c] ss:$28 sps:$4 sm:$0xff]   ;;  %v23068_v45 = vld [vmem:[%s31739_s14 + $0xd20] ss:$28 sps:$4 sm:$0xff]  }
 0xa7f   :  { %17475 = vmatprep.subr.bf16.mxu1 %v23025_v42  ;;  %v29729_v42 = vld [vmem:[%s31738_s13 + $0x8] sm:$0xff] }
 0xa81   :  { %17148 = vmatpush1.bf16.msra.mxu0 %v23020_v17  ;;  %v23071_v17 = vld [vmem:[%s31739_s14 + $0xd28] ss:$28 sps:$4 sm:$0xff]  }
 0xa82   :  { %17476 = vmatpush1.bf16.msra.mxu1 %v23023_v61  ;;  %17149 = vmatprep.subr.bf16.mxu0 %v23028_v34  ;;  %v23076_v61 = vld [vmem:[%s31739_s14 + $0xd5c] ss:$28 sps:$4 sm:$0xff]   ;;  %v23951_v34 = vld [vmem:[%s31738_s13] sm:$0xff] }
 0xa83   :  { %v29640_v7 = vpop.f32.mrb[44].mxu0  ;;  %17477 = vmatprep.subr.bf16.mxu1 %v23031_v20  ;;  %v8318_v20 = vrot.slane %v23951_v34, %v26221_v47  ;;  %v23121_v34 = vld [vmem:[%s31739_s14 + $0xeec] ss:$28 sps:$4 sm:$0xff]  }
 0xa84   :  { %v29645_v8 = vpop.f32.mrb[44].mxu1  ;;  %v29647_v31 = vpop.f32.mrb[45].mxu0 }
 0xa85   :  { %v29649_v25 = vpop.f32.mrb[45].mxu1  ;;  %v11502_v3 = vpop.f32.mrb[46].mxu0  ;;  %17150 = vmatpush1.bf16.msra.mxu0 %v23026_v54  ;;  %v23079_v54 = vld [vmem:[%s31739_s14 + $0xd64] ss:$28 sps:$4 sm:$0xff]  }
 0xa86   :  { %v11584_v23 = vpop.f32.mrb[46].mxu1  ;;  %17478 = vmatpush1.bf16.msra.mxu1 %v23029_v0  ;;  %v11503_v52 = vpop.f32.mrb[47].mxu0  ;;  %17151 = vmatprep.subr.bf16.mxu0 %v23034_v6  ;;  %v8330_v0 = vrot.slane %v29729_v42, %v25012_v5  ;;  %v23074_v6 = vld [vmem:[%s31739_s14 + $0xd58] ss:$28 sps:$4 sm:$0xff]  }
 0xa87   :  { %17479 = vmatprep.subr.bf16.mxu1 %v23037_v4  ;;  %v11585_v63 = vpop.f32.mrb[47].mxu1  ;;  %v23077_v4 = vld [vmem:[%s31739_s14 + $0xd60] ss:$28 sps:$4 sm:$0xff]   ;;  %v23082_v3 = vld [vmem:[%s31739_s14 + $0xd94] ss:$28 sps:$4 sm:$0xff]  }
 0xa88   :  { %v23085_v23 = vld [vmem:[%s31739_s14 + $0xd9c] ss:$28 sps:$4 sm:$0xff]   ;;  %v21098_v52 = vadd.f32 %v29227_v30, %v8330_v0  ;;  %v23091_v30 = vld [vmem:[%s31739_s14 + $0xdd4] ss:$28 sps:$4 sm:$0xff]  }
 0xa89   :  { %17152 = vmatpush1.bf16.msra.mxu0 %v23032_v9  ;;  %v21095_v9 = vadd.f32 %v28817_v56, %v8318_v20  ;;  %v23088_v56 = vld [vmem:[%s31739_s14 + $0xdcc] ss:$28 sps:$4 sm:$0xff]   ;;  %v23116_v20 = vld [vmem:[%s31739_s14 + $0xee0] ss:$28 sps:$4 sm:$0xff]  }
 0xa8a   :  { %17480 = vmatpush1.bf16.msra.mxu1 %v23035_v18  ;;  %17153 = vmatprep.subr.bf16.mxu0 %v23040_v10  ;;  %v23080_v18 = vld [vmem:[%s31739_s14 + $0xd90] ss:$28 sps:$4 sm:$0xff]   ;;  %v23083_v10 = vld [vmem:[%s31739_s14 + $0xd98] ss:$28 sps:$4 sm:$0xff]   ;;  %v11612_v63 = vmul.f32 0.01, %v21098_v52 }
 0xa8b   :  { %17481 = vmatprep.subr.bf16.mxu1 %v23043_v33  ;;  %v11609_v33 = vmul.f32 0.01, %v21095_v9  ;;  %vm11593_vm2 = vcmp.gt.f32.partialorder %v21095_v9, 0.0  ;;  %vm11596_vm3 = vcmp.gt.f32.partialorder %v21098_v52, 0.0  ;;  %v23124_v0 = vld [vmem:[%s31739_s14 + $0xf1c] ss:$28 sps:$4 sm:$0xff]  }
 0xa8d   :  { %17154 = vmatpush1.bf16.msra.mxu0 %v23038_v43  ;;  %v23086_v43 = vld [vmem:[%s31739_s14 + $0xdc8] ss:$28 sps:$4 sm:$0xff]  }
 0xa8e   :  { %17482 = vmatpush1.bf16.msra.mxu1 %v23041_v27  ;;  %17155 = vmatprep.subr.bf16.mxu0 %v23046_v11  ;;  %v23089_v27 = vld [vmem:[%s31739_s14 + $0xdd0] ss:$28 sps:$4 sm:$0xff]   ;;  %v23094_v11 = vld [vmem:[%s31739_s14 + $0xe04] ss:$28 sps:$4 sm:$0xff]  }
 0xa8f   :  { %17483 = vmatprep.subr.bf16.mxu1 %v23049_v13  ;;  %v11625_v13 = vsel %vm11593_vm2, %v21095_v9, %v11609_v33  ;;  %v23130_v9 = vld [vmem:[%s31739_s14 + $0xf54] ss:$28 sps:$4 sm:$0xff]   ;;  %v23134_v33 = vld [vmem:[%s31739_s14 + $0xf88] ss:$28 sps:$4 sm:$0xff]  }
 0xa91   :  { %17156 = vmatpush1.bf16.msra.mxu0 %v23044_v14  ;;  %v23097_v14 = vld [vmem:[%s31739_s14 + $0xe0c] ss:$28 sps:$4 sm:$0xff]  }
 0xa92   :  { %17484 = vmatpush1.bf16.msra.mxu1 %v23047_v15  ;;  %17157 = vmatprep.subr.bf16.mxu0 %v23052_v19  ;;  %v11628_v15 = vsel %vm11596_vm3, %v21098_v52, %v11612_v63  ;;  %v23092_v19 = vld [vmem:[%s31739_s14 + $0xe00] ss:$28 sps:$4 sm:$0xff]   ;;  %v23128_v52 = vld [vmem:[%s31739_s14 + $0xf50] ss:$28 sps:$4 sm:$0xff]  }
 0xa93   :  { %17485 = vmatprep.subr.bf16.mxu1 %v23055_v35  ;;  %v29787_v35 = vpack.c.bf16 %v11625_v13, %v11625_v13  ;;  %v23142_v63 = vld [vmem:[%s31739_s14 + $0xfc4] ss:$28 sps:$4 sm:$0xff]   ;;  %v23148_v13 = vld [vmem:[%s31739_s14 + $0xffc] ss:$28 sps:$4 sm:$0xff]  }
 0xa95   :  { %17158 = vmatpush1.bf16.msra.mxu0 %v23050_v48  ;;  %v23095_v48 = vld [vmem:[%s31739_s14 + $0xe08] ss:$28 sps:$4 sm:$0xff]  }
 0xa96   :  { %17486 = vmatpush1.bf16.msra.mxu1 %v23053_v29  ;;  %17159 = vmatprep.subr.bf16.mxu0 %v23058_v38  ;;  %v23100_v29 = vld [vmem:[%s31739_s14 + $0xe3c] ss:$28 sps:$4 sm:$0xff]   ;;  %v29795_v38 = vpack.c.bf16 %v11628_v15, %v11628_v15 }
 0xa97   :  { %17487 = vmatprep.subr.bf16.mxu1 %v23061_v1  ;;  %v23103_v1 = vld [vmem:[%s31739_s14 + $0xe44] ss:$28 sps:$4 sm:$0xff]   ;;  %v23146_v15 = vld [vmem:[%s31739_s14 + $0xff8] ss:$28 sps:$4 sm:$0xff]  }
 0xa99   :  { %17160 = vmatpush1.bf16.msra.mxu0 %v23056_v39  ;;  %v23098_v39 = vld [vmem:[%s31739_s14 + $0xe38] ss:$28 sps:$4 sm:$0xff]  }
 0xa9a   :  { %17488 = vmatpush1.bf16.msra.mxu1 %v23059_v36  ;;  %17161 = vmatprep.subr.bf16.mxu0 %v23064_v40  ;;  %v23101_v36 = vld [vmem:[%s31739_s14 + $0xe40] ss:$28 sps:$4 sm:$0xff]   ;;  %v23106_v40 = vld [vmem:[%s31739_s14 + $0xe74] ss:$28 sps:$4 sm:$0xff]  }
 0xa9b   :  { %17489 = vmatprep.subr.bf16.mxu1 %v23067_v50  ;;  %v23109_v50 = vld [vmem:[%s31739_s14 + $0xe7c] ss:$28 sps:$4 sm:$0xff]  }
 0xa9d   :  { %17162 = vmatpush1.bf16.msra.mxu0 %v23062_v44  ;;  %v23104_v44 = vld [vmem:[%s31739_s14 + $0xe70] ss:$28 sps:$4 sm:$0xff]  }
 0xa9e   :  { %17490 = vmatpush1.bf16.msra.mxu1 %v23065_v55  ;;  %17163 = vmatprep.subr.bf16.mxu0 %v23070_v46  ;;  %v23107_v55 = vld [vmem:[%s31739_s14 + $0xe78] ss:$28 sps:$4 sm:$0xff]   ;;  %v23112_v46 = vld [vmem:[%s31739_s14 + $0xeac] ss:$28 sps:$4 sm:$0xff]  }
 0xa9f   :  { %17491 = vmatprep.subr.bf16.mxu1 %v23073_v37  ;;  %v23115_v37 = vld [vmem:[%s31739_s14 + $0xeb4] ss:$28 sps:$4 sm:$0xff]  }
 0xaa1   :  { %17164 = vmatpush1.bf16.msra.mxu0 %v23068_v45  ;;  %v23110_v45 = vld [vmem:[%s31739_s14 + $0xea8] ss:$28 sps:$4 sm:$0xff]  }
 0xaa2   :  { %17492 = vmatpush1.bf16.msra.mxu1 %v23071_v17  ;;  %17165 = vmatprep.subr.bf16.mxu0 %v23076_v61  ;;  %v23113_v17 = vld [vmem:[%s31739_s14 + $0xeb0] ss:$28 sps:$4 sm:$0xff]   ;;  %v23118_v61 = vld [vmem:[%s31739_s14 + $0xee4] ss:$28 sps:$4 sm:$0xff]  }
 0xaa3   :  { %17493 = vmatprep.subr.bf16.mxu1 %v23079_v54  ;;  %v23119_v54 = vld [vmem:[%s31739_s14 + $0xee8] ss:$28 sps:$4 sm:$0xff]  }
 0xaa5   :  { %17166 = vmatpush1.bf16.msra.mxu0 %v23074_v6  ;;  %v23127_v6 = vld [vmem:[%s31739_s14 + $0xf24] ss:$28 sps:$4 sm:$0xff]  }
 0xaa6   :  { %17494 = vmatpush1.bf16.msra.mxu1 %v23077_v4  ;;  %17167 = vmatprep.subr.bf16.mxu0 %v23082_v3  ;;  %v23122_v4 = vld [vmem:[%s31739_s14 + $0xf18] ss:$28 sps:$4 sm:$0xff]   ;;  %v23125_v3 = vld [vmem:[%s31739_s14 + $0xf20] ss:$28 sps:$4 sm:$0xff]  }
 0xaa7   :  { %17495 = vmatprep.subr.bf16.mxu1 %v23085_v23  ;;  %v23133_v23 = vld [vmem:[%s31739_s14 + $0xf5c] ss:$28 sps:$4 sm:$0xff]  }
 0xaa9   :  { %17168 = vmatpush1.bf16.msra.mxu0 %v23080_v18  ;;  %v23131_v18 = vld [vmem:[%s31739_s14 + $0xf58] ss:$28 sps:$4 sm:$0xff]  }
 0xaaa   :  { %17496 = vmatpush1.bf16.msra.mxu1 %v23083_v10  ;;  %17169 = vmatprep.subr.bf16.mxu0 %v23088_v56  ;;  %v23136_v10 = vld [vmem:[%s31739_s14 + $0xf8c] ss:$28 sps:$4 sm:$0xff]   ;;  %v23139_v56 = vld [vmem:[%s31739_s14 + $0xf94] ss:$28 sps:$4 sm:$0xff]  }
 0xaab   :  { %17497 = vmatprep.subr.bf16.mxu1 %v23091_v30  ;;  %v23137_v30 = vld [vmem:[%s31739_s14 + $0xf90] ss:$28 sps:$4 sm:$0xff]  }
 0xaad   :  { %17170 = vmatpush1.bf16.msra.mxu0 %v23086_v43  ;;  %v23145_v43 = vld [vmem:[%s31739_s14 + $0xfcc] ss:$28 sps:$4 sm:$0xff]  }
 0xaae   :  { %17498 = vmatpush1.bf16.msra.mxu1 %v23089_v27  ;;  %17180 = vmatprep.subr.bf16.mxu0 %v23094_v11  ;;  %v23140_v27 = vld [vmem:[%s31739_s14 + $0xfc0] ss:$28 sps:$4 sm:$0xff]   ;;  %v23143_v11 = vld [vmem:[%s31739_s14 + $0xfc8] ss:$28 sps:$4 sm:$0xff]  }
 0xaaf   :  { %17508 = vmatprep.subr.bf16.mxu1 %v23097_v14  ;;  %v23151_v14 = vld [vmem:[%s31739_s14 + $0x1004] ss:$28 sps:$4 sm:$0xff]  }
 0xab0   :  { %17172 = vmatmul.mubr.bf16.vlgmr.msra.gmra.mrb[48].mxu0 %v29787_v35 }
 0xab1   :  { %17500 = vmatmul.mubr.bf16.vlgmr.msra.gmra.mrb[48].mxu1 %v29787_v35  ;;  %17181 = vmatpush1.bf16.msra.mxu0 %v23092_v19  ;;  %v23149_v19 = vld [vmem:[%s31739_s14 + $0x1000] ss:$28 sps:$4 sm:$0xff]  }
 0xab2   :  { %17212 = vmatprep.mubr.bf16.mxu0 %v29795_v38  ;;  %17509 = vmatpush1.bf16.msra.mxu1 %v23095_v48  ;;  %v23154_v48 = vld [vmem:[%s31739_s14 + $0x1034] ss:$28 sps:$4 sm:$0xff]  }
 0xab3   :  { %17540 = vmatprep.mubr.bf16.mxu1 %v29795_v38  ;;  %17182 = vmatprep.subr.bf16.mxu0 %v23100_v29  ;;  %v23157_v29 = vld [vmem:[%s31739_s14 + $0x103c] ss:$28 sps:$4 sm:$0xff]  }
 0xab4   :  { %17510 = vmatprep.subr.bf16.mxu1 %v23103_v1  ;;  %v23152_v1 = vld [vmem:[%s31739_s14 + $0x1030] ss:$28 sps:$4 sm:$0xff]  }
 0xab5   :  { %17183 = vmatpush1.bf16.msra.mxu0 %v23098_v39  ;;  %v23155_v39 = vld [vmem:[%s31739_s14 + $0x1038] ss:$28 sps:$4 sm:$0xff]  }
 0xab6   :  { %17511 = vmatpush1.bf16.msra.mxu1 %v23101_v36  ;;  %17184 = vmatprep.subr.bf16.mxu0 %v23106_v40  ;;  %v23160_v36 = vld [vmem:[%s31739_s14 + $0x106c] ss:$28 sps:$4 sm:$0xff]   ;;  %v23163_v40 = vld [vmem:[%s31739_s14 + $0x1074] ss:$28 sps:$4 sm:$0xff]  }
 0xab7   :  { %17512 = vmatprep.subr.bf16.mxu1 %v23109_v50  ;;  %v23158_v50 = vld [vmem:[%s31739_s14 + $0x1068] ss:$28 sps:$4 sm:$0xff]  }
 0xab9   :  { %17185 = vmatpush1.bf16.msra.mxu0 %v23104_v44  ;;  %v23161_v44 = vld [vmem:[%s31739_s14 + $0x1070] ss:$28 sps:$4 sm:$0xff]  }
 0xaba   :  { %17513 = vmatpush1.bf16.msra.mxu1 %v23107_v55  ;;  %17186 = vmatprep.subr.bf16.mxu0 %v23112_v46  ;;  %v23166_v55 = vld [vmem:[%s31739_s14 + $0x10a4] ss:$28 sps:$4 sm:$0xff]   ;;  %v23169_v46 = vld [vmem:[%s31739_s14 + $0x10ac] ss:$28 sps:$4 sm:$0xff]  }
 0xabb   :  { %17514 = vmatprep.subr.bf16.mxu1 %v23115_v37  ;;  %v23164_v37 = vld [vmem:[%s31739_s14 + $0x10a0] ss:$28 sps:$4 sm:$0xff]  }
 0xabd   :  { %17187 = vmatpush1.bf16.msra.mxu0 %v23110_v45  ;;  %v23167_v45 = vld [vmem:[%s31739_s14 + $0x10a8] ss:$28 sps:$4 sm:$0xff]  }
 0xabe   :  { %17515 = vmatpush1.bf16.msra.mxu1 %v23113_v17  ;;  %17188 = vmatprep.subr.bf16.mxu0 %v23118_v61  ;;  %v23172_v17 = vld [vmem:[%s31739_s14 + $0x10dc] ss:$28 sps:$4 sm:$0xff]   ;;  %v8326_v61 = vrot.slane %v29729_v42, %v25006_v2 }
 0xabf   :  { %17516 = vmatprep.subr.bf16.mxu1 %v23121_v34  ;;  %v23175_v34 = vld [vmem:[%s31739_s14 + $0x10e4] ss:$28 sps:$4 sm:$0xff]  }
 0xac1   :  { %17189 = vmatpush1.bf16.msra.mxu0 %v23116_v20  ;;  %v8338_v20 = vrot.slane %v29729_v42, %v25573_v51 }
 0xac2   :  { %17517 = vmatpush1.bf16.msra.mxu1 %v23119_v54  ;;  %17190 = vmatprep.subr.bf16.mxu0 %v23124_v0  ;;  %v23170_v54 = vld [vmem:[%s31739_s14 + $0x10d8] ss:$28 sps:$4 sm:$0xff]   ;;  %v23173_v0 = vld [vmem:[%s31739_s14 + $0x10e0] ss:$28 sps:$4 sm:$0xff]  }
 0xac3   :  { %17518 = vmatprep.subr.bf16.mxu1 %v23127_v6  ;;  %v23178_v6 = vld [vmem:[%s31739_s14 + $0x1114] ss:$28 sps:$4 sm:$0xff]  }
 0xac5   :  { %17191 = vmatpush1.bf16.msra.mxu0 %v23122_v4  ;;  %v21097_v4 = vadd.f32 %v29220_v22, %v8326_v61  ;;  %v23184_v22 = vld [vmem:[%s31739_s14 + $0x114c] ss:$28 sps:$4 sm:$0xff]   ;;  %v23212_v61 = vld [vmem:[%s31739_s14 + $0x1260] ss:$28 sps:$4 sm:$0xff]  }
 0xac6   :  { %17519 = vmatpush1.bf16.msra.mxu1 %v23125_v3  ;;  %17192 = vmatprep.subr.bf16.mxu0 %v23130_v9  ;;  %v23181_v3 = vld [vmem:[%s31739_s14 + $0x111c] ss:$28 sps:$4 sm:$0xff]   ;;  %v21100_v9 = vadd.f32 %v29229_v32, %v8338_v20  ;;  %v23187_v32 = vld [vmem:[%s31739_s14 + $0x1154] ss:$28 sps:$4 sm:$0xff]  }
 0xac7   :  { %17520 = vmatprep.subr.bf16.mxu1 %v23133_v23  ;;  %v23176_v23 = vld [vmem:[%s31739_s14 + $0x1110] ss:$28 sps:$4 sm:$0xff]   ;;  %vm11595_vm4 = vcmp.gt.f32.partialorder %v21097_v4, 0.0  ;;  %v23220_v20 = vld [vmem:[%s31739_s14 + $0x129c] ss:$28 sps:$4 sm:$0xff]  }
 0xac8   :  { %vm11598_vm5 = vcmp.gt.f32.partialorder %v21100_v9, 0.0 }
 0xac9   :  { %17193 = vmatpush1.bf16.msra.mxu0 %v23128_v52  ;;  %v23179_v52 = vld [vmem:[%s31739_s14 + $0x1118] ss:$28 sps:$4 sm:$0xff]  }
 0xaca   :  { %17521 = vmatpush1.bf16.msra.mxu1 %v23131_v18  ;;  %17194 = vmatprep.subr.bf16.mxu0 %v23136_v10  ;;  %v11611_v18 = vmul.f32 0.01, %v21097_v4  ;;  %v11614_v10 = vmul.f32 0.01, %v21100_v9 }
 0xacb   :  { %17522 = vmatprep.subr.bf16.mxu1 %v23139_v56  ;;  %v23182_v56 = vld [vmem:[%s31739_s14 + $0x1148] ss:$28 sps:$4 sm:$0xff]  }
 0xacd   :  { %17195 = vmatpush1.bf16.msra.mxu0 %v23134_v33  ;;  %v23185_v33 = vld [vmem:[%s31739_s14 + $0x1150] ss:$28 sps:$4 sm:$0xff]  }
 0xace   :  { %17523 = vmatpush1.bf16.msra.mxu1 %v23137_v30  ;;  %17196 = vmatprep.subr.bf16.mxu0 %v23142_v63  ;;  %v23190_v30 = vld [vmem:[%s31739_s14 + $0x1184] ss:$28 sps:$4 sm:$0xff]   ;;  %v11627_v63 = vsel %vm11595_vm4, %v21097_v4, %v11611_v18  ;;  %v23226_v4 = vld [vmem:[%s31739_s14 + $0x12d4] ss:$28 sps:$4 sm:$0xff]  }
 0xacf   :  { %17524 = vmatprep.subr.bf16.mxu1 %v23145_v43  ;;  %v23193_v43 = vld [vmem:[%s31739_s14 + $0x118c] ss:$28 sps:$4 sm:$0xff]  }
 0xad0   :  { %v23230_v18 = vld [vmem:[%s31739_s14 + $0x1308] ss:$28 sps:$4 sm:$0xff]  }
 0xad1   :  { %17197 = vmatpush1.bf16.msra.mxu0 %v23140_v27  ;;  %v11630_v27 = vsel %vm11598_vm5, %v21100_v9, %v11614_v10  ;;  %v23224_v9 = vld [vmem:[%s31739_s14 + $0x12d0] ss:$28 sps:$4 sm:$0xff]   ;;  %v23238_v10 = vld [vmem:[%s31739_s14 + $0x1344] ss:$28 sps:$4 sm:$0xff]  }
 0xad2   :  { %17525 = vmatpush1.bf16.msra.mxu1 %v23143_v11  ;;  %17198 = vmatprep.subr.bf16.mxu0 %v23148_v13  ;;  %v23188_v11 = vld [vmem:[%s31739_s14 + $0x1180] ss:$28 sps:$4 sm:$0xff]   ;;  %v29993_v13 = vpack.c.bf16 %v11627_v63, %v11627_v63 }
 0xad3   :  { %17526 = vmatprep.subr.bf16.mxu1 %v23151_v14  ;;  %v23191_v14 = vld [vmem:[%s31739_s14 + $0x1188] ss:$28 sps:$4 sm:$0xff]   ;;  %v23244_v63 = vld [vmem:[%s31739_s14 + $0x137c] ss:$28 sps:$4 sm:$0xff]  }
 0xad5   :  { %17199 = vmatpush1.bf16.msra.mxu0 %v23146_v15  ;;  %v23196_v15 = vld [vmem:[%s31739_s14 + $0x11bc] ss:$28 sps:$4 sm:$0xff]  }
 0xad6   :  { %17527 = vmatpush1.bf16.msra.mxu1 %v23149_v19  ;;  %17200 = vmatprep.subr.bf16.mxu0 %v23154_v48  ;;  %v30001_v19 = vpack.c.bf16 %v11630_v27, %v11630_v27  ;;  %v23199_v48 = vld [vmem:[%s31739_s14 + $0x11c4] ss:$28 sps:$4 sm:$0xff]   ;;  %v23242_v27 = vld [vmem:[%s31739_s14 + $0x1378] ss:$28 sps:$4 sm:$0xff]  }
 0xad7   :  { %17528 = vmatprep.subr.bf16.mxu1 %v23157_v29  ;;  %v23194_v29 = vld [vmem:[%s31739_s14 + $0x11b8] ss:$28 sps:$4 sm:$0xff]  }
 0xad9   :  { %17201 = vmatpush1.bf16.msra.mxu0 %v23152_v1  ;;  %v23197_v1 = vld [vmem:[%s31739_s14 + $0x11c0] ss:$28 sps:$4 sm:$0xff]  }
 0xada   :  { %17529 = vmatpush1.bf16.msra.mxu1 %v23155_v39  ;;  %17202 = vmatprep.subr.bf16.mxu0 %v23160_v36  ;;  %v23202_v39 = vld [vmem:[%s31739_s14 + $0x11f4] ss:$28 sps:$4 sm:$0xff]   ;;  %v23205_v36 = vld [vmem:[%s31739_s14 + $0x11fc] ss:$28 sps:$4 sm:$0xff]  }
 0xadb   :  { %17530 = vmatprep.subr.bf16.mxu1 %v23163_v40  ;;  %v23200_v40 = vld [vmem:[%s31739_s14 + $0x11f0] ss:$28 sps:$4 sm:$0xff]  }
 0xadd   :  { %17203 = vmatpush1.bf16.msra.mxu0 %v23158_v50  ;;  %v23203_v50 = vld [vmem:[%s31739_s14 + $0x11f8] ss:$28 sps:$4 sm:$0xff]  }
 0xade   :  { %17531 = vmatpush1.bf16.msra.mxu1 %v23161_v44  ;;  %17204 = vmatprep.subr.bf16.mxu0 %v23166_v55  ;;  %v23208_v44 = vld [vmem:[%s31739_s14 + $0x122c] ss:$28 sps:$4 sm:$0xff]   ;;  %v23211_v55 = vld [vmem:[%s31739_s14 + $0x1234] ss:$28 sps:$4 sm:$0xff]  }
 0xadf   :  { %17532 = vmatprep.subr.bf16.mxu1 %v23169_v46  ;;  %v23206_v46 = vld [vmem:[%s31739_s14 + $0x1228] ss:$28 sps:$4 sm:$0xff]  }
 0xae1   :  { %17205 = vmatpush1.bf16.msra.mxu0 %v23164_v37  ;;  %v23209_v37 = vld [vmem:[%s31739_s14 + $0x1230] ss:$28 sps:$4 sm:$0xff]  }
 0xae2   :  { %17533 = vmatpush1.bf16.msra.mxu1 %v23167_v45  ;;  %17206 = vmatprep.subr.bf16.mxu0 %v23172_v17  ;;  %v23214_v45 = vld [vmem:[%s31739_s14 + $0x1264] ss:$28 sps:$4 sm:$0xff]   ;;  %v23217_v17 = vld [vmem:[%s31739_s14 + $0x126c] ss:$28 sps:$4 sm:$0xff]  }
 0xae3   :  { %17534 = vmatprep.subr.bf16.mxu1 %v23175_v34  ;;  %v23215_v34 = vld [vmem:[%s31739_s14 + $0x1268] ss:$28 sps:$4 sm:$0xff]  }
 0xae5   :  { %17207 = vmatpush1.bf16.msra.mxu0 %v23170_v54  ;;  %v23223_v54 = vld [vmem:[%s31739_s14 + $0x12a4] ss:$28 sps:$4 sm:$0xff]  }
 0xae6   :  { %17535 = vmatpush1.bf16.msra.mxu1 %v23173_v0  ;;  %17208 = vmatprep.subr.bf16.mxu0 %v23178_v6  ;;  %v23218_v0 = vld [vmem:[%s31739_s14 + $0x1298] ss:$28 sps:$4 sm:$0xff]   ;;  %v23221_v6 = vld [vmem:[%s31739_s14 + $0x12a0] ss:$28 sps:$4 sm:$0xff]  }
 0xae7   :  { %17536 = vmatprep.subr.bf16.mxu1 %v23181_v3  ;;  %v23229_v3 = vld [vmem:[%s31739_s14 + $0x12dc] ss:$28 sps:$4 sm:$0xff]  }
 0xae9   :  { %17209 = vmatpush1.bf16.msra.mxu0 %v23176_v23  ;;  %v23227_v23 = vld [vmem:[%s31739_s14 + $0x12d8] ss:$28 sps:$4 sm:$0xff]  }
 0xaea   :  { %17537 = vmatpush1.bf16.msra.mxu1 %v23179_v52  ;;  %17210 = vmatprep.subr.bf16.mxu0 %v23184_v22  ;;  %v23232_v52 = vld [vmem:[%s31739_s14 + $0x130c] ss:$28 sps:$4 sm:$0xff]   ;;  %v23235_v22 = vld [vmem:[%s31739_s14 + $0x1314] ss:$28 sps:$4 sm:$0xff]  }
 0xaeb   :  { %17538 = vmatprep.subr.bf16.mxu1 %v23187_v32  ;;  %v23233_v32 = vld [vmem:[%s31739_s14 + $0x1310] ss:$28 sps:$4 sm:$0xff]  }
 0xaed   :  { %17211 = vmatpush1.bf16.msra.mxu0 %v23182_v56  ;;  %v23241_v56 = vld [vmem:[%s31739_s14 + $0x134c] ss:$28 sps:$4 sm:$0xff]  }
 0xaee   :  { %17539 = vmatpush1.bf16.msra.mxu1 %v23185_v33  ;;  %17221 = vmatprep.subr.bf16.mxu0 %v23190_v30  ;;  %v23236_v33 = vld [vmem:[%s31739_s14 + $0x1340] ss:$28 sps:$4 sm:$0xff]   ;;  %v23239_v30 = vld [vmem:[%s31739_s14 + $0x1348] ss:$28 sps:$4 sm:$0xff]  }
 0xaef   :  { %17549 = vmatprep.subr.bf16.mxu1 %v23193_v43  ;;  %v23247_v43 = vld [vmem:[%s31739_s14 + $0x1384] ss:$28 sps:$4 sm:$0xff]  }
 0xaf0   :  { %17213 = vmatmul.mubr.bf16.vlgmr.msra.gmra.mrb[48].mxu0 %v29993_v13 }
 0xaf1   :  { %17541 = vmatmul.mubr.bf16.vlgmr.msra.gmra.mrb[48].mxu1 %v29993_v13  ;;  %17222 = vmatpush1.bf16.msra.mxu0 %v23188_v11  ;;  %v23245_v11 = vld [vmem:[%s31739_s14 + $0x1380] ss:$28 sps:$4 sm:$0xff]  }
 0xaf2   :  { %17253 = vmatprep.mubr.bf16.mxu0 %v30001_v19  ;;  %17550 = vmatpush1.bf16.msra.mxu1 %v23191_v14  ;;  %v23250_v14 = vld [vmem:[%s31739_s14 + $0x13b4] ss:$28 sps:$4 sm:$0xff]  }
 0xaf3   :  { %17581 = vmatprep.mubr.bf16.mxu1 %v30001_v19  ;;  %17223 = vmatprep.subr.bf16.mxu0 %v23196_v15  ;;  %v23253_v15 = vld [vmem:[%s31739_s14 + $0x13bc] ss:$28 sps:$4 sm:$0xff]  }
 0xaf4   :  { %17551 = vmatprep.subr.bf16.mxu1 %v23199_v48  ;;  %v23248_v48 = vld [vmem:[%s31739_s14 + $0x13b0] ss:$28 sps:$4 sm:$0xff]  }
 0xaf5   :  { %17224 = vmatpush1.bf16.msra.mxu0 %v23194_v29  ;;  %v23251_v29 = vld [vmem:[%s31739_s14 + $0x13b8] ss:$28 sps:$4 sm:$0xff]  }
 0xaf6   :  { %17552 = vmatpush1.bf16.msra.mxu1 %v23197_v1  ;;  %17225 = vmatprep.subr.bf16.mxu0 %v23202_v39  ;;  %v23256_v1 = vld [vmem:[%s31739_s14 + $0x13ec] ss:$28 sps:$4 sm:$0xff]   ;;  %v23259_v39 = vld [vmem:[%s31739_s14 + $0x13f4] ss:$28 sps:$4 sm:$0xff]  }
 0xaf7   :  { %17553 = vmatprep.subr.bf16.mxu1 %v23205_v36  ;;  %v23254_v36 = vld [vmem:[%s31739_s14 + $0x13e8] ss:$28 sps:$4 sm:$0xff]  }
 0xaf9   :  { %17226 = vmatpush1.bf16.msra.mxu0 %v23200_v40  ;;  %v23257_v40 = vld [vmem:[%s31739_s14 + $0x13f0] ss:$28 sps:$4 sm:$0xff]  }
 0xafa   :  { %17554 = vmatpush1.bf16.msra.mxu1 %v23203_v50  ;;  %17227 = vmatprep.subr.bf16.mxu0 %v23208_v44  ;;  %v23262_v50 = vld [vmem:[%s31739_s14 + $0x1424] ss:$28 sps:$4 sm:$0xff]   ;;  %v23265_v44 = vld [vmem:[%s31739_s14 + $0x142c] ss:$28 sps:$4 sm:$0xff]  }
 0xafb   :  { %17555 = vmatprep.subr.bf16.mxu1 %v23211_v55  ;;  %v23260_v55 = vld [vmem:[%s31739_s14 + $0x1420] ss:$28 sps:$4 sm:$0xff]  }
 0xafd   :  { %17228 = vmatpush1.bf16.msra.mxu0 %v23206_v46  ;;  %v23263_v46 = vld [vmem:[%s31739_s14 + $0x1428] ss:$28 sps:$4 sm:$0xff]  }
 0xafe   :  { %17556 = vmatpush1.bf16.msra.mxu1 %v23209_v37  ;;  %17229 = vmatprep.subr.bf16.mxu0 %v23214_v45  ;;  %v23268_v37 = vld [vmem:[%s31739_s14 + $0x145c] ss:$28 sps:$4 sm:$0xff]   ;;  %v8334_v45 = vrot.slane %v29729_v42, %v25780_v24 }
 0xaff   :  { %17557 = vmatprep.subr.bf16.mxu1 %v23217_v17  ;;  %v23271_v17 = vld [vmem:[%s31739_s14 + $0x1464] ss:$28 sps:$4 sm:$0xff]  }
 0xb01   :  { %17230 = vmatpush1.bf16.msra.mxu0 %v23212_v61  ;;  %v8346_v61 = vrot.slane %v29729_v42, %v25789_v62 }
 0xb02   :  { %17558 = vmatpush1.bf16.msra.mxu1 %v23215_v34  ;;  %17231 = vmatprep.subr.bf16.mxu0 %v23220_v20  ;;  %v23266_v34 = vld [vmem:[%s31739_s14 + $0x1458] ss:$28 sps:$4 sm:$0xff]   ;;  %v23269_v20 = vld [vmem:[%s31739_s14 + $0x1460] ss:$28 sps:$4 sm:$0xff]  }
 0xb03   :  { %17559 = vmatprep.subr.bf16.mxu1 %v23223_v54  ;;  %v23274_v54 = vld [vmem:[%s31739_s14 + $0x1494] ss:$28 sps:$4 sm:$0xff]  }
 0xb05   :  { %17232 = vmatpush1.bf16.msra.mxu0 %v23218_v0  ;;  %v21099_v0 = vadd.f32 %v29225_v12, %v8334_v45  ;;  %v23280_v12 = vld [vmem:[%s31739_s14 + $0x14cc] ss:$28 sps:$4 sm:$0xff]   ;;  %v23308_v45 = vld [vmem:[%s31739_s14 + $0x15e0] ss:$28 sps:$4 sm:$0xff]  }
 0xb06   :  { %17560 = vmatpush1.bf16.msra.mxu1 %v23221_v6  ;;  %17233 = vmatprep.subr.bf16.mxu0 %v23226_v4  ;;  %v23277_v6 = vld [vmem:[%s31739_s14 + $0x149c] ss:$28 sps:$4 sm:$0xff]   ;;  %v21102_v4 = vadd.f32 %v29647_v31, %v8346_v61  ;;  %v23283_v31 = vld [vmem:[%s31739_s14 + $0x14d4] ss:$28 sps:$4 sm:$0xff]  }
 0xb07   :  { %17561 = vmatprep.subr.bf16.mxu1 %v23229_v3  ;;  %v23272_v3 = vld [vmem:[%s31739_s14 + $0x1490] ss:$28 sps:$4 sm:$0xff]   ;;  %vm11597_vm6 = vcmp.gt.f32.partialorder %v21099_v0, 0.0  ;;  %v23316_v61 = vld [vmem:[%s31739_s14 + $0x161c] ss:$28 sps:$4 sm:$0xff]  }
 0xb08   :  { %vm11600_vm7 = vcmp.gt.f32.partialorder %v21102_v4, 0.0 }
 0xb09   :  { %17234 = vmatpush1.bf16.msra.mxu0 %v23224_v9  ;;  %v23275_v9 = vld [vmem:[%s31739_s14 + $0x1498] ss:$28 sps:$4 sm:$0xff]  }
 0xb0a   :  { %17562 = vmatpush1.bf16.msra.mxu1 %v23227_v23  ;;  %17235 = vmatprep.subr.bf16.mxu0 %v23232_v52  ;;  %v11613_v23 = vmul.f32 0.01, %v21099_v0  ;;  %v11616_v52 = vmul.f32 0.01, %v21102_v4 }
 0xb0b   :  { %17563 = vmatprep.subr.bf16.mxu1 %v23235_v22  ;;  %v23278_v22 = vld [vmem:[%s31739_s14 + $0x14c8] ss:$28 sps:$4 sm:$0xff]  }
 0xb0d   :  { %17236 = vmatpush1.bf16.msra.mxu0 %v23230_v18  ;;  %v23281_v18 = vld [vmem:[%s31739_s14 + $0x14d0] ss:$28 sps:$4 sm:$0xff]  }
 0xb0e   :  { %17564 = vmatpush1.bf16.msra.mxu1 %v23233_v32  ;;  %17237 = vmatprep.subr.bf16.mxu0 %v23238_v10  ;;  %v23286_v32 = vld [vmem:[%s31739_s14 + $0x1504] ss:$28 sps:$4 sm:$0xff]   ;;  %v11629_v10 = vsel %vm11597_vm6, %v21099_v0, %v11613_v23  ;;  %v23322_v0 = vld [vmem:[%s31739_s14 + $0x1654] ss:$28 sps:$4 sm:$0xff]  }
 0xb0f   :  { %17565 = vmatprep.subr.bf16.mxu1 %v23241_v56  ;;  %v23289_v56 = vld [vmem:[%s31739_s14 + $0x150c] ss:$28 sps:$4 sm:$0xff]  }
 0xb10   :  { %v23326_v23 = vld [vmem:[%s31739_s14 + $0x1688] ss:$28 sps:$4 sm:$0xff]  }
 0xb11   :  { %17238 = vmatpush1.bf16.msra.mxu0 %v23236_v33  ;;  %v11632_v33 = vsel %vm11600_vm7, %v21102_v4, %v11616_v52  ;;  %v23320_v4 = vld [vmem:[%s31739_s14 + $0x1650] ss:$28 sps:$4 sm:$0xff]   ;;  %v23334_v52 = vld [vmem:[%s31739_s14 + $0x16c4] ss:$28 sps:$4 sm:$0xff]  }
 0xb12   :  { %17566 = vmatpush1.bf16.msra.mxu1 %v23239_v30  ;;  %17239 = vmatprep.subr.bf16.mxu0 %v23244_v63  ;;  %v23284_v30 = vld [vmem:[%s31739_s14 + $0x1500] ss:$28 sps:$4 sm:$0xff]   ;;  %v30199_v63 = vpack.c.bf16 %v11629_v10, %v11629_v10 }
 0xb13   :  { %17567 = vmatprep.subr.bf16.mxu1 %v23247_v43  ;;  %v23287_v43 = vld [vmem:[%s31739_s14 + $0x1508] ss:$28 sps:$4 sm:$0xff]   ;;  %v23340_v10 = vld [vmem:[%s31739_s14 + $0x16fc] ss:$28 sps:$4 sm:$0xff]  }
 0xb15   :  { %17240 = vmatpush1.bf16.msra.mxu0 %v23242_v27  ;;  %v23292_v27 = vld [vmem:[%s31739_s14 + $0x153c] ss:$28 sps:$4 sm:$0xff]  }
 0xb16   :  { %17568 = vmatpush1.bf16.msra.mxu1 %v23245_v11  ;;  %17241 = vmatprep.subr.bf16.mxu0 %v23250_v14  ;;  %v30207_v11 = vpack.c.bf16 %v11632_v33, %v11632_v33  ;;  %v23295_v14 = vld [vmem:[%s31739_s14 + $0x1544] ss:$28 sps:$4 sm:$0xff]   ;;  %v23338_v33 = vld [vmem:[%s31739_s14 + $0x16f8] ss:$28 sps:$4 sm:$0xff]  }
 0xb17   :  { %17569 = vmatprep.subr.bf16.mxu1 %v23253_v15  ;;  %v23290_v15 = vld [vmem:[%s31739_s14 + $0x1538] ss:$28 sps:$4 sm:$0xff]  }
 0xb19   :  { %17242 = vmatpush1.bf16.msra.mxu0 %v23248_v48  ;;  %v23293_v48 = vld [vmem:[%s31739_s14 + $0x1540] ss:$28 sps:$4 sm:$0xff]  }
 0xb1a   :  { %17570 = vmatpush1.bf16.msra.mxu1 %v23251_v29  ;;  %17243 = vmatprep.subr.bf16.mxu0 %v23256_v1  ;;  %v23298_v29 = vld [vmem:[%s31739_s14 + $0x1574] ss:$28 sps:$4 sm:$0xff]   ;;  %v23301_v1 = vld [vmem:[%s31739_s14 + $0x157c] ss:$28 sps:$4 sm:$0xff]  }
 0xb1b   :  { %17571 = vmatprep.subr.bf16.mxu1 %v23259_v39  ;;  %v23296_v39 = vld [vmem:[%s31739_s14 + $0x1570] ss:$28 sps:$4 sm:$0xff]  }
 0xb1d   :  { %17244 = vmatpush1.bf16.msra.mxu0 %v23254_v36  ;;  %v23299_v36 = vld [vmem:[%s31739_s14 + $0x1578] ss:$28 sps:$4 sm:$0xff]  }
 0xb1e   :  { %17572 = vmatpush1.bf16.msra.mxu1 %v23257_v40  ;;  %17245 = vmatprep.subr.bf16.mxu0 %v23262_v50  ;;  %v23304_v40 = vld [vmem:[%s31739_s14 + $0x15ac] ss:$28 sps:$4 sm:$0xff]   ;;  %v23307_v50 = vld [vmem:[%s31739_s14 + $0x15b4] ss:$28 sps:$4 sm:$0xff]  }
 0xb1f   :  { %17573 = vmatprep.subr.bf16.mxu1 %v23265_v44  ;;  %v23302_v44 = vld [vmem:[%s31739_s14 + $0x15a8] ss:$28 sps:$4 sm:$0xff]  }
 0xb21   :  { %17246 = vmatpush1.bf16.msra.mxu0 %v23260_v55  ;;  %v23305_v55 = vld [vmem:[%s31739_s14 + $0x15b0] ss:$28 sps:$4 sm:$0xff]  }
 0xb22   :  { %17574 = vmatpush1.bf16.msra.mxu1 %v23263_v46  ;;  %17247 = vmatprep.subr.bf16.mxu0 %v23268_v37  ;;  %v23310_v46 = vld [vmem:[%s31739_s14 + $0x15e4] ss:$28 sps:$4 sm:$0xff]   ;;  %v23313_v37 = vld [vmem:[%s31739_s14 + $0x15ec] ss:$28 sps:$4 sm:$0xff]  }
 0xb23   :  { %17575 = vmatprep.subr.bf16.mxu1 %v23271_v17  ;;  %v23311_v17 = vld [vmem:[%s31739_s14 + $0x15e8] ss:$28 sps:$4 sm:$0xff]  }
 0xb25   :  { %17248 = vmatpush1.bf16.msra.mxu0 %v23266_v34  ;;  %v23319_v34 = vld [vmem:[%s31739_s14 + $0x1624] ss:$28 sps:$4 sm:$0xff]  }
 0xb26   :  { %17576 = vmatpush1.bf16.msra.mxu1 %v23269_v20  ;;  %17249 = vmatprep.subr.bf16.mxu0 %v23274_v54  ;;  %v23314_v20 = vld [vmem:[%s31739_s14 + $0x1618] ss:$28 sps:$4 sm:$0xff]   ;;  %v23317_v54 = vld [vmem:[%s31739_s14 + $0x1620] ss:$28 sps:$4 sm:$0xff]  }
 0xb27   :  { %17577 = vmatprep.subr.bf16.mxu1 %v23277_v6  ;;  %v23325_v6 = vld [vmem:[%s31739_s14 + $0x165c] ss:$28 sps:$4 sm:$0xff]  }
 0xb29   :  { %17250 = vmatpush1.bf16.msra.mxu0 %v23272_v3  ;;  %v23323_v3 = vld [vmem:[%s31739_s14 + $0x1658] ss:$28 sps:$4 sm:$0xff]  }
 0xb2a   :  { %17578 = vmatpush1.bf16.msra.mxu1 %v23275_v9  ;;  %17251 = vmatprep.subr.bf16.mxu0 %v23280_v12  ;;  %v23328_v9 = vld [vmem:[%s31739_s14 + $0x168c] ss:$28 sps:$4 sm:$0xff]   ;;  %v23331_v12 = vld [vmem:[%s31739_s14 + $0x1694] ss:$28 sps:$4 sm:$0xff]  }
 0xb2b   :  { %17579 = vmatprep.subr.bf16.mxu1 %v23283_v31  ;;  %v23329_v31 = vld [vmem:[%s31739_s14 + $0x1690] ss:$28 sps:$4 sm:$0xff]  }
 0xb2d   :  { %17252 = vmatpush1.bf16.msra.mxu0 %v23278_v22  ;;  %v23337_v22 = vld [vmem:[%s31739_s14 + $0x16cc] ss:$28 sps:$4 sm:$0xff]  }
 0xb2e   :  { %17580 = vmatpush1.bf16.msra.mxu1 %v23281_v18  ;;  %17262 = vmatprep.subr.bf16.mxu0 %v23286_v32  ;;  %v23332_v18 = vld [vmem:[%s31739_s14 + $0x16c0] ss:$28 sps:$4 sm:$0xff]   ;;  %v23335_v32 = vld [vmem:[%s31739_s14 + $0x16c8] ss:$28 sps:$4 sm:$0xff]  }
 0xb2f   :  { %17590 = vmatprep.subr.bf16.mxu1 %v23289_v56  ;;  %v23343_v56 = vld [vmem:[%s31739_s14 + $0x1704] ss:$28 sps:$4 sm:$0xff]  }
 0xb30   :  { %17254 = vmatmul.mubr.bf16.vlgmr.msra.gmra.mrb[48].mxu0 %v30199_v63 }
 0xb31   :  { %17582 = vmatmul.mubr.bf16.vlgmr.msra.gmra.mrb[48].mxu1 %v30199_v63  ;;  %17263 = vmatpush1.bf16.msra.mxu0 %v23284_v30  ;;  %v23341_v30 = vld [vmem:[%s31739_s14 + $0x1700] ss:$28 sps:$4 sm:$0xff]  }
 0xb32   :  { %17294 = vmatprep.mubr.bf16.mxu0 %v30207_v11  ;;  %17591 = vmatpush1.bf16.msra.mxu1 %v23287_v43  ;;  %v23346_v43 = vld [vmem:[%s31739_s14 + $0x1734] ss:$28 sps:$4 sm:$0xff]  }
 0xb33   :  { %17622 = vmatprep.mubr.bf16.mxu1 %v30207_v11  ;;  %17264 = vmatprep.subr.bf16.mxu0 %v23292_v27  ;;  %v23349_v27 = vld [vmem:[%s31739_s14 + $0x173c] ss:$28 sps:$4 sm:$0xff]  }
 0xb34   :  { %17592 = vmatprep.subr.bf16.mxu1 %v23295_v14  ;;  %v23344_v14 = vld [vmem:[%s31739_s14 + $0x1730] ss:$28 sps:$4 sm:$0xff]  }
 0xb35   :  { %17265 = vmatpush1.bf16.msra.mxu0 %v23290_v15  ;;  %v23347_v15 = vld [vmem:[%s31739_s14 + $0x1738] ss:$28 sps:$4 sm:$0xff]  }
 0xb36   :  { %17593 = vmatpush1.bf16.msra.mxu1 %v23293_v48  ;;  %17266 = vmatprep.subr.bf16.mxu0 %v23298_v29  ;;  %v23352_v48 = vld [vmem:[%s31739_s14 + $0x176c] ss:$28 sps:$4 sm:$0xff]   ;;  %v23355_v29 = vld [vmem:[%s31739_s14 + $0x1774] ss:$28 sps:$4 sm:$0xff]  }
 0xb37   :  { %17594 = vmatprep.subr.bf16.mxu1 %v23301_v1  ;;  %v23350_v1 = vld [vmem:[%s31739_s14 + $0x1768] ss:$28 sps:$4 sm:$0xff]  }
 0xb39   :  { %17267 = vmatpush1.bf16.msra.mxu0 %v23296_v39  ;;  %v23353_v39 = vld [vmem:[%s31739_s14 + $0x1770] ss:$28 sps:$4 sm:$0xff]  }
 0xb3a   :  { %17595 = vmatpush1.bf16.msra.mxu1 %v23299_v36  ;;  %17268 = vmatprep.subr.bf16.mxu0 %v23304_v40  ;;  %v23358_v36 = vld [vmem:[%s31739_s14 + $0x17a4] ss:$28 sps:$4 sm:$0xff]   ;;  %v23361_v40 = vld [vmem:[%s31739_s14 + $0x17ac] ss:$28 sps:$4 sm:$0xff]  }
 0xb3b   :  { %17596 = vmatprep.subr.bf16.mxu1 %v23307_v50  ;;  %v23356_v50 = vld [vmem:[%s31739_s14 + $0x17a0] ss:$28 sps:$4 sm:$0xff]  }
 0xb3d   :  { %17269 = vmatpush1.bf16.msra.mxu0 %v23302_v44  ;;  %v23359_v44 = vld [vmem:[%s31739_s14 + $0x17a8] ss:$28 sps:$4 sm:$0xff]  }
 0xb3e   :  { %17597 = vmatpush1.bf16.msra.mxu1 %v23305_v55  ;;  %17270 = vmatprep.subr.bf16.mxu0 %v23310_v46  ;;  %v23364_v55 = vld [vmem:[%s31739_s14 + $0x17dc] ss:$28 sps:$4 sm:$0xff]   ;;  %v8342_v46 = vrot.slane %v29729_v42, %v26002_v57 }
 0xb3f   :  { %17598 = vmatprep.subr.bf16.mxu1 %v23313_v37  ;;  %v23367_v37 = vld [vmem:[%s31739_s14 + $0x17e4] ss:$28 sps:$4 sm:$0xff]  }
 0xb41   :  { %17271 = vmatpush1.bf16.msra.mxu0 %v23308_v45  ;;  %v8354_v45 = vrot.slane %v29729_v42, %v26005_v58  ;;  %v23373_v58 = vld [vmem:[%s31739_s14 + $0x181c] ss:$28 sps:$4 sm:$0xff]  }
 0xb42   :  { %17599 = vmatpush1.bf16.msra.mxu1 %v23311_v17  ;;  %17272 = vmatprep.subr.bf16.mxu0 %v23316_v61  ;;  %v23362_v17 = vld [vmem:[%s31739_s14 + $0x17d8] ss:$28 sps:$4 sm:$0xff]   ;;  %v23365_v61 = vld [vmem:[%s31739_s14 + $0x17e0] ss:$28 sps:$4 sm:$0xff]  }
 0xb43   :  { %17600 = vmatprep.subr.bf16.mxu1 %v23319_v34  ;;  %v23370_v34 = vld [vmem:[%s31739_s14 + $0x1814] ss:$28 sps:$4 sm:$0xff]   ;;  %v21104_v42 = vadd.f32 %v29649_v25, %v8354_v45 }
 0xb44   :  { %v23379_v25 = vld [vmem:[%s31739_s14 + $0x1854] ss:$28 sps:$4 sm:$0xff]  }
 0xb45   :  { %17273 = vmatpush1.bf16.msra.mxu0 %v23314_v20  ;;  %v21101_v20 = vadd.f32 %v29640_v7, %v8342_v46  ;;  %v23376_v7 = vld [vmem:[%s31739_s14 + $0x184c] ss:$28 sps:$4 sm:$0xff]   ;;  %vm11602_vm9 = vcmp.gt.f32.partialorder %v21104_v42, 0.0  ;;  %v23412_v46 = vld [vmem:[%s31739_s14 + $0x199c] ss:$28 sps:$4 sm:$0xff]  }
 0xb46   :  { %17601 = vmatpush1.bf16.msra.mxu1 %v23317_v54  ;;  %17274 = vmatprep.subr.bf16.mxu0 %v23322_v0  ;;  %v23368_v54 = vld [vmem:[%s31739_s14 + $0x1810] ss:$28 sps:$4 sm:$0xff]   ;;  %v23371_v0 = vld [vmem:[%s31739_s14 + $0x1818] ss:$28 sps:$4 sm:$0xff]  }
 0xb47   :  { %17602 = vmatprep.subr.bf16.mxu1 %v23325_v6  ;;  %v11615_v6 = vmul.f32 0.01, %v21101_v20  ;;  %vm11599_vm8 = vcmp.gt.f32.partialorder %v21101_v20, 0.0  ;;  %v23410_v45 = vld [vmem:[%s31739_s14 + $0x1998] ss:$28 sps:$4 sm:$0xff]  }
 0xb49   :  { %17275 = vmatpush1.bf16.msra.mxu0 %v23320_v4  ;;  %v11618_v4 = vmul.f32 0.01, %v21104_v42 }
 0xb4a   :  { %17603 = vmatpush1.bf16.msra.mxu1 %v23323_v3  ;;  %17276 = vmatprep.subr.bf16.mxu0 %v23328_v9  ;;  %v23374_v3 = vld [vmem:[%s31739_s14 + $0x1848] ss:$28 sps:$4 sm:$0xff]   ;;  %v23377_v9 = vld [vmem:[%s31739_s14 + $0x1850] ss:$28 sps:$4 sm:$0xff]  }
 0xb4b   :  { %17604 = vmatprep.subr.bf16.mxu1 %v23331_v12  ;;  %v23382_v12 = vld [vmem:[%s31739_s14 + $0x1884] ss:$28 sps:$4 sm:$0xff]  }
 0xb4d   :  { %17277 = vmatpush1.bf16.msra.mxu0 %v23326_v23  ;;  %v11631_v23 = vsel %vm11599_vm8, %v21101_v20, %v11615_v6  ;;  %v23427_v6 = vld [vmem:[%s31739_s14 + $0x1a14] ss:$28 sps:$4 sm:$0xff]  }
 0xb4e   :  { %17605 = vmatpush1.bf16.msra.mxu1 %v23329_v31  ;;  %17278 = vmatprep.subr.bf16.mxu0 %v23334_v52  ;;  %v23385_v31 = vld [vmem:[%s31739_s14 + $0x188c] ss:$28 sps:$4 sm:$0xff]   ;;  %v11634_v52 = vsel %vm11602_vm9, %v21104_v42, %v11618_v4 }
 0xb4f   :  { %17606 = vmatprep.subr.bf16.mxu1 %v23337_v22  ;;  %v23380_v22 = vld [vmem:[%s31739_s14 + $0x1880] ss:$28 sps:$4 sm:$0xff]   ;;  %v23416_v42 = vld [vmem:[%s31739_s14 + $0x19d0] ss:$28 sps:$4 sm:$0xff]  }
 0xb50   :  { %v23425_v4 = vld [vmem:[%s31739_s14 + $0x1a10] ss:$28 sps:$4 sm:$0xff]  }
 0xb51   :  { %17279 = vmatpush1.bf16.msra.mxu0 %v23332_v18  ;;  %v30405_v18 = vpack.c.bf16 %v11631_v23, %v11631_v23  ;;  %v23431_v23 = vld [vmem:[%s31739_s14 + $0x1a48] ss:$28 sps:$4 sm:$0xff]  }
 0xb52   :  { %17607 = vmatpush1.bf16.msra.mxu1 %v23335_v32  ;;  %17280 = vmatprep.subr.bf16.mxu0 %v23340_v10  ;;  %v23383_v32 = vld [vmem:[%s31739_s14 + $0x1888] ss:$28 sps:$4 sm:$0xff]   ;;  %v23388_v10 = vld [vmem:[%s31739_s14 + $0x18bc] ss:$28 sps:$4 sm:$0xff]  }
 0xb53   :  { %17608 = vmatprep.subr.bf16.mxu1 %v23343_v56  ;;  %v30413_v56 = vpack.c.bf16 %v11634_v52, %v11634_v52 }
 0xb55   :  { %17281 = vmatpush1.bf16.msra.mxu0 %v23338_v33  ;;  %v23391_v33 = vld [vmem:[%s31739_s14 + $0x18c4] ss:$28 sps:$4 sm:$0xff]  }
 0xb56   :  { %17609 = vmatpush1.bf16.msra.mxu1 %v23341_v30  ;;  %17282 = vmatprep.subr.bf16.mxu0 %v23346_v43  ;;  %v23386_v30 = vld [vmem:[%s31739_s14 + $0x18b8] ss:$28 sps:$4 sm:$0xff]   ;;  %v23389_v43 = vld [vmem:[%s31739_s14 + $0x18c0] ss:$28 sps:$4 sm:$0xff]  }
 0xb57   :  { %17610 = vmatprep.subr.bf16.mxu1 %v23349_v27  ;;  %v23394_v27 = vld [vmem:[%s31739_s14 + $0x18f4] ss:$28 sps:$4 sm:$0xff]  }
 0xb59   :  { %17283 = vmatpush1.bf16.msra.mxu0 %v23344_v14  ;;  %v23397_v14 = vld [vmem:[%s31739_s14 + $0x18fc] ss:$28 sps:$4 sm:$0xff]  }
 0xb5a   :  { %17611 = vmatpush1.bf16.msra.mxu1 %v23347_v15  ;;  %17284 = vmatprep.subr.bf16.mxu0 %v23352_v48  ;;  %v23392_v15 = vld [vmem:[%s31739_s14 + $0x18f0] ss:$28 sps:$4 sm:$0xff]   ;;  %v23395_v48 = vld [vmem:[%s31739_s14 + $0x18f8] ss:$28 sps:$4 sm:$0xff]  }
 0xb5b   :  { %17612 = vmatprep.subr.bf16.mxu1 %v23355_v29  ;;  %v23400_v29 = vld [vmem:[%s31739_s14 + $0x192c] ss:$28 sps:$4 sm:$0xff]  }
 0xb5d   :  { %17285 = vmatpush1.bf16.msra.mxu0 %v23350_v1  ;;  %v23403_v1 = vld [vmem:[%s31739_s14 + $0x1934] ss:$28 sps:$4 sm:$0xff]  }
 0xb5e   :  { %17613 = vmatpush1.bf16.msra.mxu1 %v23353_v39  ;;  %17286 = vmatprep.subr.bf16.mxu0 %v23358_v36  ;;  %v23398_v39 = vld [vmem:[%s31739_s14 + $0x1928] ss:$28 sps:$4 sm:$0xff]   ;;  %v23401_v36 = vld [vmem:[%s31739_s14 + $0x1930] ss:$28 sps:$4 sm:$0xff]  }
 0xb5f   :  { %17614 = vmatprep.subr.bf16.mxu1 %v23361_v40  ;;  %v23406_v40 = vld [vmem:[%s31739_s14 + $0x1964] ss:$28 sps:$4 sm:$0xff]  }
 0xb61   :  { %17287 = vmatpush1.bf16.msra.mxu0 %v23356_v50  ;;  %v23409_v50 = vld [vmem:[%s31739_s14 + $0x196c] ss:$28 sps:$4 sm:$0xff]  }
 0xb62   :  { %17615 = vmatpush1.bf16.msra.mxu1 %v23359_v44  ;;  %17288 = vmatprep.subr.bf16.mxu0 %v23364_v55  ;;  %v23404_v44 = vld [vmem:[%s31739_s14 + $0x1960] ss:$28 sps:$4 sm:$0xff]   ;;  %v23407_v55 = vld [vmem:[%s31739_s14 + $0x1968] ss:$28 sps:$4 sm:$0xff]  }
 0xb63   :  { %17616 = vmatprep.subr.bf16.mxu1 %v23367_v37  ;;  %v23415_v37 = vld [vmem:[%s31739_s14 + $0x19a4] ss:$28 sps:$4 sm:$0xff]  }
 0xb65   :  { %17289 = vmatpush1.bf16.msra.mxu0 %v23362_v17  ;;  %v23413_v17 = vld [vmem:[%s31739_s14 + $0x19a0] ss:$28 sps:$4 sm:$0xff]  }
 0xb66   :  { %17617 = vmatpush1.bf16.msra.mxu1 %v23365_v61  ;;  %17290 = vmatprep.subr.bf16.mxu0 %v23370_v34  ;;  %v23418_v61 = vld [vmem:[%s31739_s14 + $0x19d4] ss:$28 sps:$4 sm:$0xff]   ;;  %v23952_v34 = vld [vmem:[%s31738_s13 + $0x8] sm:$0xff] }
 0xb67   :  { %17618 = vmatprep.subr.bf16.mxu1 %v23373_v58  ;;  %v8350_v20 = vrot.slane %v23952_v34, %v26221_v47  ;;  %v23421_v58 = vld [vmem:[%s31739_s14 + $0x19dc] ss:$28 sps:$4 sm:$0xff]   ;;  %v23466_v34 = vld [vmem:[%s31739_s14 + $0x164] ss:$28 sps:$4 sm:$0xff]  }
 0xb69   :  { %17291 = vmatpush1.bf16.msra.mxu0 %v23368_v54  ;;  %v23419_v54 = vld [vmem:[%s31739_s14 + $0x19d8] ss:$28 sps:$4 sm:$0xff]  }
 0xb6a   :  { %17619 = vmatpush1.bf16.msra.mxu1 %v23371_v0  ;;  %17292 = vmatprep.subr.bf16.mxu0 %v23376_v7  ;;  %v23424_v0 = vld [vmem:[%s31739_s14 + $0x1a0c] ss:$28 sps:$4 sm:$0xff]   ;;  %v21103_v7 = vadd.f32 %v29645_v8, %v8350_v20  ;;  %v23430_v8 = vld [vmem:[%s31739_s14 + $0x1a44] ss:$28 sps:$4 sm:$0xff]  }
 0xb6b   :  { %17620 = vmatprep.subr.bf16.mxu1 %v23379_v25  ;;  %v23422_v25 = vld [vmem:[%s31739_s14 + $0x1a08] ss:$28 sps:$4 sm:$0xff]  }
 0xb6c   :  { %vm11601_vm11 = vcmp.gt.f32.partialorder %v21103_v7, 0.0  ;;  %v23467_v20 = vld [vmem:[%s31739_s14 + $0x328] ss:$28 sps:$4 sm:$0xff]  }
 0xb6d   :  { %17293 = vmatpush1.bf16.msra.mxu0 %v23374_v3  ;;  %v11617_v3 = vmul.f32 0.01, %v21103_v7 }
 0xb6e   :  { %17621 = vmatpush1.bf16.msra.mxu1 %v23377_v9  ;;  %17303 = vmatprep.subr.bf16.mxu0 %v23382_v12  ;;  %v23433_v9 = vld [vmem:[%s31739_s14 + $0x1a4c] ss:$28 sps:$4 sm:$0xff]   ;;  %v23428_v12 = vld [vmem:[%s31739_s14 + $0x1a40] ss:$28 sps:$4 sm:$0xff]  }
 0xb6f   :  { %17631 = vmatprep.subr.bf16.mxu1 %v23385_v31  ;;  %v23436_v31 = vld [vmem:[%s31739_s14 + $0x14] ss:$28 sps:$4 sm:$0xff]   ;;  %v11633_v52 = vsel %vm11601_vm11, %v21103_v7, %v11617_v3 }
 0xb70   :  { %17295 = vmatmul.mubr.bf16.vlgmr.msra.gmra.mrb[48].mxu0 %v30405_v18  ;;  %v23469_v7 = vld [vmem:[%s31739_s14 + $0x198] ss:$28 sps:$4 sm:$0xff]  }
 0xb71   :  { %17623 = vmatmul.mubr.bf16.vlgmr.msra.gmra.mrb[48].mxu1 %v30405_v18  ;;  %17304 = vmatpush1.bf16.msra.mxu0 %v23380_v22  ;;  %v23437_v22 = vld [vmem:[%s31739_s14 + $0x1d8] ss:$28 sps:$4 sm:$0xff]  }
 0xb72   :  { %20781 = vmatprep.mubr.msk.bf16.mxu0 %vm17012_vm10, %v30413_v56  ;;  %17632 = vmatpush1.bf16.msra.mxu1 %v23383_v32  ;;  %v23434_v32 = vld [vmem:[%s31739_s14 + $0x10] ss:$28 sps:$4 sm:$0xff]   ;;  %v23478_v3 = vld [vmem:[%s31739_s14 + $0x398] ss:$28 sps:$4 sm:$0xff]  }
 0xb73   :  { %20782 = vmatprep.mubr.msk.bf16.mxu1 %vm17012_vm10, %v30413_v56  ;;  %17305 = vmatprep.subr.bf16.mxu0 %v23388_v10  ;;  %v30528_v10 = vpack.c.bf16 %v11633_v52, %v11633_v52  ;;  %v23486_v52 = vld [vmem:[%s31739_s14 + $0x244] ss:$28 sps:$4 sm:$0xff]  }
 0xb74   :  { %17633 = vmatprep.subr.bf16.mxu1 %v23391_v33  ;;  %v23438_v33 = vld [vmem:[%s31739_s14 + $0x18] ss:$28 sps:$4 sm:$0xff]  }
 0xb75   :  { %17306 = vmatpush1.bf16.msra.mxu0 %v23386_v30  ;;  %v23441_v30 = vld [vmem:[%s31739_s14 + $0x4c] ss:$28 sps:$4 sm:$0xff]  }
 0xb76   :  { %17634 = vmatpush1.bf16.msra.mxu1 %v23389_v43  ;;  %17307 = vmatprep.subr.bf16.mxu0 %v23394_v27  ;;  %v23442_v43 = vld [vmem:[%s31739_s14 + $0x210] ss:$28 sps:$4 sm:$0xff]   ;;  %v23439_v27 = vld [vmem:[%s31739_s14 + $0x48] ss:$28 sps:$4 sm:$0xff]  }
 0xb77   :  { %17635 = vmatprep.subr.bf16.mxu1 %v23397_v14  ;;  %v23443_v14 = vld [vmem:[%s31739_s14 + $0x50] ss:$28 sps:$4 sm:$0xff]  }
 0xb79   :  { %17308 = vmatpush1.bf16.msra.mxu0 %v23392_v15  ;;  %v23446_v15 = vld [vmem:[%s31739_s14 + $0x84] ss:$28 sps:$4 sm:$0xff]  }
 0xb7a   :  { %17636 = vmatpush1.bf16.msra.mxu1 %v23395_v48  ;;  %17309 = vmatprep.subr.bf16.mxu0 %v23400_v29  ;;  %v23447_v48 = vld [vmem:[%s31739_s14 + $0x248] ss:$28 sps:$4 sm:$0xff]   ;;  %v23444_v29 = vld [vmem:[%s31739_s14 + $0x80] ss:$28 sps:$4 sm:$0xff]  }
 0xb7b   :  { %17637 = vmatprep.subr.bf16.mxu1 %v23403_v1  ;;  %v23448_v1 = vld [vmem:[%s31739_s14 + $0x88] ss:$28 sps:$4 sm:$0xff]  }
 0xb7d   :  { %17310 = vmatpush1.bf16.msra.mxu0 %v23398_v39  ;;  %v23452_v39 = vld [vmem:[%s31739_s14 + $0x280] ss:$28 sps:$4 sm:$0xff]  }
 0xb7e   :  { %17638 = vmatpush1.bf16.msra.mxu1 %v23401_v36  ;;  %17311 = vmatprep.subr.bf16.mxu0 %v23406_v40  ;;  %v23449_v36 = vld [vmem:[%s31739_s14 + $0xb8] ss:$28 sps:$4 sm:$0xff]   ;;  %v23453_v40 = vld [vmem:[%s31739_s14 + $0xc0] ss:$28 sps:$4 sm:$0xff]  }
 0xb7f   :  { %17639 = vmatprep.subr.bf16.mxu1 %v23409_v50  ;;  %v23456_v50 = vld [vmem:[%s31739_s14 + $0xf4] ss:$28 sps:$4 sm:$0xff]  }
 0xb81   :  { %17312 = vmatpush1.bf16.msra.mxu0 %v23404_v44  ;;  %v23457_v44 = vld [vmem:[%s31739_s14 + $0x2b8] ss:$28 sps:$4 sm:$0xff]  }
 0xb82   :  { %17640 = vmatpush1.bf16.msra.mxu1 %v23407_v55  ;;  %17313 = vmatprep.subr.bf16.mxu0 %v23412_v46  ;;  %v23454_v55 = vld [vmem:[%s31739_s14 + $0xf0] ss:$28 sps:$4 sm:$0xff]   ;;  %v23458_v46 = vld [vmem:[%s31739_s14 + $0xf8] ss:$28 sps:$4 sm:$0xff]  }
 0xb83   :  { %17641 = vmatprep.subr.bf16.mxu1 %v23415_v37  ;;  %v23461_v37 = vld [vmem:[%s31739_s14 + $0x12c] ss:$28 sps:$4 sm:$0xff]  }
 0xb85   :  { %17314 = vmatpush1.bf16.msra.mxu0 %v23410_v45  ;;  %v23462_v45 = vld [vmem:[%s31739_s14 + $0x2f0] ss:$28 sps:$4 sm:$0xff]  }
 0xb86   :  { %17642 = vmatpush1.bf16.msra.mxu1 %v23413_v17  ;;  %17315 = vmatprep.subr.bf16.mxu0 %v23418_v61  ;;  %v23459_v17 = vld [vmem:[%s31739_s14 + $0x128] ss:$28 sps:$4 sm:$0xff]   ;;  %v23463_v61 = vld [vmem:[%s31739_s14 + $0x130] ss:$28 sps:$4 sm:$0xff]  }
 0xb87   :  { %17643 = vmatprep.subr.bf16.mxu1 %v23421_v58  ;;  %v23464_v58 = vld [vmem:[%s31739_s14 + $0x160] ss:$28 sps:$4 sm:$0xff]  }
 0xb89   :  { %17316 = vmatpush1.bf16.msra.mxu0 %v23416_v42  ;;  %v23468_v42 = vld [vmem:[%s31739_s14 + $0x168] ss:$28 sps:$4 sm:$0xff]  }
 0xb8a   :  { %17644 = vmatpush1.bf16.msra.mxu1 %v23419_v54  ;;  %17317 = vmatprep.subr.bf16.mxu0 %v23424_v0  ;;  %v23471_v54 = vld [vmem:[%s31739_s14 + $0x19c] ss:$28 sps:$4 sm:$0xff]  }
 0xb8b   :  { %17645 = vmatprep.subr.bf16.mxu1 %v23427_v6  ;;  %v23472_v0 = vld [vmem:[%s31739_s14 + $0x360] ss:$28 sps:$4 sm:$0xff]  }
 0xb8c   :  { %v23473_v6 = vld [vmem:[%s31739_s14 + $0x1a0] ss:$28 sps:$4 sm:$0xff]  }
 0xb8d   :  { %17318 = vmatpush1.bf16.msra.mxu0 %v23422_v25  ;;  %v23476_v25 = vld [vmem:[%s31739_s14 + $0x1d4] ss:$28 sps:$4 sm:$0xff]  }
 0xb8e   :  { %17646 = vmatpush1.bf16.msra.mxu1 %v23425_v4  ;;  %17319 = vmatprep.subr.bf16.mxu0 %v23430_v8  ;;  %v23477_v4 = vld [vmem:[%s31739_s14 + $0x558] ss:$28 sps:$4 sm:$0xff]   ;;  %v23474_v8 = vld [vmem:[%s31739_s14 + $0x1d0] ss:$28 sps:$4 sm:$0xff]  }
 0xb8f   :  { %17647 = vmatprep.subr.bf16.mxu1 %v23433_v9  ;;  %v23481_v9 = vld [vmem:[%s31739_s14 + $0x20c] ss:$28 sps:$4 sm:$0xff]  }
 0xb91   :  { %17320 = vmatpush1.bf16.msra.mxu0 %v23428_v12  ;;  %v23482_v12 = vld [vmem:[%s31739_s14 + $0x590] ss:$28 sps:$4 sm:$0xff]  }
 0xb92   :  { %17648 = vmatpush1.bf16.msra.mxu1 %v23431_v23  ;;  %17672 = vmatprep.subr.bf16.mxu0 %v23436_v31  ;;  %v23479_v23 = vld [vmem:[%s31739_s14 + $0x208] ss:$28 sps:$4 sm:$0xff]   ;;  %v23483_v31 = vld [vmem:[%s31739_s14 + $0x3d0] ss:$28 sps:$4 sm:$0xff]  }
 0xb93   :  { %20869 = vmatprep.subr.bf16.mxu1 %v23437_v22  ;;  %v23487_v22 = vld [vmem:[%s31739_s14 + $0x5c8] ss:$28 sps:$4 sm:$0xff]  }
 0xb94   :  { %17336 = vmatmul.mubr.bf16.vlgmr.msra.gmra.mrb[48].mxu0 %v30528_v10 }
 0xb95   :  { %17664 = vmatmul.mubr.bf16.vlgmr.msra.gmra.mrb[48].mxu1 %v30528_v10  ;;  %17673 = vmatpush1.bf16.msra.mxu0 %v23434_v32  ;;  %v23484_v32 = vld [vmem:[%s31739_s14 + $0x240] ss:$28 sps:$4 sm:$0xff]  }
 0xb96   :  { %17704 = vmatprep.mubr.bf16.mxu0 %v28948_v41  ;;  %20870 = vmatpush3.bf16.msra.mxu1 %v23438_v33  ;;  %v23488_v33 = vld [vmem:[%s31739_s14 + $0x408] ss:$28 sps:$4 sm:$0xff]  }
 0xb97   :  { %18032 = vmatprep.mubr.bf16.mxu1 %v28948_v41  ;;  %17674 = vmatprep.subr.bf16.mxu0 %v23441_v30  ;;  %v23451_v41 = vld [vmem:[%s31739_s14 + $0xbc] ss:$28 sps:$4 sm:$0xff]  }
 0xb98   :  { %20871 = vmatprep.subr.bf16.mxu1 %v23442_v43  ;;  %v23491_v30 = vld [vmem:[%s31739_s14 + $0x27c] ss:$28 sps:$4 sm:$0xff]  }
 0xb99   :  { %17675 = vmatpush1.bf16.msra.mxu0 %v23439_v27  ;;  %v23492_v43 = vld [vmem:[%s31739_s14 + $0x600] ss:$28 sps:$4 sm:$0xff]   ;;  %v23489_v27 = vld [vmem:[%s31739_s14 + $0x278] ss:$28 sps:$4 sm:$0xff]  }
 0xb9a   :  { %20872 = vmatpush3.bf16.msra.mxu1 %v23443_v14  ;;  %17676 = vmatprep.subr.bf16.mxu0 %v23446_v15  ;;  %v23493_v14 = vld [vmem:[%s31739_s14 + $0x440] ss:$28 sps:$4 sm:$0xff]   ;;  %v23496_v15 = vld [vmem:[%s31739_s14 + $0x2b4] ss:$28 sps:$4 sm:$0xff]  }
 0xb9b   :  { %20873 = vmatprep.subr.bf16.mxu1 %v23447_v48  ;;  %v23497_v48 = vld [vmem:[%s31739_s14 + $0x638] ss:$28 sps:$4 sm:$0xff]  }
 0xb9d   :  { %17677 = vmatpush1.bf16.msra.mxu0 %v23444_v29  ;;  %v23494_v29 = vld [vmem:[%s31739_s14 + $0x2b0] ss:$28 sps:$4 sm:$0xff]  }
 0xb9e   :  { %20874 = vmatpush3.bf16.msra.mxu1 %v23448_v1  ;;  %17678 = vmatprep.subr.bf16.mxu0 %v23451_v41  ;;  %v23498_v1 = vld [vmem:[%s31739_s14 + $0x478] ss:$28 sps:$4 sm:$0xff]   ;;  %v23501_v41 = vld [vmem:[%s31739_s14 + $0x2ec] ss:$28 sps:$4 sm:$0xff]  }
 0xb9f   :  { %20875 = vmatprep.subr.bf16.mxu1 %v23452_v39  ;;  %v23502_v39 = vld [vmem:[%s31739_s14 + $0x670] ss:$28 sps:$4 sm:$0xff]  }
 0xba1   :  { %17679 = vmatpush1.bf16.msra.mxu0 %v23449_v36  ;;  %v23499_v36 = vld [vmem:[%s31739_s14 + $0x2e8] ss:$28 sps:$4 sm:$0xff]  }
 0xba2   :  { %20876 = vmatpush3.bf16.msra.mxu1 %v23453_v40  ;;  %17680 = vmatprep.subr.bf16.mxu0 %v23456_v50  ;;  %v23503_v40 = vld [vmem:[%s31739_s14 + $0x4b0] ss:$28 sps:$4 sm:$0xff]   ;;  %v23506_v50 = vld [vmem:[%s31739_s14 + $0x324] ss:$28 sps:$4 sm:$0xff]  }
 0xba3   :  { %20877 = vmatprep.subr.bf16.mxu1 %v23457_v44  ;;  %v23507_v44 = vld [vmem:[%s31739_s14 + $0x6a8] ss:$28 sps:$4 sm:$0xff]  }
 0xba5   :  { %17681 = vmatpush1.bf16.msra.mxu0 %v23454_v55  ;;  %v23504_v55 = vld [vmem:[%s31739_s14 + $0x320] ss:$28 sps:$4 sm:$0xff]  }
 0xba6   :  { %20878 = vmatpush3.bf16.msra.mxu1 %v23458_v46  ;;  %17682 = vmatprep.subr.bf16.mxu0 %v23461_v37  ;;  %v23508_v46 = vld [vmem:[%s31739_s14 + $0x4e8] ss:$28 sps:$4 sm:$0xff]   ;;  %v23511_v37 = vld [vmem:[%s31739_s14 + $0x35c] ss:$28 sps:$4 sm:$0xff]  }
 0xba7   :  { %20879 = vmatprep.subr.bf16.mxu1 %v23462_v45  ;;  %v23512_v45 = vld [vmem:[%s31739_s14 + $0x6e0] ss:$28 sps:$4 sm:$0xff]  }
 0xba9   :  { %17683 = vmatpush1.bf16.msra.mxu0 %v23459_v17  ;;  %v23509_v17 = vld [vmem:[%s31739_s14 + $0x358] ss:$28 sps:$4 sm:$0xff]  }
 0xbaa   :  { %20880 = vmatpush3.bf16.msra.mxu1 %v23463_v61  ;;  %17684 = vmatprep.subr.bf16.mxu0 %v23466_v34  ;;  %v23513_v61 = vld [vmem:[%s31739_s14 + $0x520] ss:$28 sps:$4 sm:$0xff]   ;;  %v23516_v34 = vld [vmem:[%s31739_s14 + $0x394] ss:$28 sps:$4 sm:$0xff]  }
 0xbab   :  { %20881 = vmatprep.subr.bf16.mxu1 %v23467_v20  ;;  %v23517_v20 = vld [vmem:[%s31739_s14 + $0x8d8] ss:$28 sps:$4 sm:$0xff]  }
 0xbad   :  { %17685 = vmatpush1.bf16.msra.mxu0 %v23464_v58  ;;  %v23514_v58 = vld [vmem:[%s31739_s14 + $0x390] ss:$28 sps:$4 sm:$0xff]  }
 0xbae   :  { %20882 = vmatpush3.bf16.msra.mxu1 %v23468_v42  ;;  %17686 = vmatprep.subr.bf16.mxu0 %v23471_v54  ;;  %v23518_v42 = vld [vmem:[%s31739_s14 + $0x718] ss:$28 sps:$4 sm:$0xff]   ;;  %v23521_v54 = vld [vmem:[%s31739_s14 + $0x3cc] ss:$28 sps:$4 sm:$0xff]  }
 0xbaf   :  { %20883 = vmatprep.subr.bf16.mxu1 %v23472_v0  ;;  %v23522_v0 = vld [vmem:[%s31739_s14 + $0x910] ss:$28 sps:$4 sm:$0xff]  }
 0xbb1   :  { %17687 = vmatpush1.bf16.msra.mxu0 %v23469_v7  ;;  %v23519_v7 = vld [vmem:[%s31739_s14 + $0x3c8] ss:$28 sps:$4 sm:$0xff]  }
 0xbb2   :  { %20884 = vmatpush3.bf16.msra.mxu1 %v23473_v6  ;;  %17688 = vmatprep.subr.bf16.mxu0 %v23476_v25  ;;  %v23523_v6 = vld [vmem:[%s31739_s14 + $0x750] ss:$28 sps:$4 sm:$0xff]   ;;  %v23527_v25 = vld [vmem:[%s31739_s14 + $0x948] ss:$28 sps:$4 sm:$0xff]  }
 0xbb3   :  { %20891 = vmatprep.subr.bf16.mxu1 %v23477_v4  ;;  %v23528_v4 = vld [vmem:[%s31739_s14 + $0x788] ss:$28 sps:$4 sm:$0xff]  }
 0xbb5   :  { %18033 = vmatmul.mubr.bf16.vlgmr.msra.gmra.mrb[52].mxu1 %v29146_v53  ;;  %17689 = vmatpush1.bf16.msra.mxu0 %v23474_v8  ;;  %v23531_v8 = vld [vmem:[%s31739_s14 + $0x43c] ss:$28 sps:$4 sm:$0xff]  }
 0xbb6   :  { %20892 = vmatpush3.bf16.msra.mxu1 %v23478_v3  ;;  %18072 = vmatprep.mubr.bf16.mxu1 %v29154_v60  ;;  %v23532_v3 = vld [vmem:[%s31739_s14 + $0x980] ss:$28 sps:$4 sm:$0xff]  }
 0xbb7   :  { %17690 = vmatprep.subr.bf16.mxu0 %v23481_v9  ;;  %20893 = vmatprep.subr.bf16.mxu1 %v23482_v12  ;;  %v23529_v9 = vld [vmem:[%s31739_s14 + $0x438] ss:$28 sps:$4 sm:$0xff]   ;;  %v23533_v12 = vld [vmem:[%s31739_s14 + $0x7c0] ss:$28 sps:$4 sm:$0xff]  }
 0xbb9   :  { %17691 = vmatpush1.bf16.msra.mxu0 %v23479_v23  ;;  %v23536_v23 = vld [vmem:[%s31739_s14 + $0x474] ss:$28 sps:$4 sm:$0xff]  }
 0xbba   :  { %20894 = vmatpush3.bf16.msra.mxu1 %v23483_v31  ;;  %17692 = vmatprep.subr.bf16.mxu0 %v23486_v52  ;;  %v23537_v31 = vld [vmem:[%s31739_s14 + $0x9b8] ss:$28 sps:$4 sm:$0xff]   ;;  %v23534_v52 = vld [vmem:[%s31739_s14 + $0x470] ss:$28 sps:$4 sm:$0xff]  }
 0xbbb   :  { %20895 = vmatprep.subr.bf16.mxu1 %v23487_v22  ;;  %v23538_v22 = vld [vmem:[%s31739_s14 + $0x7f8] ss:$28 sps:$4 sm:$0xff]  }
 0xbbd   :  { %17693 = vmatpush1.bf16.msra.mxu0 %v23484_v32  ;;  %v23541_v32 = vld [vmem:[%s31739_s14 + $0x4ac] ss:$28 sps:$4 sm:$0xff]  }
 0xbbe   :  { %20896 = vmatpush3.bf16.msra.mxu1 %v23488_v33  ;;  %17694 = vmatprep.subr.bf16.mxu0 %v23491_v30  ;;  %v23542_v33 = vld [vmem:[%s31739_s14 + $0x9f0] ss:$28 sps:$4 sm:$0xff]   ;;  %v23539_v30 = vld [vmem:[%s31739_s14 + $0x4a8] ss:$28 sps:$4 sm:$0xff]  }
 0xbbf   :  { %20897 = vmatprep.subr.bf16.mxu1 %v23492_v43  ;;  %v23543_v43 = vld [vmem:[%s31739_s14 + $0x830] ss:$28 sps:$4 sm:$0xff]  }
 0xbc1   :  { %17695 = vmatpush1.bf16.msra.mxu0 %v23489_v27  ;;  %v23546_v27 = vld [vmem:[%s31739_s14 + $0x4e4] ss:$28 sps:$4 sm:$0xff]  }
 0xbc2   :  { %20898 = vmatpush3.bf16.msra.mxu1 %v23493_v14  ;;  %17696 = vmatprep.subr.bf16.mxu0 %v23496_v15  ;;  %v23547_v14 = vld [vmem:[%s31739_s14 + $0xa28] ss:$28 sps:$4 sm:$0xff]   ;;  %v23544_v15 = vld [vmem:[%s31739_s14 + $0x4e0] ss:$28 sps:$4 sm:$0xff]  }
 0xbc3   :  { %20899 = vmatprep.subr.bf16.mxu1 %v23497_v48  ;;  %v23548_v48 = vld [vmem:[%s31739_s14 + $0x868] ss:$28 sps:$4 sm:$0xff]  }
 0xbc5   :  { %17697 = vmatpush1.bf16.msra.mxu0 %v23494_v29  ;;  %v23551_v29 = vld [vmem:[%s31739_s14 + $0x51c] ss:$28 sps:$4 sm:$0xff]  }
 0xbc6   :  { %20900 = vmatpush3.bf16.msra.mxu1 %v23498_v1  ;;  %17698 = vmatprep.subr.bf16.mxu0 %v23501_v41  ;;  %v23552_v1 = vld [vmem:[%s31739_s14 + $0xa60] ss:$28 sps:$4 sm:$0xff]   ;;  %v23549_v41 = vld [vmem:[%s31739_s14 + $0x518] ss:$28 sps:$4 sm:$0xff]  }
 0xbc7   :  { %20901 = vmatprep.subr.bf16.mxu1 %v23502_v39  ;;  %v23553_v39 = vld [vmem:[%s31739_s14 + $0x8a0] ss:$28 sps:$4 sm:$0xff]  }
 0xbc9   :  { %17699 = vmatpush1.bf16.msra.mxu0 %v23499_v36  ;;  %v23556_v36 = vld [vmem:[%s31739_s14 + $0x554] ss:$28 sps:$4 sm:$0xff]  }
 0xbca   :  { %20902 = vmatpush3.bf16.msra.mxu1 %v23503_v40  ;;  %17700 = vmatprep.subr.bf16.mxu0 %v23506_v50  ;;  %v23557_v40 = vld [vmem:[%s31739_s14 + $0xc58] ss:$28 sps:$4 sm:$0xff]   ;;  %v23554_v50 = vld [vmem:[%s31739_s14 + $0x550] ss:$28 sps:$4 sm:$0xff]  }
 0xbcb   :  { %20903 = vmatprep.subr.bf16.mxu1 %v23507_v44  ;;  %v23558_v44 = vld [vmem:[%s31739_s14 + $0xa98] ss:$28 sps:$4 sm:$0xff]  }
 0xbcd   :  { %17701 = vmatpush1.bf16.msra.mxu0 %v23504_v55  ;;  %v23561_v55 = vld [vmem:[%s31739_s14 + $0x58c] ss:$28 sps:$4 sm:$0xff]  }
 0xbce   :  { %20904 = vmatpush3.bf16.msra.mxu1 %v23508_v46  ;;  %17702 = vmatprep.subr.bf16.mxu0 %v23511_v37  ;;  %v23562_v46 = vld [vmem:[%s31739_s14 + $0xc90] ss:$28 sps:$4 sm:$0xff]   ;;  %v23559_v37 = vld [vmem:[%s31739_s14 + $0x588] ss:$28 sps:$4 sm:$0xff]  }
 0xbcf   :  { %20905 = vmatprep.subr.bf16.mxu1 %v23512_v45  ;;  %v23563_v45 = vld [vmem:[%s31739_s14 + $0xad0] ss:$28 sps:$4 sm:$0xff]  }
 0xbd1   :  { %17703 = vmatpush1.bf16.msra.mxu0 %v23509_v17  ;;  %v23566_v17 = vld [vmem:[%s31739_s14 + $0x5c4] ss:$28 sps:$4 sm:$0xff]  }
 0xbd2   :  { %20906 = vmatpush3.bf16.msra.mxu1 %v23513_v61  ;;  %17713 = vmatprep.subr.bf16.mxu0 %v23516_v34  ;;  %v23567_v61 = vld [vmem:[%s31739_s14 + $0xcc8] ss:$28 sps:$4 sm:$0xff]   ;;  %v23564_v34 = vld [vmem:[%s31739_s14 + $0x5c0] ss:$28 sps:$4 sm:$0xff]  }
 0xbd3   :  { %20913 = vmatprep.subr.bf16.mxu1 %v23517_v20  ;;  %v23568_v20 = vld [vmem:[%s31739_s14 + $0xb08] ss:$28 sps:$4 sm:$0xff]  }
 0xbd4   :  { %17705 = vmatmul.mubr.bf16.vlgmr.msra.gmra.mrb[52].mxu0 %v29146_v53  ;;  %v23526_v53 = vld [vmem:[%s31739_s14 + $0x404] ss:$28 sps:$4 sm:$0xff]  }
 0xbd5   :  { %18073 = vmatmul.mubr.bf16.vlgmr.msra.gmra.mrb[56].mxu1 %v29360_v21  ;;  %17714 = vmatpush1.bf16.msra.mxu0 %v23514_v58  ;;  %v23571_v58 = vld [vmem:[%s31739_s14 + $0x5fc] ss:$28 sps:$4 sm:$0xff]  }
 0xbd6   :  { %17745 = vmatprep.mubr.bf16.mxu0 %v29154_v60  ;;  %20914 = vmatpush3.bf16.msra.mxu1 %v23518_v42  ;;  %v23524_v60 = vld [vmem:[%s31739_s14 + $0x400] ss:$28 sps:$4 sm:$0xff]  }
 0xbd7   :  { %18112 = vmatprep.mubr.bf16.mxu1 %v29368_v59  ;;  %17715 = vmatprep.subr.bf16.mxu0 %v23521_v54  ;;  %v23572_v42 = vld [vmem:[%s31739_s14 + $0xd00] ss:$28 sps:$4 sm:$0xff]   ;;  %v23569_v54 = vld [vmem:[%s31739_s14 + $0x5f8] ss:$28 sps:$4 sm:$0xff]  }
 0xbd8   :  { %20915 = vmatprep.subr.bf16.mxu1 %v23522_v0  ;;  %v23573_v0 = vld [vmem:[%s31739_s14 + $0xb40] ss:$28 sps:$4 sm:$0xff]  }
 0xbd9   :  { %17716 = vmatpush1.bf16.msra.mxu0 %v23519_v7  ;;  %v23576_v7 = vld [vmem:[%s31739_s14 + $0x634] ss:$28 sps:$4 sm:$0xff]  }
 0xbda   :  { %20916 = vmatpush3.bf16.msra.mxu1 %v23523_v6  ;;  %17717 = vmatprep.subr.bf16.mxu0 %v23526_v53  ;;  %v23577_v6 = vld [vmem:[%s31739_s14 + $0xd38] ss:$28 sps:$4 sm:$0xff]   ;;  %v23574_v53 = vld [vmem:[%s31739_s14 + $0x630] ss:$28 sps:$4 sm:$0xff]  }
 0xbdb   :  { %20917 = vmatprep.subr.bf16.mxu1 %v23527_v25  ;;  %v23578_v25 = vld [vmem:[%s31739_s14 + $0xb78] ss:$28 sps:$4 sm:$0xff]  }
 0xbdd   :  { %17718 = vmatpush1.bf16.msra.mxu0 %v23524_v60  ;;  %v23581_v60 = vld [vmem:[%s31739_s14 + $0x66c] ss:$28 sps:$4 sm:$0xff]  }
 0xbde   :  { %20918 = vmatpush3.bf16.msra.mxu1 %v23528_v4  ;;  %17719 = vmatprep.subr.bf16.mxu0 %v23531_v8  ;;  %v23582_v4 = vld [vmem:[%s31739_s14 + $0xd70] ss:$28 sps:$4 sm:$0xff]   ;;  %v23579_v8 = vld [vmem:[%s31739_s14 + $0x668] ss:$28 sps:$4 sm:$0xff]  }
 0xbdf   :  { %20919 = vmatprep.subr.bf16.mxu1 %v23532_v3  ;;  %v23583_v3 = vld [vmem:[%s31739_s14 + $0xbb0] ss:$28 sps:$4 sm:$0xff]  }
 0xbe1   :  { %17720 = vmatpush1.bf16.msra.mxu0 %v23529_v9  ;;  %v23586_v9 = vld [vmem:[%s31739_s14 + $0x6a4] ss:$28 sps:$4 sm:$0xff]  }
 0xbe2   :  { %20920 = vmatpush3.bf16.msra.mxu1 %v23533_v12  ;;  %17721 = vmatprep.subr.bf16.mxu0 %v23536_v23  ;;  %v23587_v12 = vld [vmem:[%s31739_s14 + $0xda8] ss:$28 sps:$4 sm:$0xff]   ;;  %v23584_v23 = vld [vmem:[%s31739_s14 + $0x6a0] ss:$28 sps:$4 sm:$0xff]  }
 0xbe3   :  { %20921 = vmatprep.subr.bf16.mxu1 %v23537_v31  ;;  %v23588_v31 = vld [vmem:[%s31739_s14 + $0xbe8] ss:$28 sps:$4 sm:$0xff]  }
 0xbe5   :  { %17722 = vmatpush1.bf16.msra.mxu0 %v23534_v52  ;;  %v23591_v52 = vld [vmem:[%s31739_s14 + $0x6dc] ss:$28 sps:$4 sm:$0xff]  }
 0xbe6   :  { %20922 = vmatpush3.bf16.msra.mxu1 %v23538_v22  ;;  %17723 = vmatprep.subr.bf16.mxu0 %v23541_v32  ;;  %v23592_v22 = vld [vmem:[%s31739_s14 + $0xde0] ss:$28 sps:$4 sm:$0xff]   ;;  %v23589_v32 = vld [vmem:[%s31739_s14 + $0x6d8] ss:$28 sps:$4 sm:$0xff]  }
 0xbe7   :  { %20923 = vmatprep.subr.bf16.mxu1 %v23542_v33  ;;  %v23593_v33 = vld [vmem:[%s31739_s14 + $0xc20] ss:$28 sps:$4 sm:$0xff]  }
 0xbe9   :  { %17724 = vmatpush1.bf16.msra.mxu0 %v23539_v30  ;;  %v23596_v30 = vld [vmem:[%s31739_s14 + $0x714] ss:$28 sps:$4 sm:$0xff]  }
 0xbea   :  { %20924 = vmatpush3.bf16.msra.mxu1 %v23543_v43  ;;  %17725 = vmatprep.subr.bf16.mxu0 %v23546_v27  ;;  %v23597_v43 = vld [vmem:[%s31739_s14 + $0xfd8] ss:$28 sps:$4 sm:$0xff]   ;;  %v23594_v27 = vld [vmem:[%s31739_s14 + $0x710] ss:$28 sps:$4 sm:$0xff]  }
 0xbeb   :  { %20925 = vmatprep.subr.bf16.mxu1 %v23547_v14  ;;  %v23598_v14 = vld [vmem:[%s31739_s14 + $0xe18] ss:$28 sps:$4 sm:$0xff]  }
 0xbed   :  { %17726 = vmatpush1.bf16.msra.mxu0 %v23544_v15  ;;  %v23601_v15 = vld [vmem:[%s31739_s14 + $0x74c] ss:$28 sps:$4 sm:$0xff]  }
 0xbee   :  { %20926 = vmatpush3.bf16.msra.mxu1 %v23548_v48  ;;  %17727 = vmatprep.subr.bf16.mxu0 %v23551_v29  ;;  %v23602_v48 = vld [vmem:[%s31739_s14 + $0x1010] ss:$28 sps:$4 sm:$0xff]   ;;  %v23599_v29 = vld [vmem:[%s31739_s14 + $0x748] ss:$28 sps:$4 sm:$0xff]  }
 0xbef   :  { %20927 = vmatprep.subr.bf16.mxu1 %v23552_v1  ;;  %v23603_v1 = vld [vmem:[%s31739_s14 + $0xe50] ss:$28 sps:$4 sm:$0xff]  }
 0xbf1   :  { %17728 = vmatpush1.bf16.msra.mxu0 %v23549_v41  ;;  %v23607_v41 = vld [vmem:[%s31739_s14 + $0x1048] ss:$28 sps:$4 sm:$0xff]  }
 0xbf2   :  { %20928 = vmatpush3.bf16.msra.mxu1 %v23553_v39  ;;  %17729 = vmatprep.subr.bf16.mxu0 %v23556_v36  ;;  %v23608_v39 = vld [vmem:[%s31739_s14 + $0xe88] ss:$28 sps:$4 sm:$0xff]   ;;  %v23611_v36 = vld [vmem:[%s31739_s14 + $0x7bc] ss:$28 sps:$4 sm:$0xff]  }
 0xbf3   :  { %20935 = vmatprep.subr.bf16.mxu1 %v23557_v40  ;;  %v23612_v40 = vld [vmem:[%s31739_s14 + $0x1080] ss:$28 sps:$4 sm:$0xff]  }
 0xbf5   :  { %18113 = vmatmul.mubr.bf16.vlgmr.msra.gmra.mrb[60].mxu1 %v29566_v16  ;;  %17730 = vmatpush1.bf16.msra.mxu0 %v23554_v50  ;;  %v23609_v50 = vld [vmem:[%s31739_s14 + $0x7b8] ss:$28 sps:$4 sm:$0xff]  }
 0xbf6   :  { %20936 = vmatpush3.bf16.msra.mxu1 %v23558_v44  ;;  %18152 = vmatprep.mubr.bf16.mxu1 %v29574_v28  ;;  %v23613_v44 = vld [vmem:[%s31739_s14 + $0xec0] ss:$28 sps:$4 sm:$0xff]  }
 0xbf7   :  { %17731 = vmatprep.subr.bf16.mxu0 %v23561_v55  ;;  %20937 = vmatprep.subr.bf16.mxu1 %v23562_v46  ;;  %v23616_v55 = vld [vmem:[%s31739_s14 + $0x7f4] ss:$28 sps:$4 sm:$0xff]  }
 0xbf8   :  { %v23617_v46 = vld [vmem:[%s31739_s14 + $0x10b8] ss:$28 sps:$4 sm:$0xff]  }
 0xbf9   :  { %17732 = vmatpush1.bf16.msra.mxu0 %v23559_v37  ;;  %v23614_v37 = vld [vmem:[%s31739_s14 + $0x7f0] ss:$28 sps:$4 sm:$0xff]  }
 0xbfa   :  { %20938 = vmatpush3.bf16.msra.mxu1 %v23563_v45  ;;  %17733 = vmatprep.subr.bf16.mxu0 %v23566_v17  ;;  %v23618_v45 = vld [vmem:[%s31739_s14 + $0xef8] ss:$28 sps:$4 sm:$0xff]   ;;  %v23621_v17 = vld [vmem:[%s31739_s14 + $0x82c] ss:$28 sps:$4 sm:$0xff]  }
 0xbfb   :  { %20939 = vmatprep.subr.bf16.mxu1 %v23567_v61  ;;  %v23622_v61 = vld [vmem:[%s31739_s14 + $0x10f0] ss:$28 sps:$4 sm:$0xff]  }
 0xbfd   :  { %17734 = vmatpush1.bf16.msra.mxu0 %v23564_v34  ;;  %v23619_v34 = vld [vmem:[%s31739_s14 + $0x828] ss:$28 sps:$4 sm:$0xff]  }
 0xbfe   :  { %20940 = vmatpush3.bf16.msra.mxu1 %v23568_v20  ;;  %17735 = vmatprep.subr.bf16.mxu0 %v23571_v58  ;;  %v23623_v20 = vld [vmem:[%s31739_s14 + $0xf30] ss:$28 sps:$4 sm:$0xff]   ;;  %v23626_v58 = vld [vmem:[%s31739_s14 + $0x864] ss:$28 sps:$4 sm:$0xff]  }
 0xbff   :  { %20941 = vmatprep.subr.bf16.mxu1 %v23572_v42  ;;  %v23627_v42 = vld [vmem:[%s31739_s14 + $0x1128] ss:$28 sps:$4 sm:$0xff]  }
 0xc01   :  { %17736 = vmatpush1.bf16.msra.mxu0 %v23569_v54  ;;  %v23624_v54 = vld [vmem:[%s31739_s14 + $0x860] ss:$28 sps:$4 sm:$0xff]  }
 0xc02   :  { %20942 = vmatpush3.bf16.msra.mxu1 %v23573_v0  ;;  %17737 = vmatprep.subr.bf16.mxu0 %v23576_v7  ;;  %v23628_v0 = vld [vmem:[%s31739_s14 + $0xf68] ss:$28 sps:$4 sm:$0xff]   ;;  %v23631_v7 = vld [vmem:[%s31739_s14 + $0x89c] ss:$28 sps:$4 sm:$0xff]  }
 0xc03   :  { %20943 = vmatprep.subr.bf16.mxu1 %v23577_v6  ;;  %v23632_v6 = vld [vmem:[%s31739_s14 + $0x1160] ss:$28 sps:$4 sm:$0xff]  }
 0xc05   :  { %17738 = vmatpush1.bf16.msra.mxu0 %v23574_v53  ;;  %v23629_v53 = vld [vmem:[%s31739_s14 + $0x898] ss:$28 sps:$4 sm:$0xff]  }
 0xc06   :  { %20944 = vmatpush3.bf16.msra.mxu1 %v23578_v25  ;;  %17739 = vmatprep.subr.bf16.mxu0 %v23581_v60  ;;  %v23633_v25 = vld [vmem:[%s31739_s14 + $0xfa0] ss:$28 sps:$4 sm:$0xff]   ;;  %v23636_v60 = vld [vmem:[%s31739_s14 + $0x8d4] ss:$28 sps:$4 sm:$0xff]  }
 0xc07   :  { %20945 = vmatprep.subr.bf16.mxu1 %v23582_v4  ;;  %v23637_v4 = vld [vmem:[%s31739_s14 + $0x1358] ss:$28 sps:$4 sm:$0xff]  }
 0xc09   :  { %17740 = vmatpush1.bf16.msra.mxu0 %v23579_v8  ;;  %v23634_v8 = vld [vmem:[%s31739_s14 + $0x8d0] ss:$28 sps:$4 sm:$0xff]  }
 0xc0a   :  { %20946 = vmatpush3.bf16.msra.mxu1 %v23583_v3  ;;  %17741 = vmatprep.subr.bf16.mxu0 %v23586_v9  ;;  %v23638_v3 = vld [vmem:[%s31739_s14 + $0x1198] ss:$28 sps:$4 sm:$0xff]   ;;  %v23641_v9 = vld [vmem:[%s31739_s14 + $0x90c] ss:$28 sps:$4 sm:$0xff]  }
 0xc0b   :  { %20947 = vmatprep.subr.bf16.mxu1 %v23587_v12  ;;  %v23642_v12 = vld [vmem:[%s31739_s14 + $0x1390] ss:$28 sps:$4 sm:$0xff]  }
 0xc0d   :  { %17742 = vmatpush1.bf16.msra.mxu0 %v23584_v23  ;;  %v23639_v23 = vld [vmem:[%s31739_s14 + $0x908] ss:$28 sps:$4 sm:$0xff]  }
 0xc0e   :  { %20948 = vmatpush3.bf16.msra.mxu1 %v23588_v31  ;;  %17743 = vmatprep.subr.bf16.mxu0 %v23591_v52  ;;  %v23643_v31 = vld [vmem:[%s31739_s14 + $0x11d0] ss:$28 sps:$4 sm:$0xff]   ;;  %v23646_v52 = vld [vmem:[%s31739_s14 + $0x944] ss:$28 sps:$4 sm:$0xff]  }
 0xc0f   :  { %20949 = vmatprep.subr.bf16.mxu1 %v23592_v22  ;;  %v23647_v22 = vld [vmem:[%s31739_s14 + $0x13c8] ss:$28 sps:$4 sm:$0xff]  }
 0xc11   :  { %17744 = vmatpush1.bf16.msra.mxu0 %v23589_v32  ;;  %v23644_v32 = vld [vmem:[%s31739_s14 + $0x940] ss:$28 sps:$4 sm:$0xff]  }
 0xc12   :  { %20950 = vmatpush3.bf16.msra.mxu1 %v23593_v33  ;;  %17754 = vmatprep.subr.bf16.mxu0 %v23596_v30  ;;  %v23648_v33 = vld [vmem:[%s31739_s14 + $0x1208] ss:$28 sps:$4 sm:$0xff]   ;;  %v23651_v30 = vld [vmem:[%s31739_s14 + $0x97c] ss:$28 sps:$4 sm:$0xff]  }
 0xc13   :  { %20957 = vmatprep.subr.bf16.mxu1 %v23597_v43  ;;  %v23652_v43 = vld [vmem:[%s31739_s14 + $0x1400] ss:$28 sps:$4 sm:$0xff]  }
 0xc14   :  { %17746 = vmatmul.mubr.bf16.vlgmr.msra.gmra.mrb[52].mxu0 %v29360_v21  ;;  %v23606_v21 = vld [vmem:[%s31739_s14 + $0x784] ss:$28 sps:$4 sm:$0xff]  }
 0xc15   :  { %18153 = vmatmul.mubr.bf16.vlgmr.msra.gmra.mrb[64].mxu1 %v29787_v35  ;;  %17755 = vmatpush1.bf16.msra.mxu0 %v23594_v27  ;;  %v23649_v27 = vld [vmem:[%s31739_s14 + $0x978] ss:$28 sps:$4 sm:$0xff]  }
 0xc16   :  { %17786 = vmatprep.mubr.bf16.mxu0 %v29368_v59  ;;  %20958 = vmatpush3.bf16.msra.mxu1 %v23598_v14  ;;  %v23604_v59 = vld [vmem:[%s31739_s14 + $0x780] ss:$28 sps:$4 sm:$0xff]  }
 0xc17   :  { %18192 = vmatprep.mubr.bf16.mxu1 %v29795_v38  ;;  %17756 = vmatprep.subr.bf16.mxu0 %v23601_v15  ;;  %v23653_v14 = vld [vmem:[%s31739_s14 + $0x1240] ss:$28 sps:$4 sm:$0xff]   ;;  %v23656_v15 = vld [vmem:[%s31739_s14 + $0x9b4] ss:$28 sps:$4 sm:$0xff]  }
 0xc18   :  { %20959 = vmatprep.subr.bf16.mxu1 %v23602_v48  ;;  %v23657_v48 = vld [vmem:[%s31739_s14 + $0x1438] ss:$28 sps:$4 sm:$0xff]  }
 0xc19   :  { %17757 = vmatpush1.bf16.msra.mxu0 %v23599_v29  ;;  %v23654_v29 = vld [vmem:[%s31739_s14 + $0x9b0] ss:$28 sps:$4 sm:$0xff]  }
 0xc1a   :  { %20960 = vmatpush3.bf16.msra.mxu1 %v23603_v1  ;;  %17758 = vmatprep.subr.bf16.mxu0 %v23606_v21  ;;  %v23658_v1 = vld [vmem:[%s31739_s14 + $0x1278] ss:$28 sps:$4 sm:$0xff]   ;;  %v23661_v21 = vld [vmem:[%s31739_s14 + $0x9ec] ss:$28 sps:$4 sm:$0xff]  }
 0xc1b   :  { %20961 = vmatprep.subr.bf16.mxu1 %v23607_v41  ;;  %v23662_v41 = vld [vmem:[%s31739_s14 + $0x1470] ss:$28 sps:$4 sm:$0xff]  }
 0xc1d   :  { %17759 = vmatpush1.bf16.msra.mxu0 %v23604_v59  ;;  %v23659_v59 = vld [vmem:[%s31739_s14 + $0x9e8] ss:$28 sps:$4 sm:$0xff]  }
 0xc1e   :  { %20962 = vmatpush3.bf16.msra.mxu1 %v23608_v39  ;;  %17760 = vmatprep.subr.bf16.mxu0 %v23611_v36  ;;  %v23663_v39 = vld [vmem:[%s31739_s14 + $0x12b0] ss:$28 sps:$4 sm:$0xff]   ;;  %v23666_v36 = vld [vmem:[%s31739_s14 + $0xa24] ss:$28 sps:$4 sm:$0xff]  }
 0xc1f   :  { %20963 = vmatprep.subr.bf16.mxu1 %v23612_v40  ;;  %v23667_v40 = vld [vmem:[%s31739_s14 + $0x14a8] ss:$28 sps:$4 sm:$0xff]  }
 0xc21   :  { %17761 = vmatpush1.bf16.msra.mxu0 %v23609_v50  ;;  %v23664_v50 = vld [vmem:[%s31739_s14 + $0xa20] ss:$28 sps:$4 sm:$0xff]  }
 0xc22   :  { %20964 = vmatpush3.bf16.msra.mxu1 %v23613_v44  ;;  %17762 = vmatprep.subr.bf16.mxu0 %v23616_v55  ;;  %v23668_v44 = vld [vmem:[%s31739_s14 + $0x12e8] ss:$28 sps:$4 sm:$0xff]   ;;  %v23671_v55 = vld [vmem:[%s31739_s14 + $0xa5c] ss:$28 sps:$4 sm:$0xff]  }
 0xc23   :  { %20965 = vmatprep.subr.bf16.mxu1 %v23617_v46  ;;  %v23672_v46 = vld [vmem:[%s31739_s14 + $0x14e0] ss:$28 sps:$4 sm:$0xff]  }
 0xc25   :  { %17763 = vmatpush1.bf16.msra.mxu0 %v23614_v37  ;;  %v23669_v37 = vld [vmem:[%s31739_s14 + $0xa58] ss:$28 sps:$4 sm:$0xff]  }
 0xc26   :  { %20966 = vmatpush3.bf16.msra.mxu1 %v23618_v45  ;;  %17764 = vmatprep.subr.bf16.mxu0 %v23621_v17  ;;  %v23673_v45 = vld [vmem:[%s31739_s14 + $0x1320] ss:$28 sps:$4 sm:$0xff]   ;;  %v23676_v17 = vld [vmem:[%s31739_s14 + $0xa94] ss:$28 sps:$4 sm:$0xff]  }
 0xc27   :  { %20967 = vmatprep.subr.bf16.mxu1 %v23622_v61  ;;  %v23677_v61 = vld [vmem:[%s31739_s14 + $0x16d8] ss:$28 sps:$4 sm:$0xff]  }
 0xc29   :  { %17765 = vmatpush1.bf16.msra.mxu0 %v23619_v34  ;;  %v23674_v34 = vld [vmem:[%s31739_s14 + $0xa90] ss:$28 sps:$4 sm:$0xff]  }
 0xc2a   :  { %20968 = vmatpush3.bf16.msra.mxu1 %v23623_v20  ;;  %17766 = vmatprep.subr.bf16.mxu0 %v23626_v58  ;;  %v23678_v20 = vld [vmem:[%s31739_s14 + $0x1518] ss:$28 sps:$4 sm:$0xff]   ;;  %v23681_v58 = vld [vmem:[%s31739_s14 + $0xacc] ss:$28 sps:$4 sm:$0xff]  }
 0xc2b   :  { %20969 = vmatprep.subr.bf16.mxu1 %v23627_v42  ;;  %v23682_v42 = vld [vmem:[%s31739_s14 + $0x1710] ss:$28 sps:$4 sm:$0xff]  }
 0xc2d   :  { %17767 = vmatpush1.bf16.msra.mxu0 %v23624_v54  ;;  %v23679_v54 = vld [vmem:[%s31739_s14 + $0xac8] ss:$28 sps:$4 sm:$0xff]  }
 0xc2e   :  { %20970 = vmatpush3.bf16.msra.mxu1 %v23628_v0  ;;  %17768 = vmatprep.subr.bf16.mxu0 %v23631_v7  ;;  %v23683_v0 = vld [vmem:[%s31739_s14 + $0x1550] ss:$28 sps:$4 sm:$0xff]   ;;  %v23687_v7 = vld [vmem:[%s31739_s14 + $0x1748] ss:$28 sps:$4 sm:$0xff]  }
 0xc2f   :  { %20971 = vmatprep.subr.bf16.mxu1 %v23632_v6  ;;  %v23688_v6 = vld [vmem:[%s31739_s14 + $0x1588] ss:$28 sps:$4 sm:$0xff]  }
 0xc31   :  { %17769 = vmatpush1.bf16.msra.mxu0 %v23629_v53  ;;  %v23691_v53 = vld [vmem:[%s31739_s14 + $0xb3c] ss:$28 sps:$4 sm:$0xff]  }
 0xc32   :  { %20972 = vmatpush3.bf16.msra.mxu1 %v23633_v25  ;;  %17770 = vmatprep.subr.bf16.mxu0 %v23636_v60  ;;  %v23692_v25 = vld [vmem:[%s31739_s14 + $0x1780] ss:$28 sps:$4 sm:$0xff]   ;;  %v23689_v60 = vld [vmem:[%s31739_s14 + $0xb38] ss:$28 sps:$4 sm:$0xff]  }
 0xc33   :  { %20979 = vmatprep.subr.bf16.mxu1 %v23637_v4  ;;  %v23693_v4 = vld [vmem:[%s31739_s14 + $0x15c0] ss:$28 sps:$4 sm:$0xff]  }
 0xc35   :  { %18193 = vmatmul.mubr.bf16.vlgmr.msra.gmra.mrb[68].mxu1 %v29993_v13  ;;  %17771 = vmatpush1.bf16.msra.mxu0 %v23634_v8  ;;  %v23696_v8 = vld [vmem:[%s31739_s14 + $0xb74] ss:$28 sps:$4 sm:$0xff]  }
 0xc36   :  { %20980 = vmatpush3.bf16.msra.mxu1 %v23638_v3  ;;  %18232 = vmatprep.mubr.bf16.mxu1 %v30001_v19  ;;  %v23697_v3 = vld [vmem:[%s31739_s14 + $0x17b8] ss:$28 sps:$4 sm:$0xff]  }
 0xc37   :  { %17772 = vmatprep.subr.bf16.mxu0 %v23641_v9  ;;  %20981 = vmatprep.subr.bf16.mxu1 %v23642_v12  ;;  %v23694_v9 = vld [vmem:[%s31739_s14 + $0xb70] ss:$28 sps:$4 sm:$0xff]   ;;  %v31179_v12 = vld [vmem:[%s31740_s15] sm:$0x7f] }
 0xc39   :  { %17773 = vmatpush1.bf16.msra.mxu0 %v23639_v23  ;;  %v23698_v23 = vld [vmem:[%s31739_s14 + $0x15f8] ss:$28 sps:$4 sm:$0xff]  }
 0xc3a   :  { %20982 = vmatpush3.bf16.msra.mxu1 %v23643_v31  ;;  %17774 = vmatprep.subr.bf16.mxu0 %v23646_v52  ;;  %v23701_v31 = vld [vmem:[%s31739_s14 + $0xbac] ss:$28 sps:$4 sm:$0xff]  }
 0xc3b   :  { %20983 = vmatprep.subr.bf16.mxu1 %v23647_v22  ;;  %v23702_v52 = vld [vmem:[%s31739_s14 + $0x17f0] ss:$28 sps:$4 sm:$0xff]   ;;  %v12624_v22 = vrot.slane %v31179_v12, %v25006_v2 }
 0xc3c   :  { %v23703_v2 = vld [vmem:[%s31739_s14 + $0x1630] ss:$28 sps:$4 sm:$0xff]  }
 0xc3d   :  { %17775 = vmatpush1.bf16.msra.mxu0 %v23644_v32  ;;  %v12632_v32 = vrot.slane %v31179_v12, %v25780_v24  ;;  %v23706_v24 = vld [vmem:[%s31739_s14 + $0xbe4] ss:$28 sps:$4 sm:$0xff]  }
 0xc3e   :  { %20984 = vmatpush3.bf16.msra.mxu1 %v23648_v33  ;;  %17776 = vmatprep.subr.bf16.mxu0 %v23651_v30  ;;  %v12628_v33 = vrot.slane %v31179_v12, %v25012_v5  ;;  %v23699_v30 = vld [vmem:[%s31739_s14 + $0xba8] ss:$28 sps:$4 sm:$0xff]  }
 0xc3f   :  { %20985 = vmatprep.subr.bf16.mxu1 %v23652_v43  ;;  %v12636_v43 = vrot.slane %v31179_v12, %v25573_v51  ;;  %v23707_v5 = vld [vmem:[%s31739_s14 + $0x1828] ss:$28 sps:$4 sm:$0xff]   ;;  %v23704_v51 = vld [vmem:[%s31739_s14 + $0xbe0] ss:$28 sps:$4 sm:$0xff]  }
 0xc41   :  { %17777 = vmatpush1.bf16.msra.mxu0 %v23649_v27 }
 0xc42   :  { %20986 = vmatpush3.bf16.msra.mxu1 %v23653_v14  ;;  %17778 = vmatprep.subr.bf16.mxu0 %v23656_v15 }
 0xc43   :  { %20987 = vmatprep.subr.bf16.mxu1 %v23657_v48 }
 0xc45   :  { %17779 = vmatpush1.bf16.msra.mxu0 %v23654_v29  ;;  %v23708_v29 = vld [vmem:[%s31739_s14 + $0x1668] ss:$28 sps:$4 sm:$0xff]  }
 0xc46   :  { %20988 = vmatpush3.bf16.msra.mxu1 %v23658_v1  ;;  %17780 = vmatprep.subr.bf16.mxu0 %v23661_v21 }
 0xc47   :  { %20989 = vmatprep.subr.bf16.mxu1 %v23662_v41 }
 0xc49   :  { %17781 = vmatpush1.bf16.msra.mxu0 %v23659_v59 }
 0xc4a   :  { %20990 = vmatpush3.bf16.msra.mxu1 %v23663_v39  ;;  %17782 = vmatprep.subr.bf16.mxu0 %v23666_v36  ;;  %v23711_v39 = vld [vmem:[%s31739_s14 + $0xc1c] ss:$28 sps:$4 sm:$0xff]  }
 0xc4b   :  { %20991 = vmatprep.subr.bf16.mxu1 %v23667_v40  ;;  %v23712_v36 = vld [vmem:[%s31739_s14 + $0x1860] ss:$28 sps:$4 sm:$0xff]  }
 0xc4d   :  { %17783 = vmatpush1.bf16.msra.mxu0 %v23664_v50 }
 0xc4e   :  { %20992 = vmatpush3.bf16.msra.mxu1 %v23668_v44  ;;  %17784 = vmatprep.subr.bf16.mxu0 %v23671_v55 }
 0xc4f   :  { %20993 = vmatprep.subr.bf16.mxu1 %v23672_v46 }
 0xc51   :  { %17785 = vmatpush1.bf16.msra.mxu0 %v23669_v37 }
 0xc52   :  { %20994 = vmatpush3.bf16.msra.mxu1 %v23673_v45  ;;  %17795 = vmatprep.subr.bf16.mxu0 %v23676_v17 }
 0xc53   :  { %21001 = vmatprep.subr.bf16.mxu1 %v23677_v61 }
 0xc54   :  { %17787 = vmatmul.mubr.bf16.vlgmr.msra.gmra.mrb[52].mxu0 %v29566_v16  ;;  %v23686_v16 = vld [vmem:[%s31739_s14 + $0xb04] ss:$28 sps:$4 sm:$0xff]  }
 0xc55   :  { %18233 = vmatmul.mubr.bf16.vlgmr.msra.gmra.mrb[72].mxu1 %v30199_v63  ;;  %17796 = vmatpush1.bf16.msra.mxu0 %v23674_v34 }
 0xc56   :  { %17827 = vmatprep.mubr.bf16.mxu0 %v29574_v28  ;;  %21002 = vmatpush3.bf16.msra.mxu1 %v23678_v20  ;;  %v23684_v28 = vld [vmem:[%s31739_s14 + $0xb00] ss:$28 sps:$4 sm:$0xff]  }
 0xc57   :  { %18272 = vmatprep.mubr.bf16.mxu1 %v30207_v11  ;;  %17797 = vmatprep.subr.bf16.mxu0 %v23681_v58 }
 0xc58   :  { %21003 = vmatprep.subr.bf16.mxu1 %v23682_v42  ;;  %v23709_v42 = vld [vmem:[%s31739_s14 + $0xc18] ss:$28 sps:$4 sm:$0xff]  }
 0xc59   :  { %17798 = vmatpush1.bf16.msra.mxu0 %v23679_v54 }
 0xc5a   :  { %21004 = vmatpush3.bf16.msra.mxu1 %v23683_v0  ;;  %17799 = vmatprep.subr.bf16.mxu0 %v23686_v16 }
 0xc5b   :  { %21005 = vmatprep.subr.bf16.mxu1 %v23687_v7  ;;  %v23713_v7 = vld [vmem:[%s31739_s14 + $0x16a0] ss:$28 sps:$4 sm:$0xff]  }
 0xc5d   :  { %17800 = vmatpush1.bf16.msra.mxu0 %v23684_v28  ;;  %v23716_v28 = vld [vmem:[%s31739_s14 + $0xc54] ss:$28 sps:$4 sm:$0xff]  }
 0xc5e   :  { %21006 = vmatpush3.bf16.msra.mxu1 %v23688_v6  ;;  %17801 = vmatprep.subr.bf16.mxu0 %v23691_v53 }
 0xc5f   :  { %21007 = vmatprep.subr.bf16.mxu1 %v23692_v25 }
 0xc61   :  { %17802 = vmatpush1.bf16.msra.mxu0 %v23689_v60 }
 0xc62   :  { %21008 = vmatpush3.bf16.msra.mxu1 %v23693_v4  ;;  %17803 = vmatprep.subr.bf16.mxu0 %v23696_v8  ;;  %v23714_v8 = vld [vmem:[%s31739_s14 + $0xc50] ss:$28 sps:$4 sm:$0xff]  }
 0xc63   :  { %21009 = vmatprep.subr.bf16.mxu1 %v23697_v3  ;;  %v23717_v3 = vld [vmem:[%s31739_s14 + $0x1898] ss:$28 sps:$4 sm:$0xff]  }
 0xc65   :  { %17804 = vmatpush1.bf16.msra.mxu0 %v23694_v9  ;;  %v23720_v9 = vld [vmem:[%s31739_s14 + $0xc8c] ss:$28 sps:$4 sm:$0xff]  }
 0xc66   :  { %21010 = vmatpush3.bf16.msra.mxu1 %v23698_v23  ;;  %17805 = vmatprep.subr.bf16.mxu0 %v23701_v31  ;;  %v23718_v23 = vld [vmem:[%s31739_s14 + $0xc88] ss:$28 sps:$4 sm:$0xff]   ;;  %v23721_v31 = vld [vmem:[%s31739_s14 + $0x18d0] ss:$28 sps:$4 sm:$0xff]  }
 0xc67   :  { %v17337_v27 = vpop.f32.mrb[48].mxu0  ;;  %21011 = vmatprep.subr.bf16.mxu1 %v23702_v52  ;;  %v23724_v52 = vld [vmem:[%s31739_s14 + $0xcc4] ss:$28 sps:$4 sm:$0xff]  }
 0xc68   :  { %v21105_v14 = vadd.f32 %v17337_v27, %v12624_v22  ;;  %v17665_v15 = vpop.f32.mrb[48].mxu1  ;;  %v17339_v48 = vpop.f32.mrb[49].mxu0  ;;  %v23722_v22 = vld [vmem:[%s31739_s14 + $0xcc0] ss:$28 sps:$4 sm:$0xff]  }
 0xc69   :  { %v21107_v1 = vadd.f32 %v17665_v15, %v12632_v32  ;;  %v21106_v21 = vadd.f32 %v17339_v48, %v12628_v33  ;;  %v17667_v41 = vpop.f32.mrb[49].mxu1  ;;  %v17341_v59 = vpop.f32.mrb[50].mxu0  ;;  %17806 = vmatpush1.bf16.msra.mxu0 %v23699_v30  ;;  %v23725_v32 = vld [vmem:[%s31739_s14 + $0x1908] ss:$28 sps:$4 sm:$0xff]   ;;  %v23728_v33 = vld [vmem:[%s31739_s14 + $0xcfc] ss:$28 sps:$4 sm:$0xff]  }
 0xc6a   :  { %vm18320_vm12 = vcmp.gt.f32.partialorder %v21105_v14, 0.0  ;;  %v18327_v40 = vmul.f32 0.01, %v21105_v14  ;;  %v21108_v50 = vadd.f32 %v17667_v41, %v12636_v43  ;;  %v17669_v44 = vpop.f32.mrb[50].mxu1  ;;  %21012 = vmatpush3.bf16.msra.mxu1 %v23703_v2  ;;  %v17342_v55 = vpop.f32.mrb[51].mxu0  ;;  %17807 = vmatprep.subr.bf16.mxu0 %v23706_v24 }
 0xc6b   :  { %vm18322_vm13 = vcmp.gt.f32.partialorder %v21107_v1, 0.0  ;;  %v18329_v46 = vmul.f32 0.01, %v21107_v1  ;;  %vm18321_vm14 = vcmp.gt.f32.partialorder %v21106_v21, 0.0  ;;  %v18328_v37 = vmul.f32 0.01, %v21106_v21  ;;  %21013 = vmatprep.subr.bf16.mxu1 %v23707_v5 }
 0xc6c   :  { %v18334_v45 = vsel %vm18320_vm12, %v21105_v14, %v18327_v40  ;;  %vm18323_vm15 = vcmp.gt.f32.partialorder %v21108_v50, 0.0  ;;  %v18330_v17 = vmul.f32 0.01, %v21108_v50  ;;  %v17670_v61 = vpop.f32.mrb[51].mxu1  ;;  %v23726_v5 = vld [vmem:[%s31739_s14 + $0xcf8] ss:$28 sps:$4 sm:$0xff]  }
 0xc6d   :  { %v18341_v34 = vsub.f32 0.0, %v18334_v45  ;;  %v18336_v20 = vsel %vm18322_vm13, %v21107_v1, %v18329_v46  ;;  %v18335_v58 = vsel %vm18321_vm14, %v21106_v21, %v18328_v37  ;;  %17808 = vmatpush1.bf16.msra.mxu0 %v23704_v51  ;;  %v23729_v48 = vld [vmem:[%s31739_s14 + $0x1940] ss:$28 sps:$4 sm:$0xff]   ;;  %v23732_v51 = vld [vmem:[%s31739_s14 + $0xd34] ss:$28 sps:$4 sm:$0xff]  }
 0xc6e   :  { %v18343_v54 = vsub.f32 0.0, %v18336_v20  ;;  %v18342_v0 = vsub.f32 0.0, %v18335_v58  ;;  %v18337_v16 = vsel %vm18323_vm15, %v21108_v50, %v18330_v17  ;;  %21014 = vmatpush3.bf16.msra.mxu1 %v23708_v29  ;;  %17809 = vmatprep.subr.bf16.mxu0 %v23711_v39  ;;  %v23730_v1 = vld [vmem:[%s31739_s14 + $0xd30] ss:$28 sps:$4 sm:$0xff]   ;;  %v23733_v21 = vld [vmem:[%s31739_s14 + $0x1978] ss:$28 sps:$4 sm:$0xff]  }
 0xc6f   :  { %v18348_v6 = vmul.f32 1.442695, %v18341_v34  ;;  %v18344_v53 = vsub.f32 0.0, %v18337_v16  ;;  %21015 = vmatprep.subr.bf16.mxu1 %v23712_v36  ;;  %v23736_v41 = vld [vmem:[%s31739_s14 + $0xd6c] ss:$28 sps:$4 sm:$0xff]  }
 0xc70   :  { %v18352_v25 = vmul.f32 1.442695, %v18343_v54  ;;  %v18350_v60 = vmul.f32 1.442695, %v18342_v0  ;;  %v23734_v59 = vld [vmem:[%s31739_s14 + $0xd68] ss:$28 sps:$4 sm:$0xff]  }
 0xc71   :  { %23920 = vpow2.f32 %v18348_v6  ;;  %v18354_v4 = vmul.f32 1.442695, %v18344_v53  ;;  %17810 = vmatpush1.bf16.msra.mxu0 %v23709_v42  ;;  %v23737_v39 = vld [vmem:[%s31739_s14 + $0x19b0] ss:$28 sps:$4 sm:$0xff]   ;;  %v23740_v36 = vld [vmem:[%s31739_s14 + $0xda4] ss:$28 sps:$4 sm:$0xff]  }
 0xc72   :  { %23922 = vpow2.f32 %v18352_v25  ;;  %21016 = vmatpush3.bf16.msra.mxu1 %v23713_v7  ;;  %17811 = vmatprep.subr.bf16.mxu0 %v23716_v28  ;;  %v23738_v46 = vld [vmem:[%s31739_s14 + $0xda0] ss:$28 sps:$4 sm:$0xff]   ;;  %v23741_v61 = vld [vmem:[%s31739_s14 + $0x19e8] ss:$28 sps:$4 sm:$0xff]   ;;  %v23742_v16 = vld [vmem:[%s31739_s14 + $0xdd8] ss:$28 sps:$4 sm:$0xff]  }
 0xc73   :  { %23924 = vpow2.f32 %v18350_v60  ;;  %18280 = vmatprep.subr.bf16.mxu1 %v24024_v26  ;;  %v23744_v34 = vld [vmem:[%s31739_s14 + $0xddc] ss:$28 sps:$4 sm:$0xff]   ;;  %v23748_v6 = vld [vmem:[%s31739_s14 + $0xe14] ss:$28 sps:$4 sm:$0xff]  }
 0xc74   :  { %23926 = vpow2.f32 %v18354_v4  ;;  %v23745_v28 = vld [vmem:[%s31739_s14 + $0x1a20] ss:$28 sps:$4 sm:$0xff]   ;;  %v23746_v25 = vld [vmem:[%s31739_s14 + $0xe10] ss:$28 sps:$4 sm:$0xff]   ;;  %v23749_v60 = vld [vmem:[%s31739_s14 + $0x1a58] ss:$28 sps:$4 sm:$0xff]  }
 0xc75   :  { %18273 = vmatmul.mubr.bf16.vlgmr.msra.gmra.mrb[76].mxu1 %v30405_v18  ;;  %17812 = vmatpush1.bf16.msra.mxu0 %v23714_v8  ;;  %v23752_v4 = vld [vmem:[%s31739_s14 + $0xe4c] ss:$28 sps:$4 sm:$0xff]  }
 0xc76   :  { %18281 = vmatpush1.bf16.msra.mxu1 %v23717_v3  ;;  %20784 = vmatprep.mubr.msk.bf16.mxu1 %vm17012_vm10, %v30413_v56  ;;  %v23750_v8 = vld [vmem:[%s31739_s14 + $0xe48] ss:$28 sps:$4 sm:$0xff]  }
 0xc77   :  { %17813 = vmatprep.subr.bf16.mxu0 %v23720_v9  ;;  %18282 = vmatprep.subr.bf16.mxu1 %v24024_v26  ;;  %v23755_v3 = vld [vmem:[%s31739_s14 + $0xe84] ss:$28 sps:$4 sm:$0xff]   ;;  %v23761_v9 = vld [vmem:[%s31739_s14 + $0xef4] ss:$28 sps:$4 sm:$0xff]  }
 0xc79   :  { %17814 = vmatpush1.bf16.msra.mxu0 %v23718_v23  ;;  %v23759_v23 = vld [vmem:[%s31739_s14 + $0xef0] ss:$28 sps:$4 sm:$0xff]  }
 0xc7a   :  { %18283 = vmatpush1.bf16.msra.mxu1 %v23721_v31  ;;  %17815 = vmatprep.subr.bf16.mxu0 %v23724_v52  ;;  %v23764_v31 = vld [vmem:[%s31739_s14 + $0xf2c] ss:$28 sps:$4 sm:$0xff]  }
 0xc7b   :  { %v23921_v30 = vpop.eup %23920  ;;  %18284 = vmatprep.subr.bf16.mxu1 %v24024_v26  ;;  %v23762_v52 = vld [vmem:[%s31739_s14 + $0xf28] ss:$28 sps:$4 sm:$0xff]  }
 0xc7c   :  { %v23923_v43 = vpop.eup %23922  ;;  %v18362_v2 = vadd.f32 1.0, %v23921_v30 }
 0xc7d   :  { %v23925_v24 = vpop.eup %23924  ;;  %v18364_v27 = vadd.f32 1.0, %v23923_v43  ;;  %17816 = vmatpush1.bf16.msra.mxu0 %v23722_v22  ;;  %v12648_v22 = vrot.slane %v31179_v12, %v26221_v47  ;;  %v23765_v43 = vld [vmem:[%s31739_s14 + $0xf60] ss:$28 sps:$4 sm:$0xff]  }
 0xc7e   :  { %v23927_v14 = vpop.eup %23926  ;;  %23928 = vrcp.f32 %v18362_v2  ;;  %v18363_v15 = vadd.f32 1.0, %v23925_v24  ;;  %18285 = vmatpush1.bf16.msra.mxu1 %v23725_v32  ;;  %17817 = vmatprep.subr.bf16.mxu0 %v23728_v33  ;;  %v23767_v32 = vld [vmem:[%s31739_s14 + $0xf64] ss:$28 sps:$4 sm:$0xff]   ;;  %v23770_v47 = vld [vmem:[%s31739_s14 + $0xf9c] ss:$28 sps:$4 sm:$0xff]  }
 0xc7f   :  { %23930 = vrcp.f32 %v18364_v27  ;;  %v18365_v29 = vadd.f32 1.0, %v23927_v14  ;;  %18286 = vmatprep.subr.bf16.mxu1 %v24024_v26 }
 0xc80   :  { %23932 = vrcp.f32 %v18363_v15  ;;  %v23768_v15 = vld [vmem:[%s31739_s14 + $0xf98] ss:$28 sps:$4 sm:$0xff]  }
 0xc81   :  { %23934 = vrcp.f32 %v18365_v29  ;;  %17818 = vmatpush1.bf16.msra.mxu0 %v23726_v5  ;;  %v23776_v29 = vld [vmem:[%s31739_s14 + $0x100c] ss:$28 sps:$4 sm:$0xff]  }
 0xc82   :  { %18287 = vmatpush1.bf16.msra.mxu1 %v23729_v48  ;;  %17819 = vmatprep.subr.bf16.mxu0 %v23732_v51  ;;  %v23773_v48 = vld [vmem:[%s31739_s14 + $0xfd4] ss:$28 sps:$4 sm:$0xff]  }
 0xc83   :  { %18288 = vmatprep.subr.bf16.mxu1 %v24024_v26  ;;  %v23771_v51 = vld [vmem:[%s31739_s14 + $0xfd0] ss:$28 sps:$4 sm:$0xff]  }
 0xc85   :  { %17820 = vmatpush1.bf16.msra.mxu0 %v23730_v1  ;;  %v23774_v1 = vld [vmem:[%s31739_s14 + $0x1008] ss:$28 sps:$4 sm:$0xff]  }
 0xc86   :  { %18289 = vmatpush1.bf16.msra.mxu1 %v23733_v21  ;;  %17821 = vmatprep.subr.bf16.mxu0 %v23736_v41  ;;  %v23779_v21 = vld [vmem:[%s31739_s14 + $0x1044] ss:$28 sps:$4 sm:$0xff]  }
 0xc87   :  { %18290 = vmatprep.subr.bf16.mxu1 %v24024_v26  ;;  %v23777_v41 = vld [vmem:[%s31739_s14 + $0x1040] ss:$28 sps:$4 sm:$0xff]  }
 0xc88   :  { %v23929_v40 = vpop.eup %23928  ;;  %v20885_v50 = vpop.f32.mrb[52].mxu1 }
 0xc89   :  { %v23931_v44 = vpop.eup %23930  ;;  %v20886_v55 = vpop.f32.mrb[53].mxu1  ;;  %17822 = vmatpush1.bf16.msra.mxu0 %v23734_v59  ;;  %v23782_v59 = vld [vmem:[%s31739_s14 + $0x107c] ss:$28 sps:$4 sm:$0xff]  }
 0xc8a   :  { %v23933_v37 = vpop.eup %23932  ;;  %v20887_v45 = vadd.f32 %v20886_v55, %v20885_v50  ;;  %v20888_v17 = vpop.f32.mrb[54].mxu1  ;;  %18291 = vmatpush1.bf16.msra.mxu1 %v23737_v39  ;;  %17823 = vmatprep.subr.bf16.mxu0 %v23740_v36  ;;  %v23780_v39 = vld [vmem:[%s31739_s14 + $0x1078] ss:$28 sps:$4 sm:$0xff]   ;;  %v23788_v50 = vld [vmem:[%s31739_s14 + $0x10ec] ss:$28 sps:$4 sm:$0xff]  }
 0xc8b   :  { %v23935_v20 = vpop.eup %23934  ;;  %v18390_v58 = vcombine.low %v23929_v40, %v23933_v37  ;;  %v20889_v42 = vpop.f32.mrb[55].mxu1  ;;  %18292 = vmatprep.subr.bf16.mxu1 %v24024_v26  ;;  %v23785_v36 = vld [vmem:[%s31739_s14 + $0x10b4] ss:$28 sps:$4 sm:$0xff]   ;;  %v23791_v55 = vld [vmem:[%s31739_s14 + $0x1124] ss:$28 sps:$4 sm:$0xff]  }
 0xc8c   :  { %v18391_v54 = vcombine.low %v23931_v44, %v23935_v20  ;;  %v18035_v2 = vadd.f32 %v20887_v45, %v12648_v22  ;;  %v23783_v40 = vld [vmem:[%s31739_s14 + $0x10b0] ss:$28 sps:$4 sm:$0xff]   ;;  %v23786_v44 = vld [vmem:[%s31739_s14 + $0x10e8] ss:$28 sps:$4 sm:$0xff]   ;;  %v23789_v45 = vld [vmem:[%s31739_s14 + $0x1120] ss:$28 sps:$4 sm:$0xff]  }
 0xc8d   :  { %v18398_v0 = vrot.slane %v18390_v58, %v24266_v49  ;;  %17824 = vmatpush1.bf16.msra.mxu0 %v23738_v46  ;;  %v23792_v42 = vld [vmem:[%s31739_s14 + $0x1158] ss:$28 sps:$4 sm:$0xff]  }
 0xc8e   :  { %v18405_v7 = vrot.slane %v18391_v54, %v24266_v49  ;;  %18293 = vmatpush1.bf16.msra.mxu1 %v23741_v61  ;;  %17825 = vmatprep.subr.bf16.mxu0 %v23744_v34  ;;  %v23794_v34 = vld [vmem:[%s31739_s14 + $0x115c] ss:$28 sps:$4 sm:$0xff]   ;;  %v23797_v54 = vld [vmem:[%s31739_s14 + $0x1194] ss:$28 sps:$4 sm:$0xff]  }
 0xc8f   :  { %18294 = vmatprep.subr.bf16.mxu1 %v24024_v26  ;;  %v23816_v22 = vld [vmem:[%s31739_s14 + $0x1318] ss:$28 sps:$4 sm:$0xff]  }
 0xc90   :  { %v18406_v53 = vcombine.low %v18398_v0, %v18405_v7  ;;  %v23795_v0 = vld [vmem:[%s31739_s14 + $0x1190] ss:$28 sps:$4 sm:$0xff]   ;;  %v23798_v7 = vld [vmem:[%s31739_s14 + $0x11c8] ss:$28 sps:$4 sm:$0xff]  }
 0xc91   :  { %17826 = vmatpush1.bf16.msra.mxu0 %v23742_v16  ;;  %v23800_v16 = vld [vmem:[%s31739_s14 + $0x11cc] ss:$28 sps:$4 sm:$0xff]  }
 0xc92   :  { %18425 = vst [vmem:[%s31744_s19] sm:$0xff] %v18406_v53  ;;  %18295 = vmatpush1.bf16.msra.mxu1 %v23745_v28  ;;  %17836 = vmatprep.subr.bf16.mxu0 %v23748_v6  ;;  %v23803_v28 = vld [vmem:[%s31739_s14 + $0x1204] ss:$28 sps:$4 sm:$0xff]   ;;  %v23809_v53 = vld [vmem:[%s31739_s14 + $0x1274] ss:$28 sps:$4 sm:$0xff]  }
 0xc93   :  { %18296 = vmatprep.subr.bf16.mxu1 %v24024_v26  ;;  %v23753_v26 = vld [vmem:[%s31739_s14 + $0xe80] ss:$28 sps:$4 sm:$0xff]  }
 0xc94   :  { %17828 = vmatmul.mubr.bf16.vlgmr.msra.gmra.mrb[52].mxu0 %v29787_v35  ;;  %v23758_v35 = vld [vmem:[%s31739_s14 + $0xebc] ss:$28 sps:$4 sm:$0xff]  }
 0xc95   :  { %17837 = vmatpush1.bf16.msra.mxu0 %v23746_v25  ;;  %17868 = vmatprep.mubr.bf16.mxu0 %v29795_v38  ;;  %v23756_v38 = vld [vmem:[%s31739_s14 + $0xeb8] ss:$28 sps:$4 sm:$0xff]   ;;  %v23801_v6 = vld [vmem:[%s31739_s14 + $0x1200] ss:$28 sps:$4 sm:$0xff]   ;;  %v23807_v25 = vld [vmem:[%s31739_s14 + $0x1270] ss:$28 sps:$4 sm:$0xff]  }
 0xc96   :  { %18297 = vmatpush1.bf16.msra.mxu1 %v23749_v60  ;;  %17838 = vmatprep.subr.bf16.mxu0 %v23752_v4  ;;  %v23812_v60 = vld [vmem:[%s31739_s14 + $0x12ac] ss:$28 sps:$4 sm:$0xff]  }
 0xc97   :  { %v23810_v4 = vld [vmem:[%s31739_s14 + $0x12a8] ss:$28 sps:$4 sm:$0xff]  }
 0xc99   :  { %18313 = vmatmul.mubr.bf16.vlgmr.msra.gmra.mrb[80].mxu1 %v30528_v10  ;;  %17839 = vmatpush1.bf16.msra.mxu0 %v23750_v8  ;;  %v23815_v8 = vld [vmem:[%s31739_s14 + $0x12e4] ss:$28 sps:$4 sm:$0xff]  }
 0xc9a   :  { %17840 = vmatprep.subr.bf16.mxu0 %v23755_v3 }
 0xc9d   :  { %17841 = vmatpush1.bf16.msra.mxu0 %v23753_v26 }
 0xc9e   :  { %17842 = vmatprep.subr.bf16.mxu0 %v23758_v35  ;;  %v23813_v35 = vld [vmem:[%s31739_s14 + $0x12e0] ss:$28 sps:$4 sm:$0xff]  }
 0xca1   :  { %17843 = vmatpush1.bf16.msra.mxu0 %v23756_v38 }
 0xca2   :  { %17844 = vmatprep.subr.bf16.mxu0 %v23761_v9 }
 0xca5   :  { %17845 = vmatpush1.bf16.msra.mxu0 %v23759_v23  ;;  %v23818_v23 = vld [vmem:[%s31739_s14 + $0x131c] ss:$28 sps:$4 sm:$0xff]  }
 0xca6   :  { %17846 = vmatprep.subr.bf16.mxu0 %v23764_v31 }
 0xca8   :  { %v20907_v33 = vpop.f32.mrb[56].mxu1 }
 0xca9   :  { %v20908_v30 = vpop.f32.mrb[57].mxu1  ;;  %17847 = vmatpush1.bf16.msra.mxu0 %v23762_v52 }
 0xcaa   :  { %v20909_v24 = vadd.f32 %v20908_v30, %v20907_v33  ;;  %v20910_v27 = vpop.f32.mrb[58].mxu1  ;;  %17848 = vmatprep.subr.bf16.mxu0 %v23767_v32  ;;  %v23821_v32 = vld [vmem:[%s31739_s14 + $0x1354] ss:$28 sps:$4 sm:$0xff]   ;;  %v23824_v30 = vld [vmem:[%s31739_s14 + $0x138c] ss:$28 sps:$4 sm:$0xff]  }
 0xcab   :  { %v20911_v5 = vpop.f32.mrb[59].mxu1  ;;  %v23819_v33 = vld [vmem:[%s31739_s14 + $0x1350] ss:$28 sps:$4 sm:$0xff]   ;;  %v23830_v27 = vld [vmem:[%s31739_s14 + $0x13fc] ss:$28 sps:$4 sm:$0xff]  }
 0xcac   :  { %v18075_v14 = vadd.f32 %v20909_v24, %v18035_v2  ;;  %v23827_v2 = vld [vmem:[%s31739_s14 + $0x13c4] ss:$28 sps:$4 sm:$0xff]   ;;  %v23833_v5 = vld [vmem:[%s31739_s14 + $0x1434] ss:$28 sps:$4 sm:$0xff]  }
 0xcad   :  { %17849 = vmatpush1.bf16.msra.mxu0 %v23765_v43  ;;  %v23822_v43 = vld [vmem:[%s31739_s14 + $0x1388] ss:$28 sps:$4 sm:$0xff]   ;;  %v23825_v24 = vld [vmem:[%s31739_s14 + $0x13c0] ss:$28 sps:$4 sm:$0xff]  }
 0xcae   :  { %17850 = vmatprep.subr.bf16.mxu0 %v23770_v47  ;;  %v23828_v47 = vld [vmem:[%s31739_s14 + $0x13f8] ss:$28 sps:$4 sm:$0xff]  }
 0xcb1   :  { %17851 = vmatpush1.bf16.msra.mxu0 %v23768_v15  ;;  %v23836_v15 = vld [vmem:[%s31739_s14 + $0x146c] ss:$28 sps:$4 sm:$0xff]  }
 0xcb2   :  { %17852 = vmatprep.subr.bf16.mxu0 %v23773_v48  ;;  %v23834_v48 = vld [vmem:[%s31739_s14 + $0x1468] ss:$28 sps:$4 sm:$0xff]  }
 0xcb5   :  { %17853 = vmatpush1.bf16.msra.mxu0 %v23771_v51  ;;  %v23839_v51 = vld [vmem:[%s31739_s14 + $0x14a4] ss:$28 sps:$4 sm:$0xff]  }
 0xcb6   :  { %17854 = vmatprep.subr.bf16.mxu0 %v23776_v29 }
 0xcb9   :  { %17855 = vmatpush1.bf16.msra.mxu0 %v23774_v1 }
 0xcba   :  { %17856 = vmatprep.subr.bf16.mxu0 %v23779_v21  ;;  %v23837_v21 = vld [vmem:[%s31739_s14 + $0x14a0] ss:$28 sps:$4 sm:$0xff]  }
 0xcbd   :  { %17857 = vmatpush1.bf16.msra.mxu0 %v23777_v41 }
 0xcbe   :  { %17858 = vmatprep.subr.bf16.mxu0 %v23782_v59 }
 0xcc1   :  { %17859 = vmatpush1.bf16.msra.mxu0 %v23780_v39  ;;  %v23842_v39 = vld [vmem:[%s31739_s14 + $0x14dc] ss:$28 sps:$4 sm:$0xff]  }
 0xcc2   :  { %17860 = vmatprep.subr.bf16.mxu0 %v23785_v36 }
 0xcc5   :  { %17861 = vmatpush1.bf16.msra.mxu0 %v23783_v40 }
 0xcc6   :  { %17862 = vmatprep.subr.bf16.mxu0 %v23788_v50  ;;  %v23840_v50 = vld [vmem:[%s31739_s14 + $0x14d8] ss:$28 sps:$4 sm:$0xff]  }
 0xcc8   :  { %v20929_v46 = vpop.f32.mrb[60].mxu1 }
 0xcc9   :  { %v20930_v37 = vpop.f32.mrb[61].mxu1  ;;  %17863 = vmatpush1.bf16.msra.mxu0 %v23786_v44  ;;  %v23845_v44 = vld [vmem:[%s31739_s14 + $0x1514] ss:$28 sps:$4 sm:$0xff]  }
 0xcca   :  { %v20931_v17 = vadd.f32 %v20930_v37, %v20929_v46  ;;  %v20932_v61 = vpop.f32.mrb[62].mxu1  ;;  %17864 = vmatprep.subr.bf16.mxu0 %v23791_v55  ;;  %v23843_v55 = vld [vmem:[%s31739_s14 + $0x1510] ss:$28 sps:$4 sm:$0xff]   ;;  %v23846_v37 = vld [vmem:[%s31739_s14 + $0x1548] ss:$28 sps:$4 sm:$0xff]  }
 0xccb   :  { %v20933_v20 = vpop.f32.mrb[63].mxu1  ;;  %v23848_v46 = vld [vmem:[%s31739_s14 + $0x154c] ss:$28 sps:$4 sm:$0xff]   ;;  %v23857_v61 = vld [vmem:[%s31739_s14 + $0x15f4] ss:$28 sps:$4 sm:$0xff]  }
 0xccc   :  { %v18115_v58 = vadd.f32 %v20931_v17, %v18075_v14  ;;  %v23831_v14 = vld [vmem:[%s31739_s14 + $0x1430] ss:$28 sps:$4 sm:$0xff]   ;;  %v23849_v17 = vld [vmem:[%s31739_s14 + $0x1580] ss:$28 sps:$4 sm:$0xff]  }
 0xccd   :  { %17865 = vmatpush1.bf16.msra.mxu0 %v23789_v45  ;;  %v23851_v45 = vld [vmem:[%s31739_s14 + $0x1584] ss:$28 sps:$4 sm:$0xff]   ;;  %v23860_v20 = vld [vmem:[%s31739_s14 + $0x162c] ss:$28 sps:$4 sm:$0xff]  }
 0xcce   :  { %17866 = vmatprep.subr.bf16.mxu0 %v23794_v34  ;;  %v23855_v34 = vld [vmem:[%s31739_s14 + $0x15f0] ss:$28 sps:$4 sm:$0xff]  }
 0xcd1   :  { %17867 = vmatpush1.bf16.msra.mxu0 %v23792_v42  ;;  %v23863_v42 = vld [vmem:[%s31739_s14 + $0x1664] ss:$28 sps:$4 sm:$0xff]  }
 0xcd2   :  { %17877 = vmatprep.subr.bf16.mxu0 %v23797_v54 }
 0xcd4   :  { %17869 = vmatmul.mubr.bf16.vlgmr.msra.gmra.mrb[52].mxu0 %v29993_v13  ;;  %v23806_v13 = vld [vmem:[%s31739_s14 + $0x123c] ss:$28 sps:$4 sm:$0xff]  }
 0xcd5   :  { %17878 = vmatpush1.bf16.msra.mxu0 %v23795_v0  ;;  %17909 = vmatprep.mubr.bf16.mxu0 %v30001_v19  ;;  %v23804_v19 = vld [vmem:[%s31739_s14 + $0x1238] ss:$28 sps:$4 sm:$0xff]  }
 0xcd6   :  { %17879 = vmatprep.subr.bf16.mxu0 %v23800_v16  ;;  %v23861_v16 = vld [vmem:[%s31739_s14 + $0x1660] ss:$28 sps:$4 sm:$0xff]  }
 0xcd9   :  { %17880 = vmatpush1.bf16.msra.mxu0 %v23798_v7 }
 0xcda   :  { %17881 = vmatprep.subr.bf16.mxu0 %v23803_v28 }
 0xcdd   :  { %17882 = vmatpush1.bf16.msra.mxu0 %v23801_v6  ;;  %v23866_v6 = vld [vmem:[%s31739_s14 + $0x169c] ss:$28 sps:$4 sm:$0xff]  }
 0xcde   :  { %17883 = vmatprep.subr.bf16.mxu0 %v23806_v13 }
 0xce1   :  { %17884 = vmatpush1.bf16.msra.mxu0 %v23804_v19 }
 0xce2   :  { %17885 = vmatprep.subr.bf16.mxu0 %v23809_v53  ;;  %v23864_v53 = vld [vmem:[%s31739_s14 + $0x1698] ss:$28 sps:$4 sm:$0xff]  }
 0xce5   :  { %17886 = vmatpush1.bf16.msra.mxu0 %v23807_v25  ;;  %v23869_v25 = vld [vmem:[%s31739_s14 + $0x16d4] ss:$28 sps:$4 sm:$0xff]  }
 0xce6   :  { %17887 = vmatprep.subr.bf16.mxu0 %v23812_v60  ;;  %v23867_v60 = vld [vmem:[%s31739_s14 + $0x16d0] ss:$28 sps:$4 sm:$0xff]  }
 0xce8   :  { %v20951_v3 = vpop.f32.mrb[64].mxu1 }
 0xce9   :  { %v20952_v26 = vpop.f32.mrb[65].mxu1  ;;  %17888 = vmatpush1.bf16.msra.mxu0 %v23810_v4  ;;  %v23872_v4 = vld [vmem:[%s31739_s14 + $0x170c] ss:$28 sps:$4 sm:$0xff]  }
 0xcea   :  { %v20953_v38 = vadd.f32 %v20952_v26, %v20951_v3  ;;  %v20954_v9 = vpop.f32.mrb[66].mxu1  ;;  %17889 = vmatprep.subr.bf16.mxu0 %v23815_v8  ;;  %v23870_v8 = vld [vmem:[%s31739_s14 + $0x1708] ss:$28 sps:$4 sm:$0xff]   ;;  %v23873_v26 = vld [vmem:[%s31739_s14 + $0x1740] ss:$28 sps:$4 sm:$0xff]  }
 0xceb   :  { %v20955_v31 = vpop.f32.mrb[67].mxu1  ;;  %v23875_v3 = vld [vmem:[%s31739_s14 + $0x1744] ss:$28 sps:$4 sm:$0xff]   ;;  %v23881_v9 = vld [vmem:[%s31739_s14 + $0x17b4] ss:$28 sps:$4 sm:$0xff]  }
 0xcec   :  { %v18155_v52 = vadd.f32 %v20953_v38, %v18115_v58  ;;  %v23858_v58 = vld [vmem:[%s31739_s14 + $0x1628] ss:$28 sps:$4 sm:$0xff]   ;;  %v23876_v38 = vld [vmem:[%s31739_s14 + $0x1778] ss:$28 sps:$4 sm:$0xff]  }
 0xced   :  { %17890 = vmatpush1.bf16.msra.mxu0 %v23813_v35  ;;  %v23878_v35 = vld [vmem:[%s31739_s14 + $0x177c] ss:$28 sps:$4 sm:$0xff]   ;;  %v23884_v31 = vld [vmem:[%s31739_s14 + $0x17ec] ss:$28 sps:$4 sm:$0xff]  }
 0xcee   :  { %17891 = vmatprep.subr.bf16.mxu0 %v23818_v23  ;;  %v23879_v23 = vld [vmem:[%s31739_s14 + $0x17b0] ss:$28 sps:$4 sm:$0xff]  }
 0xcf1   :  { %17892 = vmatpush1.bf16.msra.mxu0 %v23816_v22  ;;  %v23887_v22 = vld [vmem:[%s31739_s14 + $0x1824] ss:$28 sps:$4 sm:$0xff]  }
 0xcf2   :  { %17893 = vmatprep.subr.bf16.mxu0 %v23821_v32 }
 0xcf5   :  { %17894 = vmatpush1.bf16.msra.mxu0 %v23819_v33 }
 0xcf6   :  { %17895 = vmatprep.subr.bf16.mxu0 %v23824_v30  ;;  %v23885_v30 = vld [vmem:[%s31739_s14 + $0x1820] ss:$28 sps:$4 sm:$0xff]  }
 0xcf9   :  { %17896 = vmatpush1.bf16.msra.mxu0 %v23822_v43 }
 0xcfa   :  { %17897 = vmatprep.subr.bf16.mxu0 %v23827_v2 }
 0xcfd   :  { %17898 = vmatpush1.bf16.msra.mxu0 %v23825_v24  ;;  %v23890_v24 = vld [vmem:[%s31739_s14 + $0x185c] ss:$28 sps:$4 sm:$0xff]  }
 0xcfe   :  { %17899 = vmatprep.subr.bf16.mxu0 %v23830_v27 }
 0xd01   :  { %17900 = vmatpush1.bf16.msra.mxu0 %v23828_v47 }
 0xd02   :  { %17901 = vmatprep.subr.bf16.mxu0 %v23833_v5  ;;  %v23888_v5 = vld [vmem:[%s31739_s14 + $0x1858] ss:$28 sps:$4 sm:$0xff]  }
 0xd05   :  { %17902 = vmatpush1.bf16.msra.mxu0 %v23831_v14  ;;  %v23893_v14 = vld [vmem:[%s31739_s14 + $0x1894] ss:$28 sps:$4 sm:$0xff]  }
 0xd06   :  { %17903 = vmatprep.subr.bf16.mxu0 %v23836_v15  ;;  %v23891_v15 = vld [vmem:[%s31739_s14 + $0x1890] ss:$28 sps:$4 sm:$0xff]  }
 0xd08   :  { %v20973_v29 = vpop.f32.mrb[68].mxu1 }
 0xd09   :  { %v20974_v1 = vpop.f32.mrb[69].mxu1  ;;  %17904 = vmatpush1.bf16.msra.mxu0 %v23834_v48  ;;  %v23896_v48 = vld [vmem:[%s31739_s14 + $0x18cc] ss:$28 sps:$4 sm:$0xff]  }
 0xd0a   :  { %v20975_v41 = vadd.f32 %v20974_v1, %v20973_v29  ;;  %v20976_v59 = vpop.f32.mrb[70].mxu1  ;;  %17905 = vmatprep.subr.bf16.mxu0 %v23839_v51  ;;  %v23894_v51 = vld [vmem:[%s31739_s14 + $0x18c8] ss:$28 sps:$4 sm:$0xff]   ;;  %v23897_v1 = vld [vmem:[%s31739_s14 + $0x1900] ss:$28 sps:$4 sm:$0xff]  }
 0xd0b   :  { %v20977_v36 = vpop.f32.mrb[71].mxu1  ;;  %v23899_v29 = vld [vmem:[%s31739_s14 + $0x1904] ss:$28 sps:$4 sm:$0xff]   ;;  %v23908_v59 = vld [vmem:[%s31739_s14 + $0x19ac] ss:$28 sps:$4 sm:$0xff]  }
 0xd0c   :  { %v18195_v40 = vadd.f32 %v20975_v41, %v18155_v52  ;;  %v23882_v52 = vld [vmem:[%s31739_s14 + $0x17e8] ss:$28 sps:$4 sm:$0xff]   ;;  %v23903_v41 = vld [vmem:[%s31739_s14 + $0x1970] ss:$28 sps:$4 sm:$0xff]  }
 0xd0d   :  { %17906 = vmatpush1.bf16.msra.mxu0 %v23837_v21  ;;  %v23905_v21 = vld [vmem:[%s31739_s14 + $0x1974] ss:$28 sps:$4 sm:$0xff]   ;;  %v23911_v36 = vld [vmem:[%s31739_s14 + $0x19e4] ss:$28 sps:$4 sm:$0xff]  }
 0xd0e   :  { %17907 = vmatprep.subr.bf16.mxu0 %v23842_v39  ;;  %v23906_v39 = vld [vmem:[%s31739_s14 + $0x19a8] ss:$28 sps:$4 sm:$0xff]  }
 0xd11   :  { %17908 = vmatpush1.bf16.msra.mxu0 %v23840_v50  ;;  %v23914_v50 = vld [vmem:[%s31739_s14 + $0x1a1c] ss:$28 sps:$4 sm:$0xff]  }
 0xd12   :  { %17918 = vmatprep.subr.bf16.mxu0 %v23845_v44 }
 0xd14   :  { %17910 = vmatmul.mubr.bf16.vlgmr.msra.gmra.mrb[52].mxu0 %v30199_v63  ;;  %v23854_v63 = vld [vmem:[%s31739_s14 + $0x15bc] ss:$28 sps:$4 sm:$0xff]  }
 0xd15   :  { %17919 = vmatpush1.bf16.msra.mxu0 %v23843_v55  ;;  %17950 = vmatprep.mubr.bf16.mxu0 %v30207_v11  ;;  %v23852_v11 = vld [vmem:[%s31739_s14 + $0x15b8] ss:$28 sps:$4 sm:$0xff]  }
 0xd16   :  { %17920 = vmatprep.subr.bf16.mxu0 %v23848_v46 }
 0xd19   :  { %17921 = vmatpush1.bf16.msra.mxu0 %v23846_v37  ;;  %v23912_v37 = vld [vmem:[%s31739_s14 + $0x1a18] ss:$28 sps:$4 sm:$0xff]  }
 0xd1a   :  { %17922 = vmatprep.subr.bf16.mxu0 %v23851_v45 }
 0xd1d   :  { %17923 = vmatpush1.bf16.msra.mxu0 %v23849_v17  ;;  %v23917_v17 = vld [vmem:[%s31739_s14 + $0x1a54] ss:$28 sps:$4 sm:$0xff]  }
 0xd1e   :  { %17924 = vmatprep.subr.bf16.mxu0 %v23854_v63 }
 0xd21   :  { %17925 = vmatpush1.bf16.msra.mxu0 %v23852_v11  ;;  %v23915_v11 = vld [vmem:[%s31739_s14 + $0x1a50] ss:$28 sps:$4 sm:$0xff]  }
 0xd22   :  { %17926 = vmatprep.subr.bf16.mxu0 %v23857_v61 }
 0xd25   :  { %17927 = vmatpush1.bf16.msra.mxu0 %v23855_v34 }
 0xd26   :  { %17928 = vmatprep.subr.bf16.mxu0 %v23860_v20 }
 0xd28   :  { %v20995_v54 = vpop.f32.mrb[72].mxu1 }
 0xd29   :  { %v20996_v0 = vpop.f32.mrb[73].mxu1  ;;  %17929 = vmatpush1.bf16.msra.mxu0 %v23858_v58 }
 0xd2a   :  { %v20997_v7 = vadd.f32 %v20996_v0, %v20995_v54  ;;  %v20998_v28 = vpop.f32.mrb[74].mxu1  ;;  %17930 = vmatprep.subr.bf16.mxu0 %v23863_v42 }
 0xd2b   :  { %v20999_v13 = vpop.f32.mrb[75].mxu1 }
 0xd2c   :  { %v18235_v19 = vadd.f32 %v20997_v7, %v18195_v40  ;;  %v23909_v40 = vld [vmem:[%s31739_s14 + $0x19e0] ss:$28 sps:$4 sm:$0xff]  }
 0xd2d   :  { %17931 = vmatpush1.bf16.msra.mxu0 %v23861_v16 }
 0xd2e   :  { %17932 = vmatprep.subr.bf16.mxu0 %v23866_v6 }
 0xd31   :  { %17933 = vmatpush1.bf16.msra.mxu0 %v23864_v53 }
 0xd32   :  { %17934 = vmatprep.subr.bf16.mxu0 %v23869_v25 }
 0xd35   :  { %17935 = vmatpush1.bf16.msra.mxu0 %v23867_v60 }
 0xd36   :  { %17936 = vmatprep.subr.bf16.mxu0 %v23872_v4 }
 0xd39   :  { %17937 = vmatpush1.bf16.msra.mxu0 %v23870_v8 }
 0xd3a   :  { %17938 = vmatprep.subr.bf16.mxu0 %v23875_v3 }
 0xd3d   :  { %17939 = vmatpush1.bf16.msra.mxu0 %v23873_v26 }
 0xd3e   :  { %17940 = vmatprep.subr.bf16.mxu0 %v23878_v35 }
 0xd41   :  { %17941 = vmatpush1.bf16.msra.mxu0 %v23876_v38 }
 0xd42   :  { %17942 = vmatprep.subr.bf16.mxu0 %v23881_v9 }
 0xd45   :  { %17943 = vmatpush1.bf16.msra.mxu0 %v23879_v23 }
 0xd46   :  { %17944 = vmatprep.subr.bf16.mxu0 %v23884_v31 }
 0xd48   :  { %v21017_v32 = vpop.f32.mrb[76].mxu1 }
 0xd49   :  { %v21018_v33 = vpop.f32.mrb[77].mxu1  ;;  %17945 = vmatpush1.bf16.msra.mxu0 %v23882_v52 }
 0xd4a   :  { %v21019_v43 = vadd.f32 %v21018_v33, %v21017_v32  ;;  %v21020_v2 = vpop.f32.mrb[78].mxu1  ;;  %17946 = vmatprep.subr.bf16.mxu0 %v23887_v22 }
 0xd4b   :  { %v21021_v27 = vpop.f32.mrb[79].mxu1 }
 0xd4c   :  { %v18275_v47 = vadd.f32 %v21019_v43, %v18235_v19 }
 0xd4d   :  { %17947 = vmatpush1.bf16.msra.mxu0 %v23885_v30 }
 0xd4e   :  { %17948 = vmatprep.subr.bf16.mxu0 %v23890_v24 }
 0xd51   :  { %17949 = vmatpush1.bf16.msra.mxu0 %v23888_v5 }
 0xd52   :  { %17959 = vmatprep.subr.bf16.mxu0 %v23893_v14 }
 0xd54   :  { %17951 = vmatmul.mubr.bf16.vlgmr.msra.gmra.mrb[52].mxu0 %v30405_v18  ;;  %v23902_v18 = vld [vmem:[%s31739_s14 + $0x193c] ss:$28 sps:$4 sm:$0xff]  }
 0xd55   :  { %17960 = vmatpush1.bf16.msra.mxu0 %v23891_v15  ;;  %20783 = vmatprep.mubr.msk.bf16.mxu0 %vm17012_vm10, %v30413_v56  ;;  %v23900_v56 = vld [vmem:[%s31739_s14 + $0x1938] ss:$28 sps:$4 sm:$0xff]  }
 0xd56   :  { %17961 = vmatprep.subr.bf16.mxu0 %v23896_v48 }
 0xd59   :  { %17962 = vmatpush1.bf16.msra.mxu0 %v23894_v51 }
 0xd5a   :  { %17963 = vmatprep.subr.bf16.mxu0 %v23899_v29 }
 0xd5d   :  { %17964 = vmatpush1.bf16.msra.mxu0 %v23897_v1 }
 0xd5e   :  { %17965 = vmatprep.subr.bf16.mxu0 %v23902_v18 }
 0xd61   :  { %17966 = vmatpush1.bf16.msra.mxu0 %v23900_v56 }
 0xd62   :  { %17967 = vmatprep.subr.bf16.mxu0 %v23905_v21 }
 0xd65   :  { %17968 = vmatpush1.bf16.msra.mxu0 %v23903_v41 }
 0xd66   :  { %17969 = vmatprep.subr.bf16.mxu0 %v23908_v59 }
 0xd69   :  { %17970 = vmatpush1.bf16.msra.mxu0 %v23906_v39 }
 0xd6a   :  { %17971 = vmatprep.subr.bf16.mxu0 %v23911_v36 }
 0xd6c   :  { %v18314_v44 = vpop.f32.mrb[80].mxu1 }
 0xd6d   :  { %v31665_v55 = vadd.f32 %v18314_v44, %v18275_v47  ;;  %v18316_v46 = vpop.f32.mrb[81].mxu1  ;;  %17972 = vmatpush1.bf16.msra.mxu0 %v23909_v40 }
 0xd6e   :  { %v18317_v45 = vpop.f32.mrb[82].mxu1  ;;  %17973 = vmatprep.subr.bf16.mxu0 %v23914_v50 }
 0xd6f   :  { %v18318_v63 = vpop.f32.mrb[83].mxu1 }
 0xd71   :  { %17974 = vmatpush1.bf16.msra.mxu0 %v23912_v37 }
 0xd72   :  { %17975 = vmatprep.subr.bf16.mxu0 %v23917_v17 }
 0xd75   :  { %17976 = vmatpush1.bf16.msra.mxu0 %v23915_v11 }
 0xd78   :  { %17992 = vmatmul.mubr.bf16.vlgmr.msra.gmra.mrb[52].mxu0 %v30528_v10 }
 0xd79   :  { %23964 = shalt.err (!%p23961_p4)
}
 0xd7a   :  { %s23965_s14 = scalar_lea.hbm %s31742_s17, 32 }
 0xd7b   :  { %p23966_p5 = scmp.ne.s32.totalorder %s31742_s17, %s23965_s14  ;;  %p23969_p6 = scmp.lt.u32.totalorder %s23965_s14, %s31742_s17 }
 0xd7d   :  { %p23971_p7 = pnand %p23969_p6, %p23966_p5 }
 0xd7f   :  { %23974 = shalt.err (!%p23971_p7)
}
 0xd80   :  { %18451 = dma.vmem_to_hbm [thread:$0]  %s18449_s7, 32, %s31742_s17, [#allocation5]  }
 0xd81   :  { %s23975_s6 = scalar_lea.vmem %s18439_s8, 32  ;;  %p23980_p9 = scmp.lt.s32.totalorder %s18439_s8, %s18439_s8 }
 0xd82   :  { %p23976_p8 = scmp.ne.s32.totalorder %s18439_s8, %s23975_s6  ;;  %p23981_p10 = scmp.lt.s32.totalorder %s23975_s6, %s23975_s6 }
 0xd84   :  { %p23982_p11 = por %p23981_p10, %p23980_p9 }
 0xd86   :  { %p23983_p12 = pnand %p23982_p11, %p23976_p8 }
 0xd88   :  { %23986 = shalt.err (!%p23983_p12)
}
 0xd89   :  { %s23987_s20 = scalar_lea.hbm %s31741_s16, 32 }
 0xd8a   :  { %p23988_p13 = scmp.ne.s32.totalorder %s31741_s16, %s23987_s20  ;;  %p23991_p0 = scmp.lt.u32.totalorder %s23987_s20, %s31741_s16 }
 0xd8c   :  { %p23993_p1 = pnand %p23991_p0, %p23988_p13 }
 0xd8e   :  { %23996 = shalt.err (!%p23993_p1)
}
 0xd8f   :  { %18441 = dma.vmem_to_hbm [thread:$0]  %s18439_s8, 32, %s31741_s16, [#allocation3]  }
 0xd90   :  { %s24030_s12 = smov [#allocation6]  }
 0xd91   :  { %s18458_s28 = sshll.u32 %s24030_s12, 4  ;;  %s18459_s28 = int_to_ptr.vmem [resolvable:$true] %s18458_s28 }
 0xd92   :  { %s23997_s29 = scalar_lea.vmem %s18459_s28, 32  ;;  %p24002_p3 = scmp.lt.s32.totalorder %s18459_s28, %s18459_s28 }
 0xd93   :  { %p23998_p2 = scmp.ne.s32.totalorder %s18459_s28, %s23997_s29  ;;  %p24003_p4 = scmp.lt.s32.totalorder %s23997_s29, %s23997_s29 }
 0xd95   :  { %p24004_p5 = por %p24003_p4, %p24002_p3 }
 0xd97   :  { %p24005_p6 = pnand %p24004_p5, %p23998_p2 }
 0xd99   :  { %24008 = shalt.err (!%p24005_p6)
}
 0xd9a   :  { %s24009_s7 = scalar_lea.hbm %s31743_s18, 32 }
 0xd9b   :  { %p24010_p7 = scmp.ne.s32.totalorder %s31743_s18, %s24009_s7  ;;  %p24013_p8 = scmp.lt.u32.totalorder %s24009_s7, %s31743_s18 }
 0xd9d   :  { %p24015_p9 = pnand %p24013_p8, %p24010_p7 }
 0xd9f   :  { %24018 = shalt.err (!%p24015_p9)
}
 0xda0   :  { %18461 = dma.vmem_to_hbm [thread:$0]  %s18459_s28, 32, %s31743_s18, [#allocation5]   ;;  %v18333_v10 = vmul.f32 0.01, %v31665_v55  ;;  %vm18326_vm0 = vcmp.gt.f32.partialorder %v31665_v55, 0.0  ;;  %v12640_v20 = vrot.slane %v31179_v12, %v26002_v57  ;;  %v12644_v58 = vrot.slane %v31179_v12, %v25789_v62 }
 0xda1   :  { %vm18426_vm3 = vcmask 1041408   ;;  %vm18427_vm4 = vcmask 1043458   ;;  %vm18429_vm6 = vcmask 128004  }
 0xda2   :  { %v18340_v61 = vsel %vm18326_vm0, %v31665_v55, %v18333_v10  ;;  %vm18428_vm5 = vmor %vm18427_vm4, %vm18426_vm3 }
 0xda3   :  { %v18347_v34 = vsub.f32 0.0, %v18340_v61  ;;  %vm18430_vm7 = vmor %vm18429_vm6, %vm18428_vm5 }
 0xda5   :  { %v18360_v54 = vmul.f32 1.442695, %v18347_v34 }
 0xda7   :  { %23936 = vpow2.f32 %v18360_v54 }
 0xdb1   :  { %v23937_v62 = vpop.eup %23936 }
 0xdb2   :  { %v18368_v12 = vadd.f32 1.0, %v23937_v62 }
 0xe4b   :  { %v17993_v42 = vpop.f32.mrb[52].mxu0 }
 0xe4c   :  { %v21109_v0 = vadd.f32 %v17993_v42, %v12640_v20  ;;  %v17995_v16 = vpop.f32.mrb[53].mxu0 }
 0xe4d   :  { %v21110_v7 = vadd.f32 %v17995_v16, %v12644_v58  ;;  %v17997_v28 = vpop.f32.mrb[54].mxu0 }
 0xe4e   :  { %vm18324_vm1 = vcmp.gt.f32.partialorder %v21109_v0, 0.0  ;;  %v18331_v6 = vmul.f32 0.01, %v21109_v0  ;;  %v17998_v13 = vpop.f32.mrb[55].mxu0 }
 0xe4f   :  { %vm18325_vm2 = vcmp.gt.f32.partialorder %v21110_v7, 0.0  ;;  %v18332_v19 = vmul.f32 0.01, %v21110_v7 }
 0xe50   :  { %v18338_v53 = vsel %vm18324_vm1, %v21109_v0, %v18331_v6 }
 0xe51   :  { %v18345_v25 = vsub.f32 0.0, %v18338_v53  ;;  %v18339_v60 = vsel %vm18325_vm2, %v21110_v7, %v18332_v19 }
 0xe52   :  { %v18346_v4 = vsub.f32 0.0, %v18339_v60 }
 0xe53   :  { %v18356_v57 = vmul.f32 1.442695, %v18345_v25 }
 0xe54   :  { %v18358_v8 = vmul.f32 1.442695, %v18346_v4 }
 0xe55   :  { %23938 = vpow2.f32 %v18356_v57 }
 0xe56   :  { %23940 = vpow2.f32 %v18358_v8 }
 0xe57   :  { %23942 = vrcp.f32 %v18368_v12 }
 0xe5f   :  { %v23939_v3 = vpop.eup %23938 }
 0xe60   :  { %v23941_v26 = vpop.eup %23940  ;;  %v18366_v35 = vadd.f32 1.0, %v23939_v3 }
 0xe61   :  { %v18367_v38 = vadd.f32 1.0, %v23941_v26  ;;  %v23943_v9 = vpop.eup %23942 }
 0xe62   :  { %23944 = vrcp.f32 %v18366_v35  ;;  %v18421_v22 = vrot.slane %v23943_v9, %v24266_v49 }
 0xe63   :  { %23946 = vrcp.f32 %v18367_v38 }
 0xe6c   :  { %v23945_v23 = vpop.eup %23944 }
 0xe6d   :  { %v23947_v31 = vpop.eup %23946 }
 0xe6e   :  { %v18407_v52 = vcombine.low %v23945_v23, %v23947_v31 }
 0xe70   :  { %v18414_v32 = vrot.slane %v18407_v52, %v24266_v49 }
 0xe72   :  { %v18422_v33 = vcombine.low %v18414_v32, %v18421_v22 }
 0xe74   :  { %18431 = vst.msk [vmem:[%s31744_s19 + $0x8] sm:$0x3f] %vm18430_vm7, %v18422_v33 }
 0xe75   :  { %24019 = dma.done.wait [#allocation3], 32  }
 0xe76   :  { %24020 = vsyncadd [#allocation3], 4294967264 }
 0xe77   :  { %24021 = dma.done.wait [#allocation5], 64  }
 0xe78   :  { %24022 = vsyncadd [#allocation5], 4294967232 }
 0xe79   :  { %18475 = vsyncpa [#allocation3], 1 }
 0xe7a   :  { %18476 = vsyncpa [#allocation5], 1 }

</bundles_post_ra>
